<compile_context>
chip_gen: v7x
topology: tpu7x:2x2x1
jax: 0.10.0
libtpu: 0.0.40
codegen_flags: <defaults>
</compile_context>

<pallas_src>
import functools

import jax
import jax.numpy as jnp
from jax.experimental import pallas as pl
from jax.experimental.pallas import tpu as pltpu


def _round_up(x, m):
    return (x + m - 1) // m * m


def _vmem_limit_bytes():
    """~70% of physical VMEM (89.6 MiB on v5e/v6e, 44.8 MiB on v7x)."""
    cap = 64 * 1024 * 1024
    try:
        cap = int(pltpu.get_tpu_info().vmem_capacity_bytes)
    except Exception:
        pass
    return max(32 * 1024 * 1024, min(int(cap * 0.7), 96 * 1024 * 1024))


def _pick_images_per_tile(n_images, rpi, cin, cout, cw, vmem_limit):
    """Fill ~half the VMEM budget but keep >= 8 grid steps for pipelining."""
    per_img = 2 * 2 * rpi * (cin + cout) + 2 * rpi * cw  # dbl-buffered x/out + y1
    budget = max(vmem_limit // 2, per_img)
    tb = max(1, min(budget // per_img, max(1, n_images // 8)))
    while n_images % tb:
        tb -= 1
    return int(tb)


# ---------------------------------------------------------------------------
# Kernel
# ---------------------------------------------------------------------------
def bottleneck_kernel(x_ref, m_ref, w1_ref, b1_ref, w2_ref, b2_ref,
                      w3_ref, b3_ref, out_ref, y1_ref,
                      *, row_stride, halo, chunk, rows_per_image):
    """One grid step = `images_per_tile` zero-halo-padded images, row-flattened.

    x_ref   : (R, Cin)   bf16  input rows (NHWC, 1-px halo, row-flattened)
    m_ref   : (rpi, 1)   bf16  per-image mask: 1 on real pixels, 0 on halo rows
    w*_ref  : bf16 matmul weights with the BN scale pre-folded in
    b*_ref  : (1, C)     f32   folded BN bias
    out_ref : (R, Cout)  bf16
    y1_ref  : (halo + R + halo, width) bf16 scratch for the conv1 output
    """
    R = x_ref.shape[0]
    cw = w1_ref.shape[1]                     # bottleneck width
    n_chunks = R // chunk

    # Halo strips of the y1 scratch: only ever read for taps whose outputs
    # land on discarded halo rows, but keep them finite (tiny stores).
    zeros = jnp.zeros((halo, cw), y1_ref.dtype)
    y1_ref[:halo, :] = zeros
    y1_ref[halo + R:halo + R + halo, :] = zeros

    b1 = b1_ref[...]
    # ---- phase 1: conv1 (1x1) + bn1 + relu, halo-masked, bf16 -> scratch ---
    for c in range(n_chunks):
        r0 = c * chunk
        p0 = r0 % rows_per_image             # static per-image mask offset
        y1 = jnp.dot(x_ref[r0:r0 + chunk, :], w1_ref[...],
                     preferred_element_type=jnp.float32)
        y1 = jnp.maximum(y1 + b1, 0.0)
        y1_ref[halo + r0:halo + r0 + chunk, :] = (
            y1.astype(jnp.bfloat16) * m_ref[p0:p0 + chunk, :])

    b2 = b2_ref[...]
    b3 = b3_ref[...]
    # ---- phase 2: conv2 (3x3 as 9 shifted K=cw dots) + bn2 + relu,
    #               conv3 (1x1) + bn3 + residual (f32) + relu ---------------
    for c in range(n_chunks):
        r0 = c * chunk
        acc = jnp.zeros((chunk, cw), jnp.float32)
        for t in range(9):
            off = (t // 3 - 1) * row_stride + (t % 3 - 1)
            lhs = y1_ref[halo + r0 + off:halo + r0 + off + chunk, :]
            acc = acc + jnp.dot(lhs, w2_ref[t * cw:(t + 1) * cw, :],
                                preferred_element_type=jnp.float32)
        y2 = jnp.maximum(acc + b2, 0.0).astype(jnp.bfloat16)
        y3 = jnp.dot(y2, w3_ref[...], preferred_element_type=jnp.float32)
        identity = x_ref[r0:r0 + chunk, :].astype(jnp.float32)   # no hoist
        out_ref[r0:r0 + chunk, :] = jnp.maximum(
            y3 + b3 + identity, 0.0).astype(out_ref.dtype)


# ---------------------------------------------------------------------------
# Layout helpers (one-time conversion at network boundaries)
# ---------------------------------------------------------------------------
def nchw_to_rows(x_nchw):
    N, C, H, W = x_nchw.shape
    Hp, Wp = H + 2, W + 2
    rpi = _round_up(Hp * Wp, 8)
    x = jnp.transpose(x_nchw, (0, 2, 3, 1))
    x = jnp.pad(x, ((0, 0), (1, 1), (1, 1), (0, 0)))
    x = x.reshape(N, Hp * Wp, C)
    x = jnp.pad(x, ((0, 0), (0, rpi - Hp * Wp), (0, 0)))
    return x.reshape(N * rpi, C).astype(jnp.bfloat16)


def rows_to_nchw(rows, N, H, W, C):
    Hp, Wp = H + 2, W + 2
    rpi = _round_up(Hp * Wp, 8)
    x = rows.reshape(N, rpi, C)[:, :Hp * Wp, :].reshape(N, Hp, Wp, C)
    x = x[:, 1:H + 1, 1:W + 1, :]
    return jnp.transpose(x, (0, 3, 1, 2))


def _halo_mask(H, W, rpi):
    Hp, Wp = H + 2, W + 2
    idx = jnp.arange(rpi)
    hh, ww = idx // Wp, idx % Wp
    m = (idx < Hp * Wp) & (hh >= 1) & (hh <= H) & (ww >= 1) & (ww <= W)
    return m.astype(jnp.bfloat16).reshape(rpi, 1)


# ---------------------------------------------------------------------------
# Forward (row layout = the layout chained blocks should stay in)
# ---------------------------------------------------------------------------
def bottleneck_forward_rows(x_rows, kp, *, n_images, height, width_hw,
                            images_per_tile=None):
    H, W = height, width_hw
    Hp, Wp = H + 2, W + 2
    rpi = _round_up(Hp * Wp, 8)
    N = n_images
    Cin = x_rows.shape[1]
    cw = kp["w1"].shape[1]
    Cout = kp["w3"].shape[1]
    assert x_rows.shape[0] == N * rpi
    assert Cout == Cin, "identity path requires Cout == Cin (no downsample)"

    vmem_limit = _vmem_limit_bytes()
    tb = images_per_tile or _pick_images_per_tile(N, rpi, Cin, Cout, cw,
                                                  vmem_limit)
    assert N % tb == 0
    R = tb * rpi
    halo = _round_up(Wp + 1, 8)              # >= max |tap shift|, sublane aligned
    chunk = max(c for c in (128, 64, 32, 16, 8) if rpi % c == 0)

    mask = _halo_mask(H, W, rpi)

    kernel = functools.partial(bottleneck_kernel, row_stride=Wp, halo=halo,
                               chunk=chunk, rows_per_image=rpi)

    def resident(arr):                       # full-array block, constant index_map
        nd = arr.ndim
        return pl.BlockSpec(arr.shape, lambda *_: (0,) * nd)

    flops = 2 * N * rpi * (Cin * cw + 9 * cw * cw + cw * Cout)
    bytes_accessed = (2 * N * rpi * (Cin + Cout) + 2 * rpi
                      + 2 * (Cin * cw + 9 * cw * cw + cw * Cout)
                      + 4 * (2 * cw + Cout))

    out_rows = pl.pallas_call(
        kernel,
        out_shape=jax.ShapeDtypeStruct((N * rpi, Cout), jnp.bfloat16),
        grid=(N // tb,),
        in_specs=[
            pl.BlockSpec((R, Cin), lambda b: (b, 0)),
            resident(mask),
            resident(kp["w1"]), resident(kp["b1"]),
            resident(kp["w2"]), resident(kp["b2"]),
            resident(kp["w3"]), resident(kp["b3"]),
        ],
        out_specs=pl.BlockSpec((R, Cout), lambda b: (b, 0)),
        scratch_shapes=[pltpu.VMEM((R + 2 * halo, cw), jnp.bfloat16)],
        compiler_params=pltpu.CompilerParams(
            dimension_semantics=("parallel",),
            vmem_limit_bytes=vmem_limit),
        cost_estimate=pl.CostEstimate(flops=int(flops), transcendentals=0,
                                      bytes_accessed=int(bytes_accessed)),
    )(x_rows, mask, kp["w1"], kp["b1"], kp["w2"], kp["b2"], kp["w3"], kp["b3"])
    return out_rows


def bottleneck_forward(x_nchw, kp, images_per_tile=None):
    """NCHW f32 in -> NCHW f32 out (layout conversion done once, demo only)."""
    N, Cin, H, W = x_nchw.shape
    Cout = kp["w3"].shape[1]
    rows = nchw_to_rows(x_nchw)
    out_rows = bottleneck_forward_rows(rows, kp, n_images=N, height=H,
                                       width_hw=W,
                                       images_per_tile=images_per_tile)
    return rows_to_nchw(out_rows, N, H, W, Cout).astype(jnp.float32)


# ---------------------------------------------------------------------------
# Deterministic parameter init (PyTorch OIHW layout) + fold BN (eval mode)
# into per-channel scale/bias, then fold the scale into the conv weights.
# ---------------------------------------------------------------------------
def init_params(key, inplanes, planes, base_width=64, groups=1, w_scale=0.03):
    width = int(planes * (base_width / 64.0)) * groups
    cout = planes * 4  # expansion = 4
    ks = jax.random.split(key, 15)

    conv1_w = w_scale * jax.random.normal(ks[0], (width, inplanes, 1, 1), jnp.float32)
    conv2_w = w_scale * jax.random.normal(ks[1], (width, width, 3, 3), jnp.float32)
    conv3_w = w_scale * jax.random.normal(ks[2], (cout, width, 1, 1), jnp.float32)

    def bn_fold(kg, kb, km, kv, c):
        gamma = 1.0 + 0.1 * jax.random.normal(kg, (c,), jnp.float32)
        beta = 0.1 * jax.random.normal(kb, (c,), jnp.float32)
        mean = 0.1 * jax.random.normal(km, (c,), jnp.float32)
        var = jax.nn.softplus(jax.random.normal(kv, (c,), jnp.float32)) + 0.5
        scale = gamma / jnp.sqrt(var + 1e-5)
        bias = beta - mean * scale
        return scale, bias

    s1, b1 = bn_fold(ks[3], ks[4], ks[5], ks[6], width)
    s2, b2 = bn_fold(ks[7], ks[8], ks[9], ks[10], width)
    s3, b3 = bn_fold(ks[11], ks[12], ks[13], ks[14], cout)

    torch_p = dict(conv1_w=conv1_w, conv2_w=conv2_w, conv3_w=conv3_w,
                   s1=s1, b1=b1, s2=s2, b2=b2, s3=s3, b3=b3)

    w1 = conv1_w[:, :, 0, 0].T * s1[None, :]                          # (Cin, width)
    w2 = jnp.concatenate(
        [conv2_w[:, :, t // 3, t % 3].T * s2[None, :] for t in range(9)],
        axis=0)                                                       # (9*width, width)
    w3 = conv3_w[:, :, 0, 0].T * s3[None, :]                          # (width, Cout)

    kernel_p = dict(
        w1=w1.astype(jnp.bfloat16), b1=b1.reshape(1, -1),
        w2=w2.astype(jnp.bfloat16), b2=b2.reshape(1, -1),
        w3=w3.astype(jnp.bfloat16), b3=b3.reshape(1, -1),
    )
    return torch_p, kernel_p


# ---------------------------------------------------------------------------
# Pure-JAX reference (NCHW, same math as the PyTorch module in eval mode).
# ---------------------------------------------------------------------------
def ref_forward(x, tp):
    def conv(x, w, pad):
        return jax.lax.conv_general_dilated(
            x, w, window_strides=(1, 1), padding=[(pad, pad), (pad, pad)],
            dimension_numbers=("NCHW", "OIHW", "NCHW"))

    def bn(x, s, b):
        return x * s[None, :, None, None] + b[None, :, None, None]

    y = jax.nn.relu(bn(conv(x, tp["conv1_w"], 0), tp["s1"], tp["b1"]))
    y = jax.nn.relu(bn(conv(y, tp["conv2_w"], 1), tp["s2"], tp["b2"]))
    y = bn(conv(y, tp["conv3_w"], 0), tp["s3"], tp["b3"])
    return jax.nn.relu(y + x)


if __name__ == "__main__":
    key = jax.random.PRNGKey(0)
    kx, kparam = jax.random.split(key)

    # inplanes must equal planes*expansion so the identity path (stride=1,
    # downsample=None) type-checks, exactly as in the PyTorch module.
    # N=16 keeps the grid >= 8 steps so v7x's two cores both pipeline.
    N, inplanes, H, W = 16, 256, 14, 14
    planes = 64  # width = 64, Cout = 256

    x = jax.random.normal(kx, (N, inplanes, H, W), jnp.float32)
    torch_p, kernel_p = init_params(kparam, inplanes, planes)

    out = bottleneck_forward(x, kernel_p)
    out = jax.block_until_ready(out)

    ref = ref_forward(x, torch_p)
    assert out.shape == ref.shape == (N, planes * 4, H, W)
    max_err = float(jnp.max(jnp.abs(out - ref)))
    if not (max_err < 1e-1):   # bf16 activations/weights vs f32 reference
        raise SystemExit(f"mismatch vs reference: max abs err = {max_err}")
    print("KERNEL_OK")
</pallas_src>

<mosaic_0001>
module attributes {stable_mosaic.version = 11 : i64} {
  func.func @bottleneck_kernel(%arg0: i32, %arg1: memref<512x256xbf16, #tpu.memory_space<vmem>>, %arg2: memref<256x1xbf16, #tpu.memory_space<vmem>>, %arg3: memref<256x64xbf16, #tpu.memory_space<vmem>>, %arg4: memref<1x64xf32, #tpu.memory_space<vmem>>, %arg5: memref<576x64xbf16, #tpu.memory_space<vmem>>, %arg6: memref<1x64xf32, #tpu.memory_space<vmem>>, %arg7: memref<64x256xbf16, #tpu.memory_space<vmem>>, %arg8: memref<1x256xf32, #tpu.memory_space<vmem>>, %arg9: memref<512x256xbf16, #tpu.memory_space<vmem>>, %arg10: memref<560x64xbf16, #tpu.memory_space<vmem>>) attributes {dimension_semantics = [#tpu.dimension_semantics<parallel>], iteration_bounds = array<i64: 8>, scalar_prefetch = 0 : i64, scratch_operands = 1 : i64, tpu.core_type = #tpu.core_type<tc>, window_params = [{transform_indices = @transform_0, window_bounds = array<i64: 512, 256>}, {pipeline_mode = #tpu.pipeline_mode<synchronous>, transform_indices = @transform_1, window_bounds = array<i64: 256, 1>}, {pipeline_mode = #tpu.pipeline_mode<synchronous>, transform_indices = @transform_2, window_bounds = array<i64: 256, 64>}, {pipeline_mode = #tpu.pipeline_mode<synchronous>, transform_indices = @transform_3, window_bounds = array<i64: 1, 64>}, {pipeline_mode = #tpu.pipeline_mode<synchronous>, transform_indices = @transform_4, window_bounds = array<i64: 576, 64>}, {pipeline_mode = #tpu.pipeline_mode<synchronous>, transform_indices = @transform_5, window_bounds = array<i64: 1, 64>}, {pipeline_mode = #tpu.pipeline_mode<synchronous>, transform_indices = @transform_6, window_bounds = array<i64: 64, 256>}, {pipeline_mode = #tpu.pipeline_mode<synchronous>, transform_indices = @transform_7, window_bounds = array<i64: 1, 256>}, {transform_indices = @transform_8, window_bounds = array<i64: 512, 256>}]} {
    %cst = arith.constant 0.000000e+00 : bf16
    %0 = vector.broadcast %cst : bf16 to vector<24x64xbf16>
    %c0 = arith.constant 0 : index
    %c0_0 = arith.constant 0 : index
    %1 = vector.load %arg10[%c0, %c0_0] : memref<560x64xbf16, #tpu.memory_space<vmem>>, vector<24x64xbf16>
    tpu.vector_store %arg10[%c0, %c0_0], %0 {strides = array<i32>} : memref<560x64xbf16, #tpu.memory_space<vmem>>, vector<24x64xbf16>,
    %c536 = arith.constant 536 : index
    %c0_1 = arith.constant 0 : index
    %2 = vector.load %arg10[%c536, %c0_1] : memref<560x64xbf16, #tpu.memory_space<vmem>>, vector<24x64xbf16>
    tpu.vector_store %arg10[%c536, %c0_1], %0 {strides = array<i32>} : memref<560x64xbf16, #tpu.memory_space<vmem>>, vector<24x64xbf16>,
    %c0_2 = arith.constant 0 : index
    %c0_3 = arith.constant 0 : index
    %3 = vector.load %arg4[%c0_2, %c0_3] : memref<1x64xf32, #tpu.memory_space<vmem>>, vector<1x64xf32>
    %c0_4 = arith.constant 0 : index
    %c0_5 = arith.constant 0 : index
    %4 = vector.load %arg1[%c0_4, %c0_5] : memref<512x256xbf16, #tpu.memory_space<vmem>>, vector<128x256xbf16>
    %c0_6 = arith.constant 0 : index
    %c0_7 = arith.constant 0 : index
    %5 = vector.load %arg3[%c0_6, %c0_7] : memref<256x64xbf16, #tpu.memory_space<vmem>>, vector<256x64xbf16>
    %cst_8 = arith.constant dense<0.000000e+00> : vector<128x64xf32>
    %6 = tpu.matmul %4, %5, %cst_8 {dimension_numbers = #tpu.dot_dimension_numbers<[1], [0], [0], [1], [0, 0, 1, 1], [], []>} : vector<128x256xbf16>, vector<256x64xbf16>, vector<128x64xf32> -> vector<128x64xf32>
    %7 = vector.broadcast %3 : vector<1x64xf32> to vector<128x64xf32>
    %8 = arith.addf %6, %7 : vector<128x64xf32>
    %cst_9 = arith.constant 0.000000e+00 : f32
    %9 = vector.broadcast %cst_9 : f32 to vector<128x64xf32>
    %10 = arith.maximumf %8, %9 : vector<128x64xf32>
    %11 = arith.truncf %10 : vector<128x64xf32> to vector<128x64xbf16>
    %c0_10 = arith.constant 0 : index
    %c0_11 = arith.constant 0 : index
    %12 = vector.load %arg2[%c0_10, %c0_11] : memref<256x1xbf16, #tpu.memory_space<vmem>>, vector<128x1xbf16>
    %13 = vector.broadcast %12 : vector<128x1xbf16> to vector<128x64xbf16>
    %14 = arith.mulf %11, %13 : vector<128x64xbf16>
    %c24 = arith.constant 24 : index
    %c0_12 = arith.constant 0 : index
    %15 = vector.load %arg10[%c24, %c0_12] : memref<560x64xbf16, #tpu.memory_space<vmem>>, vector<128x64xbf16>
    tpu.vector_store %arg10[%c24, %c0_12], %14 {strides = array<i32>} : memref<560x64xbf16, #tpu.memory_space<vmem>>, vector<128x64xbf16>,
    %c128 = arith.constant 128 : index
    %c0_13 = arith.constant 0 : index
    %16 = vector.load %arg1[%c128, %c0_13] : memref<512x256xbf16, #tpu.memory_space<vmem>>, vector<128x256xbf16>
    %c0_14 = arith.constant 0 : index
    %c0_15 = arith.constant 0 : index
    %17 = vector.load %arg3[%c0_14, %c0_15] : memref<256x64xbf16, #tpu.memory_space<vmem>>, vector<256x64xbf16>
    %cst_16 = arith.constant dense<0.000000e+00> : vector<128x64xf32>
    %18 = tpu.matmul %16, %17, %cst_16 {dimension_numbers = #tpu.dot_dimension_numbers<[1], [0], [0], [1], [0, 0, 1, 1], [], []>} : vector<128x256xbf16>, vector<256x64xbf16>, vector<128x64xf32> -> vector<128x64xf32>
    %19 = vector.broadcast %3 : vector<1x64xf32> to vector<128x64xf32>
    %20 = arith.addf %18, %19 : vector<128x64xf32>
    %cst_17 = arith.constant 0.000000e+00 : f32
    %21 = vector.broadcast %cst_17 : f32 to vector<128x64xf32>
    %22 = arith.maximumf %20, %21 : vector<128x64xf32>
    %23 = arith.truncf %22 : vector<128x64xf32> to vector<128x64xbf16>
    %c128_18 = arith.constant 128 : index
    %c0_19 = arith.constant 0 : index
    %24 = vector.load %arg2[%c128_18, %c0_19] : memref<256x1xbf16, #tpu.memory_space<vmem>>, vector<128x1xbf16>
    %25 = vector.broadcast %24 : vector<128x1xbf16> to vector<128x64xbf16>
    %26 = arith.mulf %23, %25 : vector<128x64xbf16>
    %c152 = arith.constant 152 : index
    %c0_20 = arith.constant 0 : index
    %27 = vector.load %arg10[%c152, %c0_20] : memref<560x64xbf16, #tpu.memory_space<vmem>>, vector<128x64xbf16>
    tpu.vector_store %arg10[%c152, %c0_20], %26 {strides = array<i32>} : memref<560x64xbf16, #tpu.memory_space<vmem>>, vector<128x64xbf16>,
    %c256 = arith.constant 256 : index
    %c0_21 = arith.constant 0 : index
    %28 = vector.load %arg1[%c256, %c0_21] : memref<512x256xbf16, #tpu.memory_space<vmem>>, vector<128x256xbf16>
    %c0_22 = arith.constant 0 : index
    %c0_23 = arith.constant 0 : index
    %29 = vector.load %arg3[%c0_22, %c0_23] : memref<256x64xbf16, #tpu.memory_space<vmem>>, vector<256x64xbf16>
    %cst_24 = arith.constant dense<0.000000e+00> : vector<128x64xf32>
    %30 = tpu.matmul %28, %29, %cst_24 {dimension_numbers = #tpu.dot_dimension_numbers<[1], [0], [0], [1], [0, 0, 1, 1], [], []>} : vector<128x256xbf16>, vector<256x64xbf16>, vector<128x64xf32> -> vector<128x64xf32>
    %31 = vector.broadcast %3 : vector<1x64xf32> to vector<128x64xf32>
    %32 = arith.addf %30, %31 : vector<128x64xf32>
    %cst_25 = arith.constant 0.000000e+00 : f32
    %33 = vector.broadcast %cst_25 : f32 to vector<128x64xf32>
    %34 = arith.maximumf %32, %33 : vector<128x64xf32>
    %35 = arith.truncf %34 : vector<128x64xf32> to vector<128x64xbf16>
    %c0_26 = arith.constant 0 : index
    %c0_27 = arith.constant 0 : index
    %36 = vector.load %arg2[%c0_26, %c0_27] : memref<256x1xbf16, #tpu.memory_space<vmem>>, vector<128x1xbf16>
    %37 = vector.broadcast %36 : vector<128x1xbf16> to vector<128x64xbf16>
    %38 = arith.mulf %35, %37 : vector<128x64xbf16>
    %c280 = arith.constant 280 : index
    %c0_28 = arith.constant 0 : index
    %39 = vector.load %arg10[%c280, %c0_28] : memref<560x64xbf16, #tpu.memory_space<vmem>>, vector<128x64xbf16>
    tpu.vector_store %arg10[%c280, %c0_28], %38 {strides = array<i32>} : memref<560x64xbf16, #tpu.memory_space<vmem>>, vector<128x64xbf16>,
    %c384 = arith.constant 384 : index
    %c0_29 = arith.constant 0 : index
    %40 = vector.load %arg1[%c384, %c0_29] : memref<512x256xbf16, #tpu.memory_space<vmem>>, vector<128x256xbf16>
    %c0_30 = arith.constant 0 : index
    %c0_31 = arith.constant 0 : index
    %41 = vector.load %arg3[%c0_30, %c0_31] : memref<256x64xbf16, #tpu.memory_space<vmem>>, vector<256x64xbf16>
    %cst_32 = arith.constant dense<0.000000e+00> : vector<128x64xf32>
    %42 = tpu.matmul %40, %41, %cst_32 {dimension_numbers = #tpu.dot_dimension_numbers<[1], [0], [0], [1], [0, 0, 1, 1], [], []>} : vector<128x256xbf16>, vector<256x64xbf16>, vector<128x64xf32> -> vector<128x64xf32>
    %43 = vector.broadcast %3 : vector<1x64xf32> to vector<128x64xf32>
    %44 = arith.addf %42, %43 : vector<128x64xf32>
    %cst_33 = arith.constant 0.000000e+00 : f32
    %45 = vector.broadcast %cst_33 : f32 to vector<128x64xf32>
    %46 = arith.maximumf %44, %45 : vector<128x64xf32>
    %47 = arith.truncf %46 : vector<128x64xf32> to vector<128x64xbf16>
    %c128_34 = arith.constant 128 : index
    %c0_35 = arith.constant 0 : index
    %48 = vector.load %arg2[%c128_34, %c0_35] : memref<256x1xbf16, #tpu.memory_space<vmem>>, vector<128x1xbf16>
    %49 = vector.broadcast %48 : vector<128x1xbf16> to vector<128x64xbf16>
    %50 = arith.mulf %47, %49 : vector<128x64xbf16>
    %c408 = arith.constant 408 : index
    %c0_36 = arith.constant 0 : index
    %51 = vector.load %arg10[%c408, %c0_36] : memref<560x64xbf16, #tpu.memory_space<vmem>>, vector<128x64xbf16>
    tpu.vector_store %arg10[%c408, %c0_36], %50 {strides = array<i32>} : memref<560x64xbf16, #tpu.memory_space<vmem>>, vector<128x64xbf16>,
    %c0_37 = arith.constant 0 : index
    %c0_38 = arith.constant 0 : index
    %52 = vector.load %arg6[%c0_37, %c0_38] : memref<1x64xf32, #tpu.memory_space<vmem>>, vector<1x64xf32>
    %c0_39 = arith.constant 0 : index
    %c0_40 = arith.constant 0 : index
    %53 = vector.load %arg8[%c0_39, %c0_40] : memref<1x256xf32, #tpu.memory_space<vmem>>, vector<1x256xf32>
    %cst_41 = arith.constant 0.000000e+00 : f32
    %54 = vector.broadcast %cst_41 : f32 to vector<128x64xf32>
    %c7 = arith.constant 7 : index
    %c0_42 = arith.constant 0 : index
    %55 = vector.load %arg10[%c7, %c0_42] : memref<560x64xbf16, #tpu.memory_space<vmem>>, vector<128x64xbf16>
    %c0_43 = arith.constant 0 : index
    %c0_44 = arith.constant 0 : index
    %56 = vector.load %arg5[%c0_43, %c0_44] : memref<576x64xbf16, #tpu.memory_space<vmem>>, vector<64x64xbf16>
    %cst_45 = arith.constant dense<0.000000e+00> : vector<128x64xf32>
    %57 = tpu.matmul %55, %56, %cst_45 {dimension_numbers = #tpu.dot_dimension_numbers<[1], [0], [0], [1], [0, 0, 1, 1], [], []>} : vector<128x64xbf16>, vector<64x64xbf16>, vector<128x64xf32> -> vector<128x64xf32>
    %58 = arith.addf %54, %57 : vector<128x64xf32>
    %c8 = arith.constant 8 : index
    %c0_46 = arith.constant 0 : index
    %59 = vector.load %arg10[%c8, %c0_46] : memref<560x64xbf16, #tpu.memory_space<vmem>>, vector<128x64xbf16>
    %c64 = arith.constant 64 : index
    %c0_47 = arith.constant 0 : index
    %60 = vector.load %arg5[%c64, %c0_47] : memref<576x64xbf16, #tpu.memory_space<vmem>>, vector<64x64xbf16>
    %cst_48 = arith.constant dense<0.000000e+00> : vector<128x64xf32>
    %61 = tpu.matmul %59, %60, %cst_48 {dimension_numbers = #tpu.dot_dimension_numbers<[1], [0], [0], [1], [0, 0, 1, 1], [], []>} : vector<128x64xbf16>, vector<64x64xbf16>, vector<128x64xf32> -> vector<128x64xf32>
    %62 = arith.addf %58, %61 : vector<128x64xf32>
    %c9 = arith.constant 9 : index
    %c0_49 = arith.constant 0 : index
    %63 = vector.load %arg10[%c9, %c0_49] : memref<560x64xbf16, #tpu.memory_space<vmem>>, vector<128x64xbf16>
    %c128_50 = arith.constant 128 : index
    %c0_51 = arith.constant 0 : index
    %64 = vector.load %arg5[%c128_50, %c0_51] : memref<576x64xbf16, #tpu.memory_space<vmem>>, vector<64x64xbf16>
    %cst_52 = arith.constant dense<0.000000e+00> : vector<128x64xf32>
    %65 = tpu.matmul %63, %64, %cst_52 {dimension_numbers = #tpu.dot_dimension_numbers<[1], [0], [0], [1], [0, 0, 1, 1], [], []>} : vector<128x64xbf16>, vector<64x64xbf16>, vector<128x64xf32> -> vector<128x64xf32>
    %66 = arith.addf %62, %65 : vector<128x64xf32>
    %c23 = arith.constant 23 : index
    %c0_53 = arith.constant 0 : index
    %67 = vector.load %arg10[%c23, %c0_53] : memref<560x64xbf16, #tpu.memory_space<vmem>>, vector<128x64xbf16>
    %c192 = arith.constant 192 : index
    %c0_54 = arith.constant 0 : index
    %68 = vector.load %arg5[%c192, %c0_54] : memref<576x64xbf16, #tpu.memory_space<vmem>>, vector<64x64xbf16>
    %cst_55 = arith.constant dense<0.000000e+00> : vector<128x64xf32>
    %69 = tpu.matmul %67, %68, %cst_55 {dimension_numbers = #tpu.dot_dimension_numbers<[1], [0], [0], [1], [0, 0, 1, 1], [], []>} : vector<128x64xbf16>, vector<64x64xbf16>, vector<128x64xf32> -> vector<128x64xf32>
    %70 = arith.addf %66, %69 : vector<128x64xf32>
    %c24_56 = arith.constant 24 : index
    %c0_57 = arith.constant 0 : index
    %71 = vector.load %arg10[%c24_56, %c0_57] : memref<560x64xbf16, #tpu.memory_space<vmem>>, vector<128x64xbf16>
    %c256_58 = arith.constant 256 : index
    %c0_59 = arith.constant 0 : index
    %72 = vector.load %arg5[%c256_58, %c0_59] : memref<576x64xbf16, #tpu.memory_space<vmem>>, vector<64x64xbf16>
    %cst_60 = arith.constant dense<0.000000e+00> : vector<128x64xf32>
    %73 = tpu.matmul %71, %72, %cst_60 {dimension_numbers = #tpu.dot_dimension_numbers<[1], [0], [0], [1], [0, 0, 1, 1], [], []>} : vector<128x64xbf16>, vector<64x64xbf16>, vector<128x64xf32> -> vector<128x64xf32>
    %74 = arith.addf %70, %73 : vector<128x64xf32>
    %c25 = arith.constant 25 : index
    %c0_61 = arith.constant 0 : index
    %75 = vector.load %arg10[%c25, %c0_61] : memref<560x64xbf16, #tpu.memory_space<vmem>>, vector<128x64xbf16>
    %c320 = arith.constant 320 : index
    %c0_62 = arith.constant 0 : index
    %76 = vector.load %arg5[%c320, %c0_62] : memref<576x64xbf16, #tpu.memory_space<vmem>>, vector<64x64xbf16>
    %cst_63 = arith.constant dense<0.000000e+00> : vector<128x64xf32>
    %77 = tpu.matmul %75, %76, %cst_63 {dimension_numbers = #tpu.dot_dimension_numbers<[1], [0], [0], [1], [0, 0, 1, 1], [], []>} : vector<128x64xbf16>, vector<64x64xbf16>, vector<128x64xf32> -> vector<128x64xf32>
    %78 = arith.addf %74, %77 : vector<128x64xf32>
    %c39 = arith.constant 39 : index
    %c0_64 = arith.constant 0 : index
    %79 = vector.load %arg10[%c39, %c0_64] : memref<560x64xbf16, #tpu.memory_space<vmem>>, vector<128x64xbf16>
    %c384_65 = arith.constant 384 : index
    %c0_66 = arith.constant 0 : index
    %80 = vector.load %arg5[%c384_65, %c0_66] : memref<576x64xbf16, #tpu.memory_space<vmem>>, vector<64x64xbf16>
    %cst_67 = arith.constant dense<0.000000e+00> : vector<128x64xf32>
    %81 = tpu.matmul %79, %80, %cst_67 {dimension_numbers = #tpu.dot_dimension_numbers<[1], [0], [0], [1], [0, 0, 1, 1], [], []>} : vector<128x64xbf16>, vector<64x64xbf16>, vector<128x64xf32> -> vector<128x64xf32>
    %82 = arith.addf %78, %81 : vector<128x64xf32>
    %c40 = arith.constant 40 : index
    %c0_68 = arith.constant 0 : index
    %83 = vector.load %arg10[%c40, %c0_68] : memref<560x64xbf16, #tpu.memory_space<vmem>>, vector<128x64xbf16>
    %c448 = arith.constant 448 : index
    %c0_69 = arith.constant 0 : index
    %84 = vector.load %arg5[%c448, %c0_69] : memref<576x64xbf16, #tpu.memory_space<vmem>>, vector<64x64xbf16>
    %cst_70 = arith.constant dense<0.000000e+00> : vector<128x64xf32>
    %85 = tpu.matmul %83, %84, %cst_70 {dimension_numbers = #tpu.dot_dimension_numbers<[1], [0], [0], [1], [0, 0, 1, 1], [], []>} : vector<128x64xbf16>, vector<64x64xbf16>, vector<128x64xf32> -> vector<128x64xf32>
    %86 = arith.addf %82, %85 : vector<128x64xf32>
    %c41 = arith.constant 41 : index
    %c0_71 = arith.constant 0 : index
    %87 = vector.load %arg10[%c41, %c0_71] : memref<560x64xbf16, #tpu.memory_space<vmem>>, vector<128x64xbf16>
    %c512 = arith.constant 512 : index
    %c0_72 = arith.constant 0 : index
    %88 = vector.load %arg5[%c512, %c0_72] : memref<576x64xbf16, #tpu.memory_space<vmem>>, vector<64x64xbf16>
    %cst_73 = arith.constant dense<0.000000e+00> : vector<128x64xf32>
    %89 = tpu.matmul %87, %88, %cst_73 {dimension_numbers = #tpu.dot_dimension_numbers<[1], [0], [0], [1], [0, 0, 1, 1], [], []>} : vector<128x64xbf16>, vector<64x64xbf16>, vector<128x64xf32> -> vector<128x64xf32>
    %90 = arith.addf %86, %89 : vector<128x64xf32>
    %91 = vector.broadcast %52 : vector<1x64xf32> to vector<128x64xf32>
    %92 = arith.addf %90, %91 : vector<128x64xf32>
    %cst_74 = arith.constant 0.000000e+00 : f32
    %93 = vector.broadcast %cst_74 : f32 to vector<128x64xf32>
    %94 = arith.maximumf %92, %93 : vector<128x64xf32>
    %95 = arith.truncf %94 : vector<128x64xf32> to vector<128x64xbf16>
    %c0_75 = arith.constant 0 : index
    %c0_76 = arith.constant 0 : index
    %96 = vector.load %arg7[%c0_75, %c0_76] : memref<64x256xbf16, #tpu.memory_space<vmem>>, vector<64x256xbf16>
    %cst_77 = arith.constant dense<0.000000e+00> : vector<128x256xf32>
    %97 = tpu.matmul %95, %96, %cst_77 {dimension_numbers = #tpu.dot_dimension_numbers<[1], [0], [0], [1], [0, 0, 1, 1], [], []>} : vector<128x64xbf16>, vector<64x256xbf16>, vector<128x256xf32> -> vector<128x256xf32>
    %c0_78 = arith.constant 0 : index
    %c0_79 = arith.constant 0 : index
    %98 = vector.load %arg1[%c0_78, %c0_79] : memref<512x256xbf16, #tpu.memory_space<vmem>>, vector<128x256xbf16>
    %99 = arith.extf %98 : vector<128x256xbf16> to vector<128x256xf32>
    %100 = vector.broadcast %53 : vector<1x256xf32> to vector<128x256xf32>
    %101 = arith.addf %97, %100 : vector<128x256xf32>
    %102 = arith.addf %101, %99 : vector<128x256xf32>
    %cst_80 = arith.constant 0.000000e+00 : f32
    %103 = vector.broadcast %cst_80 : f32 to vector<128x256xf32>
    %104 = arith.maximumf %102, %103 : vector<128x256xf32>
    %105 = arith.truncf %104 : vector<128x256xf32> to vector<128x256xbf16>
    %c0_81 = arith.constant 0 : index
    %c0_82 = arith.constant 0 : index
    %106 = vector.load %arg9[%c0_81, %c0_82] : memref<512x256xbf16, #tpu.memory_space<vmem>>, vector<128x256xbf16>
    tpu.vector_store %arg9[%c0_81, %c0_82], %105 {strides = array<i32>} : memref<512x256xbf16, #tpu.memory_space<vmem>>, vector<128x256xbf16>,
    %cst_83 = arith.constant 0.000000e+00 : f32
    %107 = vector.broadcast %cst_83 : f32 to vector<128x64xf32>
    %c135 = arith.constant 135 : index
    %c0_84 = arith.constant 0 : index
    %108 = vector.load %arg10[%c135, %c0_84] : memref<560x64xbf16, #tpu.memory_space<vmem>>, vector<128x64xbf16>
    %c0_85 = arith.constant 0 : index
    %c0_86 = arith.constant 0 : index
    %109 = vector.load %arg5[%c0_85, %c0_86] : memref<576x64xbf16, #tpu.memory_space<vmem>>, vector<64x64xbf16>
    %cst_87 = arith.constant dense<0.000000e+00> : vector<128x64xf32>
    %110 = tpu.matmul %108, %109, %cst_87 {dimension_numbers = #tpu.dot_dimension_numbers<[1], [0], [0], [1], [0, 0, 1, 1], [], []>} : vector<128x64xbf16>, vector<64x64xbf16>, vector<128x64xf32> -> vector<128x64xf32>
    %111 = arith.addf %107, %110 : vector<128x64xf32>
    %c136 = arith.constant 136 : index
    %c0_88 = arith.constant 0 : index
    %112 = vector.load %arg10[%c136, %c0_88] : memref<560x64xbf16, #tpu.memory_space<vmem>>, vector<128x64xbf16>
    %c64_89 = arith.constant 64 : index
    %c0_90 = arith.constant 0 : index
    %113 = vector.load %arg5[%c64_89, %c0_90] : memref<576x64xbf16, #tpu.memory_space<vmem>>, vector<64x64xbf16>
    %cst_91 = arith.constant dense<0.000000e+00> : vector<128x64xf32>
    %114 = tpu.matmul %112, %113, %cst_91 {dimension_numbers = #tpu.dot_dimension_numbers<[1], [0], [0], [1], [0, 0, 1, 1], [], []>} : vector<128x64xbf16>, vector<64x64xbf16>, vector<128x64xf32> -> vector<128x64xf32>
    %115 = arith.addf %111, %114 : vector<128x64xf32>
    %c137 = arith.constant 137 : index
    %c0_92 = arith.constant 0 : index
    %116 = vector.load %arg10[%c137, %c0_92] : memref<560x64xbf16, #tpu.memory_space<vmem>>, vector<128x64xbf16>
    %c128_93 = arith.constant 128 : index
    %c0_94 = arith.constant 0 : index
    %117 = vector.load %arg5[%c128_93, %c0_94] : memref<576x64xbf16, #tpu.memory_space<vmem>>, vector<64x64xbf16>
    %cst_95 = arith.constant dense<0.000000e+00> : vector<128x64xf32>
    %118 = tpu.matmul %116, %117, %cst_95 {dimension_numbers = #tpu.dot_dimension_numbers<[1], [0], [0], [1], [0, 0, 1, 1], [], []>} : vector<128x64xbf16>, vector<64x64xbf16>, vector<128x64xf32> -> vector<128x64xf32>
    %119 = arith.addf %115, %118 : vector<128x64xf32>
    %c151 = arith.constant 151 : index
    %c0_96 = arith.constant 0 : index
    %120 = vector.load %arg10[%c151, %c0_96] : memref<560x64xbf16, #tpu.memory_space<vmem>>, vector<128x64xbf16>
    %c192_97 = arith.constant 192 : index
    %c0_98 = arith.constant 0 : index
    %121 = vector.load %arg5[%c192_97, %c0_98] : memref<576x64xbf16, #tpu.memory_space<vmem>>, vector<64x64xbf16>
    %cst_99 = arith.constant dense<0.000000e+00> : vector<128x64xf32>
    %122 = tpu.matmul %120, %121, %cst_99 {dimension_numbers = #tpu.dot_dimension_numbers<[1], [0], [0], [1], [0, 0, 1, 1], [], []>} : vector<128x64xbf16>, vector<64x64xbf16>, vector<128x64xf32> -> vector<128x64xf32>
    %123 = arith.addf %119, %122 : vector<128x64xf32>
    %c152_100 = arith.constant 152 : index
    %c0_101 = arith.constant 0 : index
    %124 = vector.load %arg10[%c152_100, %c0_101] : memref<560x64xbf16, #tpu.memory_space<vmem>>, vector<128x64xbf16>
    %c256_102 = arith.constant 256 : index
    %c0_103 = arith.constant 0 : index
    %125 = vector.load %arg5[%c256_102, %c0_103] : memref<576x64xbf16, #tpu.memory_space<vmem>>, vector<64x64xbf16>
    %cst_104 = arith.constant dense<0.000000e+00> : vector<128x64xf32>
    %126 = tpu.matmul %124, %125, %cst_104 {dimension_numbers = #tpu.dot_dimension_numbers<[1], [0], [0], [1], [0, 0, 1, 1], [], []>} : vector<128x64xbf16>, vector<64x64xbf16>, vector<128x64xf32> -> vector<128x64xf32>
    %127 = arith.addf %123, %126 : vector<128x64xf32>
    %c153 = arith.constant 153 : index
    %c0_105 = arith.constant 0 : index
    %128 = vector.load %arg10[%c153, %c0_105] : memref<560x64xbf16, #tpu.memory_space<vmem>>, vector<128x64xbf16>
    %c320_106 = arith.constant 320 : index
    %c0_107 = arith.constant 0 : index
    %129 = vector.load %arg5[%c320_106, %c0_107] : memref<576x64xbf16, #tpu.memory_space<vmem>>, vector<64x64xbf16>
    %cst_108 = arith.constant dense<0.000000e+00> : vector<128x64xf32>
    %130 = tpu.matmul %128, %129, %cst_108 {dimension_numbers = #tpu.dot_dimension_numbers<[1], [0], [0], [1], [0, 0, 1, 1], [], []>} : vector<128x64xbf16>, vector<64x64xbf16>, vector<128x64xf32> -> vector<128x64xf32>
    %131 = arith.addf %127, %130 : vector<128x64xf32>
    %c167 = arith.constant 167 : index
    %c0_109 = arith.constant 0 : index
    %132 = vector.load %arg10[%c167, %c0_109] : memref<560x64xbf16, #tpu.memory_space<vmem>>, vector<128x64xbf16>
    %c384_110 = arith.constant 384 : index
    %c0_111 = arith.constant 0 : index
    %133 = vector.load %arg5[%c384_110, %c0_111] : memref<576x64xbf16, #tpu.memory_space<vmem>>, vector<64x64xbf16>
    %cst_112 = arith.constant dense<0.000000e+00> : vector<128x64xf32>
    %134 = tpu.matmul %132, %133, %cst_112 {dimension_numbers = #tpu.dot_dimension_numbers<[1], [0], [0], [1], [0, 0, 1, 1], [], []>} : vector<128x64xbf16>, vector<64x64xbf16>, vector<128x64xf32> -> vector<128x64xf32>
    %135 = arith.addf %131, %134 : vector<128x64xf32>
    %c168 = arith.constant 168 : index
    %c0_113 = arith.constant 0 : index
    %136 = vector.load %arg10[%c168, %c0_113] : memref<560x64xbf16, #tpu.memory_space<vmem>>, vector<128x64xbf16>
    %c448_114 = arith.constant 448 : index
    %c0_115 = arith.constant 0 : index
    %137 = vector.load %arg5[%c448_114, %c0_115] : memref<576x64xbf16, #tpu.memory_space<vmem>>, vector<64x64xbf16>
    %cst_116 = arith.constant dense<0.000000e+00> : vector<128x64xf32>
    %138 = tpu.matmul %136, %137, %cst_116 {dimension_numbers = #tpu.dot_dimension_numbers<[1], [0], [0], [1], [0, 0, 1, 1], [], []>} : vector<128x64xbf16>, vector<64x64xbf16>, vector<128x64xf32> -> vector<128x64xf32>
    %139 = arith.addf %135, %138 : vector<128x64xf32>
    %c169 = arith.constant 169 : index
    %c0_117 = arith.constant 0 : index
    %140 = vector.load %arg10[%c169, %c0_117] : memref<560x64xbf16, #tpu.memory_space<vmem>>, vector<128x64xbf16>
    %c512_118 = arith.constant 512 : index
    %c0_119 = arith.constant 0 : index
    %141 = vector.load %arg5[%c512_118, %c0_119] : memref<576x64xbf16, #tpu.memory_space<vmem>>, vector<64x64xbf16>
    %cst_120 = arith.constant dense<0.000000e+00> : vector<128x64xf32>
    %142 = tpu.matmul %140, %141, %cst_120 {dimension_numbers = #tpu.dot_dimension_numbers<[1], [0], [0], [1], [0, 0, 1, 1], [], []>} : vector<128x64xbf16>, vector<64x64xbf16>, vector<128x64xf32> -> vector<128x64xf32>
    %143 = arith.addf %139, %142 : vector<128x64xf32>
    %144 = vector.broadcast %52 : vector<1x64xf32> to vector<128x64xf32>
    %145 = arith.addf %143, %144 : vector<128x64xf32>
    %cst_121 = arith.constant 0.000000e+00 : f32
    %146 = vector.broadcast %cst_121 : f32 to vector<128x64xf32>
    %147 = arith.maximumf %145, %146 : vector<128x64xf32>
    %148 = arith.truncf %147 : vector<128x64xf32> to vector<128x64xbf16>
    %c0_122 = arith.constant 0 : index
    %c0_123 = arith.constant 0 : index
    %149 = vector.load %arg7[%c0_122, %c0_123] : memref<64x256xbf16, #tpu.memory_space<vmem>>, vector<64x256xbf16>
    %cst_124 = arith.constant dense<0.000000e+00> : vector<128x256xf32>
    %150 = tpu.matmul %148, %149, %cst_124 {dimension_numbers = #tpu.dot_dimension_numbers<[1], [0], [0], [1], [0, 0, 1, 1], [], []>} : vector<128x64xbf16>, vector<64x256xbf16>, vector<128x256xf32> -> vector<128x256xf32>
    %c128_125 = arith.constant 128 : index
    %c0_126 = arith.constant 0 : index
    %151 = vector.load %arg1[%c128_125, %c0_126] : memref<512x256xbf16, #tpu.memory_space<vmem>>, vector<128x256xbf16>
    %152 = arith.extf %151 : vector<128x256xbf16> to vector<128x256xf32>
    %153 = vector.broadcast %53 : vector<1x256xf32> to vector<128x256xf32>
    %154 = arith.addf %150, %153 : vector<128x256xf32>
    %155 = arith.addf %154, %152 : vector<128x256xf32>
    %cst_127 = arith.constant 0.000000e+00 : f32
    %156 = vector.broadcast %cst_127 : f32 to vector<128x256xf32>
    %157 = arith.maximumf %155, %156 : vector<128x256xf32>
    %158 = arith.truncf %157 : vector<128x256xf32> to vector<128x256xbf16>
    %c128_128 = arith.constant 128 : index
    %c0_129 = arith.constant 0 : index
    %159 = vector.load %arg9[%c128_128, %c0_129] : memref<512x256xbf16, #tpu.memory_space<vmem>>, vector<128x256xbf16>
    tpu.vector_store %arg9[%c128_128, %c0_129], %158 {strides = array<i32>} : memref<512x256xbf16, #tpu.memory_space<vmem>>, vector<128x256xbf16>,
    %cst_130 = arith.constant 0.000000e+00 : f32
    %160 = vector.broadcast %cst_130 : f32 to vector<128x64xf32>
    %c263 = arith.constant 263 : index
    %c0_131 = arith.constant 0 : index
    %161 = vector.load %arg10[%c263, %c0_131] : memref<560x64xbf16, #tpu.memory_space<vmem>>, vector<128x64xbf16>
    %c0_132 = arith.constant 0 : index
    %c0_133 = arith.constant 0 : index
    %162 = vector.load %arg5[%c0_132, %c0_133] : memref<576x64xbf16, #tpu.memory_space<vmem>>, vector<64x64xbf16>
    %cst_134 = arith.constant dense<0.000000e+00> : vector<128x64xf32>
    %163 = tpu.matmul %161, %162, %cst_134 {dimension_numbers = #tpu.dot_dimension_numbers<[1], [0], [0], [1], [0, 0, 1, 1], [], []>} : vector<128x64xbf16>, vector<64x64xbf16>, vector<128x64xf32> -> vector<128x64xf32>
    %164 = arith.addf %160, %163 : vector<128x64xf32>
    %c264 = arith.constant 264 : index
    %c0_135 = arith.constant 0 : index
    %165 = vector.load %arg10[%c264, %c0_135] : memref<560x64xbf16, #tpu.memory_space<vmem>>, vector<128x64xbf16>
    %c64_136 = arith.constant 64 : index
    %c0_137 = arith.constant 0 : index
    %166 = vector.load %arg5[%c64_136, %c0_137] : memref<576x64xbf16, #tpu.memory_space<vmem>>, vector<64x64xbf16>
    %cst_138 = arith.constant dense<0.000000e+00> : vector<128x64xf32>
    %167 = tpu.matmul %165, %166, %cst_138 {dimension_numbers = #tpu.dot_dimension_numbers<[1], [0], [0], [1], [0, 0, 1, 1], [], []>} : vector<128x64xbf16>, vector<64x64xbf16>, vector<128x64xf32> -> vector<128x64xf32>
    %168 = arith.addf %164, %167 : vector<128x64xf32>
    %c265 = arith.constant 265 : index
    %c0_139 = arith.constant 0 : index
    %169 = vector.load %arg10[%c265, %c0_139] : memref<560x64xbf16, #tpu.memory_space<vmem>>, vector<128x64xbf16>
    %c128_140 = arith.constant 128 : index
    %c0_141 = arith.constant 0 : index
    %170 = vector.load %arg5[%c128_140, %c0_141] : memref<576x64xbf16, #tpu.memory_space<vmem>>, vector<64x64xbf16>
    %cst_142 = arith.constant dense<0.000000e+00> : vector<128x64xf32>
    %171 = tpu.matmul %169, %170, %cst_142 {dimension_numbers = #tpu.dot_dimension_numbers<[1], [0], [0], [1], [0, 0, 1, 1], [], []>} : vector<128x64xbf16>, vector<64x64xbf16>, vector<128x64xf32> -> vector<128x64xf32>
    %172 = arith.addf %168, %171 : vector<128x64xf32>
    %c279 = arith.constant 279 : index
    %c0_143 = arith.constant 0 : index
    %173 = vector.load %arg10[%c279, %c0_143] : memref<560x64xbf16, #tpu.memory_space<vmem>>, vector<128x64xbf16>
    %c192_144 = arith.constant 192 : index
    %c0_145 = arith.constant 0 : index
    %174 = vector.load %arg5[%c192_144, %c0_145] : memref<576x64xbf16, #tpu.memory_space<vmem>>, vector<64x64xbf16>
    %cst_146 = arith.constant dense<0.000000e+00> : vector<128x64xf32>
    %175 = tpu.matmul %173, %174, %cst_146 {dimension_numbers = #tpu.dot_dimension_numbers<[1], [0], [0], [1], [0, 0, 1, 1], [], []>} : vector<128x64xbf16>, vector<64x64xbf16>, vector<128x64xf32> -> vector<128x64xf32>
    %176 = arith.addf %172, %175 : vector<128x64xf32>
    %c280_147 = arith.constant 280 : index
    %c0_148 = arith.constant 0 : index
    %177 = vector.load %arg10[%c280_147, %c0_148] : memref<560x64xbf16, #tpu.memory_space<vmem>>, vector<128x64xbf16>
    %c256_149 = arith.constant 256 : index
    %c0_150 = arith.constant 0 : index
    %178 = vector.load %arg5[%c256_149, %c0_150] : memref<576x64xbf16, #tpu.memory_space<vmem>>, vector<64x64xbf16>
    %cst_151 = arith.constant dense<0.000000e+00> : vector<128x64xf32>
    %179 = tpu.matmul %177, %178, %cst_151 {dimension_numbers = #tpu.dot_dimension_numbers<[1], [0], [0], [1], [0, 0, 1, 1], [], []>} : vector<128x64xbf16>, vector<64x64xbf16>, vector<128x64xf32> -> vector<128x64xf32>
    %180 = arith.addf %176, %179 : vector<128x64xf32>
    %c281 = arith.constant 281 : index
    %c0_152 = arith.constant 0 : index
    %181 = vector.load %arg10[%c281, %c0_152] : memref<560x64xbf16, #tpu.memory_space<vmem>>, vector<128x64xbf16>
    %c320_153 = arith.constant 320 : index
    %c0_154 = arith.constant 0 : index
    %182 = vector.load %arg5[%c320_153, %c0_154] : memref<576x64xbf16, #tpu.memory_space<vmem>>, vector<64x64xbf16>
    %cst_155 = arith.constant dense<0.000000e+00> : vector<128x64xf32>
    %183 = tpu.matmul %181, %182, %cst_155 {dimension_numbers = #tpu.dot_dimension_numbers<[1], [0], [0], [1], [0, 0, 1, 1], [], []>} : vector<128x64xbf16>, vector<64x64xbf16>, vector<128x64xf32> -> vector<128x64xf32>
    %184 = arith.addf %180, %183 : vector<128x64xf32>
    %c295 = arith.constant 295 : index
    %c0_156 = arith.constant 0 : index
    %185 = vector.load %arg10[%c295, %c0_156] : memref<560x64xbf16, #tpu.memory_space<vmem>>, vector<128x64xbf16>
    %c384_157 = arith.constant 384 : index
    %c0_158 = arith.constant 0 : index
    %186 = vector.load %arg5[%c384_157, %c0_158] : memref<576x64xbf16, #tpu.memory_space<vmem>>, vector<64x64xbf16>
    %cst_159 = arith.constant dense<0.000000e+00> : vector<128x64xf32>
    %187 = tpu.matmul %185, %186, %cst_159 {dimension_numbers = #tpu.dot_dimension_numbers<[1], [0], [0], [1], [0, 0, 1, 1], [], []>} : vector<128x64xbf16>, vector<64x64xbf16>, vector<128x64xf32> -> vector<128x64xf32>
    %188 = arith.addf %184, %187 : vector<128x64xf32>
    %c296 = arith.constant 296 : index
    %c0_160 = arith.constant 0 : index
    %189 = vector.load %arg10[%c296, %c0_160] : memref<560x64xbf16, #tpu.memory_space<vmem>>, vector<128x64xbf16>
    %c448_161 = arith.constant 448 : index
    %c0_162 = arith.constant 0 : index
    %190 = vector.load %arg5[%c448_161, %c0_162] : memref<576x64xbf16, #tpu.memory_space<vmem>>, vector<64x64xbf16>
    %cst_163 = arith.constant dense<0.000000e+00> : vector<128x64xf32>
    %191 = tpu.matmul %189, %190, %cst_163 {dimension_numbers = #tpu.dot_dimension_numbers<[1], [0], [0], [1], [0, 0, 1, 1], [], []>} : vector<128x64xbf16>, vector<64x64xbf16>, vector<128x64xf32> -> vector<128x64xf32>
    %192 = arith.addf %188, %191 : vector<128x64xf32>
    %c297 = arith.constant 297 : index
    %c0_164 = arith.constant 0 : index
    %193 = vector.load %arg10[%c297, %c0_164] : memref<560x64xbf16, #tpu.memory_space<vmem>>, vector<128x64xbf16>
    %c512_165 = arith.constant 512 : index
    %c0_166 = arith.constant 0 : index
    %194 = vector.load %arg5[%c512_165, %c0_166] : memref<576x64xbf16, #tpu.memory_space<vmem>>, vector<64x64xbf16>
    %cst_167 = arith.constant dense<0.000000e+00> : vector<128x64xf32>
    %195 = tpu.matmul %193, %194, %cst_167 {dimension_numbers = #tpu.dot_dimension_numbers<[1], [0], [0], [1], [0, 0, 1, 1], [], []>} : vector<128x64xbf16>, vector<64x64xbf16>, vector<128x64xf32> -> vector<128x64xf32>
    %196 = arith.addf %192, %195 : vector<128x64xf32>
    %197 = vector.broadcast %52 : vector<1x64xf32> to vector<128x64xf32>
    %198 = arith.addf %196, %197 : vector<128x64xf32>
    %cst_168 = arith.constant 0.000000e+00 : f32
    %199 = vector.broadcast %cst_168 : f32 to vector<128x64xf32>
    %200 = arith.maximumf %198, %199 : vector<128x64xf32>
    %201 = arith.truncf %200 : vector<128x64xf32> to vector<128x64xbf16>
    %c0_169 = arith.constant 0 : index
    %c0_170 = arith.constant 0 : index
    %202 = vector.load %arg7[%c0_169, %c0_170] : memref<64x256xbf16, #tpu.memory_space<vmem>>, vector<64x256xbf16>
    %cst_171 = arith.constant dense<0.000000e+00> : vector<128x256xf32>
    %203 = tpu.matmul %201, %202, %cst_171 {dimension_numbers = #tpu.dot_dimension_numbers<[1], [0], [0], [1], [0, 0, 1, 1], [], []>} : vector<128x64xbf16>, vector<64x256xbf16>, vector<128x256xf32> -> vector<128x256xf32>
    %c256_172 = arith.constant 256 : index
    %c0_173 = arith.constant 0 : index
    %204 = vector.load %arg1[%c256_172, %c0_173] : memref<512x256xbf16, #tpu.memory_space<vmem>>, vector<128x256xbf16>
    %205 = arith.extf %204 : vector<128x256xbf16> to vector<128x256xf32>
    %206 = vector.broadcast %53 : vector<1x256xf32> to vector<128x256xf32>
    %207 = arith.addf %203, %206 : vector<128x256xf32>
    %208 = arith.addf %207, %205 : vector<128x256xf32>
    %cst_174 = arith.constant 0.000000e+00 : f32
    %209 = vector.broadcast %cst_174 : f32 to vector<128x256xf32>
    %210 = arith.maximumf %208, %209 : vector<128x256xf32>
    %211 = arith.truncf %210 : vector<128x256xf32> to vector<128x256xbf16>
    %c256_175 = arith.constant 256 : index
    %c0_176 = arith.constant 0 : index
    %212 = vector.load %arg9[%c256_175, %c0_176] : memref<512x256xbf16, #tpu.memory_space<vmem>>, vector<128x256xbf16>
    tpu.vector_store %arg9[%c256_175, %c0_176], %211 {strides = array<i32>} : memref<512x256xbf16, #tpu.memory_space<vmem>>, vector<128x256xbf16>,
    %cst_177 = arith.constant 0.000000e+00 : f32
    %213 = vector.broadcast %cst_177 : f32 to vector<128x64xf32>
    %c391 = arith.constant 391 : index
    %c0_178 = arith.constant 0 : index
    %214 = vector.load %arg10[%c391, %c0_178] : memref<560x64xbf16, #tpu.memory_space<vmem>>, vector<128x64xbf16>
    %c0_179 = arith.constant 0 : index
    %c0_180 = arith.constant 0 : index
    %215 = vector.load %arg5[%c0_179, %c0_180] : memref<576x64xbf16, #tpu.memory_space<vmem>>, vector<64x64xbf16>
    %cst_181 = arith.constant dense<0.000000e+00> : vector<128x64xf32>
    %216 = tpu.matmul %214, %215, %cst_181 {dimension_numbers = #tpu.dot_dimension_numbers<[1], [0], [0], [1], [0, 0, 1, 1], [], []>} : vector<128x64xbf16>, vector<64x64xbf16>, vector<128x64xf32> -> vector<128x64xf32>
    %217 = arith.addf %213, %216 : vector<128x64xf32>
    %c392 = arith.constant 392 : index
    %c0_182 = arith.constant 0 : index
    %218 = vector.load %arg10[%c392, %c0_182] : memref<560x64xbf16, #tpu.memory_space<vmem>>, vector<128x64xbf16>
    %c64_183 = arith.constant 64 : index
    %c0_184 = arith.constant 0 : index
    %219 = vector.load %arg5[%c64_183, %c0_184] : memref<576x64xbf16, #tpu.memory_space<vmem>>, vector<64x64xbf16>
    %cst_185 = arith.constant dense<0.000000e+00> : vector<128x64xf32>
    %220 = tpu.matmul %218, %219, %cst_185 {dimension_numbers = #tpu.dot_dimension_numbers<[1], [0], [0], [1], [0, 0, 1, 1], [], []>} : vector<128x64xbf16>, vector<64x64xbf16>, vector<128x64xf32> -> vector<128x64xf32>
    %221 = arith.addf %217, %220 : vector<128x64xf32>
    %c393 = arith.constant 393 : index
    %c0_186 = arith.constant 0 : index
    %222 = vector.load %arg10[%c393, %c0_186] : memref<560x64xbf16, #tpu.memory_space<vmem>>, vector<128x64xbf16>
    %c128_187 = arith.constant 128 : index
    %c0_188 = arith.constant 0 : index
    %223 = vector.load %arg5[%c128_187, %c0_188] : memref<576x64xbf16, #tpu.memory_space<vmem>>, vector<64x64xbf16>
    %cst_189 = arith.constant dense<0.000000e+00> : vector<128x64xf32>
    %224 = tpu.matmul %222, %223, %cst_189 {dimension_numbers = #tpu.dot_dimension_numbers<[1], [0], [0], [1], [0, 0, 1, 1], [], []>} : vector<128x64xbf16>, vector<64x64xbf16>, vector<128x64xf32> -> vector<128x64xf32>
    %225 = arith.addf %221, %224 : vector<128x64xf32>
    %c407 = arith.constant 407 : index
    %c0_190 = arith.constant 0 : index
    %226 = vector.load %arg10[%c407, %c0_190] : memref<560x64xbf16, #tpu.memory_space<vmem>>, vector<128x64xbf16>
    %c192_191 = arith.constant 192 : index
    %c0_192 = arith.constant 0 : index
    %227 = vector.load %arg5[%c192_191, %c0_192] : memref<576x64xbf16, #tpu.memory_space<vmem>>, vector<64x64xbf16>
    %cst_193 = arith.constant dense<0.000000e+00> : vector<128x64xf32>
    %228 = tpu.matmul %226, %227, %cst_193 {dimension_numbers = #tpu.dot_dimension_numbers<[1], [0], [0], [1], [0, 0, 1, 1], [], []>} : vector<128x64xbf16>, vector<64x64xbf16>, vector<128x64xf32> -> vector<128x64xf32>
    %229 = arith.addf %225, %228 : vector<128x64xf32>
    %c408_194 = arith.constant 408 : index
    %c0_195 = arith.constant 0 : index
    %230 = vector.load %arg10[%c408_194, %c0_195] : memref<560x64xbf16, #tpu.memory_space<vmem>>, vector<128x64xbf16>
    %c256_196 = arith.constant 256 : index
    %c0_197 = arith.constant 0 : index
    %231 = vector.load %arg5[%c256_196, %c0_197] : memref<576x64xbf16, #tpu.memory_space<vmem>>, vector<64x64xbf16>
    %cst_198 = arith.constant dense<0.000000e+00> : vector<128x64xf32>
    %232 = tpu.matmul %230, %231, %cst_198 {dimension_numbers = #tpu.dot_dimension_numbers<[1], [0], [0], [1], [0, 0, 1, 1], [], []>} : vector<128x64xbf16>, vector<64x64xbf16>, vector<128x64xf32> -> vector<128x64xf32>
    %233 = arith.addf %229, %232 : vector<128x64xf32>
    %c409 = arith.constant 409 : index
    %c0_199 = arith.constant 0 : index
    %234 = vector.load %arg10[%c409, %c0_199] : memref<560x64xbf16, #tpu.memory_space<vmem>>, vector<128x64xbf16>
    %c320_200 = arith.constant 320 : index
    %c0_201 = arith.constant 0 : index
    %235 = vector.load %arg5[%c320_200, %c0_201] : memref<576x64xbf16, #tpu.memory_space<vmem>>, vector<64x64xbf16>
    %cst_202 = arith.constant dense<0.000000e+00> : vector<128x64xf32>
    %236 = tpu.matmul %234, %235, %cst_202 {dimension_numbers = #tpu.dot_dimension_numbers<[1], [0], [0], [1], [0, 0, 1, 1], [], []>} : vector<128x64xbf16>, vector<64x64xbf16>, vector<128x64xf32> -> vector<128x64xf32>
    %237 = arith.addf %233, %236 : vector<128x64xf32>
    %c423 = arith.constant 423 : index
    %c0_203 = arith.constant 0 : index
    %238 = vector.load %arg10[%c423, %c0_203] : memref<560x64xbf16, #tpu.memory_space<vmem>>, vector<128x64xbf16>
    %c384_204 = arith.constant 384 : index
    %c0_205 = arith.constant 0 : index
    %239 = vector.load %arg5[%c384_204, %c0_205] : memref<576x64xbf16, #tpu.memory_space<vmem>>, vector<64x64xbf16>
    %cst_206 = arith.constant dense<0.000000e+00> : vector<128x64xf32>
    %240 = tpu.matmul %238, %239, %cst_206 {dimension_numbers = #tpu.dot_dimension_numbers<[1], [0], [0], [1], [0, 0, 1, 1], [], []>} : vector<128x64xbf16>, vector<64x64xbf16>, vector<128x64xf32> -> vector<128x64xf32>
    %241 = arith.addf %237, %240 : vector<128x64xf32>
    %c424 = arith.constant 424 : index
    %c0_207 = arith.constant 0 : index
    %242 = vector.load %arg10[%c424, %c0_207] : memref<560x64xbf16, #tpu.memory_space<vmem>>, vector<128x64xbf16>
    %c448_208 = arith.constant 448 : index
    %c0_209 = arith.constant 0 : index
    %243 = vector.load %arg5[%c448_208, %c0_209] : memref<576x64xbf16, #tpu.memory_space<vmem>>, vector<64x64xbf16>
    %cst_210 = arith.constant dense<0.000000e+00> : vector<128x64xf32>
    %244 = tpu.matmul %242, %243, %cst_210 {dimension_numbers = #tpu.dot_dimension_numbers<[1], [0], [0], [1], [0, 0, 1, 1], [], []>} : vector<128x64xbf16>, vector<64x64xbf16>, vector<128x64xf32> -> vector<128x64xf32>
    %245 = arith.addf %241, %244 : vector<128x64xf32>
    %c425 = arith.constant 425 : index
    %c0_211 = arith.constant 0 : index
    %246 = vector.load %arg10[%c425, %c0_211] : memref<560x64xbf16, #tpu.memory_space<vmem>>, vector<128x64xbf16>
    %c512_212 = arith.constant 512 : index
    %c0_213 = arith.constant 0 : index
    %247 = vector.load %arg5[%c512_212, %c0_213] : memref<576x64xbf16, #tpu.memory_space<vmem>>, vector<64x64xbf16>
    %cst_214 = arith.constant dense<0.000000e+00> : vector<128x64xf32>
    %248 = tpu.matmul %246, %247, %cst_214 {dimension_numbers = #tpu.dot_dimension_numbers<[1], [0], [0], [1], [0, 0, 1, 1], [], []>} : vector<128x64xbf16>, vector<64x64xbf16>, vector<128x64xf32> -> vector<128x64xf32>
    %249 = arith.addf %245, %248 : vector<128x64xf32>
    %250 = vector.broadcast %52 : vector<1x64xf32> to vector<128x64xf32>
    %251 = arith.addf %249, %250 : vector<128x64xf32>
    %cst_215 = arith.constant 0.000000e+00 : f32
    %252 = vector.broadcast %cst_215 : f32 to vector<128x64xf32>
    %253 = arith.maximumf %251, %252 : vector<128x64xf32>
    %254 = arith.truncf %253 : vector<128x64xf32> to vector<128x64xbf16>
    %c0_216 = arith.constant 0 : index
    %c0_217 = arith.constant 0 : index
    %255 = vector.load %arg7[%c0_216, %c0_217] : memref<64x256xbf16, #tpu.memory_space<vmem>>, vector<64x256xbf16>
    %cst_218 = arith.constant dense<0.000000e+00> : vector<128x256xf32>
    %256 = tpu.matmul %254, %255, %cst_218 {dimension_numbers = #tpu.dot_dimension_numbers<[1], [0], [0], [1], [0, 0, 1, 1], [], []>} : vector<128x64xbf16>, vector<64x256xbf16>, vector<128x256xf32> -> vector<128x256xf32>
    %c384_219 = arith.constant 384 : index
    %c0_220 = arith.constant 0 : index
    %257 = vector.load %arg1[%c384_219, %c0_220] : memref<512x256xbf16, #tpu.memory_space<vmem>>, vector<128x256xbf16>
    %258 = arith.extf %257 : vector<128x256xbf16> to vector<128x256xf32>
    %259 = vector.broadcast %53 : vector<1x256xf32> to vector<128x256xf32>
    %260 = arith.addf %256, %259 : vector<128x256xf32>
    %261 = arith.addf %260, %258 : vector<128x256xf32>
    %cst_221 = arith.constant 0.000000e+00 : f32
    %262 = vector.broadcast %cst_221 : f32 to vector<128x256xf32>
    %263 = arith.maximumf %261, %262 : vector<128x256xf32>
    %264 = arith.truncf %263 : vector<128x256xf32> to vector<128x256xbf16>
    %c384_222 = arith.constant 384 : index
    %c0_223 = arith.constant 0 : index
    %265 = vector.load %arg9[%c384_222, %c0_223] : memref<512x256xbf16, #tpu.memory_space<vmem>>, vector<128x256xbf16>
    tpu.vector_store %arg9[%c384_222, %c0_223], %264 {strides = array<i32>} : memref<512x256xbf16, #tpu.memory_space<vmem>>, vector<128x256xbf16>,
    return
  }
  func.func @transform_0(%arg0: i32) -> (i32, i32) {
    %c0_i32 = arith.constant 0 : i32
    %c0_i32_0 = arith.constant 0 : i32
    return %arg0, %c0_i32 : i32, i32
  }
  func.func @transform_1(%arg0: i32) -> (i32, i32) {
    %c0_i32 = arith.constant 0 : i32
    %c0_i32_0 = arith.constant 0 : i32
    %c0_i32_1 = arith.constant 0 : i32
    return %c0_i32, %c0_i32_0 : i32, i32
  }
  func.func @transform_2(%arg0: i32) -> (i32, i32) {
    %c0_i32 = arith.constant 0 : i32
    %c0_i32_0 = arith.constant 0 : i32
    %c0_i32_1 = arith.constant 0 : i32
    return %c0_i32, %c0_i32_0 : i32, i32
  }
  func.func @transform_3(%arg0: i32) -> (i32, i32) {
    %c0_i32 = arith.constant 0 : i32
    %c0_i32_0 = arith.constant 0 : i32
    %c0_i32_1 = arith.constant 0 : i32
    return %c0_i32, %c0_i32_0 : i32, i32
  }
  func.func @transform_4(%arg0: i32) -> (i32, i32) {
    %c0_i32 = arith.constant 0 : i32
    %c0_i32_0 = arith.constant 0 : i32
    %c0_i32_1 = arith.constant 0 : i32
    return %c0_i32, %c0_i32_0 : i32, i32
  }
  func.func @transform_5(%arg0: i32) -> (i32, i32) {
    %c0_i32 = arith.constant 0 : i32
    %c0_i32_0 = arith.constant 0 : i32
    %c0_i32_1 = arith.constant 0 : i32
    return %c0_i32, %c0_i32_0 : i32, i32
  }
  func.func @transform_6(%arg0: i32) -> (i32, i32) {
    %c0_i32 = arith.constant 0 : i32
    %c0_i32_0 = arith.constant 0 : i32
    %c0_i32_1 = arith.constant 0 : i32
    return %c0_i32, %c0_i32_0 : i32, i32
  }
  func.func @transform_7(%arg0: i32) -> (i32, i32) {
    %c0_i32 = arith.constant 0 : i32
    %c0_i32_0 = arith.constant 0 : i32
    %c0_i32_1 = arith.constant 0 : i32
    return %c0_i32, %c0_i32_0 : i32, i32
  }
  func.func @transform_8(%arg0: i32) -> (i32, i32) {
    %c0_i32 = arith.constant 0 : i32
    %c0_i32_0 = arith.constant 0 : i32
    return %arg0, %c0_i32 : i32, i32
  }
}

</mosaic_0001>

<bundles_post_ra>
// kernel: tpu_custom_call.1
= control target key start
LH: loop header
LB: loop body
LE: loop exit
PB: predicated region body
PF: predicated region fallthrough
CT: control target
= control target key end

     0   :  { %s20487_s0 = inlined_call_operand.hbm [shape: bf16[4096,256], index: 0, kind: input, shape index: {}]   ;;  %s20488_s1 = inlined_call_operand.vmem [shape: bf16[256,1], index: 1, kind: input, shape index: {}]   ;;  %s20489_s2 = inlined_call_operand.vmem [shape: bf16[256,64], index: 2, kind: input, shape index: {}]   ;;  %s20490_s3 = inlined_call_operand.hbm [shape: f32[1,64], index: 3, kind: input, shape index: {}]   ;;  %s20491_s4 = inlined_call_operand.vmem [shape: bf16[576,64], index: 4, kind: input, shape index: {}]   ;;  %s20492_s5 = inlined_call_operand.hbm [shape: f32[1,64], index: 5, kind: input, shape index: {}]   ;;  %s20493_s6 = inlined_call_operand.hbm [shape: bf16[64,256], index: 6, kind: input, shape index: {}]   ;;  %s20494_s7 = inlined_call_operand.hbm [shape: f32[1,256], index: 7, kind: input, shape index: {}]   ;;  %s20495_s8 = inlined_call_operand.hbm [shape: bf16[4096,256], index: 8, kind: output, shape index: {}]  }
   0x1   :  { %20594 = sst [smem:[#allocation46_spill]] %s20490_s3 }
   0x2   :  { %13 = vsyncpa [#allocation4], 0 }
   0x3   :  { %15 = vsyncpa [#allocation4 + $0x1], 0 }
   0x4   :  { %16 = vsyncpa [#allocation7], 0 }
   0x5   :  { %17 = vsyncpa [#allocation10], 0 }
   0x6   :  { %18 = vsyncpa [#allocation5], 0 }
   0x7   :  { %20 = vsyncpa [#allocation5 + $0x1], 0  ;;  %s16466_s27 = smov 0   ;;  %s16468_s28 = smov 0  }
   0x8   :  { %s16470_s29 = smov 0   ;;  %s16472_s30 = smov 0  }
   0x9 LB: > { %s16487_s9 = sadd.s32 4294967295, %s16407_s30   ;;  %s12838_s10 = sadd.s32 4294967294, %s16407_s30   ;;  %s16407_s30 = sphi %s16472_s30, %s20769_s30   ;;  %s16403_s29 = sphi %s16470_s29, %s20768_s29   ;;  %s16399_s28 = sphi %s16468_s28, %s20767_s28   ;;  %s16395_s27 = sphi %s16466_s27, %s20766_s27  }
   0xa   : > { %p46_p0 = scmp.ne.s32.totalorder %s16399_s28, %s16395_s27  ;;  %p20496_p1 = scmp.eq.s32.totalorder %s16487_s9, 0 }
   0xb   : > { %p223_p3 = scmp.eq.s32.totalorder %s12838_s10, 7  ;;  %p12839_p5 = scmp.ge.s32.totalorder %s16407_s30, 1 }
   0xc   : > { %p16496_p4 = por %p20496_p1, %p46_p0  ;;  %p230_p7 = scmp.lt.s32.totalorder %s16407_s30, 9 }
   0xd   : > { %p16501_p6 = por %p223_p3, %p46_p0  ;;  %s16409_s14 = smov [#allocation6]  }
   0xe   : > { %s20595_s11 = scalar_select %p16496_p4, 1, 0 }
   0xf   : > { %s20596_s12 = scalar_select %p16501_p6, 1, 0 }
  0x10   : > { %p16506_p8 = pnand %p12839_p5, %p230_p7  ;;  %s249_s15 = sshll.u32 %s16409_s14, 4  ;;  %s250_s15 = int_to_ptr.vmem [resolvable:$true] %s249_s15 }
  0x11   : > { %s16410_s16 = smov [#allocation9]   ;;  %s16411_s19 = smov [#allocation8]  }
  0x12   : > { %s20597_s13 = scalar_select %p16506_p8, 1, 0 }
  0x13   : > { %p15736_p9 = pneg %p16506_p8  ;;  %s273_s17 = sshll.u32 %s16410_s16, 4  ;;  %s16518_s17 = int_to_ptr.vmem [resolvable:$true] %s273_s17 }
  0x14   : > { %s16520_s20 = sshll.u32 %s16411_s19, 4  ;;  %s20599_s3 = sld [smem:[#allocation46_spill]]  ;;  %s264_s20 = int_to_ptr.vmem [resolvable:$true] %s16520_s20 }
  0x15   : > { %p16514_p10 = pnand %p15736_p9, %p20496_p1 }
  0x17   : > { %p16530_p12 = pneg %p16514_p10 }
  0x1a   : > { %s16191_s23 = scalar_lea.hbm %s20599_s3, 16 }
  0x1b   : > { %p16192_p11 = scmp.ne.s32.totalorder %s20599_s3, %s16191_s23  ;;  %p16198_p3 = scmp.lt.u32.totalorder %s16191_s23, %s20599_s3 }
  0x1d   : > { %p16194_p13 = pnand %p16530_p12, %p16192_p11 }
  0x1f   : > { %p16195_p0 = pneg %p16194_p13 }
  0x21   : > { %p16200_p5 = pnand %p16198_p3, %p16195_p0 }
  0x23   : > { %16203 = shalt.err (!%p16200_p5)
}
  0x24   : > { %s16204_s16 = scalar_lea.vmem %s250_s15, 16  ;;  %s16211_s19 = scalar_lea.vmem %s250_s15, 32 }
  0x25   : > { %p16205_p7 = scmp.ne.s32.totalorder %s250_s15, %s16204_s16  ;;  %p16212_p2 = scmp.lt.s32.totalorder %s250_s15, %s250_s15 }
  0x26   : > { %p16213_p6 = scmp.lt.s32.totalorder %s16211_s19, %s16204_s16 }
  0x27   : > { %p16207_p9 = pnand %p16205_p7, %p16530_p12 }
  0x28   : > { %p16214_p4 = por %p16213_p6, %p16212_p2 }
  0x29   : > { %p16208_p1 = pneg %p16207_p9 }
  0x2b   : > { %p16215_p8 = pnand %p16214_p4, %p16208_p1 }
  0x2d   : > { %16218 = shalt.err (!%p16215_p8)
}
  0x2e   : > { %15739 = dma.hbm_to_vmem [thread:$0]  (!%p16514_p10), %s20599_s3, 16, %s250_s15, [#allocation7]  }
  0x2f   : > { %s16219_s25 = scalar_lea.hbm %s20493_s6, 1024 }
  0x30   : > { %p16220_p11 = scmp.ne.s32.totalorder %s20493_s6, %s16219_s25  ;;  %p16226_p1 = scmp.lt.u32.totalorder %s16219_s25, %s20493_s6 }
  0x32   : > { %p16222_p13 = pnand %p16220_p11, %p16530_p12 }
  0x34   : > { %p16223_p2 = pneg %p16222_p13 }
  0x36   : > { %p16228_p4 = pnand %p16226_p1, %p16223_p2 }
  0x38   : > { %16231 = shalt.err (!%p16228_p4)
}
  0x39   : > { %s16232_s15 = scalar_lea.vmem %s16518_s17, 1024  ;;  %p16240_p3 = scmp.lt.s32.totalorder %s16518_s17, %s16518_s17 }
  0x3a   : > { %p16233_p6 = scmp.ne.s32.totalorder %s16518_s17, %s16232_s15  ;;  %p16241_p5 = scmp.lt.s32.totalorder %s16232_s15, %s16232_s15 }
  0x3c   : > { %p16235_p8 = pnand %p16233_p6, %p16530_p12  ;;  %p16242_p7 = por %p16241_p5, %p16240_p3 }
  0x3e   : > { %p16236_p0 = pneg %p16235_p8 }
  0x40   : > { %p16243_p9 = pnand %p16242_p7, %p16236_p0 }
  0x42   : > { %16246 = shalt.err (!%p16243_p9)
}
  0x43   : > { %s20499_s21 = smov 128   ;;  %s16413_s22 = smov 8  }
  0x44   : > { %15745 = dma.hbm_to_vmem [thread:$0]  (!%p16514_p10), %s20493_s6, 1024, %s16518_s17, [#allocation10], %s20499_s21, %s20499_s21, %s16413_s22  }
  0x45   : > { %s16247_s14 = scalar_lea.hbm %s20492_s5, 16 }
  0x46   : > { %p16248_p11 = scmp.ne.s32.totalorder %s20492_s5, %s16247_s14  ;;  %p16254_p1 = scmp.lt.u32.totalorder %s16247_s14, %s20492_s5 }
  0x48   : > { %p16250_p13 = pnand %p16248_p11, %p16530_p12 }
  0x4a   : > { %p16251_p2 = pneg %p16250_p13 }
  0x4c   : > { %p16256_p4 = pnand %p16254_p1, %p16251_p2 }
  0x4e   : > { %16259 = shalt.err (!%p16256_p4)
}
  0x4f   : > { %s16260_s23 = scalar_lea.vmem %s264_s20, 16  ;;  %s16267_s17 = scalar_lea.vmem %s264_s20, 32 }
  0x50   : > { %p16261_p6 = scmp.ne.s32.totalorder %s264_s20, %s16260_s23  ;;  %p16268_p3 = scmp.lt.s32.totalorder %s264_s20, %s264_s20 }
  0x51   : > { %p16269_p5 = scmp.lt.s32.totalorder %s16267_s17, %s16260_s23 }
  0x52   : > { %p16263_p8 = pnand %p16261_p6, %p16530_p12 }
  0x53   : > { %p16270_p7 = por %p16269_p5, %p16268_p3 }
  0x54   : > { %p16264_p0 = pneg %p16263_p8 }
  0x56   : > { %p16271_p9 = pnand %p16270_p7, %p16264_p0 }
  0x58   : > { %16274 = shalt.err (!%p16271_p9)
}
  0x59   : > { %15742 = dma.hbm_to_vmem [thread:$0]  (!%p16514_p10), %s20492_s5, 16, %s264_s20, [#allocation7]  }
  0x5a   : > { %s16414_s3 = smov [#allocation11]   ;;  %s16275_s19 = scalar_lea.hbm %s20494_s7, 32 }
  0x5b   : > { %s287_s10 = sshll.u32 %s16414_s3, 4  ;;  %p16276_p11 = scmp.ne.s32.totalorder %s20494_s7, %s16275_s19  ;;  %s288_s10 = int_to_ptr.vmem [resolvable:$true] %s287_s10 }
  0x5c   : > { %p16282_p1 = scmp.lt.u32.totalorder %s16275_s19, %s20494_s7 }
  0x5d   : > { %p16278_p13 = pnand %p16276_p11, %p16530_p12 }
  0x5f   : > { %p16279_p2 = pneg %p16278_p13 }
  0x61   : > { %p16284_p4 = pnand %p16282_p1, %p16279_p2 }
  0x63   : > { %16287 = shalt.err (!%p16284_p4)
}
  0x64   : > { %s16288_s20 = scalar_lea.vmem %s288_s10, 32  ;;  %p16296_p3 = scmp.lt.s32.totalorder %s288_s10, %s288_s10 }
  0x65   : > { %p16289_p6 = scmp.ne.s32.totalorder %s288_s10, %s16288_s20  ;;  %p16297_p5 = scmp.lt.s32.totalorder %s16288_s20, %s16288_s20 }
  0x67   : > { %p16291_p8 = pnand %p16289_p6, %p16530_p12  ;;  %p16298_p7 = por %p16297_p5, %p16296_p3 }
  0x69   : > { %p16292_p0 = pneg %p16291_p8 }
  0x6b   : > { %p16299_p9 = pnand %p16298_p7, %p16292_p0 }
  0x6d   : > { %16302 = shalt.err (!%p16299_p9)
}
  0x6e   : > { %15748 = dma.hbm_to_vmem [thread:$0]  (!%p16514_p10), %s20494_s7, 32, %s288_s10, [#allocation10]  }
  0x6f   : > { %s16610_s26 = sadd.s32 1, %s16407_s30   ;;  %s33_s25 = sadd.s32 1, %s16403_s29 }
  0x70   : > { %s30_s18 = ssub.s32 %s16407_s30, %s16610_s26  ;;  %p40_p12 = scmp.ne.s32.totalorder %s16403_s29, %s16399_s28 }
  0x71   : > { %p31_p11 = scmp.eq.s32.totalorder %s30_s18, 0  ;;  %p41_p13 = scmp.eq.s32.totalorder %s16407_s30, 0 }
  0x72   : > { %p20601_p2 = scmp.eq.s32.totalorder %s16487_s9, 7  ;;  %p15761_p4 = scmp.lt.s32.totalorder %s16407_s30, 8 }
  0x73   : > { %s16626_s14 = scalar_select %p31_p11, %s16403_s29, %s33_s25  }
  0x74   : > { %p16620_p1 = por %p20601_p2, %p40_p12  ;;  %p42_p6 = por %p41_p13, %p40_p12 }
  0x75   : > { %s298_s16 = sand.u32 1, %s16403_s29   ;;  %s13585_s10 = sshll.u32 %s16407_s30, 13 }
  0x76   : > { %s12845_s19 = sshll.u32 %s298_s16, 9  ;;  %s16633_s17 = scalar_lea.hbm %s20487_s0, %s13585_s10 }
  0x77   : > { %s302_s20 = scalar_lea.vmem [#allocation3], %s12845_s19  ;;  %p16637_p10 = pnand %p15761_p4, %p42_p6 }
  0x78   : > { %s310_s21 = sshll.u32 %s302_s20, 4  ;;  %s16641_s25 = scalar_lea.sflag [#allocation4], %s298_s16  ;;  %s16635_s21 = int_to_ptr.vmem [resolvable:$true] %s310_s21 }
  0x79   : > { %s16303_s18 = scalar_lea.hbm %s16633_s17, 8192  ;;  %p16305_p0 = pneg %p16637_p10 }
  0x7a   : > { %p16304_p8 = scmp.ne.s32.totalorder %s16633_s17, %s16303_s18  ;;  %s16308_s15 = scalar_lea.hbm %s20487_s0, 65536 }
  0x7b   : > { %p16309_p7 = scmp.lt.u32.totalorder %s16633_s17, %s20487_s0  ;;  %p16310_p9 = scmp.lt.u32.totalorder %s16308_s15, %s16303_s18 }
  0x7c   : > { %p16306_p3 = pnand %p16305_p0, %p16304_p8  ;;  %p16312_p11 = scmp.lt.u32.totalorder %s16303_s18, %s16633_s17 }
  0x7d   : > { %p16311_p12 = por %p16310_p9, %p16309_p7 }
  0x7e   : > { %p16307_p5 = pneg %p16306_p3 }
  0x7f   : > { %p16313_p13 = por %p16312_p11, %p16311_p12 }
  0x81   : > { %p16314_p2 = pnand %p16313_p13, %p16307_p5 }
  0x83   : > { %16317 = shalt.err (!%p16314_p2)
}
  0x84   : > { %s16318_s16 = scalar_lea.vmem %s16635_s21, 8192  ;;  %s16415_s19 = smov [#allocation3]  }
  0x85   : > { %p16319_p4 = scmp.ne.s32.totalorder %s16635_s21, %s16318_s16  ;;  %s16323_s10 = sshll.u32 %s16415_s19, 4  ;;  %s16324_s10 = int_to_ptr.vmem [resolvable:$false] %s16323_s10 }
  0x86   : > { %s16325_s23 = scalar_lea.vmem %s16324_s10, 16384  ;;  %p16326_p3 = scmp.lt.s32.totalorder %s16635_s21, %s16324_s10 }
  0x87   : > { %p16321_p6 = pnand %p16319_p4, %p16305_p0  ;;  %p16327_p7 = scmp.lt.s32.totalorder %s16325_s23, %s16318_s16 }
  0x89   : > { %p16322_p8 = pneg %p16321_p6  ;;  %p16328_p9 = por %p16327_p7, %p16326_p3 }
  0x8b   : > { %p16329_p12 = pnand %p16328_p9, %p16322_p8 }
  0x8d   : > { %16332 = shalt.err (!%p16329_p12)
}
  0x8e   : > { %s20604_s18 = smov 128   ;;  %p20605_p0 = scmp.ne.s32.totalorder %s20597_s13, 0 }
  0x8f   : > { %15752 = dma.hbm_to_vmem [thread:$0]  (!%p16637_p10), %s16633_s17, 8192, %s16635_s21, %s16641_s25, %s20604_s18, %s20604_s18, %s16413_s22  }
  0x90   : > { %322 = sbr.rel (%p20605_p0) target bundleno = 2862 (0xb2e), region = 52 }
  0x97   : > { %s16675_s15 = sand.u32 1, %s16399_s28   ;;  %p20606_p5 = scmp.ne.s32.totalorder %s20595_s11, 0 }
  0x98   : > { %s12850_s20 = sshll.u32 %s16675_s15, 9  ;;  %s325_s16 = scalar_lea.sflag [#allocation4], %s16675_s15 }
  0x99   : > { %s16681_s24 = scalar_lea.vmem [#allocation3], %s12850_s20 }
  0x9a   : > { %16378 = dma.done.wait (%p20606_p5), %s325_s16, 8192  }
  0x9b   : > { %16380 = vsyncadd (%p20606_p5), %s325_s16, 4294959104  ;;  %p20607_p10 = scmp.eq.s32.totalorder %s16487_s9, 0 }
  0x9d   : > { %16382 = dma.done.wait (%p20607_p10), [#allocation7], 32   ;;  %p20608_p11 = pmov %p20607_p10 }
  0x9e   : > { %p20609_p13 = pmov %p20607_p10 }
  0x9f   : > { %16384 = vsyncadd (%p20608_p11), [#allocation7], 4294967264 }
  0xa0   : > { %16386 = dma.done.wait (%p20609_p13), [#allocation10], 1056   ;;  %p20610_p2 = pmov %p20607_p10 }
  0xa1   : > { %v20500_v0 = vmov 0   ;;  %v15811_v1 = vld [vmem:[%s20489_s2 + $0x40] sm:$0xff]   ;;  %v15815_v5 = vld [vmem:[%s20489_s2 + $0x48] sm:$0xff]   ;;  %v15819_v9 = vld [vmem:[%s20489_s2 + $0x50] sm:$0xff]   ;;  %vm384_vm0 = vcmask 523268   ;;  %vm380_vm1 = vcmask 523264  }
  0xa2   : > { %16388 = vsyncadd (%p20610_p2), [#allocation10], 4294966240  ;;  %15810 = vset.pattern.permute.xlu1 %v20500_v0  ;;  %15809 = vset.pattern.permute.xlu0 %v20500_v0  ;;  %v15812_v2 = vld [vmem:[%s20489_s2 + $0x40] sm:$0xff]   ;;  %v15816_v6 = vld [vmem:[%s20489_s2 + $0x48] sm:$0xff]   ;;  %385 = vst.msk [vmem:[#allocation2 + $0x108] sm:$0xf0] %vm384_vm0, %v20500_v0 }
  0xa3   : > { %13652 = vmatprep.subr.bf16.mxu0 %v15811_v1  ;;  %v15813_v3 = vld [vmem:[%s20489_s2] sm:$0xff]   ;;  %13716 = vmatprep.subr.bf16.mxu1 %v15812_v2  ;;  %v15817_v7 = vld [vmem:[%s20489_s2 + $0x8] sm:$0xff]   ;;  %v15820_v10 = vld [vmem:[%s20489_s2 + $0x50] sm:$0xff]   ;;  %vm382_vm2 = vcmask 519168   ;;  %381 = vst.msk [vmem:[#allocation2] sm:$0xff] %vm380_vm1, %v20500_v0  ;;  %vm1011_vm3 = vcmask 1043456  }
  0xa4   : > { %v15814_v4 = vld [vmem:[%s20489_s2] sm:$0xff]   ;;  %13653 = vmatpush3.bf16.msra.mxu0 %v15813_v3  ;;  %v15818_v8 = vld [vmem:[%s20489_s2 + $0x8] sm:$0xff]   ;;  %v15821_v11 = vld [vmem:[%s20489_s2 + $0x10] sm:$0xff]   ;;  %386 = vst.msk [vmem:[#allocation2 + $0x110] sm:$0xff] %vm380_vm1, %v20500_v0  ;;  %vm3194_vm4 = vsmask.f32 4352 }
  0xa5   : > { %13717 = vmatpush3.bf16.msra.mxu1 %v15814_v4  ;;  %13654 = vmatprep.subr.bf16.mxu0 %v15815_v5  ;;  %v15822_v12 = vld [vmem:[%s20489_s2 + $0x10] sm:$0xff]   ;;  %v15823_v13 = vld [vmem:[%s20489_s2 + $0x58] sm:$0xff]   ;;  %v15827_v17 = vld [vmem:[%s20489_s2 + $0x60] sm:$0xff]   ;;  %383 = vst.msk [vmem:[#allocation2 + $0x8] sm:$0xf] %vm382_vm2, %v20500_v0  ;;  %s19013_s21 = scalar_lea.vmem [#allocation12], %s12850_s20 }
  0xa6   : > { %13718 = vmatprep.subr.bf16.mxu1 %v15816_v6  ;;  %v15824_v14 = vld [vmem:[%s20489_s2 + $0x58] sm:$0xff]   ;;  %v15828_v18 = vld [vmem:[%s20489_s2 + $0x60] sm:$0xff]   ;;  %v15831_v21 = vld [vmem:[%s20489_s2 + $0x68] sm:$0xff]   ;;  %vm3429_vm5 = vsmask.f32 3328  ;;  %s12727_s19 = sshll.u32 %s19013_s21, 4  ;;  %s20442_s19 = int_to_ptr.vmem [resolvable:$true] %s12727_s19 }
  0xa7   : > { %v15825_v15 = vld [vmem:[%s20489_s2 + $0x18] sm:$0xff]   ;;  %v15829_v19 = vld [vmem:[%s20489_s2 + $0x20] sm:$0xff]   ;;  %v15832_v22 = vld [vmem:[%s20489_s2 + $0x68] sm:$0xff]   ;;  %s12713_s18 = scalar_lea.sflag [#allocation5], %s16675_s15  ;;  %s16333_s16 = scalar_lea.vmem %s20442_s19, 8192 }
  0xa8   : > { %13655 = vmatpush3.bf16.msra.mxu0 %v15817_v7  ;;  %v15826_v16 = vld [vmem:[%s20489_s2 + $0x18] sm:$0xff]   ;;  %v15830_v20 = vld [vmem:[%s20489_s2 + $0x20] sm:$0xff]   ;;  %v15833_v23 = vld [vmem:[%s20489_s2 + $0x28] sm:$0xff]   ;;  %p16334_p4 = scmp.ne.s32.totalorder %s20442_s19, %s16333_s16 }
  0xa9   : > { %13719 = vmatpush3.bf16.msra.mxu1 %v15818_v8  ;;  %13656 = vmatprep.subr.bf16.mxu0 %v15819_v9  ;;  %v15834_v24 = vld [vmem:[%s20489_s2 + $0x28] sm:$0xff]   ;;  %v15835_v25 = vld [vmem:[%s20489_s2 + $0x70] sm:$0xff]   ;;  %v739_v30 = vld [vmem:[%s20488_s1] sm:$0xf] }
  0xaa   : > { %13720 = vmatprep.subr.bf16.mxu1 %v15820_v10  ;;  %v15836_v26 = vld [vmem:[%s20489_s2 + $0x70] sm:$0xff]   ;;  %v741_v29 = vld [vmem:[%s20488_s1 + $0x8] sm:$0xf]  ;;  %v15839_v31 = vld [vmem:[%s20489_s2 + $0x78] sm:$0xff]   ;;  %757 = vperm.xlu0 %15809, %v739_v30   ;;  %p16335_p6 = pnand %p16334_p4, %p16620_p1 }
  0xab   : > { %v15837_v27 = vld [vmem:[%s20489_s2 + $0x30] sm:$0xff]   ;;  %781 = vperm.xlu1 %15810, %v741_v29   ;;  %v15840_v32 = vld [vmem:[%s20489_s2 + $0x78] sm:$0xff]   ;;  %v742_v37 = vld [vmem:[%s20488_s1 + $0xc] sm:$0xf] }
  0xac   : > { %13657 = vmatpush3.bf16.msra.mxu0 %v15821_v11  ;;  %v15838_v28 = vld [vmem:[%s20489_s2 + $0x30] sm:$0xff]   ;;  %v15841_v33 = vld [vmem:[%s20489_s2 + $0x38] sm:$0xff]   ;;  %v740_v38 = vld [vmem:[%s20488_s1 + $0x4] sm:$0xf]  ;;  %p16336_p8 = pneg %p16335_p6 }
  0xad   : > { %13721 = vmatpush3.bf16.msra.mxu1 %v15822_v12  ;;  %13658 = vmatprep.subr.bf16.mxu0 %v15823_v13  ;;  %v15842_v34 = vld [vmem:[%s20489_s2 + $0x38] sm:$0xff]   ;;  %v744_v41 = vld [vmem:[%s20488_s1 + $0x14] sm:$0xf]  ;;  %v743_v42 = vld [vmem:[%s20488_s1 + $0x10] sm:$0xf] }
  0xae   : > { %13722 = vmatprep.subr.bf16.mxu1 %v15824_v14  ;;  %v15843_v35 = vld [vmem:[%s16681_s24 + $0x80] ss:$8 sps:$4 sm:$0xff]   ;;  %v15845_v36 = vld [vmem:[%s16681_s24 + $0x84] ss:$8 sps:$4 sm:$0xff]   ;;  %769 = vperm.xlu0 %15809, %v740_v38   ;;  %v15849_v43 = vld [vmem:[%s16681_s24 + $0x94] ss:$8 sps:$4 sm:$0xff]  }
  0xaf   : > { %1301 = vmatprep.mubr.bf16.mxu1 %v15845_v36  ;;  %793 = vperm.xlu1 %15810, %v742_v37   ;;  %v15846_v39 = vld [vmem:[%s16681_s24] ss:$8 sps:$4 sm:$0xff]   ;;  %v15848_v40 = vld [vmem:[%s16681_s24 + $0x4] ss:$8 sps:$4 sm:$0xff]   ;;  %v15851_v44 = vld [vmem:[%s16681_s24 + $0x14] ss:$8 sps:$4 sm:$0xff]  }
  0xb0   : > { %13659 = vmatpush3.bf16.msra.mxu0 %v15825_v15  ;;  %650 = vmatprep.mubr.bf16.mxu0 %v15848_v40  ;;  %v746_v45 = vld [vmem:[%s20488_s1 + $0x1c] sm:$0xf]  ;;  %v745_v46 = vld [vmem:[%s20488_s1 + $0x18] sm:$0xf]  ;;  %v15853_v47 = vld [vmem:[%s16681_s24 + $0x10] ss:$8 sps:$4 sm:$0xff]  }
  0xb1   : > { %13723 = vmatpush3.bf16.msra.mxu1 %v15826_v16  ;;  %13660 = vmatprep.subr.bf16.mxu0 %v15827_v17  ;;  %v15854_v48 = vld [vmem:[%s16681_s24 + $0x90] ss:$8 sps:$4 sm:$0xff]   ;;  %v15855_v49 = vld [vmem:[%s16681_s24 + $0xa4] ss:$8 sps:$4 sm:$0xff]   ;;  %v747_v52 = vld [vmem:[%s20488_s1 + $0x20] sm:$0xf] }
  0xb2   : > { %13724 = vmatprep.subr.bf16.mxu1 %v15828_v18  ;;  %805 = vperm.xlu0 %15809, %v743_v42   ;;  %v15857_v50 = vld [vmem:[%s16681_s24 + $0x24] ss:$8 sps:$4 sm:$0xff]   ;;  %v750_v53 = vld [vmem:[%s20488_s1 + $0x2c] sm:$0xf]  ;;  %v749_v54 = vld [vmem:[%s20488_s1 + $0x28] sm:$0xf] }
  0xb3   : > { %817 = vperm.xlu1 %15810, %v744_v41   ;;  %v748_v51 = vld [vmem:[%s20488_s1 + $0x24] sm:$0xf]  ;;  %v15859_v55 = vld [vmem:[%s16681_s24 + $0x20] ss:$8 sps:$4 sm:$0xff]   ;;  %v15861_v57 = vld [vmem:[%s16681_s24 + $0xb4] ss:$8 sps:$4 sm:$0xff]  }
  0xb4   : > { %13661 = vmatpush3.bf16.msra.mxu0 %v15829_v19  ;;  %v15860_v56 = vld [vmem:[%s16681_s24 + $0xa0] ss:$8 sps:$4 sm:$0xff]   ;;  %v752_v58 = vld [vmem:[%s20488_s1 + $0x34] sm:$0xf]  ;;  %v751_v59 = vld [vmem:[%s20488_s1 + $0x30] sm:$0xf] }
  0xb5   : > { %13725 = vmatpush3.bf16.msra.mxu1 %v15830_v20  ;;  %13662 = vmatprep.subr.bf16.mxu0 %v15831_v21  ;;  %v15863_v60 = vld [vmem:[%s16681_s24 + $0x34] ss:$8 sps:$4 sm:$0xff]   ;;  %v15873_v61 = vld [vmem:[%s20489_s2 + $0x40] sm:$0xff]   ;;  %v754_v63 = vld [vmem:[%s20488_s1 + $0x3c] sm:$0xf] }
  0xb6   : > { %13726 = vmatprep.subr.bf16.mxu1 %v15832_v22  ;;  %829 = vperm.xlu0 %15809, %v745_v46   ;;  %v15874_v62 = vld [vmem:[%s20489_s2 + $0x40] sm:$0xff]   ;;  %v753_v2 = vld [vmem:[%s20488_s1 + $0x38] sm:$0xf]  ;;  %v15865_v4 = vld [vmem:[%s16681_s24 + $0x30] ss:$8 sps:$4 sm:$0xff]  }
  0xb7   : > { %841 = vperm.xlu1 %15810, %v746_v45   ;;  %v15875_v1 = vld [vmem:[%s20489_s2] sm:$0xff]   ;;  %v15866_v5 = vld [vmem:[%s16681_s24 + $0xb0] ss:$8 sps:$4 sm:$0xff]   ;;  %v1393_v14 = vld [vmem:[%s20488_s1 + $0x4c] sm:$0xf] }
  0xb8   : > { %13663 = vmatpush3.bf16.msra.mxu0 %v15833_v23  ;;  %v15876_v3 = vld [vmem:[%s20489_s2] sm:$0xff]   ;;  %v15877_v8 = vld [vmem:[%s20489_s2 + $0x48] sm:$0xff]   ;;  %v15887_v19 = vld [vmem:[%s20489_s2 + $0x50] sm:$0xff]  }
  0xb9   : > { %13727 = vmatpush3.bf16.msra.mxu1 %v15834_v24  ;;  %13664 = vmatprep.subr.bf16.mxu0 %v15835_v25  ;;  %v15867_v6 = vld [vmem:[%s16681_s24 + $0xc4] ss:$8 sps:$4 sm:$0xff]   ;;  %v15878_v10 = vld [vmem:[%s20489_s2 + $0x48] sm:$0xff]   ;;  %v1390_v13 = vld [vmem:[%s20488_s1 + $0x40] sm:$0xf] }
  0xba   : > { %13728 = vmatprep.subr.bf16.mxu1 %v15836_v26  ;;  %853 = vperm.xlu0 %15809, %v747_v52   ;;  %v15869_v7 = vld [vmem:[%s16681_s24 + $0x44] ss:$8 sps:$4 sm:$0xff]   ;;  %v15879_v11 = vld [vmem:[%s20489_s2 + $0x8] sm:$0xff]   ;;  %v15872_v16 = vld [vmem:[%s16681_s24 + $0xc0] ss:$8 sps:$4 sm:$0xff]  }
  0xbb   : > { %865 = vperm.xlu1 %15810, %v748_v51   ;;  %v1391_v9 = vld [vmem:[%s20488_s1 + $0x44] sm:$0xf]  ;;  %v15880_v12 = vld [vmem:[%s20489_s2 + $0x8] sm:$0xff]   ;;  %v15871_v17 = vld [vmem:[%s16681_s24 + $0x40] ss:$8 sps:$4 sm:$0xff]  }
  0xbc   : > { %13665 = vmatpush3.bf16.msra.mxu0 %v15837_v27  ;;  %v1392_v15 = vld [vmem:[%s20488_s1 + $0x48] sm:$0xf]  ;;  %v15881_v18 = vld [vmem:[%s16681_s24 + $0xd4] ss:$8 sps:$4 sm:$0xff]   ;;  %v1394_v24 = vld [vmem:[%s20488_s1 + $0x50] sm:$0xf] }
  0xbd   : > { %13729 = vmatpush3.bf16.msra.mxu1 %v15838_v28  ;;  %13666 = vmatprep.subr.bf16.mxu0 %v15839_v31  ;;  %v15888_v20 = vld [vmem:[%s20489_s2 + $0x50] sm:$0xff]   ;;  %v15891_v26 = vld [vmem:[%s20489_s2 + $0x58] sm:$0xff]   ;;  %v1398_v36 = vld [vmem:[%s20488_s1 + $0x60] sm:$0xf] }
  0xbe   : > { %13730 = vmatprep.subr.bf16.mxu1 %v15840_v32  ;;  %877 = vperm.xlu0 %15809, %v749_v54   ;;  %v1395_v21 = vld [vmem:[%s20488_s1 + $0x54] sm:$0xf]  ;;  %v1397_v27 = vld [vmem:[%s20488_s1 + $0x5c] sm:$0xf]  ;;  %v1396_v29 = vld [vmem:[%s20488_s1 + $0x58] sm:$0xf] }
  0xbf   : > { %889 = vperm.xlu1 %15810, %v750_v53   ;;  %v15889_v22 = vld [vmem:[%s20489_s2 + $0x10] sm:$0xff]   ;;  %v15892_v28 = vld [vmem:[%s20489_s2 + $0x58] sm:$0xff]   ;;  %v15901_v38 = vld [vmem:[%s20489_s2 + $0x60] sm:$0xff]  }
  0xc0   : > { %13667 = vmatpush3.bf16.msra.mxu0 %v15841_v33  ;;  %v15883_v23 = vld [vmem:[%s16681_s24 + $0x54] ss:$8 sps:$4 sm:$0xff]   ;;  %v15893_v30 = vld [vmem:[%s20489_s2 + $0x18] sm:$0xff]   ;;  %v15885_v32 = vld [vmem:[%s16681_s24 + $0x50] ss:$8 sps:$4 sm:$0xff]  }
  0xc1   : > { %13731 = vmatpush3.bf16.msra.mxu1 %v15842_v34  ;;  %13780 = vmatprep.subr.bf16.mxu0 %v15873_v61  ;;  %v15890_v25 = vld [vmem:[%s20489_s2 + $0x10] sm:$0xff]   ;;  %v15894_v31 = vld [vmem:[%s20489_s2 + $0x18] sm:$0xff]   ;;  %v1401_v40 = vld [vmem:[%s20488_s1 + $0x6c] sm:$0xf] }
  0xc2   : > { %901 = vperm.xlu0 %15809, %v751_v59   ;;  %13844 = vmatprep.subr.bf16.mxu1 %v15874_v62  ;;  %v15886_v33 = vld [vmem:[%s16681_s24 + $0xd0] ss:$8 sps:$4 sm:$0xff]   ;;  %v15895_v34 = vld [vmem:[%s16681_s24 + $0xe4] ss:$8 sps:$4 sm:$0xff]   ;;  %v15900_v45 = vld [vmem:[%s16681_s24 + $0xe0] ss:$8 sps:$4 sm:$0xff]  }
  0xc3   : > { %651 = vmatmul.mubr.bf16.vlgmr.msra.gmra.mrb[0].mxu0 %v15846_v39  ;;  %913 = vperm.xlu1 %15810, %v752_v58   ;;  %v15897_v37 = vld [vmem:[%s16681_s24 + $0x64] ss:$8 sps:$4 sm:$0xff]   ;;  %v1400_v42 = vld [vmem:[%s20488_s1 + $0x68] sm:$0xf]  ;;  %v1402_v51 = vld [vmem:[%s20488_s1 + $0x70] sm:$0xf] }
  0xc4   : > { %1302 = vmatmul.mubr.bf16.vlgmr.msra.gmra.mrb[0].mxu1 %v15843_v35  ;;  %658 = vmatprep.mubr.bf16.mxu0 %v15851_v44  ;;  %v1399_v35 = vld [vmem:[%s20488_s1 + $0x64] sm:$0xf]  ;;  %v15899_v44 = vld [vmem:[%s16681_s24 + $0x60] ss:$8 sps:$4 sm:$0xff]   ;;  %v15905_v46 = vld [vmem:[%s20489_s2 + $0x68] sm:$0xff]  }
  0xc5   : > { %1309 = vmatprep.mubr.bf16.mxu1 %v15849_v43  ;;  %13781 = vmatpush3.bf16.msra.mxu0 %v15875_v1  ;;  %v15902_v39 = vld [vmem:[%s20489_s2 + $0x60] sm:$0xff]   ;;  %v15909_v52 = vld [vmem:[%s16681_s24 + $0xf4] ss:$8 sps:$4 sm:$0xff]   ;;  %v1405_v53 = vld [vmem:[%s20488_s1 + $0x7c] sm:$0xf] }
  0xc6   : > { %13845 = vmatpush3.bf16.msra.mxu1 %v15876_v3  ;;  %13782 = vmatprep.subr.bf16.mxu0 %v15877_v8  ;;  %v15903_v41 = vld [vmem:[%s20489_s2 + $0x20] sm:$0xff]   ;;  %v1404_v54 = vld [vmem:[%s20488_s1 + $0x78] sm:$0xf]  ;;  %v15915_v58 = vld [vmem:[%s20489_s2 + $0x70] sm:$0xff]  }
  0xc7   : > { %937 = vperm.xlu1 %15810, %v754_v63   ;;  %925 = vperm.xlu0 %15809, %v753_v2   ;;  %v15904_v43 = vld [vmem:[%s20489_s2 + $0x20] sm:$0xff]   ;;  %v15916_v59 = vld [vmem:[%s20489_s2 + $0x70] sm:$0xff]   ;;  %v15919_v1 = vld [vmem:[%s20489_s2 + $0x78] sm:$0xff]  }
  0xc8   : > { %13846 = vmatprep.subr.bf16.mxu1 %v15878_v10  ;;  %v15918_v61 = vld [vmem:[%s20489_s2 + $0x30] sm:$0xff]   ;;  %v2041_v62 = vld [vmem:[%s20488_s1 + $0x4] sm:$0xf]  ;;  %v2040_v63 = vld [vmem:[%s20488_s1] sm:$0xf] }
  0xc9   : > { %13783 = vmatpush3.bf16.msra.mxu0 %v15879_v11  ;;  %v15920_v2 = vld [vmem:[%s20489_s2 + $0x78] sm:$0xff]   ;;  %v2042_v8 = vld [vmem:[%s20488_s1 + $0x8] sm:$0xf]  ;;  %v2045_v11 = vld [vmem:[%s20488_s1 + $0x14] sm:$0xf] }
  0xca   : > { %13847 = vmatpush3.bf16.msra.mxu1 %v15880_v12  ;;  %13784 = vmatprep.subr.bf16.mxu0 %v15887_v19  ;;  %v15921_v3 = vld [vmem:[%s20489_s2 + $0x38] sm:$0xff]   ;;  %v2044_v12 = vld [vmem:[%s20488_s1 + $0x10] sm:$0xf] }
  0xcb   : > { %659 = vmatmul.mubr.bf16.gmra.mrb[4].mxu0 %v15853_v47  ;;  %1420 = vperm.xlu1 %15810, %v1391_v9   ;;  %v1403_v47 = vld [vmem:[%s20488_s1 + $0x74] sm:$0xf]  ;;  %v15926_v9 = vld [vmem:[%s16681_s24 + $0x100] ss:$8 sps:$4 sm:$0xff]   ;;  %v15928_v10 = vld [vmem:[%s16681_s24 + $0x104] ss:$8 sps:$4 sm:$0xff]  }
  0xcc   : > { %1310 = vmatmul.mubr.bf16.gmra.mrb[4].mxu1 %v15854_v48  ;;  %666 = vmatprep.mubr.bf16.mxu0 %v15857_v50  ;;  %v15906_v48 = vld [vmem:[%s20489_s2 + $0x68] sm:$0xff]   ;;  %v15935_v19 = vld [vmem:[%s16681_s24 + $0x1a4] ss:$8 sps:$4 sm:$0xff]  }
  0xcd   : > { %1317 = vmatprep.mubr.bf16.mxu1 %v15855_v49  ;;  %1408 = vperm.xlu0 %15809, %v1390_v13   ;;  %v15907_v49 = vld [vmem:[%s20489_s2 + $0x28] sm:$0xff]  }
  0xce   : > { %13848 = vmatprep.subr.bf16.mxu1 %v15888_v20  ;;  %13785 = vmatpush3.bf16.msra.mxu0 %v15889_v22  ;;  %v15908_v50 = vld [vmem:[%s20489_s2 + $0x28] sm:$0xff]   ;;  %v15937_v20 = vld [vmem:[%s16681_s24 + $0x124] ss:$8 sps:$4 sm:$0xff]   ;;  %v2048_v22 = vld [vmem:[%s20488_s1 + $0x20] sm:$0xf] }
  0xcf   : > { %1444 = vperm.xlu1 %15810, %v1393_v14   ;;  %13849 = vmatpush3.bf16.msra.mxu1 %v15890_v25  ;;  %v15929_v13 = vld [vmem:[%s16681_s24 + $0x194] ss:$8 sps:$4 sm:$0xff]   ;;  %v15939_v25 = vld [vmem:[%s16681_s24 + $0x120] ss:$8 sps:$4 sm:$0xff]  }
  0xd0   : > { %13786 = vmatprep.subr.bf16.mxu0 %v15891_v26  ;;  %13850 = vmatprep.subr.bf16.mxu1 %v15892_v28  ;;  %v15931_v14 = vld [vmem:[%s16681_s24 + $0x114] ss:$8 sps:$4 sm:$0xff]   ;;  %v15940_v26 = vld [vmem:[%s16681_s24 + $0x1a0] ss:$8 sps:$4 sm:$0xff]  }
  0xd1   : > { %1432 = vperm.xlu0 %15809, %v1392_v15   ;;  %v2047_v15 = vld [vmem:[%s20488_s1 + $0x1c] sm:$0xf]  ;;  %v15943_v28 = vld [vmem:[%s16681_s24 + $0x134] ss:$8 sps:$4 sm:$0xff]  }
  0xd2   : > { %13787 = vmatpush3.bf16.msra.mxu0 %v15893_v30  ;;  %v2052_v30 = vld [vmem:[%s20488_s1 + $0x30] sm:$0xf] }
  0xd3   : > { %667 = vmatmul.mubr.bf16.gmra.mrb[8].mxu0 %v15859_v55  ;;  %1468 = vperm.xlu1 %15810, %v1395_v21   ;;  %v15911_v55 = vld [vmem:[%s16681_s24 + $0x74] ss:$8 sps:$4 sm:$0xff]   ;;  %v2049_v21 = vld [vmem:[%s20488_s1 + $0x24] sm:$0xf] }
  0xd4   : > { %1318 = vmatmul.mubr.bf16.gmra.mrb[8].mxu1 %v15860_v56  ;;  %674 = vmatprep.mubr.bf16.mxu0 %v15863_v60  ;;  %v15914_v56 = vld [vmem:[%s16681_s24 + $0xf0] ss:$8 sps:$4 sm:$0xff]  }
  0xd5   : > { %1325 = vmatprep.mubr.bf16.mxu1 %v15861_v57  ;;  %1456 = vperm.xlu0 %15809, %v1394_v24   ;;  %v15913_v57 = vld [vmem:[%s16681_s24 + $0x70] ss:$8 sps:$4 sm:$0xff]  }
  0xd6   : > { %13851 = vmatpush3.bf16.msra.mxu1 %v15894_v31  ;;  %13788 = vmatprep.subr.bf16.mxu0 %v15901_v38  ;;  %v15917_v60 = vld [vmem:[%s20489_s2 + $0x30] sm:$0xff]   ;;  %v2050_v24 = vld [vmem:[%s20488_s1 + $0x28] sm:$0xf]  ;;  %v2055_v31 = vld [vmem:[%s20488_s1 + $0x3c] sm:$0xf] }
  0xd7   : > { %1492 = vperm.xlu1 %15810, %v1397_v27   ;;  %13852 = vmatprep.subr.bf16.mxu1 %v15902_v39  ;;  %v15941_v27 = vld [vmem:[%s16681_s24 + $0x1b4] ss:$8 sps:$4 sm:$0xff]   ;;  %v2690_v38 = vld [vmem:[%s20488_s1 + $0x40] sm:$0xf] }
  0xd8   : > { %13789 = vmatpush3.bf16.msra.mxu0 %v15903_v41  ;;  %v2693_v39 = vld [vmem:[%s20488_s1 + $0x4c] sm:$0xf]  ;;  %v15952_v41 = vld [vmem:[%s16681_s24 + $0x1c0] ss:$8 sps:$4 sm:$0xff]  }
  0xd9   : > { %1480 = vperm.xlu0 %15809, %v1396_v29   ;;  %13790 = vmatprep.subr.bf16.mxu0 %v15905_v46  ;;  %v2053_v29 = vld [vmem:[%s20488_s1 + $0x34] sm:$0xf] }
  0xda   : > { %13853 = vmatpush3.bf16.msra.mxu1 %v15904_v43  ;;  %v15953_v43 = vld [vmem:[%s16681_s24 + $0x1d4] ss:$8 sps:$4 sm:$0xff]  }
  0xdb   : > { %675 = vmatmul.mubr.bf16.gmra.mrb[12].mxu0 %v15865_v4  ;;  %1516 = vperm.xlu1 %15810, %v1399_v35   ;;  %v15922_v4 = vld [vmem:[%s20489_s2 + $0x38] sm:$0xff]   ;;  %v2695_v46 = vld [vmem:[%s20488_s1 + $0x54] sm:$0xf] }
  0xdc   : > { %1326 = vmatmul.mubr.bf16.gmra.mrb[12].mxu1 %v15866_v5  ;;  %682 = vmatprep.mubr.bf16.mxu0 %v15869_v7  ;;  %v15923_v5 = vld [vmem:[%s16681_s24 + $0x180] ss:$8 sps:$4 sm:$0xff]   ;;  %v2043_v7 = vld [vmem:[%s20488_s1 + $0xc] sm:$0xf]  ;;  %v15947_v35 = vld [vmem:[%s16681_s24 + $0x1c4] ss:$8 sps:$4 sm:$0xff]  }
  0xdd   : > { %1333 = vmatprep.mubr.bf16.mxu1 %v15867_v6  ;;  %1504 = vperm.xlu0 %15809, %v1398_v36   ;;  %v15925_v6 = vld [vmem:[%s16681_s24 + $0x184] ss:$8 sps:$4 sm:$0xff]  }
  0xde   : > { %13854 = vmatprep.subr.bf16.mxu1 %v15906_v48  ;;  %13791 = vmatpush3.bf16.msra.mxu0 %v15907_v49  ;;  %v15949_v36 = vld [vmem:[%s16681_s24 + $0x144] ss:$8 sps:$4 sm:$0xff]   ;;  %v2696_v49 = vld [vmem:[%s20488_s1 + $0x58] sm:$0xf] }
  0xdf   : > { %1540 = vperm.xlu1 %15810, %v1401_v40   ;;  %13855 = vmatpush3.bf16.msra.mxu1 %v15908_v50  ;;  %v2692_v40 = vld [vmem:[%s20488_s1 + $0x48] sm:$0xf]  ;;  %v2697_v48 = vld [vmem:[%s20488_s1 + $0x5c] sm:$0xf] }
  0xe0   : > { %13792 = vmatprep.subr.bf16.mxu0 %v15915_v58  ;;  %13856 = vmatprep.subr.bf16.mxu1 %v15916_v59  ;;  %v15958_v50 = vld [vmem:[%s16681_s24 + $0x1d0] ss:$8 sps:$4 sm:$0xff]   ;;  %v15964_v58 = vld [vmem:[%s16681_s24 + $0x1e0] ss:$8 sps:$4 sm:$0xff]  }
  0xe1   : > { %1528 = vperm.xlu0 %15809, %v1400_v42   ;;  %v15951_v42 = vld [vmem:[%s16681_s24 + $0x140] ss:$8 sps:$4 sm:$0xff]   ;;  %v15972_v59 = vld [vmem:[%s20491_s4 + $0x28] sm:$0xff]  }
  0xe2   : > { %13793 = vmatpush3.bf16.msra.mxu0 %v15917_v60  ;;  %v15963_v60 = vld [vmem:[%s16681_s24 + $0x160] ss:$8 sps:$4 sm:$0xff]  }
  0xe3   : > { %683 = vmatmul.mubr.bf16.gmra.mrb[16].mxu0 %v15871_v17  ;;  %1564 = vperm.xlu1 %15810, %v1403_v47   ;;  %v15933_v17 = vld [vmem:[%s16681_s24 + $0x110] ss:$8 sps:$4 sm:$0xff]  }
  0xe4   : > { %1334 = vmatmul.mubr.bf16.gmra.mrb[16].mxu1 %v15872_v16  ;;  %690 = vmatprep.mubr.bf16.mxu0 %v15883_v23  ;;  %v2046_v16 = vld [vmem:[%s20488_s1 + $0x18] sm:$0xf]  ;;  %v2051_v23 = vld [vmem:[%s20488_s1 + $0x2c] sm:$0xf]  ;;  %v2694_v47 = vld [vmem:[%s20488_s1 + $0x50] sm:$0xf] }
  0xe5   : > { %1341 = vmatprep.mubr.bf16.mxu1 %v15881_v18  ;;  %1552 = vperm.xlu0 %15809, %v1402_v51   ;;  %v15934_v18 = vld [vmem:[%s16681_s24 + $0x190] ss:$8 sps:$4 sm:$0xff]  }
  0xe6   : > { %13857 = vmatpush3.bf16.msra.mxu1 %v15918_v61  ;;  %13794 = vmatprep.subr.bf16.mxu0 %v15919_v1  ;;  %v15957_v51 = vld [vmem:[%s16681_s24 + $0x150] ss:$8 sps:$4 sm:$0xff]   ;;  %v15965_v61 = vld [vmem:[%s16681_s24 + $0x1f4] ss:$8 sps:$4 sm:$0xff]  }
  0xe7   : > { %1588 = vperm.xlu1 %15810, %v1405_v53   ;;  %13858 = vmatprep.subr.bf16.mxu1 %v15920_v2  ;;  %v15961_v53 = vld [vmem:[%s16681_s24 + $0x164] ss:$8 sps:$4 sm:$0xff]   ;;  %v15973_v1 = vld [vmem:[%s20491_s4 + $0x30] sm:$0xff]  }
  0xe8   : > { %13795 = vmatpush3.bf16.msra.mxu0 %v15921_v3  ;;  %v2702_v2 = vld [vmem:[%s20488_s1 + $0x70] sm:$0xf]  ;;  %v2705_v3 = vld [vmem:[%s20488_s1 + $0x7c] sm:$0xf] }
  0xe9   : > { %1576 = vperm.xlu0 %15809, %v1404_v54   ;;  %v2699_v54 = vld [vmem:[%s20488_s1 + $0x64] sm:$0xf] }
  0xea   : > { %13859 = vmatpush3.bf16.msra.mxu1 %v15922_v4  ;;  %v2704_v4 = vld [vmem:[%s20488_s1 + $0x78] sm:$0xf] }
  0xeb   : > { %691 = vmatmul.mubr.bf16.gmra.mrb[20].mxu0 %v15885_v32  ;;  %2070 = vperm.xlu1 %15810, %v2041_v62   ;;  %v2054_v32 = vld [vmem:[%s20488_s1 + $0x38] sm:$0xf]  ;;  %v2703_v62 = vld [vmem:[%s20488_s1 + $0x74] sm:$0xf] }
  0xec   : > { %1342 = vmatmul.mubr.bf16.gmra.mrb[20].mxu1 %v15886_v33  ;;  %698 = vmatprep.mubr.bf16.mxu0 %v15897_v37  ;;  %v15945_v33 = vld [vmem:[%s16681_s24 + $0x130] ss:$8 sps:$4 sm:$0xff]   ;;  %v2691_v37 = vld [vmem:[%s20488_s1 + $0x44] sm:$0xf] }
  0xed   : > { %1349 = vmatprep.mubr.bf16.mxu1 %v15895_v34  ;;  %2058 = vperm.xlu0 %15809, %v2040_v63   ;;  %v15946_v34 = vld [vmem:[%s16681_s24 + $0x1b0] ss:$8 sps:$4 sm:$0xff]   ;;  %v15967_v63 = vld [vmem:[%s16681_s24 + $0x174] ss:$8 sps:$4 sm:$0xff]  }
  0xef   : > { %2094 = vperm.xlu1 %15810, %v2043_v7   ;;  %v15969_v7 = vld [vmem:[%s16681_s24 + $0x170] ss:$8 sps:$4 sm:$0xff]  }
  0xf1   : > { %2082 = vperm.xlu0 %15809, %v2042_v8  }
  0xf3   : > { %699 = vmatmul.mubr.bf16.gmra.mrb[24].mxu0 %v15899_v44  ;;  %2118 = vperm.xlu1 %15810, %v2045_v11   ;;  %v15971_v44 = vld [vmem:[%s20491_s4 + $0x20] sm:$0xff]  }
  0xf4   : > { %1350 = vmatmul.mubr.bf16.gmra.mrb[24].mxu1 %v15900_v45  ;;  %706 = vmatprep.mubr.bf16.mxu0 %v15911_v55  ;;  %v15955_v45 = vld [vmem:[%s16681_s24 + $0x154] ss:$8 sps:$4 sm:$0xff]   ;;  %v2698_v55 = vld [vmem:[%s20488_s1 + $0x60] sm:$0xf] }
  0xf5   : > { %1357 = vmatprep.mubr.bf16.mxu1 %v15909_v52  ;;  %2106 = vperm.xlu0 %15809, %v2044_v12   ;;  %v15959_v52 = vld [vmem:[%s16681_s24 + $0x1e4] ss:$8 sps:$4 sm:$0xff]  }
  0xf6   : > { %14340 = vmatprep.subr.bf16.mxu0 %v15971_v44 }
  0xf7   : > { %2142 = vperm.xlu1 %15810, %v2047_v15  }
  0xf9   : > { %2130 = vperm.xlu0 %15809, %v2046_v16  }
  0xfb   : > { %707 = vmatmul.mubr.bf16.gmra.mrb[28].mxu0 %v15913_v57  ;;  %2166 = vperm.xlu1 %15810, %v2049_v21   ;;  %v2700_v57 = vld [vmem:[%s20488_s1 + $0x68] sm:$0xf] }
  0xfc   : > { %1358 = vmatmul.mubr.bf16.gmra.mrb[28].mxu1 %v15914_v56  ;;  %1951 = vmatprep.mubr.bf16.mxu0 %v15928_v10  ;;  %v2701_v56 = vld [vmem:[%s20488_s1 + $0x6c] sm:$0xf] }
  0xfd   : > { %2601 = vmatprep.mubr.bf16.mxu1 %v15925_v6  ;;  %2154 = vperm.xlu0 %15809, %v2048_v22   ;;  %v15970_v6 = vld [vmem:[%s16681_s24 + $0x1f0] ss:$8 sps:$4 sm:$0xff]  }
  0xff   : > { %2190 = vperm.xlu1 %15810, %v2051_v23  }
 0x101   : > { %2178 = vperm.xlu0 %15809, %v2050_v24  }
 0x103   : > { %1952 = vmatmul.mubr.bf16.vlgmr.msra.gmra.mrb[32].mxu0 %v15926_v9  ;;  %2214 = vperm.xlu1 %15810, %v2053_v29  }
 0x104   : > { %2602 = vmatmul.mubr.bf16.vlgmr.msra.gmra.mrb[32].mxu1 %v15923_v5  ;;  %1959 = vmatprep.mubr.bf16.mxu0 %v15931_v14  ;;  %v15974_v5 = vld [vmem:[%s20491_s4 + $0x38] sm:$0xff]  }
 0x105   : > { %2609 = vmatprep.mubr.bf16.mxu1 %v15929_v13  ;;  %2202 = vperm.xlu0 %15809, %v2052_v30  }
 0x106   : > { %14341 = vmatpush3.bf16.msra.mxu0 %v15971_v44 }
 0x107   : > { %2238 = vperm.xlu1 %15810, %v2055_v31   ;;  %14342 = vmatprep.subr.bf16.mxu0 %v15972_v59 }
 0x109   : > { %2226 = vperm.xlu0 %15809, %v2054_v32  }
 0x10a   : > { %14343 = vmatpush3.bf16.msra.mxu0 %v15972_v59 }
 0x10b   : > { %1960 = vmatmul.mubr.bf16.gmra.mrb[36].mxu0 %v15933_v17  ;;  %2720 = vperm.xlu1 %15810, %v2691_v37  }
 0x10c   : > { %2610 = vmatmul.mubr.bf16.gmra.mrb[36].mxu1 %v15934_v18  ;;  %1967 = vmatprep.mubr.bf16.mxu0 %v15937_v20 }
 0x10d   : > { %2617 = vmatprep.mubr.bf16.mxu1 %v15935_v19  ;;  %2708 = vperm.xlu0 %15809, %v2690_v38  }
 0x10e   : > { %14344 = vmatprep.subr.bf16.mxu0 %v15973_v1 }
 0x10f   : > { %2744 = vperm.xlu1 %15810, %v2693_v39   ;;  %14345 = vmatpush3.bf16.msra.mxu0 %v15973_v1 }
 0x110   : > { %14346 = vmatprep.subr.bf16.mxu0 %v15974_v5 }
 0x111   : > { %2732 = vperm.xlu0 %15809, %v2692_v40  }
 0x113   : > { %1968 = vmatmul.mubr.bf16.gmra.mrb[40].mxu0 %v15939_v25  ;;  %2768 = vperm.xlu1 %15810, %v2695_v46  }
 0x114   : > { %2618 = vmatmul.mubr.bf16.gmra.mrb[40].mxu1 %v15940_v26  ;;  %1975 = vmatprep.mubr.bf16.mxu0 %v15943_v28 }
 0x115   : > { %2625 = vmatprep.mubr.bf16.mxu1 %v15941_v27  ;;  %2756 = vperm.xlu0 %15809, %v2694_v47   ;;  %v17207_v27 = vld [vmem:[%s20491_s4] sm:$0xff]   ;;  %v763_v47 = vlaneseq }
 0x116   : > { %14347 = vmatpush3.bf16.msra.mxu0 %v15974_v5  ;;  %20611 = vst [vmem:[#allocation17_spill] sm:$0xff] %v17207_v27 }
 0x117   : > { %2792 = vperm.xlu1 %15810, %v2697_v48   ;;  %14364 = vmatprep.subr.bf16.mxu0 %v17207_v27 }
 0x119   : > { %2780 = vperm.xlu0 %15809, %v2696_v49  }
 0x11b   : > { %1976 = vmatmul.mubr.bf16.gmra.mrb[44].mxu0 %v15945_v33  ;;  %2816 = vperm.xlu1 %15810, %v2699_v54   ;;  %v17252_v54 = vld [vmem:[#allocation2] sm:$0xf0] }
 0x11c   : > { %2626 = vmatmul.mubr.bf16.gmra.mrb[44].mxu1 %v15946_v34  ;;  %1983 = vmatprep.mubr.bf16.mxu0 %v15949_v36  ;;  %v3434_v5 = vshll.u32 %v17252_v54, 16 }
 0x11d   : > { %2633 = vmatprep.mubr.bf16.mxu1 %v15947_v35  ;;  %2804 = vperm.xlu0 %15809, %v2698_v55  }
 0x11f   : > { %2840 = vperm.xlu1 %15810, %v2701_v56  }
 0x121   : > { %2828 = vperm.xlu0 %15809, %v2700_v57  }
 0x123   : > { %1984 = vmatmul.mubr.bf16.gmra.mrb[48].mxu0 %v15951_v42  ;;  %2864 = vperm.xlu1 %15810, %v2703_v62   ;;  %v17259_v62 = vld [vmem:[#allocation6] ss:$0 sm:$0xff] }
 0x124   : > { %2634 = vmatmul.mubr.bf16.gmra.mrb[48].mxu1 %v15952_v41  ;;  %1991 = vmatprep.mubr.bf16.mxu0 %v15955_v45  ;;  %v16417_v45 = vmov 839922192  }
 0x125   : > { %2641 = vmatprep.mubr.bf16.mxu1 %v15953_v43  ;;  %2852 = vperm.xlu0 %15809, %v2702_v2   ;;  %v761_v46 = vunpack.c.l.s4 %v16417_v45  ;;  %v3431_v2 = vshrl.u32 %v17252_v54, 16 }
 0x127   : > { %2888 = vperm.xlu1 %15810, %v2705_v3  }
 0x129   : > { %2876 = vperm.xlu0 %15809, %v2704_v4   ;;  %v17167_v9 = vpop.permute.xlu0 %757 }
 0x12a   : > { %v17165_v8 = vpop.permute.xlu1 %781 }
 0x12b   : > { %1992 = vmatmul.mubr.bf16.gmra.mrb[52].mxu0 %v15957_v51  ;;  %v17248_v51 = vshrl.u32 %v763_v47, 7 }
 0x12c   : > { %2642 = vmatmul.mubr.bf16.gmra.mrb[52].mxu1 %v15958_v50  ;;  %1999 = vmatprep.mubr.bf16.mxu0 %v15961_v53  ;;  %v762_v50 = vunpack.c.0.s8 %v761_v46 }
 0x12d   : > { %2649 = vmatprep.mubr.bf16.mxu1 %v15959_v52  ;;  %v17172_v11 = vpop.permute.xlu0 %769  ;;  %20613 = vst [vmem:[#allocation19_spill] sm:$0xff] %v17248_v51  ;;  %v2997_v52 = vld [vmem:[#allocation2] sm:$0xf8] }
 0x12e   : > { %v17170_v10 = vpop.permute.xlu1 %793  ;;  %v3196_v57 = vshrl.u32 %v2997_v52, 16  ;;  %v17257_v59 = vsub.s32 %v762_v50, %v17248_v51 }
 0x130   : > { %v17264_v46 = vrot.slane %v3196_v57, 3  ;;  %v766_v50 = vrot.slane %v17167_v9, %v17257_v59  ;;  %v790_v9 = vrot.slane %v17165_v8, %v17257_v59 }
 0x131   : > { %v17176_v13 = vpop.permute.xlu0 %805 }
 0x132   : > { %v17174_v12 = vpop.permute.xlu1 %817 }
 0x133   : > { %2000 = vmatmul.mubr.bf16.gmra.mrb[56].mxu0 %v15963_v60 }
 0x134   : > { %2650 = vmatmul.mubr.bf16.gmra.mrb[56].mxu1 %v15964_v58  ;;  %2007 = vmatprep.mubr.bf16.mxu0 %v15967_v63  ;;  %v3199_v58 = vshll.u32 %v2997_v52, 16  ;;  %v778_v52 = vrot.slane %v17172_v11, %v17257_v59  ;;  %v802_v11 = vrot.slane %v17170_v10, %v17257_v59 }
 0x135   : > { %2657 = vmatprep.mubr.bf16.mxu1 %v15965_v61  ;;  %v17180_v15 = vpop.permute.xlu0 %829 }
 0x136   : > { %v17178_v14 = vpop.permute.xlu1 %841  ;;  %v17266_v47 = vrot.slane %v3199_v58, 4  ;;  %v12889_v8 = vcombine.low %v766_v50, %v778_v52 }
 0x139   : > { %v17184_v17 = vpop.permute.xlu0 %853 }
 0x13a   : > { %v17182_v16 = vpop.permute.xlu1 %865 }
 0x13b   : > { %2008 = vmatmul.mubr.bf16.gmra.mrb[60].mxu0 %v15969_v7 }
 0x13c   : > { %2658 = vmatmul.mubr.bf16.gmra.mrb[60].mxu1 %v15970_v6 }
 0x13d   : > { %5183 = vmatprep.mubr.bf16.mxu1 %v20500_v0  ;;  %v17188_v19 = vpop.permute.xlu0 %877  ;;  %v17279_v0 = vrot.slane %v3431_v2, 4 }
 0x13e   : > { %v17186_v18 = vpop.permute.xlu1 %889 }
 0x141   : > { %v17192_v21 = vpop.permute.xlu0 %901 }
 0x142   : > { %v17190_v20 = vpop.permute.xlu1 %913 }
 0x146   : > { %v17194_v22 = vpop.permute.xlu1 %937  ;;  %v17196_v23 = vpop.permute.xlu0 %925 }
 0x14a   : > { %v17198_v24 = vpop.permute.xlu1 %1420 }
 0x14c   : > { %v17200_v25 = vpop.permute.xlu0 %1408 }
 0x14d   : > { %v1417_v57 = vrot.slane %v17200_v25, %v17257_v59  ;;  %v814_v25 = vrot.slane %v17176_v13, %v17257_v59 }
 0x14e   : > { %v17202_v26 = vpop.permute.xlu1 %1444 }
 0x150   : > { %v17209_v28 = vpop.permute.xlu0 %1432 }
 0x152   : > { %v17212_v29 = vpop.permute.xlu1 %1468 }
 0x154   : > { %v17214_v30 = vpop.permute.xlu0 %1456 }
 0x156   : > { %v17216_v31 = vpop.permute.xlu1 %1492 }
 0x158   : > { %v17218_v32 = vpop.permute.xlu0 %1480 }
 0x15a   : > { %v17220_v33 = vpop.permute.xlu1 %1516 }
 0x15c   : > { %v17222_v34 = vpop.permute.xlu0 %1504 }
 0x15e   : > { %v17224_v35 = vpop.permute.xlu1 %1540 }
 0x160   : > { %v17226_v36 = vpop.permute.xlu0 %1528 }
 0x162   : > { %v17228_v37 = vpop.permute.xlu1 %1564 }
 0x164   : > { %v17230_v38 = vpop.permute.xlu0 %1552 }
 0x166   : > { %v17232_v39 = vpop.permute.xlu1 %1588 }
 0x168   : > { %v17234_v40 = vpop.permute.xlu0 %1576 }
 0x16a   : > { %v17236_v41 = vpop.permute.xlu1 %2070 }
 0x16c   : > { %v17238_v42 = vpop.permute.xlu0 %2058 }
 0x16e   : > { %v17240_v43 = vpop.permute.xlu1 %2094 }
 0x170   : > { %v17242_v44 = vpop.permute.xlu0 %2082 }
 0x172   : > { %v17244_v48 = vpop.permute.xlu1 %2118 }
 0x174   : > { %v17246_v49 = vpop.permute.xlu0 %2106 }
 0x175   : > { %20612 = vst [vmem:[#allocation18_spill] sm:$0xff] %v17246_v49  ;;  %v17298_v49 = vcombine.low %v790_v9, %v802_v11  ;;  %v838_v9 = vrot.slane %v17180_v15, %v17257_v59  ;;  %v862_v15 = vrot.slane %v17184_v17, %v17257_v59 }
 0x176   : > { %v17250_v53 = vpop.permute.xlu1 %2142 }
 0x177   : > { %20614 = vst [vmem:[#allocation20_spill] sm:$0xff] %v17250_v53 }
 0x178   : > { %v17254_v55 = vpop.permute.xlu0 %2130 }
 0x179   : > { %20615 = vst [vmem:[#allocation21_spill] sm:$0xff] %v17254_v55 }
 0x17c   : > { %v17285_v51 = vpop.permute.xlu0 %2154 }
 0x17d   : > { %20617 = vst [vmem:[#allocation23_spill] sm:$0xff] %v17285_v51 }
 0x180   : > { %v17311_v11 = vpop.permute.xlu0 %2178 }
 0x196   : > { %v13668_v60 = vpop.f32.mrb[0].mxu0 }
 0x197   : > { %v13732_v56 = vpop.f32.mrb[0].mxu1  ;;  %v13669_v63 = vpop.f32.mrb[1].mxu0 }
 0x198   : > { %v13733_v61 = vpop.f32.mrb[1].mxu1  ;;  %v13670_v3 = vadd.f32 %v13669_v63, %v13668_v60  ;;  %v13671_v4 = vpop.f32.mrb[2].mxu0 }
 0x199   : > { %v13734_v1 = vadd.f32 %v13733_v61, %v13732_v56  ;;  %v13672_v6 = vpop.f32.mrb[3].mxu0  ;;  %v13735_v45 = vpop.f32.mrb[2].mxu1 }
 0x19a   : > { %v17272_v56 = vpop.permute.xlu1 %2166  ;;  %v653_v60 = vadd.f32 %v13670_v3, %v17259_v62  ;;  %v13673_v61 = vadd.f32 %v13672_v6, %v13671_v4  ;;  %v13736_v63 = vpop.f32.mrb[3].mxu1  ;;  %v17288_v4 = vrot.slane %v3434_v5, 5 }
 0x19b   : > { %v1304_v7 = vadd.f32 %v13734_v1, %v17259_v62  ;;  %20616 = vst [vmem:[#allocation22_spill] sm:$0xff] %v17272_v56  ;;  %v1429_v1 = vrot.slane %v17198_v24, %v17257_v59  ;;  %v13737_v58 = vadd.f32 %v13736_v63, %v13735_v45  ;;  %v826_v24 = vrot.slane %v17174_v12, %v17257_v59 }
 0x19c   : > { %v656_v3 = vadd.f32 %v13673_v61, %v17259_v62  ;;  %v715_v63 = vmax.f32 %v653_v60, 0.0 }
 0x19d   : > { %v1366_v2 = vmax.f32 %v1304_v7, 0.0  ;;  %v1307_v6 = vadd.f32 %v13737_v58, %v17259_v62  ;;  %v12929_v61 = vcombine.low %v1417_v57, %v1429_v1  ;;  %v17304_v60 = vcombine.low %v814_v25, %v826_v24 }
 0x19e   : > { %v716_v56 = vmax.f32 %v656_v3, 0.0  ;;  %v13674_v10 = vpop.f32.mrb[4].mxu0  ;;  %v17300_v13 = vpop.permute.xlu1 %2190  ;;  %v850_v1 = vrot.slane %v17178_v14, %v17257_v59  ;;  %v1453_v24 = vrot.slane %v17202_v26, %v17257_v59  ;;  %v1441_v14 = vrot.slane %v17209_v28, %v17257_v59 }
 0x19f   : > { %v13738_v45 = vpop.f32.mrb[4].mxu1  ;;  %v13675_v5 = vpop.f32.mrb[5].mxu0  ;;  %v1367_v53 = vmax.f32 %v1307_v6, 0.0  ;;  %v874_v25 = vrot.slane %v17182_v16, %v17257_v59  ;;  %v922_v16 = vrot.slane %v17190_v20, %v17257_v59  ;;  %v1477_v20 = vrot.slane %v17212_v29, %v17257_v59 }
 0x1a0   : > { %v13739_v55 = vpop.f32.mrb[5].mxu1  ;;  %v731_v7 = vpack.c.bf16 %v716_v56, %v715_v63  ;;  %v13676_v58 = vadd.f32 %v13675_v5, %v13674_v10  ;;  %v13677_v50 = vpop.f32.mrb[6].mxu0  ;;  %v898_v5 = vrot.slane %v17186_v18, %v17257_v59  ;;  %v910_v18 = vrot.slane %v17192_v21, %v17257_v59 }
 0x1a1   : > { %v13740_v27 = vadd.f32 %v13739_v55, %v13738_v45  ;;  %v13678_v57 = vpop.f32.mrb[7].mxu0  ;;  %v1382_v55 = vpack.c.bf16 %v1367_v53, %v1366_v2  ;;  %v13741_v6 = vpop.f32.mrb[6].mxu1  ;;  %v17342_v21 = vcombine.low %v838_v9, %v850_v1  ;;  %v946_v1 = vrot.slane %v17194_v22, %v17257_v59 }
 0x1a2   : > { %v995_v56 = vmul.bf16 %v12889_v8, %v731_v7  ;;  %v661_v45 = vadd.f32 %v13676_v58, %v17259_v62  ;;  %v13679_v63 = vadd.f32 %v13678_v57, %v13677_v50  ;;  %v13742_v10 = vpop.f32.mrb[7].mxu1 }
 0x1a3   : > { %v1312_v3 = vadd.f32 %v13740_v27, %v17259_v62  ;;  %v1646_v53 = vmul.bf16 %v12929_v61, %v1382_v55  ;;  %v13743_v27 = vadd.f32 %v13742_v10, %v13741_v6  ;;  %v886_v61 = vrot.slane %v17188_v19, %v17257_v59  ;;  %v17340_v10 = vpop.permute.xlu0 %2202 }
 0x1a4   : > { %v1012_v2 = vrot.slane %v995_v56, 4  ;;  %v664_v8 = vadd.f32 %v13679_v63, %v17259_v62  ;;  %v717_v17 = vmax.f32 %v661_v45, 0.0  ;;  %v12930_v6 = vcombine.low %v1441_v14, %v1453_v24 }
 0x1a5   : > { %v1662_v7 = vrot.slane %v1646_v53, 4  ;;  %v1368_v26 = vmax.f32 %v1312_v3, 0.0  ;;  %v1315_v58 = vadd.f32 %v13743_v27, %v17259_v62  ;;  %v17333_v3 = vpop.permute.xlu1 %2214  ;;  %v1465_v45 = vrot.slane %v17214_v30, %v17257_v59 }
 0x1a6   : > { %1036 = vst.msk [vmem:[#allocation2 + $0x8] sm:$0xf0] %vm384_vm0, %v1012_v2  ;;  %v718_v50 = vmax.f32 %v664_v8, 0.0  ;;  %v13680_v57 = vpop.f32.mrb[8].mxu0  ;;  %v17344_v24 = vcombine.low %v862_v15, %v874_v25  ;;  %v934_v15 = vrot.slane %v17196_v23, %v17257_v59 }
 0x1a7   : > { %v13744_v28 = vpop.f32.mrb[8].mxu1  ;;  %v13681_v56 = vpop.f32.mrb[9].mxu0  ;;  %1686 = vst.msk [vmem:[#allocation2 + $0x48] sm:$0xf0] %vm384_vm0, %v1662_v7  ;;  %v1369_v63 = vmax.f32 %v1315_v58, 0.0 }
 0x1a8   : > { %v13745_v55 = vpop.f32.mrb[9].mxu1  ;;  %v732_v53 = vpack.c.bf16 %v718_v50, %v717_v17  ;;  %v13682_v27 = vadd.f32 %v13681_v56, %v13680_v57  ;;  %v13683_v8 = vpop.f32.mrb[10].mxu0  ;;  %v17351_v17 = vcombine.low %v910_v18, %v922_v16 }
 0x1a9   : > { %v13746_v19 = vadd.f32 %v13745_v55, %v13744_v28  ;;  %v13684_v14 = vpop.f32.mrb[11].mxu0  ;;  %v1383_v52 = vpack.c.bf16 %v1369_v63, %v1368_v26  ;;  %v13747_v28 = vpop.f32.mrb[10].mxu1  ;;  %v17347_v55 = vcombine.low %v886_v61, %v898_v5  ;;  %v12931_v26 = vcombine.low %v1465_v45, %v1477_v20 }
 0x1aa   : > { %v996_v29 = vmul.bf16 %v17298_v49, %v732_v53  ;;  %v669_v30 = vadd.f32 %v13682_v27, %v17259_v62  ;;  %v13685_v12 = vadd.f32 %v13684_v14, %v13683_v8  ;;  %v13748_v51 = vpop.f32.mrb[11].mxu1  ;;  %v1501_v49 = vrot.slane %v17216_v31, %v17257_v59  ;;  %v17360_v61 = vpop.permute.xlu1 %2238 }
 0x1ab   : > { %v1320_v58 = vadd.f32 %v13746_v19, %v17259_v62  ;;  %v1647_v9 = vmul.bf16 %v12930_v6, %v1383_v52  ;;  %v13749_v25 = vadd.f32 %v13748_v51, %v13747_v28  ;;  %v1489_v31 = vrot.slane %v17218_v32, %v17257_v59  ;;  %v17369_v19 = vpop.permute.xlu0 %2226 }
 0x1ac   : > { %v1013_v50 = vrot.slane %v996_v29, 4  ;;  %v672_v5 = vadd.f32 %v13685_v12, %v17259_v62  ;;  %v719_v52 = vmax.f32 %v669_v30, 0.0  ;;  %v20618_v32 = vrot.slane %v17252_v54, 4 }
 0x1ad   : > { %v1663_v57 = vrot.slane %v1647_v9, 4  ;;  %v1370_v16 = vmax.f32 %v1320_v58, 0.0  ;;  %v1323_v18 = vadd.f32 %v13749_v25, %v17259_v62  ;;  %v17363_v56 = vld [vmem:[#allocation2 + $0x8] sm:$0xff]  ;;  %v1549_v29 = vrot.slane %v17224_v35, %v17257_v59 }
 0x1ae   : > { %v1014_v51 = vsel %vm1011_vm3, %v1012_v2, %v1013_v50  ;;  %v720_v23 = vmax.f32 %v672_v5, 0.0  ;;  %v13686_v6 = vpop.f32.mrb[12].mxu0  ;;  %v3033_v63 = vrot.slane %v17363_v56, 4  ;;  %v1525_v2 = vrot.slane %v17220_v33, %v17257_v59 }
 0x1af   : > { %v13750_v22 = vpop.f32.mrb[12].mxu1  ;;  %1037 = vst.msk [vmem:[#allocation2 + $0x10] sm:$0xff] %vm380_vm1, %v1014_v51  ;;  %v1664_v20 = vsel %vm1011_vm3, %v1662_v7, %v1663_v57  ;;  %v13687_v45 = vpop.f32.mrb[13].mxu0  ;;  %v1371_v53 = vmax.f32 %v1323_v18, 0.0  ;;  %v1513_v7 = vrot.slane %v17222_v34, %v17257_v59  ;;  %v1537_v5 = vrot.slane %v17226_v36, %v17257_v59 }
 0x1b0   : > { %v13751_v12 = vpop.f32.mrb[13].mxu1  ;;  %v733_v8 = vpack.c.bf16 %v720_v23, %v719_v52  ;;  %1687 = vst.msk [vmem:[#allocation2 + $0x50] sm:$0xff] %vm380_vm1, %v1664_v20  ;;  %v13688_v14 = vadd.f32 %v13687_v45, %v13686_v6  ;;  %v13689_v58 = vpop.f32.mrb[14].mxu0  ;;  %v3034_v28 = vsel %vm1011_vm3, %v20618_v32, %v3033_v63  ;;  %v1573_v34 = vrot.slane %v17228_v37, %v17257_v59 }
 0x1b1   : > { %v13752_v27 = vadd.f32 %v13751_v12, %v13750_v22  ;;  %v1384_v30 = vpack.c.bf16 %v1371_v53, %v1370_v16  ;;  %v13690_v9 = vpop.f32.mrb[15].mxu0  ;;  %14348 = vmatprep.mubr.msk.bf16.mxu0 %vm380_vm1, %v3034_v28  ;;  %v13753_v25 = vpop.f32.mrb[14].mxu1  ;;  %v1561_v35 = vrot.slane %v17230_v38, %v17257_v59  ;;  %v17395_v23 = vcombine.low %v934_v15, %v946_v1 }
 0x1b2   : > { %v997_v54 = vmul.bf16 %v17304_v60, %v733_v8  ;;  %v677_v18 = vadd.f32 %v13688_v14, %v17259_v62  ;;  %v13691_v22 = vadd.f32 %v13690_v9, %v13689_v58  ;;  %v13754_v51 = vpop.f32.mrb[15].mxu1  ;;  %v12932_v6 = vcombine.low %v1489_v31, %v1501_v49  ;;  %v17397_v12 = vpop.permute.xlu1 %2720 }
 0x1b3   : > { %v1328_v33 = vadd.f32 %v13752_v27, %v17259_v62  ;;  %v1648_v16 = vmul.bf16 %v12931_v26, %v1384_v30  ;;  %v13755_v52 = vadd.f32 %v13754_v51, %v13753_v25  ;;  %v17400_v20 = vcombine.low %v1513_v7, %v1525_v2  ;;  %v17402_v45 = vpop.permute.xlu0 %2708 }
 0x1b4   : > { %v1015_v36 = vrot.slane %v997_v54, 4  ;;  %v680_v60 = vadd.f32 %v13691_v22, %v17259_v62  ;;  %v17405_v38 = vcombine.low %v1537_v5, %v1549_v29  ;;  %v721_v15 = vmax.f32 %v677_v18, 0.0 }
 0x1b5   : > { %v1665_v53 = vrot.slane %v1648_v16, 4  ;;  %v1372_v27 = vmax.f32 %v1328_v33, 0.0  ;;  %v1331_v37 = vadd.f32 %v13755_v52, %v17259_v62  ;;  %v17410_v58 = vcombine.low %v1561_v35, %v1573_v34 }
 0x1b6   : > { %v1016_v1 = vsel %vm1011_vm3, %v1013_v50, %v1015_v36  ;;  %v722_v26 = vmax.f32 %v680_v60, 0.0  ;;  %v13692_v49 = vpop.f32.mrb[16].mxu0  ;;  %v17408_v14 = vld [vmem:[#allocation2 + $0x10] sm:$0xff]  ;;  %v1597_v29 = vrot.slane %v17232_v39, %v17257_v59  ;;  %v1585_v54 = vrot.slane %v17234_v40, %v17257_v59 }
 0x1b7   : > { %v13756_v8 = vpop.f32.mrb[16].mxu1  ;;  %1038 = vst.msk [vmem:[#allocation2 + $0x18] sm:$0xff] %vm380_vm1, %v1016_v1  ;;  %v1666_v2 = vsel %vm1011_vm3, %v1663_v57, %v1665_v53  ;;  %v1373_v32 = vmax.f32 %v1331_v37, 0.0  ;;  %v13693_v28 = vpop.f32.mrb[17].mxu0  ;;  %v3035_v5 = vrot.slane %v17408_v14, 4  ;;  %v2079_v51 = vrot.slane %v17236_v41, %v17257_v59 }
 0x1b8   : > { %v13757_v31 = vpop.f32.mrb[17].mxu1  ;;  %1688 = vst.msk [vmem:[#allocation2 + $0x58] sm:$0xff] %vm380_vm1, %v1666_v2  ;;  %v734_v50 = vpack.c.bf16 %v722_v26, %v721_v15  ;;  %v13694_v9 = vadd.f32 %v13693_v28, %v13692_v49  ;;  %v13695_v33 = vpop.f32.mrb[18].mxu0  ;;  %v2067_v39 = vrot.slane %v17238_v42, %v17257_v59  ;;  %v2103_v41 = vrot.slane %v17240_v43, %v17257_v59  ;;  %v20619_v2 = vld [vmem:[#allocation18_spill] sm:$0xff] }
 0x1b9   : > { %v13758_v7 = vadd.f32 %v13757_v31, %v13756_v8  ;;  %v13759_v30 = vpop.f32.mrb[18].mxu1  ;;  %v1385_v18 = vpack.c.bf16 %v1373_v32, %v1372_v27  ;;  %v13696_v16 = vpop.f32.mrb[19].mxu0  ;;  %v15976_v27 = vld [vmem:[%s20491_s4 + $0x8] sm:$0xff]   ;;  %v2091_v42 = vrot.slane %v17242_v44, %v17257_v59  ;;  %v17442_v1 = vcombine.low %v1585_v54, %v1597_v29 }
 0x1ba   : > { %v13760_v25 = vpop.f32.mrb[19].mxu1  ;;  %v998_v34 = vmul.bf16 %v17342_v21, %v734_v50  ;;  %v685_v35 = vadd.f32 %v13694_v9, %v17259_v62  ;;  %v13697_v40 = vadd.f32 %v13696_v16, %v13695_v33  ;;  %v17435_v8 = vpop.permute.xlu1 %2744  ;;  %v2127_v44 = vrot.slane %v17244_v48, %v17257_v59  ;;  %v20620_v50 = vld [vmem:[#allocation17_spill] sm:$0xff] }
 0x1bb   : > { %v1336_v57 = vadd.f32 %v13758_v7, %v17259_v62  ;;  %v13761_v22 = vadd.f32 %v13760_v25, %v13759_v30  ;;  %v1649_v52 = vmul.bf16 %v12932_v6, %v1385_v18  ;;  %v3036_v6 = vsel %vm1011_vm3, %v3033_v63, %v3035_v5  ;;  %v17444_v15 = vpop.permute.xlu0 %2732 }
 0x1bc   : > { %v17437_v21 = vrot.slane %v998_v34, 4  ;;  %v688_v31 = vadd.f32 %v13697_v40, %v17259_v62  ;;  %14349 = vmatmul.mubr.msk.bf16.vlgmr.msra.gmra.mrb[64].mxu0 %vm380_vm1, %v3036_v6  ;;  %v2115_v32 = vrot.slane %v20619_v2, %v17257_v59  ;;  %v723_v28 = vmax.f32 %v685_v35, 0.0  ;;  %v20621_v2 = vld [vmem:[#allocation20_spill] sm:$0xff] }
 0x1bd   : > { %v1374_v60 = vmax.f32 %v1336_v57, 0.0  ;;  %v1339_v37 = vadd.f32 %v13761_v22, %v17259_v62  ;;  %v1667_v26 = vrot.slane %v1649_v52, 4  ;;  %14365 = vmatpush3.bf16.msra.mxu0 %v20620_v50  ;;  %v17462_v57 = vcombine.low %v2067_v39, %v2079_v51 }
 0x1be   : > { %v1018_v63 = vsel %vm1011_vm3, %v1015_v36, %v17437_v21  ;;  %v13698_v7 = vpop.f32.mrb[20].mxu0  ;;  %v17454_v29 = vld [vmem:[#allocation2 + $0x18] sm:$0xff]  ;;  %v724_v25 = vmax.f32 %v688_v31, 0.0  ;;  %14366 = vmatprep.subr.bf16.mxu0 %v15976_v27  ;;  %v15977_v36 = vld [vmem:[%s20491_s4 + $0x10] sm:$0xff]   ;;  %v17464_v22 = vcombine.low %v2091_v42, %v2103_v41 }
 0x1bf   : > { %v1375_v49 = vmax.f32 %v1339_v37, 0.0  ;;  %v13762_v43 = vpop.f32.mrb[20].mxu1  ;;  %1039 = vst.msk [vmem:[#allocation2 + $0x20] sm:$0xff] %vm380_vm1, %v1018_v63  ;;  %v1668_v9 = vsel %vm1011_vm3, %v1665_v53, %v1667_v26  ;;  %v13699_v48 = vpop.f32.mrb[21].mxu0  ;;  %v3037_v53 = vrot.slane %v17454_v29, 4  ;;  %v20623_v63 = vld [vmem:[#allocation22_spill] sm:$0xff] }
 0x1c0   : > { %v13763_v30 = vpop.f32.mrb[21].mxu1  ;;  %1689 = vst.msk [vmem:[#allocation2 + $0x60] sm:$0xff] %vm380_vm1, %v1668_v9  ;;  %v13700_v34 = vadd.f32 %v13699_v48, %v13698_v7  ;;  %v13701_v35 = vpop.f32.mrb[22].mxu0 }
 0x1c1   : > { %v1386_v33 = vpack.c.bf16 %v1375_v49, %v1374_v60  ;;  %v13764_v54 = vadd.f32 %v13763_v30, %v13762_v43  ;;  %v13765_v18 = vpop.f32.mrb[22].mxu1  ;;  %v735_v60 = vpack.c.bf16 %v724_v25, %v723_v28  ;;  %v13702_v40 = vpop.f32.mrb[23].mxu0  ;;  %v17470_v49 = vcombine.low %v2115_v32, %v2127_v44  ;;  %14367 = vmatpush3.bf16.msra.mxu0 %v15976_v27  ;;  %v15978_v44 = vld [vmem:[%s20491_s4 + $0x18] sm:$0xff]   ;;  %v20624_v30 = vld [vmem:[#allocation23_spill] sm:$0xff] }
 0x1c2   : > { %v13766_v16 = vpop.f32.mrb[23].mxu1  ;;  %v693_v51 = vadd.f32 %v13700_v34, %v17259_v62  ;;  %v13703_v39 = vadd.f32 %v13702_v40, %v13701_v35  ;;  %v3038_v41 = vsel %vm1011_vm3, %v3035_v5, %v3037_v53  ;;  %14368 = vmatprep.subr.bf16.mxu0 %v15977_v36  ;;  %v2151_v32 = vrot.slane %v20621_v2, %v17257_v59  ;;  %v20622_v5 = vld [vmem:[#allocation21_spill] sm:$0xff]  ;;  %v17493_v9 = vpop.permute.xlu0 %2756 }
 0x1c3   : > { %v1650_v52 = vmul.bf16 %v17400_v20, %v1386_v33  ;;  %v1344_v37 = vadd.f32 %v13764_v54, %v17259_v62  ;;  %v13767_v6 = vadd.f32 %v13766_v16, %v13765_v18  ;;  %v999_v31 = vmul.bf16 %v17344_v24, %v735_v60  ;;  %14352 = vmatprep.mubr.msk.bf16.mxu0 %vm380_vm1, %v3038_v41  ;;  %v17488_v24 = vpop.permute.xlu1 %2768 }
 0x1c4   : > { %v2139_v27 = vrot.slane %v20622_v5, %v17257_v59  ;;  %v2175_v28 = vrot.slane %v20623_v63, %v17257_v59  ;;  %v696_v7 = vadd.f32 %v13703_v39, %v17259_v62  ;;  %v2163_v50 = vrot.slane %v20624_v30, %v17257_v59 }
 0x1c5   : > { %v17474_v42 = vrot.slane %v1650_v52, 4  ;;  %v1376_v43 = vmax.f32 %v1344_v37, 0.0  ;;  %v1347_v20 = vadd.f32 %v13767_v6, %v17259_v62  ;;  %v1019_v25 = vrot.slane %v999_v31, 4  ;;  %14369 = vmatpush3.bf16.msra.mxu0 %v15977_v36 }
 0x1c6   : > { %v2199_v18 = vrot.slane %v17300_v13, %v17257_v59  ;;  %v2187_v34 = vrot.slane %v17311_v11, %v17257_v59  ;;  %v725_v35 = vmax.f32 %v693_v51, 0.0  ;;  %v726_v16 = vmax.f32 %v696_v7, 0.0  ;;  %v13704_v52 = vpop.f32.mrb[24].mxu0  ;;  %v17502_v37 = vld [vmem:[#allocation2 + $0x20] sm:$0xff]  ;;  %14370 = vmatprep.subr.bf16.mxu0 %v15978_v44 }
 0x1c7   : > { %v1670_v33 = vsel %vm1011_vm3, %v1667_v26, %v17474_v42  ;;  %v1377_v48 = vmax.f32 %v1347_v20, 0.0  ;;  %v13768_v54 = vpop.f32.mrb[24].mxu1  ;;  %v1020_v26 = vsel %vm1011_vm3, %v17437_v21, %v1019_v25  ;;  %v13705_v6 = vpop.f32.mrb[25].mxu0  ;;  %v3039_v13 = vrot.slane %v17502_v37, 4  ;;  %v17515_v21 = vld [vmem:[%s20491_s4 + $0x40] sm:$0xff]  }
 0x1c8   : > { %1690 = vst.msk [vmem:[#allocation2 + $0x68] sm:$0xff] %vm380_vm1, %v1670_v33  ;;  %v13769_v60 = vpop.f32.mrb[25].mxu1  ;;  %v2223_v11 = vrot.slane %v17333_v3, %v17257_v59  ;;  %v2211_v51 = vrot.slane %v17340_v10, %v17257_v59  ;;  %1040 = vst.msk [vmem:[#allocation2 + $0x28] sm:$0xff] %vm380_vm1, %v1020_v26  ;;  %v736_v31 = vpack.c.bf16 %v726_v16, %v725_v35  ;;  %v13707_v20 = vpop.f32.mrb[26].mxu0 }
 0x1c9   : > { %v1387_v40 = vpack.c.bf16 %v1377_v48, %v1376_v43  ;;  %v13770_v39 = vadd.f32 %v13769_v60, %v13768_v54  ;;  %v13771_v41 = vpop.f32.mrb[26].mxu1  ;;  %v13706_v36 = vadd.f32 %v13705_v6, %v13704_v52  ;;  %v13708_v63 = vpop.f32.mrb[27].mxu0  ;;  %v3040_v10 = vsel %vm1011_vm3, %v3037_v53, %v3039_v13  ;;  %14371 = vmatpush3.bf16.msra.mxu0 %v15978_v44 }
 0x1ca   : > { %v13772_v2 = vpop.f32.mrb[27].mxu1  ;;  %v17522_v7 = vcombine.low %v2139_v27, %v2151_v32  ;;  %v1000_v30 = vmul.bf16 %v17347_v55, %v736_v31  ;;  %v13709_v48 = vadd.f32 %v13708_v63, %v13707_v20  ;;  %14353 = vmatmul.mubr.msk.bf16.gmra.mrb[68].mxu0 %vm380_vm1, %v3040_v10  ;;  %v17527_v54 = vcombine.low %v2163_v50, %v2175_v28  ;;  %v17534_v53 = vpop.permute.xlu1 %2792 }
 0x1cb   : > { %v1651_v43 = vmul.bf16 %v17405_v38, %v1387_v40  ;;  %v1352_v5 = vadd.f32 %v13770_v39, %v17259_v62  ;;  %v13773_v3 = vadd.f32 %v13772_v2, %v13771_v41  ;;  %v701_v33 = vadd.f32 %v13706_v36, %v17259_v62  ;;  %14388 = vmatprep.subr.bf16.mxu0 %v17515_v21  ;;  %v17542_v50 = vpop.permute.xlu0 %2780 }
 0x1cc   : > { %v17530_v52 = vcombine.low %v2187_v34, %v2199_v18  ;;  %v17532_v60 = vcombine.low %v2211_v51, %v2223_v11  ;;  %v1021_v32 = vrot.slane %v1000_v30, 4  ;;  %v704_v55 = vadd.f32 %v13709_v48, %v17259_v62 }
 0x1cd   : > { %v1671_v38 = vrot.slane %v1651_v43, 4  ;;  %v1378_v35 = vmax.f32 %v1352_v5, 0.0  ;;  %v1355_v16 = vadd.f32 %v13773_v3, %v17259_v62  ;;  %v2247_v27 = vrot.slane %v17360_v61, %v17257_v59 }
 0x1ce   : > { %v2235_v28 = vrot.slane %v17369_v19, %v17257_v59  ;;  %v2729_v26 = vrot.slane %v17397_v12, %v17257_v59  ;;  %v1022_v40 = vsel %vm1011_vm3, %v1019_v25, %v1021_v32  ;;  %v727_v6 = vmax.f32 %v701_v33, 0.0  ;;  %v13710_v61 = vpop.f32.mrb[28].mxu0 }
 0x1cf   : > { %v1672_v44 = vsel %vm1011_vm3, %v17474_v42, %v1671_v38  ;;  %v1379_v18 = vmax.f32 %v1355_v16, 0.0  ;;  %v13774_v34 = vpop.f32.mrb[28].mxu1  ;;  %v728_v39 = vmax.f32 %v704_v55, 0.0  ;;  %v2717_v19 = vrot.slane %v17402_v45, %v17257_v59  ;;  %1041 = vst.msk [vmem:[#allocation2 + $0x30] sm:$0xff] %vm380_vm1, %v1022_v40  ;;  %v13711_v51 = vpop.f32.mrb[29].mxu0  ;;  %v17555_v36 = vld [vmem:[#allocation2 + $0x28] sm:$0xff] }
 0x1d0   : > { %1691 = vst.msk [vmem:[#allocation2 + $0x70] sm:$0xff] %vm380_vm1, %v1672_v44  ;;  %v13775_v41 = vpop.f32.mrb[29].mxu1  ;;  %v2753_v11 = vrot.slane %v17435_v8, %v17257_v59  ;;  %v2741_v25 = vrot.slane %v17444_v15, %v17257_v59  ;;  %v13712_v2 = vadd.f32 %v13711_v51, %v13710_v61  ;;  %v13713_v43 = vpop.f32.mrb[30].mxu0  ;;  %v17560_v45 = vrot.slane %v17555_v36, 4 }
 0x1d1   : > { %v1388_v42 = vpack.c.bf16 %v1379_v18, %v1378_v35  ;;  %v13776_v31 = vadd.f32 %v13775_v41, %v13774_v34  ;;  %v13777_v12 = vpop.f32.mrb[30].mxu1  ;;  %v737_v20 = vpack.c.bf16 %v728_v39, %v727_v6  ;;  %v17562_v63 = vcombine.low %v2235_v28, %v2247_v27  ;;  %v13714_v10 = vpop.f32.mrb[31].mxu0 }
 0x1d2   : > { %v13778_v5 = vpop.f32.mrb[31].mxu1  ;;  %v709_v48 = vadd.f32 %v13712_v2, %v17259_v62  ;;  %v13715_v15 = vadd.f32 %v13714_v10, %v13713_v43  ;;  %v3042_v35 = vsel %vm1011_vm3, %v3039_v13, %v17560_v45  ;;  %v17572_v16 = vcombine.low %v2717_v19, %v2729_v26  ;;  %v17578_v44 = vpop.permute.xlu1 %2816 }
 0x1d3   : > { %v1652_v8 = vmul.bf16 %v17410_v58, %v1388_v42  ;;  %v1360_v3 = vadd.f32 %v13776_v31, %v17259_v62  ;;  %v13779_v30 = vadd.f32 %v13778_v5, %v13777_v12  ;;  %v1001_v33 = vmul.bf16 %v17351_v17, %v737_v20  ;;  %14356 = vmatprep.mubr.msk.bf16.mxu0 %vm380_vm1, %v3042_v35  ;;  %v17586_v40 = vpop.permute.xlu0 %2804 }
 0x1d4   : > { %v17576_v28 = vcombine.low %v2741_v25, %v2753_v11  ;;  %v712_v18 = vadd.f32 %v13715_v15, %v17259_v62  ;;  %v3204_v34 = vshrl.u32 %v17363_v56, 16  ;;  %v2777_v13 = vrot.slane %v17488_v24, %v17257_v59 }
 0x1d5   : > { %v1673_v55 = vrot.slane %v1652_v8, 4  ;;  %v1380_v27 = vmax.f32 %v1360_v3, 0.0  ;;  %v1363_v58 = vadd.f32 %v13779_v30, %v17259_v62  ;;  %v1023_v17 = vrot.slane %v1001_v33, 4 }
 0x1d6   : > { %v2765_v26 = vrot.slane %v17493_v9, %v17257_v59  ;;  %v729_v19 = vmax.f32 %v709_v48, 0.0  ;;  %v730_v11 = vmax.f32 %v712_v18, 0.0  ;;  %v13796_v42 = vpop.f32.mrb[32].mxu0  ;;  %v17591_v31 = vld [vmem:[#allocation2 + $0x30] sm:$0xff]  ;;  %v3207_v12 = vshll.u32 %v17363_v56, 16 }
 0x1d7   : > { %v1674_v6 = vsel %vm1011_vm3, %v1671_v38, %v1673_v55  ;;  %v1381_v39 = vmax.f32 %v1363_v58, 0.0  ;;  %v13860_v61 = vpop.f32.mrb[32].mxu1  ;;  %v1024_v41 = vsel %vm1011_vm3, %v1021_v32, %v1023_v17  ;;  %v2801_v25 = vrot.slane %v17534_v53, %v17257_v59  ;;  %v13797_v20 = vpop.f32.mrb[33].mxu0 }
 0x1d8   : > { %1692 = vst.msk [vmem:[#allocation2 + $0x78] sm:$0xff] %vm380_vm1, %v1674_v6  ;;  %v13861_v51 = vpop.f32.mrb[33].mxu1  ;;  %1042 = vst.msk [vmem:[#allocation2 + $0x38] sm:$0xff] %vm380_vm1, %v1024_v41  ;;  %v3043_v32 = vrot.slane %v17591_v31, 4  ;;  %v2789_v5 = vrot.slane %v17542_v50, %v17257_v59  ;;  %v738_v8 = vpack.c.bf16 %v730_v11, %v729_v19  ;;  %v13798_v3 = vadd.f32 %v13797_v20, %v13796_v42  ;;  %v13799_v10 = vpop.f32.mrb[34].mxu0 }
 0x1d9   : > { %v1389_v38 = vpack.c.bf16 %v1381_v39, %v1380_v27  ;;  %v13862_v2 = vadd.f32 %v13861_v51, %v13860_v61  ;;  %v13863_v43 = vpop.f32.mrb[34].mxu1  ;;  %v3206_v33 = vrot.slane %v3204_v34, 3  ;;  %v13800_v35 = vpop.f32.mrb[35].mxu0  ;;  %v3209_v61 = vrot.slane %v3207_v12, 4 }
 0x1da   : > { %v13864_v30 = vpop.f32.mrb[35].mxu1  ;;  %v17606_v58 = vsel %vm1011_vm3, %v17560_v45, %v3043_v32  ;;  %v1002_v18 = vmul.bf16 %v17395_v23, %v738_v8  ;;  %v1954_v6 = vadd.f32 %v13798_v3, %v17259_v62  ;;  %v13801_v39 = vadd.f32 %v13800_v35, %v13799_v10  ;;  %v2841_v42 = vpop.permute.xlu1 %2840 }
 0x1db   : > { %v1653_v48 = vmul.bf16 %v17442_v1, %v1389_v38  ;;  %v2604_v15 = vadd.f32 %v13862_v2, %v17259_v62  ;;  %v13865_v27 = vadd.f32 %v13864_v30, %v13863_v43  ;;  %14357 = vmatmul.mubr.msk.bf16.gmra.mrb[72].mxu0 %vm380_vm1, %v17606_v58  ;;  %v2825_v1 = vrot.slane %v17578_v44, %v17257_v59  ;;  %v2829_v8 = vpop.permute.xlu0 %2828 }
 0x1dc   : > { %v1025_v51 = vrot.slane %v1002_v18, 4  ;;  %v2016_v23 = vmax.f32 %v1954_v6, 0.0  ;;  %v1957_v38 = vadd.f32 %v13801_v39, %v17259_v62  ;;  %v3213_v20 = vshrl.u32 %v17408_v14, 16 }
 0x1dd   : > { %v1675_v41 = vrot.slane %v1653_v48, 4  ;;  %v2666_v19 = vmax.f32 %v2604_v15, 0.0  ;;  %v2607_v11 = vadd.f32 %v13865_v27, %v17259_v62  ;;  %v2813_v2 = vrot.slane %v17586_v40, %v17257_v59 }
 0x1de   : > { %v2849_v43 = vrot.slane %v2841_v42, %v17257_v59  ;;  %v2837_v30 = vrot.slane %v2829_v8, %v17257_v59  ;;  %v1026_v48 = vsel %vm1011_vm3, %v1023_v17, %v1025_v51  ;;  %1044 = vst.msk [vmem:[#allocation2 + $0x48] sm:$0xf] %vm382_vm2, %v1025_v51  ;;  %v2017_v15 = vmax.f32 %v1957_v38, 0.0  ;;  %v13802_v35 = vpop.f32.mrb[36].mxu0 }
 0x1df   : > { %v1676_v44 = vsel %vm1011_vm3, %v1673_v55, %v1675_v41  ;;  %1694 = vst.msk [vmem:[#allocation2 + $0x88] sm:$0xf] %vm382_vm2, %v1675_v41  ;;  %v2667_v3 = vmax.f32 %v2607_v11, 0.0  ;;  %v13866_v10 = vpop.f32.mrb[36].mxu1  ;;  %v17628_v27 = vld [vmem:[#allocation2 + $0x38] sm:$0xff]  ;;  %v17630_v18 = vor.u32 %v3209_v61, %v3206_v33  ;;  %v13803_v6 = vpop.f32.mrb[37].mxu0  ;;  %v20625_v50 = vor.u32 %v17266_v47, %v17264_v46 }
 0x1e0   : > { %1693 = vst.msk [vmem:[#allocation2 + $0x80] sm:$0xff] %vm380_vm1, %v1676_v44  ;;  %v13867_v40 = vpop.f32.mrb[37].mxu1  ;;  %1043 = vst.msk [vmem:[#allocation2 + $0x40] sm:$0xff] %vm380_vm1, %v1026_v48  ;;  %v17634_v11 = vrot.slane %v17628_v27, 4  ;;  %v3216_v17 = vshll.u32 %v17408_v14, 16  ;;  %v2032_v42 = vpack.c.bf16 %v2017_v15, %v2016_v23  ;;  %v13804_v51 = vadd.f32 %v13803_v6, %v13802_v35  ;;  %v13805_v38 = vpop.f32.mrb[38].mxu0 }
 0x1e1   : > { %v2682_v55 = vpack.c.bf16 %v2667_v3, %v2666_v19  ;;  %v13868_v39 = vadd.f32 %v13867_v40, %v13866_v10  ;;  %v13869_v41 = vpop.f32.mrb[38].mxu1  ;;  %v3215_v44 = vrot.slane %v3213_v20, 3  ;;  %v3222_v33 = vshrl.u32 %v17454_v29, 16  ;;  %v13806_v3 = vpop.f32.mrb[39].mxu0 }
 0x1e2   : > { %v13870_v8 = vpop.f32.mrb[39].mxu1  ;;  %v17644_v48 = vsel %vm1011_vm3, %v3043_v32, %v17634_v11  ;;  %v2296_v23 = vmul.bf16 %v17462_v57, %v2032_v42  ;;  %v1962_v15 = vadd.f32 %v13804_v51, %v17259_v62  ;;  %v13807_v35 = vadd.f32 %v13806_v3, %v13805_v38 }
 0x1e3   : > { %v2946_v61 = vmul.bf16 %v17572_v16, %v2682_v55  ;;  %v2612_v19 = vadd.f32 %v13868_v39, %v17259_v62  ;;  %v13871_v10 = vadd.f32 %v13870_v8, %v13869_v41  ;;  %14360 = vmatprep.mubr.msk.bf16.mxu0 %vm380_vm1, %v17644_v48  ;;  %v20505_v40 = vshll.u32 %v17454_v29, 16 }
 0x1e4   : > { %v3218_v39 = vrot.slane %v3216_v17, 4  ;;  %v17660_v57 = vcombine.low %v2765_v26, %v2777_v13  ;;  %v2312_v32 = vrot.slane %v2296_v23, 4  ;;  %v2018_v41 = vmax.f32 %v1962_v15, 0.0 }
 0x1e5   : > { %v2962_v6 = vrot.slane %v2946_v61, 4  ;;  %v2668_v16 = vmax.f32 %v2612_v19, 0.0  ;;  %v2615_v55 = vadd.f32 %v13871_v10, %v17259_v62  ;;  %v1965_v42 = vadd.f32 %v13807_v35, %v17259_v62 }
 0x1e6   : > { %v17669_v51 = vcombine.low %v2789_v5, %v2801_v25  ;;  %v17671_v38 = vcombine.low %v2813_v2, %v2825_v1  ;;  %v3224_v13 = vrot.slane %v3222_v33, 3  ;;  %v17676_v26 = vcombine.low %v2837_v30, %v2849_v43  ;;  %2336 = vst.msk [vmem:[#allocation2 + $0x88] sm:$0xf0] %vm384_vm0, %v2312_v32  ;;  %v13808_v53 = vpop.f32.mrb[40].mxu0 }
 0x1e7   : > { %2986 = vst.msk [vmem:[#allocation2 + $0xc8] sm:$0xf0] %vm384_vm0, %v2962_v6  ;;  %v2669_v24 = vmax.f32 %v2615_v55, 0.0  ;;  %v13872_v9 = vpop.f32.mrb[40].mxu1  ;;  %v2019_v8 = vmax.f32 %v1965_v42, 0.0  ;;  %v3211_v25 = vsel %vm3194_vm4, %v20625_v50, %v17630_v18  ;;  %v3227_v5 = vrot.slane %v20505_v40, 4 }
 0x1e8   : > { %v13873_v61 = vpop.f32.mrb[41].mxu1  ;;  %v17679_v19 = vld [vmem:[#allocation2 + $0x40] sm:$0xf]  ;;  %v13809_v2 = vpop.f32.mrb[41].mxu0  ;;  %v3219_v10 = vor.u32 %v3218_v39, %v3215_v44  ;;  %v20507_v42 = vshrl.u32 %v17502_v37, 16  ;;  %v20506_v46 = vshll.u32 %v17502_v37, 16 }
 0x1e9   : > { %v2683_v1 = vpack.c.bf16 %v2669_v24, %v2668_v16  ;;  %v13874_v43 = vadd.f32 %v13873_v61, %v13872_v9  ;;  %v13875_v30 = vpop.f32.mrb[42].mxu1  ;;  %v3047_v3 = vrot.slane %v17679_v19, 4  ;;  %v2033_v23 = vpack.c.bf16 %v2019_v8, %v2018_v41  ;;  %v13811_v35 = vpop.f32.mrb[42].mxu0 }
 0x1ea   : > { %v13810_v15 = vadd.f32 %v13809_v2, %v13808_v53  ;;  %v13876_v55 = vpop.f32.mrb[43].mxu1  ;;  %v13812_v40 = vpop.f32.mrb[43].mxu0  ;;  %v17698_v41 = vor.u32 %v3227_v5, %v3224_v13  ;;  %v3240_v61 = vshrl.u32 %v17555_v36, 16 }
 0x1eb   : > { %v2947_v47 = vmul.bf16 %v17576_v28, %v2683_v1  ;;  %v2620_v50 = vadd.f32 %v13874_v43, %v17259_v62  ;;  %v13877_v16 = vadd.f32 %v13876_v55, %v13875_v30  ;;  %v3048_v24 = vsel %vm1011_vm3, %v17634_v11, %v3047_v3  ;;  %v17703_v1 = vpop.permute.xlu1 %2864  ;;  %v17707_v30 = vpop.permute.xlu0 %2852 }
 0x1ec   : > { %v2297_v9 = vmul.bf16 %v17464_v22, %v2033_v23  ;;  %v1970_v44 = vadd.f32 %v13810_v15, %v17259_v62  ;;  %v13813_v39 = vadd.f32 %v13812_v40, %v13811_v35  ;;  %14361 = vmatmul.mubr.msk.bf16.gmra.mrb[76].mxu0 %vm380_vm1, %v3048_v24  ;;  %v20508_v40 = vshll.u32 %v17555_v36, 16 }
 0x1ed   : > { %v2963_v8 = vrot.slane %v2947_v47, 4  ;;  %v2670_v53 = vmax.f32 %v2620_v50, 0.0  ;;  %v2623_v28 = vadd.f32 %v13877_v16, %v17259_v62  ;;  %14372 = vmatprep.mubr.msk.bf16.mxu0 %vm380_vm1, %v3211_v25  ;;  %v3233_v23 = vrot.slane %v20507_v42, 3 }
 0x1ee   : > { %v2313_v2 = vrot.slane %v2297_v9, 4  ;;  %v2020_v43 = vmax.f32 %v1970_v44, 0.0  ;;  %v1973_v22 = vadd.f32 %v13813_v39, %v17259_v62  ;;  %v3236_v25 = vrot.slane %v20506_v46, 4 }
 0x1ef   : > { %v2964_v13 = vsel %vm1011_vm3, %v2962_v6, %v2963_v8  ;;  %v2671_v5 = vmax.f32 %v2623_v28, 0.0  ;;  %v13878_v3 = vpop.f32.mrb[44].mxu1  ;;  %v2873_v15 = vrot.slane %v17703_v1, %v17257_v59  ;;  %v2861_v62 = vrot.slane %v17707_v30, %v17257_v59  ;;  %v13814_v6 = vpop.f32.mrb[44].mxu0 }
 0x1f0   : > { %v2314_v35 = vsel %vm1011_vm3, %v2312_v32, %v2313_v2  ;;  %2987 = vst.msk [vmem:[#allocation2 + $0xd0] sm:$0xff] %vm380_vm1, %v2964_v13  ;;  %v2021_v55 = vmax.f32 %v1973_v22, 0.0  ;;  %v13879_v47 = vpop.f32.mrb[45].mxu1  ;;  %v13815_v16 = vpop.f32.mrb[45].mxu0  ;;  %v3220_v44 = vsel %vm3194_vm4, %v17630_v18, %v3219_v10  ;;  %v3229_v39 = vsel %vm3194_vm4, %v3219_v10, %v17698_v41  ;;  %v15980_v22 = vld [vmem:[%s20491_s4 + $0x48] sm:$0xff]  }
 0x1f1   : > { %2337 = vst.msk [vmem:[#allocation2 + $0x90] sm:$0xff] %vm380_vm1, %v2314_v35  ;;  %v2684_v50 = vpack.c.bf16 %v2671_v5, %v2670_v53  ;;  %v13880_v24 = vadd.f32 %v13879_v47, %v13878_v3  ;;  %v13881_v9 = vpop.f32.mrb[46].mxu1  ;;  %v13816_v46 = vadd.f32 %v13815_v16, %v13814_v6  ;;  %v13817_v32 = vpop.f32.mrb[46].mxu0  ;;  %v3242_v53 = vrot.slane %v3240_v61, 3  ;;  %v17733_v18 = vld [vmem:[#allocation6] ss:$0 sm:$0xff] }
 0x1f2   : > { %v2034_v28 = vpack.c.bf16 %v2021_v55, %v2020_v43  ;;  %v13882_v42 = vpop.f32.mrb[47].mxu1  ;;  %v3245_v13 = vrot.slane %v20508_v40, 4  ;;  %v13818_v43 = vpop.f32.mrb[47].mxu0  ;;  %v17736_v35 = vor.u32 %v3236_v25, %v3233_v23  ;;  %v3249_v16 = vshrl.u32 %v17591_v31, 16 }
 0x1f3   : > { %v2948_v5 = vmul.bf16 %v17660_v57, %v2684_v50  ;;  %v2628_v10 = vadd.f32 %v17733_v18, %v13880_v24  ;;  %v13883_v3 = vadd.f32 %v13882_v42, %v13881_v9  ;;  %v1978_v6 = vadd.f32 %v17733_v18, %v13816_v46  ;;  %v15981_v24 = vld [vmem:[%s20491_s4 + $0x50] sm:$0xff]  }
 0x1f4   : > { %v2298_v55 = vmul.bf16 %v17470_v49, %v2034_v28  ;;  %v13819_v47 = vadd.f32 %v13818_v43, %v13817_v32  ;;  %14373 = vmatmul.mubr.msk.bf16.vlgmr.msra.gmra.mrb[64].mxu0 %vm380_vm1, %v3220_v44  ;;  %v3252_v42 = vshll.u32 %v17591_v31, 16  ;;  %v17751_v25 = vor.u32 %v3245_v13, %v3242_v53 }
 0x1f5   : > { %v17742_v40 = vrot.slane %v2948_v5, 4  ;;  %v2672_v57 = vmax.f32 %v2628_v10, 0.0  ;;  %v2631_v50 = vadd.f32 %v17733_v18, %v13883_v3  ;;  %14389 = vmatpush3.bf16.msra.mxu0 %v17515_v21  ;;  %14376 = vmatprep.mubr.msk.bf16.mxu0 %vm380_vm1, %v3229_v39  ;;  %v2022_v49 = vmax.f32 %v1978_v6, 0.0 }
 0x1f6   : > { %v17748_v23 = vrot.slane %v2298_v55, 4  ;;  %v1981_v46 = vadd.f32 %v17733_v18, %v13819_v47  ;;  %14390 = vmatprep.subr.bf16.mxu0 %v15980_v22  ;;  %v3258_v39 = vshrl.u32 %v17628_v27, 16  ;;  %v3438_v28 = vrot.slane %v3204_v34, 4  ;;  %v13820_v13 = vpop.f32.mrb[48].mxu0 }
 0x1f7   : > { %v2966_v9 = vsel %vm1011_vm3, %v2963_v8, %v17742_v40  ;;  %v2673_v21 = vmax.f32 %v2631_v50, 0.0  ;;  %v13884_v44 = vpop.f32.mrb[48].mxu1  ;;  %v3261_v10 = vshll.u32 %v17628_v27, 16  ;;  %v3439_v8 = vrot.slane %v3207_v12, 5  ;;  %v13821_v3 = vpop.f32.mrb[49].mxu0 }
 0x1f8   : > { %v2316_v32 = vsel %vm1011_vm3, %v2313_v2, %v17748_v23  ;;  %2988 = vst.msk [vmem:[#allocation2 + $0xd8] sm:$0xff] %vm380_vm1, %v2966_v9  ;;  %v2023_v53 = vmax.f32 %v1981_v46, 0.0  ;;  %v13885_v5 = vpop.f32.mrb[49].mxu1  ;;  %v3251_v34 = vrot.slane %v3249_v16, 3  ;;  %v3254_v2 = vrot.slane %v3252_v42, 4  ;;  %v13823_v46 = vpop.f32.mrb[50].mxu0 }
 0x1f9   : > { %2338 = vst.msk [vmem:[#allocation2 + $0x98] sm:$0xff] %vm380_vm1, %v2316_v32  ;;  %v2685_v43 = vpack.c.bf16 %v2673_v21, %v2672_v57  ;;  %v13886_v55 = vadd.f32 %v13885_v5, %v13884_v44  ;;  %v13887_v6 = vpop.f32.mrb[50].mxu1  ;;  %14391 = vmatpush3.bf16.msra.mxu0 %v15980_v22  ;;  %v13822_v50 = vadd.f32 %v13821_v3, %v13820_v13  ;;  %v15982_v22 = vld [vmem:[%s20491_s4 + $0x58] sm:$0xff]   ;;  %v13824_v21 = vpop.f32.mrb[51].mxu0  ;;  %v3260_v32 = vrot.slane %v3258_v39, 3 }
 0x1fa   : > { %v2035_v47 = vpack.c.bf16 %v2023_v53, %v2022_v49  ;;  %v13888_v9 = vpop.f32.mrb[51].mxu1  ;;  %v3238_v56 = vsel %vm3194_vm4, %v17698_v41, %v17736_v35  ;;  %v17778_v12 = vsel %vm3194_vm4, %v17736_v35, %v17751_v25  ;;  %14392 = vmatprep.subr.bf16.mxu0 %v15981_v24  ;;  %v13825_v13 = vadd.f32 %v13824_v21, %v13823_v46  ;;  %v17802_v46 = vld [vmem:[%s20491_s4 + $0x60] sm:$0xff]  }
 0x1fb   : > { %v2949_v57 = vmul.bf16 %v17669_v51, %v2685_v43  ;;  %v2636_v49 = vadd.f32 %v17733_v18, %v13886_v55  ;;  %v13889_v44 = vadd.f32 %v13888_v9, %v13887_v6  ;;  %v1986_v53 = vadd.f32 %v17733_v18, %v13822_v50 }
 0x1fc   : > { %v2299_v41 = vmul.bf16 %v17522_v7, %v2035_v47  ;;  %14377 = vmatmul.mubr.msk.bf16.gmra.mrb[68].mxu0 %vm380_vm1, %v3238_v56  ;;  %v3263_v5 = vrot.slane %v3261_v10, 4  ;;  %v3255_v55 = vor.u32 %v3254_v2, %v3251_v34  ;;  %v1989_v47 = vadd.f32 %v17733_v18, %v13825_v13 }
 0x1fd   : > { %v17792_v3 = vrot.slane %v2949_v57, 4  ;;  %v2674_v51 = vmax.f32 %v2636_v49, 0.0  ;;  %v2639_v43 = vadd.f32 %v17733_v18, %v13889_v44  ;;  %14380 = vmatprep.mubr.msk.bf16.mxu0 %vm380_vm1, %v17778_v12  ;;  %14393 = vmatpush3.bf16.msra.mxu0 %v15981_v24  ;;  %v2024_v6 = vmax.f32 %v1986_v53, 0.0 }
 0x1fe   : > { %v2317_v7 = vrot.slane %v2299_v41, 4  ;;  %14394 = vmatprep.subr.bf16.mxu0 %v15982_v22  ;;  %v3267_v50 = vshrl.u32 %v17679_v19, 16  ;;  %v3270_v24 = vshll.u32 %v17679_v19, 16  ;;  %v17808_v2 = vor.u32 %v3439_v8, %v3438_v28  ;;  %v13826_v21 = vpop.f32.mrb[52].mxu0 }
 0x1ff   : > { %v2968_v9 = vsel %vm1011_vm3, %v17742_v40, %v17792_v3  ;;  %v2675_v56 = vmax.f32 %v2639_v43, 0.0  ;;  %v13890_v34 = vpop.f32.mrb[52].mxu1  ;;  %v2025_v49 = vmax.f32 %v1989_v47, 0.0  ;;  %v17813_v41 = vor.u32 %v3263_v5, %v3260_v32  ;;  %v13827_v13 = vpop.f32.mrb[53].mxu0 }
 0x200   : > { %v2318_v57 = vsel %vm1011_vm3, %v17748_v23, %v2317_v7  ;;  %2989 = vst.msk [vmem:[#allocation2 + $0xe0] sm:$0xff] %vm380_vm1, %v2968_v9  ;;  %v13891_v44 = vpop.f32.mrb[53].mxu1  ;;  %v3442_v53 = vrot.slane %v3213_v20, 4  ;;  %v3443_v23 = vrot.slane %v3216_v17, 5  ;;  %v3446_v8 = vrot.slane %v3222_v33, 4  ;;  %v13829_v32 = vpop.f32.mrb[54].mxu0 }
 0x201   : > { %2339 = vst.msk [vmem:[#allocation2 + $0xa0] sm:$0xff] %vm380_vm1, %v2318_v57  ;;  %v2686_v40 = vpack.c.bf16 %v2675_v56, %v2674_v51  ;;  %v13892_v19 = vadd.f32 %v13891_v44, %v13890_v34  ;;  %v13893_v28 = vpop.f32.mrb[54].mxu1  ;;  %14395 = vmatpush3.bf16.msra.mxu0 %v15982_v22  ;;  %v2036_v43 = vpack.c.bf16 %v2025_v49, %v2024_v6  ;;  %v3269_v9 = vrot.slane %v3267_v50, 3  ;;  %v13830_v14 = vpop.f32.mrb[55].mxu0 }
 0x202   : > { %v13828_v47 = vadd.f32 %v13827_v13, %v13826_v21  ;;  %v13894_v5 = vpop.f32.mrb[55].mxu1  ;;  %v17824_v20 = vsel %vm3194_vm4, %v17751_v25, %v3255_v55  ;;  %14412 = vmatprep.subr.bf16.mxu0 %v17802_v46  ;;  %v3272_v56 = vrot.slane %v3270_v24, 4  ;;  %v2889_v34 = vpop.permute.xlu1 %2888  ;;  %v13831_v57 = vadd.f32 %v13830_v14, %v13829_v32 }
 0x203   : > { %v2950_v51 = vmul.bf16 %v17671_v38, %v2686_v40  ;;  %v2644_v22 = vadd.f32 %v17733_v18, %v13892_v19  ;;  %v13895_v17 = vadd.f32 %v13894_v5, %v13893_v28  ;;  %v2300_v33 = vmul.bf16 %v17527_v54, %v2036_v43  ;;  %v2877_v50 = vpop.permute.xlu0 %2876 }
 0x204   : > { %v1994_v6 = vadd.f32 %v17733_v18, %v13828_v47  ;;  %14381 = vmatmul.mubr.msk.bf16.gmra.mrb[72].mxu0 %vm380_vm1, %v17824_v20  ;;  %v17835_v25 = vsel %vm3194_vm4, %v3255_v55, %v17813_v41  ;;  %v20626_v54 = vshll.u32 %v17454_v29, 16  ;;  %v17848_v44 = vcombine.low %v2861_v62, %v2873_v15 }
 0x205   : > { %v2969_v38 = vrot.slane %v2950_v51, 4  ;;  %v2676_v49 = vmax.f32 %v2644_v22, 0.0  ;;  %v2647_v21 = vadd.f32 %v17733_v18, %v13895_v17  ;;  %14384 = vmatprep.mubr.msk.bf16.mxu0 %vm380_vm1, %v17835_v25  ;;  %v2319_v55 = vrot.slane %v2300_v33, 4 }
 0x206   : > { %v3447_v24 = vrot.slane %v20626_v54, 5  ;;  %v2026_v40 = vmax.f32 %v1994_v6, 0.0  ;;  %v1997_v13 = vadd.f32 %v17733_v18, %v13831_v57  ;;  %v2897_v19 = vrot.slane %v2889_v34, %v17257_v59  ;;  %v13832_v15 = vpop.f32.mrb[56].mxu0 }
 0x207   : > { %v2970_v28 = vsel %vm1011_vm3, %v17792_v3, %v2969_v38  ;;  %v2677_v43 = vmax.f32 %v2647_v21, 0.0  ;;  %v13896_v29 = vpop.f32.mrb[56].mxu1  ;;  %v3273_v47 = vor.u32 %v3272_v56, %v3269_v9  ;;  %v2885_v32 = vrot.slane %v2877_v50, %v17257_v59  ;;  %v13833_v22 = vpop.f32.mrb[57].mxu0 }
 0x208   : > { %v2320_v1 = vsel %vm1011_vm3, %v2317_v7, %v2319_v55  ;;  %2990 = vst.msk [vmem:[#allocation2 + $0xe8] sm:$0xff] %vm380_vm1, %v2970_v28  ;;  %v2027_v30 = vmax.f32 %v1997_v13, 0.0  ;;  %v13897_v62 = vpop.f32.mrb[57].mxu1  ;;  %v20627_v5 = vor.u32 %v17288_v4, %v17279_v0  ;;  %v3444_v59 = vor.u32 %v3443_v23, %v3442_v53  ;;  %v13835_v34 = vpop.f32.mrb[58].mxu0 }
 0x209   : > { %2340 = vst.msk [vmem:[#allocation2 + $0xa8] sm:$0xff] %vm380_vm1, %v2320_v1  ;;  %v2687_v3 = vpack.c.bf16 %v2677_v43, %v2676_v49  ;;  %v13898_v9 = vadd.f32 %v13897_v62, %v13896_v29  ;;  %v13899_v14 = vpop.f32.mrb[58].mxu1  ;;  %v17863_v17 = vor.u32 %v3447_v24, %v3446_v8  ;;  %v13834_v56 = vadd.f32 %v13833_v22, %v13832_v15  ;;  %v13836_v21 = vpop.f32.mrb[59].mxu0 }
 0x20a   : > { %v3441_v51 = vsel %vm3429_vm5, %v20627_v5, %v17808_v2  ;;  %v2037_v7 = vpack.c.bf16 %v2027_v30, %v2026_v40  ;;  %v13900_v33 = vpop.f32.mrb[59].mxu1  ;;  %v20628_v6 = vshrl.u32 %v17502_v37, 16  ;;  %v20629_v0 = vshll.u32 %v17502_v37, 16  ;;  %v17885_v30 = vld [vmem:[#allocation2 + $0x10] sm:$0xff] }
 0x20b   : > { %v2951_v50 = vmul.bf16 %v17676_v26, %v2687_v3  ;;  %v2652_v49 = vadd.f32 %v17733_v18, %v13898_v9  ;;  %v13901_v54 = vadd.f32 %v13900_v33, %v13899_v14  ;;  %v3274_v53 = vsel %vm3194_vm4, %v17813_v41, %v3273_v47  ;;  %v17896_v9 = vld [vmem:[#allocation2 + $0x18] sm:$0xff] }
 0x20c   : > { %v3450_v57 = vrot.slane %v20628_v6, 4  ;;  %v3451_v4 = vrot.slane %v20629_v0, 5  ;;  %v2301_v23 = vmul.bf16 %v17530_v52, %v2037_v7  ;;  %v2002_v8 = vadd.f32 %v17733_v18, %v13834_v56  ;;  %14385 = vmatmul.mubr.msk.bf16.gmra.mrb[76].mxu0 %vm380_vm1, %v3274_v53 }
 0x20d   : > { %v13837_v24 = vadd.f32 %v13836_v21, %v13835_v34  ;;  %v3454_v37 = vrot.slane %v3240_v61, 4  ;;  %v2971_v40 = vrot.slane %v2951_v50, 4  ;;  %v2678_v13 = vmax.f32 %v2652_v49, 0.0  ;;  %14396 = vmatprep.mubr.msk.bf16.mxu0 %vm380_vm1, %v3441_v51 }
 0x20e   : > { %v2655_v26 = vadd.f32 %v17733_v18, %v13901_v54  ;;  %v20630_v28 = vshll.u32 %v17555_v36, 16  ;;  %v17882_v29 = vcombine.low %v2885_v32, %v2897_v19  ;;  %v2321_v52 = vrot.slane %v2301_v23, 4  ;;  %v13838_v32 = vpop.f32.mrb[60].mxu0 }
 0x20f   : > { %v2028_v47 = vmax.f32 %v2002_v8, 0.0  ;;  %v2005_v1 = vadd.f32 %v17733_v18, %v13837_v24  ;;  %v2972_v15 = vsel %vm1011_vm3, %v2969_v38, %v2971_v40  ;;  %v13902_v62 = vpop.f32.mrb[60].mxu1  ;;  %v3445_v5 = vsel %vm3429_vm5, %v17808_v2, %v3444_v59  ;;  %v13839_v14 = vpop.f32.mrb[61].mxu0 }
 0x210   : > { %v3455_v43 = vrot.slane %v20630_v28, 5  ;;  %v2679_v61 = vmax.f32 %v2655_v26, 0.0  ;;  %v3449_v51 = vsel %vm3429_vm5, %v3444_v59, %v17863_v17  ;;  %v2322_v36 = vsel %vm1011_vm3, %v2319_v55, %v2321_v52  ;;  %2991 = vst.msk [vmem:[#allocation2 + $0xf0] sm:$0xff] %vm380_vm1, %v2972_v15  ;;  %v13903_v3 = vpop.f32.mrb[61].mxu1  ;;  %v13841_v33 = vpop.f32.mrb[62].mxu0 }
 0x211   : > { %v2029_v19 = vmax.f32 %v2005_v1, 0.0  ;;  %v17894_v22 = vor.u32 %v3451_v4, %v3450_v57  ;;  %2341 = vst.msk [vmem:[#allocation2 + $0xb0] sm:$0xff] %vm380_vm1, %v2322_v36  ;;  %v13904_v7 = vadd.f32 %v13903_v3, %v13902_v62  ;;  %v13905_v2 = vpop.f32.mrb[62].mxu1  ;;  %v3662_v59 = vshrl.u32 %v17885_v30, 16  ;;  %v15984_v57 = vld [vmem:[%s20491_s4 + $0x68] sm:$0xff]   ;;  %v17906_v4 = vld [vmem:[#allocation2 + $0x40] sm:$0xff] }
 0x212   : > { %v2688_v38 = vpack.c.bf16 %v2679_v61, %v2678_v13  ;;  %v17899_v56 = vor.u32 %v3455_v43, %v3454_v37  ;;  %v13840_v34 = vadd.f32 %v13839_v14, %v13838_v32  ;;  %v13906_v6 = vpop.f32.mrb[63].mxu1  ;;  %v3665_v0 = vshll.u32 %v17885_v30, 16  ;;  %v13842_v21 = vpop.f32.mrb[63].mxu0  ;;  %v15985_v1 = vld [vmem:[%s20491_s4 + $0x70] sm:$0xff]   ;;  %v15986_v32 = vld [vmem:[%s20491_s4 + $0x78] sm:$0xff]  }
 0x213   : > { %v2038_v55 = vpack.c.bf16 %v2029_v19, %v2028_v47  ;;  %v2660_v49 = vadd.f32 %v17733_v18, %v13904_v7  ;;  %v13907_v54 = vadd.f32 %v13906_v6, %v13905_v2  ;;  %v3671_v53 = vshrl.u32 %v17896_v9, 16 }
 0x214   : > { %v2952_v50 = vmul.bf16 %v17848_v44, %v2688_v38  ;;  %v2010_v8 = vadd.f32 %v17733_v18, %v13840_v34  ;;  %v13843_v24 = vadd.f32 %v13842_v21, %v13841_v33  ;;  %14397 = vmatmul.mubr.msk.bf16.vlgmr.msra.gmra.mrb[64].mxu0 %vm380_vm1, %v3445_v5  ;;  %v3674_v37 = vshll.u32 %v17896_v9, 16  ;;  %v3636_v21 = vld [vmem:[#allocation2 + $0x8] sm:$0xf8] }
 0x215   : > { %v2302_v23 = vmul.bf16 %v17532_v60, %v2038_v55  ;;  %v2680_v26 = vmax.f32 %v2660_v49, 0.0  ;;  %v2663_v28 = vadd.f32 %v17733_v18, %v13907_v54  ;;  %14413 = vmatpush3.bf16.msra.mxu0 %v17802_v46  ;;  %14400 = vmatprep.mubr.msk.bf16.mxu0 %vm380_vm1, %v3449_v51  ;;  %v3716_v44 = vshrl.u32 %v17906_v4, 16  ;;  %v3420_v55 = vld [vmem:[#allocation2 + $0x40] sm:$0x1f] }
 0x216   : > { %v2973_v13 = vrot.slane %v2952_v50, 4  ;;  %v2030_v47 = vmax.f32 %v2010_v8, 0.0  ;;  %v2013_v60 = vadd.f32 %v17733_v18, %v13843_v24  ;;  %14414 = vmatprep.subr.bf16.mxu0 %v15984_v57  ;;  %v3719_v15 = vshll.u32 %v17906_v4, 16  ;;  %v17983_v54 = vld [vmem:[%s20491_s4 + $0x80] sm:$0xff]  }
 0x217   : > { %v2323_v43 = vrot.slane %v2302_v23, 4  ;;  %v2681_v62 = vmax.f32 %v2663_v28, 0.0  ;;  %v3462_v46 = vrot.slane %v3258_v39, 4  ;;  %v3463_v5 = vrot.slane %v3261_v10, 5 }
 0x218   : > { %v2974_v61 = vsel %vm1011_vm3, %v2971_v40, %v2973_v13  ;;  %v2031_v18 = vmax.f32 %v2013_v60, 0.0  ;;  %v4107_v36 = vrot.slane %v3662_v59, 4  ;;  %v4108_v19 = vrot.slane %v3665_v0, 5 }
 0x219   : > { %v2324_v51 = vsel %vm1011_vm3, %v2321_v52, %v2323_v43  ;;  %2992 = vst.msk [vmem:[#allocation2 + $0xf8] sm:$0xff] %vm380_vm1, %v2974_v61  ;;  %v2689_v40 = vpack.c.bf16 %v2681_v62, %v2680_v26  ;;  %v3453_v39 = vsel %vm3429_vm5, %v17863_v17, %v17894_v22  ;;  %14415 = vmatpush3.bf16.msra.mxu0 %v15984_v57  ;;  %v4111_v27 = vrot.slane %v3671_v53, 4 }
 0x21a   : > { %2342 = vst.msk [vmem:[#allocation2 + $0xb8] sm:$0xff] %vm380_vm1, %v2324_v51  ;;  %v4112_v10 = vrot.slane %v3674_v37, 5  ;;  %v2039_v52 = vpack.c.bf16 %v2031_v18, %v2030_v47  ;;  %14416 = vmatprep.subr.bf16.mxu0 %v15985_v1  ;;  %v17946_v3 = vor.u32 %v4108_v19, %v4107_v36  ;;  %v4131_v38 = vrot.slane %v3716_v44, 4  ;;  %v18013_v18 = vld [vmem:[#allocation2 + $0x28] sm:$0xff]  ;;  %v18016_v36 = vld [vmem:[#allocation2 + $0x30] sm:$0xff]  ;;  %v18018_v19 = vld [vmem:[#allocation2 + $0x38] sm:$0xff] }
 0x21b   : > { %v4132_v17 = vrot.slane %v3719_v15, 5  ;;  %v2953_v14 = vmul.bf16 %v17882_v29, %v2689_v40  ;;  %v3458_v7 = vrot.slane %v3249_v16, 4  ;;  %v3459_v2 = vrot.slane %v3252_v42, 5 }
 0x21c   : > { %v17957_v34 = vor.u32 %v4112_v10, %v4111_v27  ;;  %v2303_v33 = vmul.bf16 %v17562_v63, %v2039_v52  ;;  %14401 = vmatmul.mubr.msk.bf16.gmra.mrb[68].mxu0 %vm380_vm1, %v3453_v39  ;;  %v17964_v6 = vsel %vm3429_vm5, %v17894_v22, %v17899_v56  ;;  %v3464_v57 = vor.u32 %v3463_v5, %v3462_v46  ;;  %v18023_v27 = vld [vmem:[#allocation2 + $0x48] sm:$0xff] }
 0x21d   : > { %v17966_v29 = vor.u32 %v4132_v17, %v4131_v38  ;;  %v2975_v50 = vrot.slane %v2953_v14, 4  ;;  %14404 = vmatprep.mubr.msk.bf16.mxu0 %vm380_vm1, %v17964_v6  ;;  %14417 = vmatpush3.bf16.msra.mxu0 %v15985_v1  ;;  %v3467_v42 = vshrl.u32 %v3420_v55, 16  ;;  %v3470_v49 = vshll.u32 %v3420_v55, 16 }
 0x21e   : > { %v17973_v31 = vsel %vm3429_vm5, %v17946_v3, %v17957_v34  ;;  %v17978_v63 = vsel %vm3429_vm5, %v17957_v34, %v17894_v22  ;;  %v2325_v16 = vrot.slane %v2303_v33, 4  ;;  %14418 = vmatprep.subr.bf16.mxu0 %v15986_v32  ;;  %v3460_v22 = vor.u32 %v3459_v2, %v3458_v7 }
 0x21f   : > { %v17987_v23 = vsel %vm3429_vm5, %v3464_v57, %v17966_v29  ;;  %v2976_v8 = vsel %vm1011_vm3, %v2973_v13, %v2975_v50  ;;  %2994 = vst.msk [vmem:[#allocation2 + $0x108] sm:$0xf] %vm382_vm2, %v2975_v50  ;;  %v3654_v26 = vshrl.u32 %v3636_v21, 16  ;;  %v3657_v28 = vshll.u32 %v3636_v21, 16 }
 0x220   : > { %v2326_v24 = vsel %vm1011_vm3, %v2323_v43, %v2325_v16  ;;  %2344 = vst.msk [vmem:[#allocation2 + $0xc8] sm:$0xf] %vm382_vm2, %v2325_v16  ;;  %v3469_v47 = vrot.slane %v3467_v42, 4  ;;  %v3472_v60 = vrot.slane %v3470_v49, 5  ;;  %v17998_v13 = vsel %vm3429_vm5, %v17899_v56, %v3460_v22  ;;  %v18011_v56 = vld [vmem:[#allocation2 + $0x20] sm:$0xff] }
 0x221   : > { %2993 = vst.msk [vmem:[#allocation2 + $0x100] sm:$0xff] %vm380_vm1, %v2976_v8  ;;  %2343 = vst.msk [vmem:[#allocation2 + $0xc0] sm:$0xff] %vm380_vm1, %v2326_v24  ;;  %14419 = vmatpush3.bf16.msra.mxu0 %v15986_v32  ;;  %v3664_v43 = vrot.slane %v3662_v59, 3  ;;  %v3667_v1 = vrot.slane %v3665_v0, 4  ;;  %v18007_v61 = vsel %vm3429_vm5, %v3460_v22, %v3464_v57  ;;  %v3656_v62 = vrot.slane %v3654_v26, 3 }
 0x222   : > { %14436 = vmatprep.subr.bf16.mxu0 %v17983_v54  ;;  %v3659_v46 = vrot.slane %v3657_v28, 4  ;;  %v3473_v5 = vor.u32 %v3472_v60, %v3469_v47  ;;  %v4340_v0 = vshrl.u32 %v18011_v56, 16  ;;  %v3673_v39 = vrot.slane %v3671_v53, 3  ;;  %v15988_v28 = vld [vmem:[%s20491_s4 + $0x88] sm:$0xff]  }
 0x223   : > { %v3668_v51 = vor.u32 %v3667_v1, %v3664_v43  ;;  %v3676_v52 = vrot.slane %v3674_v37, 4  ;;  %v4343_v32 = vshll.u32 %v18011_v56, 16  ;;  %v4349_v38 = vshrl.u32 %v18013_v18, 16 }
 0x224   : > { %14405 = vmatmul.mubr.msk.bf16.gmra.mrb[72].mxu0 %vm380_vm1, %v17998_v13  ;;  %v3660_v59 = vor.u32 %v3659_v46, %v3656_v62  ;;  %v3474_v40 = vsel %vm3429_vm5, %v3464_v57, %v3473_v5  ;;  %v4352_v17 = vshll.u32 %v18013_v18, 16  ;;  %v4358_v14 = vshrl.u32 %v18016_v36, 16 }
 0x225   : > { %14408 = vmatprep.mubr.msk.bf16.mxu0 %vm380_vm1, %v18007_v61  ;;  %v20523_v7 = vshll.u32 %v18016_v36, 16  ;;  %v20520_v53 = vshrl.u32 %v18018_v19, 16  ;;  %v20519_v2 = vshll.u32 %v18018_v19, 16  ;;  %v20517_v37 = vshrl.u32 %v18023_v27, 16 }
 0x226   : > { %v3669_v10 = vsel %vm3194_vm4, %v3660_v59, %v3668_v51  ;;  %v4780_v55 = vrot.slane %v4340_v0, 4  ;;  %v20515_v33 = vshll.u32 %v18023_v27, 16  ;;  %v18041_v57 = vor.u32 %v3676_v52, %v3673_v39 }
 0x227   : > { %v4781_v50 = vrot.slane %v4343_v32, 5  ;;  %v4784_v16 = vrot.slane %v4349_v38, 4  ;;  %v4785_v42 = vrot.slane %v4352_v17, 5  ;;  %v4788_v49 = vrot.slane %v4358_v14, 4 }
 0x228   : > { %v4789_v21 = vrot.slane %v20523_v7, 5  ;;  %v4792_v8 = vrot.slane %v20520_v53, 4  ;;  %v4793_v24 = vrot.slane %v20519_v2, 5  ;;  %v4800_v26 = vrot.slane %v20517_v37, 4  ;;  %v16012_v2 = vld [vmem:[#allocation9 + $0x14] ss:$8 sps:$4 sm:$0xff]  }
 0x229   : > { %v4782_v22 = vor.u32 %v4781_v50, %v4780_v55  ;;  %v4786_v47 = vor.u32 %v4785_v42, %v4784_v16  ;;  %v4801_v43 = vrot.slane %v20515_v33, 5  ;;  %v3678_v1 = vsel %vm3194_vm4, %v3668_v51, %v18041_v57  ;;  %v18108_v16 = vld [vmem:[#allocation2 + $0x48] sm:$0xf]  ;;  %v15991_v42 = vld [vmem:[%s20491_s4 + $0xa0] sm:$0xff]  }
 0x22a   : > { %v4790_v60 = vor.u32 %v4789_v21, %v4788_v49  ;;  %v4794_v46 = vor.u32 %v4793_v24, %v4792_v8  ;;  %v3687_v5 = vsel %vm3194_vm4, %v18041_v57, %v17736_v35  ;;  %v15989_v35 = vld [vmem:[%s20491_s4 + $0x90] sm:$0xff]   ;;  %v3718_v55 = vrot.slane %v3716_v44, 3 }
 0x22b   : > { %v18068_v62 = vsel %vm3429_vm5, %v17957_v34, %v4782_v22  ;;  %v18075_v59 = vsel %vm3429_vm5, %v4782_v22, %v4786_v47  ;;  %v18080_v39 = vor.u32 %v4801_v43, %v4800_v26  ;;  %v3721_v50 = vrot.slane %v3719_v15, 4  ;;  %v3894_v22 = vld [vmem:[#allocation2 + $0x8] sm:$0xf0] }
 0x22c   : > { %14409 = vmatmul.mubr.msk.bf16.gmra.mrb[76].mxu0 %vm380_vm1, %v3474_v40  ;;  %v18078_v40 = vsel %vm3429_vm5, %v4786_v47, %v4790_v60  ;;  %v18085_v51 = vsel %vm3429_vm5, %v4790_v60, %v4794_v46  ;;  %v3725_v49 = vshrl.u32 %v18108_v16, 16  ;;  %v3913_v24 = vrot.slane %v17885_v30, 4  ;;  %v18130_v60 = vld [vmem:[#allocation2 + $0x78] sm:$0xff] }
 0x22d   : > { %14420 = vmatprep.mubr.msk.bf16.mxu0 %vm380_vm1, %v3669_v10  ;;  %v18089_v10 = vsel %vm3429_vm5, %v4794_v46, %v17966_v29  ;;  %v18097_v52 = vsel %vm3429_vm5, %v17966_v29, %v18080_v39  ;;  %v18117_v21 = vor.u32 %v3721_v50, %v3718_v55  ;;  %v3912_v26 = vrot.slane %v3894_v22, 4 }
 0x22e   : > { %v3727_v44 = vrot.slane %v3725_v49, 3  ;;  %v20512_v43 = vshrl.u32 %v18130_v60, 16  ;;  %v20511_v30 = vshll.u32 %v18130_v60, 16 }
 0x22f   : > { %v3914_v47 = vsel %vm1011_vm3, %v3912_v26, %v3913_v24 }
 0x230   : > { %v5904_v50 = vrot.slane %v20511_v30, 5 }
 0x234   : > { %14421 = vmatmul.mubr.msk.bf16.vlgmr.msra.gmra.mrb[64].mxu0 %vm380_vm1, %v3678_v1  ;;  %v16164_v1 = vld [vmem:[#allocation2 + $0x20] sm:$0xff] }
 0x235   : > { %14437 = vmatpush3.bf16.msra.mxu0 %v17983_v54  ;;  %14424 = vmatprep.mubr.msk.bf16.mxu0 %vm380_vm1, %v3687_v5  ;;  %v15990_v54 = vld [vmem:[%s20491_s4 + $0x98] sm:$0xff]   ;;  %v3917_v46 = vrot.slane %v16164_v1, 4  ;;  %v4103_v1 = vshll.u32 %v3894_v22, 16 }
 0x236   : > { %14438 = vmatprep.subr.bf16.mxu0 %v15988_v28 }
 0x237   : > { %v3920_v26 = vsel %vm1011_vm3, %v3917_v46, %v17560_v45 }
 0x239   : > { %14439 = vmatpush3.bf16.msra.mxu0 %v15988_v28 }
 0x23a   : > { %14440 = vmatprep.subr.bf16.mxu0 %v15989_v35 }
 0x23c   : > { %14425 = vmatmul.mubr.msk.bf16.gmra.mrb[68].mxu0 %vm380_vm1, %v17778_v12  ;;  %v3728_v12 = vshll.u32 %v18108_v16, 16 }
 0x23d   : > { %14428 = vmatprep.mubr.msk.bf16.mxu0 %vm380_vm1, %v17824_v20  ;;  %14441 = vmatpush3.bf16.msra.mxu0 %v15989_v35  ;;  %v3723_v20 = vsel %vm3194_vm4, %v17813_v41, %v18117_v21  ;;  %v18136_v41 = vrot.slane %v17896_v9, 4  ;;  %v5903_v9 = vrot.slane %v20512_v43, 4 }
 0x23e   : > { %14442 = vmatprep.subr.bf16.mxu0 %v15990_v54  ;;  %v3730_v15 = vrot.slane %v3728_v12, 4 }
 0x23f   : > { %v3916_v55 = vsel %vm1011_vm3, %v3913_v24, %v18136_v41  ;;  %v3918_v49 = vsel %vm1011_vm3, %v18136_v41, %v3917_v46  ;;  %v15994_v24 = vld [vmem:[%s20491_s4 + $0xb8] sm:$0xff]   ;;  %v4105_v46 = vrot.slane %v4103_v1, 5 }
 0x240   : > { %v3731_v8 = vor.u32 %v3730_v15, %v3727_v44  ;;  %v15993_v15 = vld [vmem:[%s20491_s4 + $0xb0] sm:$0xff]  }
 0x241   : > { %14443 = vmatpush3.bf16.msra.mxu0 %v15990_v54  ;;  %v15992_v54 = vld [vmem:[%s20491_s4 + $0xa8] sm:$0xff]  }
 0x242   : > { %14460 = vmatprep.subr.bf16.mxu0 %v15991_v42  ;;  %v3732_v28 = vsel %vm3194_vm4, %v18117_v21, %v3731_v8 }
 0x244   : > { %14429 = vmatmul.mubr.msk.bf16.gmra.mrb[72].mxu0 %vm380_vm1, %v17835_v25  ;;  %v18133_v25 = vld [vmem:[#allocation2 + $0x80] sm:$0xff] }
 0x245   : > { %14432 = vmatprep.mubr.msk.bf16.mxu0 %vm380_vm1, %v3723_v20  ;;  %v20510_v5 = vshrl.u32 %v18133_v25, 16  ;;  %v20509_v35 = vshll.u32 %v18133_v25, 16  ;;  %v18162_v20 = vor.u32 %v5904_v50, %v5903_v9 }
 0x247   : > { %v6572_v12 = vrot.slane %v20510_v5, 4  ;;  %v6573_v44 = vrot.slane %v20509_v35, 5  ;;  %v18217_v35 = vld [vmem:[#allocation2 + $0x88] sm:$0xff] }
 0x248   : > { %v20525_v33 = vshrl.u32 %v18217_v35, 16 }
 0x249   : > { %v18164_v8 = vor.u32 %v6573_v44, %v6572_v12 }
 0x24c   : > { %14433 = vmatmul.mubr.msk.bf16.gmra.mrb[76].mxu0 %vm380_vm1, %v3732_v28  ;;  %v18182_v28 = vld [vmem:[%s20491_s4 + $0xc0] sm:$0xff]  }
 0x24d   : > { %14444 = vmatprep.mubr.msk.bf16.mxu0 %vm380_vm1, %v3914_v47  ;;  %v4100_v47 = vshrl.u32 %v3894_v22, 16  ;;  %v18197_v22 = vld [vmem:[#allocation2 + $0x68] sm:$0xff] }
 0x24f   : > { %v4102_v45 = vrot.slane %v4100_v47, 4 }
 0x254   : > { %14445 = vmatmul.mubr.msk.bf16.vlgmr.msra.gmra.mrb[64].mxu0 %vm380_vm1, %v3916_v55  ;;  %v18188_v55 = vld [vmem:[#allocation2 + $0x58] sm:$0xff] }
 0x255   : > { %14461 = vmatpush3.bf16.msra.mxu0 %v15991_v42  ;;  %14448 = vmatprep.mubr.msk.bf16.mxu0 %vm380_vm1, %v3918_v49  ;;  %v18169_v42 = vsel %vm3429_vm5, %v18162_v20, %v18164_v8  ;;  %v20513_v50 = vshrl.u32 %v18188_v55, 16  ;;  %v20514_v49 = vshll.u32 %v18188_v55, 16 }
 0x256   : > { %14462 = vmatprep.subr.bf16.mxu0 %v15992_v54 }
 0x259   : > { %14463 = vmatpush3.bf16.msra.mxu0 %v15992_v54  ;;  %v18185_v54 = vrot.slane %v17906_v4, 4  ;;  %v3927_v4 = vrot.slane %v18108_v16, 4 }
 0x25a   : > { %14464 = vmatprep.subr.bf16.mxu0 %v15993_v15 }
 0x25b   : > { %v3926_v9 = vsel %vm1011_vm3, %v17634_v11, %v18185_v54  ;;  %v20522_v11 = vshll.u32 %v18197_v22, 16  ;;  %v3928_v16 = vsel %vm1011_vm3, %v18185_v54, %v3927_v4 }
 0x25c   : > { %14449 = vmatmul.mubr.msk.bf16.gmra.mrb[68].mxu0 %vm380_vm1, %v3920_v26  ;;  %v18209_v26 = vld [vmem:[#allocation2 + $0x78] sm:$0xff] }
 0x25d   : > { %14452 = vmatprep.mubr.msk.bf16.mxu0 %vm380_vm1, %v17606_v58  ;;  %14465 = vmatpush3.bf16.msra.mxu0 %v15993_v15  ;;  %v18190_v58 = vld [vmem:[#allocation2 + $0x60] sm:$0xff]  ;;  %v18205_v15 = vld [vmem:[#allocation2 + $0x70] sm:$0xff]  ;;  %v7226_v43 = vrot.slane %v20522_v11, 5 }
 0x25e   : > { %14466 = vmatprep.subr.bf16.mxu0 %v15994_v24  ;;  %v20516_v12 = vshrl.u32 %v18190_v58, 16  ;;  %v20518_v44 = vshll.u32 %v18190_v58, 16  ;;  %v20533_v1 = vshrl.u32 %v18205_v15, 16 }
 0x260   : > { %v7221_v5 = vrot.slane %v20516_v12, 4  ;;  %v7222_v4 = vrot.slane %v20518_v44, 5  ;;  %v20526_v12 = vshll.u32 %v18217_v35, 16  ;;  %v7229_v7 = vrot.slane %v20533_v1, 4 }
 0x261   : > { %14467 = vmatpush3.bf16.msra.mxu0 %v15994_v24  ;;  %v20521_v24 = vshrl.u32 %v18197_v22, 16 }
 0x262   : > { %14484 = vmatprep.subr.bf16.mxu0 %v18182_v28  ;;  %v7223_v44 = vor.u32 %v7222_v4, %v7221_v5  ;;  %v16013_v4 = vld [vmem:[#allocation9 + $0x20] ss:$8 sps:$4 sm:$0xff]  }
 0x263   : > { %v7225_v30 = vrot.slane %v20521_v24, 4 }
 0x264   : > { %14453 = vmatmul.mubr.msk.bf16.gmra.mrb[72].mxu0 %vm380_vm1, %v17644_v48  ;;  %v4106_v48 = vor.u32 %v4105_v46, %v4102_v45  ;;  %v7217_v45 = vrot.slane %v20513_v50, 4  ;;  %v7218_v46 = vrot.slane %v20514_v49, 5  ;;  %v16007_v50 = vld [vmem:[#allocation9] ss:$8 sps:$4 sm:$0xff]   ;;  %v16009_v49 = vld [vmem:[#allocation9 + $0x4] ss:$8 sps:$4 sm:$0xff]  }
 0x265   : > { %14456 = vmatprep.mubr.msk.bf16.mxu0 %vm380_vm1, %v3926_v9  ;;  %v20532_v9 = vshll.u32 %v18205_v15, 16  ;;  %v7227_v53 = vor.u32 %v7226_v43, %v7225_v30  ;;  %5151 = vmatprep.subr.bf16.mxu1 %v16009_v49  ;;  %v7242_v49 = vrot.slane %v20526_v12, 5 }
 0x266   : > { %v4110_v47 = vsel %vm3429_vm5, %v4106_v48, %v17946_v3  ;;  %v20524_v3 = vshrl.u32 %v18209_v26, 16  ;;  %v20531_v48 = vshll.u32 %v18209_v26, 16  ;;  %v18236_v37 = vor.u32 %v7218_v46, %v7217_v45  ;;  %5152 = vmatpush1.bf16.msra.mxu1 %v16007_v50  ;;  %v15996_v45 = vld [vmem:[%s20491_s4 + $0xc8] sm:$0xff]  }
 0x267   : > { %v18244_v11 = vsel %vm3429_vm5, %v7223_v44, %v7227_v53  ;;  %v7230_v5 = vrot.slane %v20532_v9, 5  ;;  %5153 = vmatprep.subr.bf16.mxu1 %v16012_v2  ;;  %v7241_v50 = vrot.slane %v20525_v33, 4  ;;  %v16018_v33 = vld [vmem:[#allocation9 + $0x34] ss:$8 sps:$4 sm:$0xff]  }
 0x268   : > { %v18241_v24 = vsel %vm3429_vm5, %v18236_v37, %v7223_v44  ;;  %v7233_v43 = vrot.slane %v20524_v3, 4  ;;  %v7234_v30 = vrot.slane %v20531_v48, 5  ;;  %v18407_v48 = vld [vmem:[#allocation2 + $0x10] sm:$0xf0] }
 0x269   : > { %v7231_v44 = vor.u32 %v7230_v5, %v7229_v7  ;;  %v18261_v2 = vor.u32 %v7242_v49, %v7241_v50  ;;  %v15998_v5 = vld [vmem:[%s20491_s4 + $0xd8] sm:$0xff]  }
 0x26a   : > { %v7235_v46 = vor.u32 %v7234_v30, %v7233_v43  ;;  %v4305_v43 = vld [vmem:[#allocation2 + $0x10] sm:$0xf8] }
 0x26b   : > { %v18264_v3 = vsel %vm3429_vm5, %v7227_v53, %v7231_v44  ;;  %v16016_v53 = vld [vmem:[#allocation9 + $0x30] ss:$8 sps:$4 sm:$0xff]   ;;  %v4323_v30 = vshrl.u32 %v4305_v43, 16  ;;  %v4326_v50 = vshll.u32 %v4305_v43, 16 }
 0x26c   : > { %14457 = vmatmul.mubr.msk.bf16.gmra.mrb[76].mxu0 %vm380_vm1, %v3928_v16  ;;  %v16010_v16 = vld [vmem:[#allocation9 + $0x10] ss:$8 sps:$4 sm:$0xff]   ;;  %v18269_v12 = vsel %vm3429_vm5, %v7231_v44, %v7235_v46  ;;  %v18273_v7 = vsel %vm3429_vm5, %v7235_v46, %v18164_v8 }
 0x26d   : > { %14468 = vmatprep.mubr.msk.bf16.mxu0 %vm380_vm1, %v4110_v47  ;;  %v16015_v47 = vld [vmem:[#allocation9 + $0x24] ss:$8 sps:$4 sm:$0xff]   ;;  %5154 = vmatpush1.bf16.msra.mxu1 %v16010_v16  ;;  %v18278_v16 = vsel %vm3429_vm5, %v18164_v8, %v18261_v2 }
 0x26e   : > { %5155 = vmatprep.subr.bf16.mxu1 %v16015_v47 }
 0x271   : > { %5156 = vmatpush1.bf16.msra.mxu1 %v16013_v4  ;;  %v18300_v4 = vld [vmem:[#allocation2 + $0xb8] sm:$0xff] }
 0x272   : > { %5157 = vmatprep.subr.bf16.mxu1 %v16018_v33  ;;  %20631 = vst [vmem:[#allocation18_spill] sm:$0xff] %v18300_v4 }
 0x274   : > { %14469 = vmatmul.mubr.msk.bf16.vlgmr.msra.gmra.mrb[64].mxu0 %vm380_vm1, %v17973_v31  ;;  %v15997_v31 = vld [vmem:[%s20491_s4 + $0xd0] sm:$0xff]  }
 0x275   : > { %14485 = vmatpush3.bf16.msra.mxu0 %v18182_v28  ;;  %14472 = vmatprep.mubr.msk.bf16.mxu0 %vm380_vm1, %v17978_v63  ;;  %v4090_v28 = vld [vmem:[#allocation2 + $0x48] sm:$0x1f]  ;;  %v15999_v63 = vld [vmem:[%s20491_s4 + $0xe0] sm:$0xff]  }
 0x276   : > { %14486 = vmatprep.subr.bf16.mxu0 %v15996_v45  ;;  %5158 = vmatpush1.bf16.msra.mxu1 %v16016_v53  ;;  %v4136_v33 = vshrl.u32 %v4090_v28, 16  ;;  %v4139_v47 = vshll.u32 %v4090_v28, 16  ;;  %v4342_v53 = vrot.slane %v4340_v0, 3  ;;  %v4354_v28 = vrot.slane %v4352_v17, 4 }
 0x277   : > { %v20529_v0 = vshll.u32 %v18300_v4, 16 }
 0x278   : > { %v4138_v49 = vrot.slane %v4136_v33, 4  ;;  %v4141_v44 = vrot.slane %v4139_v47, 5  ;;  %v18315_v33 = vld [vmem:[#allocation2 + $0xc0] sm:$0xff] }
 0x279   : > { %14487 = vmatpush3.bf16.msra.mxu0 %v15996_v45  ;;  %20632 = vst [vmem:[#allocation17_spill] sm:$0xff] %v18315_v33  ;;  %v20528_v47 = vshrl.u32 %v18315_v33, 16  ;;  %v20527_v43 = vshll.u32 %v18315_v33, 16  ;;  %v8328_v17 = vrot.slane %v20529_v0, 5 }
 0x27a   : > { %14488 = vmatprep.subr.bf16.mxu0 %v15997_v31  ;;  %v4142_v45 = vor.u32 %v4141_v44, %v4138_v49  ;;  %v4360_v49 = vrot.slane %v4358_v14, 3  ;;  %v20635_v14 = vshll.u32 %v18018_v19, 16 }
 0x27c   : > { %14473 = vmatmul.mubr.msk.bf16.gmra.mrb[68].mxu0 %vm380_vm1, %v17964_v6  ;;  %v4325_v6 = vrot.slane %v4323_v30, 3 }
 0x27d   : > { %14476 = vmatprep.mubr.msk.bf16.mxu0 %vm380_vm1, %v17998_v13  ;;  %14489 = vmatpush3.bf16.msra.mxu0 %v15997_v31  ;;  %v4328_v13 = vrot.slane %v4326_v50, 4  ;;  %v4143_v31 = vsel %vm3429_vm5, %v17966_v29, %v4142_v45  ;;  %v20530_v29 = vshrl.u32 %v18300_v4, 16  ;;  %v16000_v50 = vld [vmem:[%s20491_s4 + $0xe8] sm:$0xff]   ;;  %v8996_v45 = vrot.slane %v20528_v47, 4 }
 0x27e   : > { %14490 = vmatprep.subr.bf16.mxu0 %v15998_v5  ;;  %v18402_v47 = vld [vmem:[#allocation2 + $0xc8] sm:$0xff] }
 0x27f   : > { %v4329_v46 = vor.u32 %v4328_v13, %v4325_v6  ;;  %v20633_v6 = vshll.u32 %v18016_v36, 16 }
 0x281   : > { %14491 = vmatpush3.bf16.msra.mxu0 %v15998_v5  ;;  %v4345_v5 = vrot.slane %v4343_v32, 4  ;;  %v4363_v13 = vrot.slane %v20633_v6, 4 }
 0x282   : > { %14508 = vmatprep.subr.bf16.mxu0 %v15999_v63 }
 0x283   : > { %v4346_v32 = vor.u32 %v4345_v5, %v4342_v53  ;;  %v20634_v53 = vshrl.u32 %v18018_v19, 16 }
 0x284   : > { %14477 = vmatmul.mubr.msk.bf16.gmra.mrb[72].mxu0 %vm380_vm1, %v18007_v61  ;;  %v4351_v61 = vrot.slane %v4349_v38, 3  ;;  %v8327_v38 = vrot.slane %v20530_v29, 4 }
 0x285   : > { %14480 = vmatprep.mubr.msk.bf16.mxu0 %vm380_vm1, %v17987_v23  ;;  %v4338_v23 = vsel %vm3194_vm4, %v4329_v46, %v18041_v57  ;;  %v4347_v44 = vsel %vm3194_vm4, %v18041_v57, %v4346_v32  ;;  %v8997_v46 = vrot.slane %v20527_v43, 5  ;;  %v4369_v5 = vrot.slane %v20634_v53, 3  ;;  %v18378_v53 = vld [vmem:[#allocation2 + $0x98] sm:$0xff] }
 0x286   : > { %v4355_v30 = vor.u32 %v4354_v28, %v4351_v61  ;;  %v18346_v57 = vor.u32 %v8328_v17, %v8327_v38  ;;  %v16001_v28 = vld [vmem:[%s20491_s4 + $0xf0] sm:$0xff]   ;;  %v20638_v17 = vshrl.u32 %v18023_v27, 16  ;;  %20640 = vst [vmem:[#allocation22_spill] sm:$0xff] %v18378_v53  ;;  %v4581_v43 = vrot.slane %v18407_v48, 4 }
 0x287   : > { %v18348_v61 = vor.u32 %v8997_v46, %v8996_v45  ;;  %v20639_v46 = vshll.u32 %v18023_v27, 16 }
 0x288   : > { %20636 = vst [vmem:[#allocation20_spill] sm:$0xff] %v18346_v57  ;;  %v4387_v45 = vrot.slane %v20638_v17, 3 }
 0x28c   : > { %14481 = vmatmul.mubr.msk.bf16.gmra.mrb[76].mxu0 %vm380_vm1, %v4143_v31  ;;  %v4356_v31 = vsel %vm3194_vm4, %v4346_v32, %v4355_v30  ;;  %v18356_v32 = vsel %vm3429_vm5, %v18346_v57, %v18348_v61 }
 0x28d   : > { %14492 = vmatprep.mubr.msk.bf16.mxu0 %vm380_vm1, %v4338_v23  ;;  %v4372_v23 = vrot.slane %v20635_v14, 4  ;;  %20637 = vst [vmem:[#allocation21_spill] sm:$0xff] %v18356_v32 }
 0x28f   : > { %v4373_v6 = vor.u32 %v4372_v23, %v4369_v5  ;;  %v18382_v23 = vld [vmem:[#allocation2 + $0xa0] sm:$0xff] }
 0x290   : > { %20641 = vst [vmem:[#allocation23_spill] sm:$0xff] %v18382_v23  ;;  %v20643_v29 = vshll.u32 %v18382_v23, 16 }
 0x294   : > { %14493 = vmatmul.mubr.msk.bf16.vlgmr.msra.gmra.mrb[64].mxu0 %vm380_vm1, %v4347_v44  ;;  %v4364_v44 = vor.u32 %v4363_v13, %v4360_v49  ;;  %v4390_v49 = vrot.slane %v20639_v46, 4  ;;  %v18395_v46 = vld [vmem:[#allocation2 + $0xb8] sm:$0xff] }
 0x295   : > { %14509 = vmatpush3.bf16.msra.mxu0 %v15999_v63  ;;  %14496 = vmatprep.mubr.msk.bf16.mxu0 %vm380_vm1, %v4356_v31  ;;  %v16002_v63 = vld [vmem:[%s20491_s4 + $0xf8] sm:$0xff]  }
 0x296   : > { %14510 = vmatprep.subr.bf16.mxu0 %v16000_v50  ;;  %v4365_v38 = vsel %vm3194_vm4, %v4355_v30, %v4364_v44  ;;  %v4374_v13 = vsel %vm3194_vm4, %v4364_v44, %v4373_v6  ;;  %v18374_v30 = vld [vmem:[%s20491_s4 + $0x100] sm:$0xff]   ;;  %v18376_v31 = vor.u32 %v4390_v49, %v4387_v45  ;;  %v18387_v44 = vld [vmem:[#allocation2 + $0xb0] sm:$0xff]  ;;  %v20534_v45 = vshrl.u32 %v18378_v53, 16 }
 0x297   : > { %v20540_v49 = vshrl.u32 %v18382_v23, 16 }
 0x298   : > { %v4392_v17 = vsel %vm3194_vm4, %v18117_v21, %v18376_v31 }
 0x299   : > { %14511 = vmatpush3.bf16.msra.mxu0 %v16000_v50  ;;  %v18369_v50 = vld [vmem:[#allocation2 + $0x50] sm:$0xf] }
 0x29a   : > { %14512 = vmatprep.subr.bf16.mxu0 %v16001_v28  ;;  %v4394_v5 = vshrl.u32 %v18369_v50, 16  ;;  %v4397_v14 = vshll.u32 %v18369_v50, 16 }
 0x29c   : > { %14497 = vmatmul.mubr.msk.bf16.gmra.mrb[68].mxu0 %vm380_vm1, %v4365_v38  ;;  %v4383_v38 = vsel %vm3194_vm4, %v4373_v6, %v18117_v21  ;;  %v4396_v6 = vrot.slane %v4394_v5, 3  ;;  %v4399_v21 = vrot.slane %v4397_v14, 4  ;;  %v9641_v5 = vrot.slane %v20534_v45, 4 }
 0x29d   : > { %14500 = vmatprep.mubr.msk.bf16.mxu0 %vm380_vm1, %v4374_v13  ;;  %14513 = vmatpush3.bf16.msra.mxu0 %v16001_v28  ;;  %v18384_v28 = vld [vmem:[#allocation2 + $0xa8] sm:$0xff]  ;;  %v20646_v45 = vshrl.u32 %v18387_v44, 16 }
 0x29e   : > { %14514 = vmatprep.subr.bf16.mxu0 %v16002_v63  ;;  %20642 = vst [vmem:[#allocation24_spill] sm:$0xff] %v18384_v28  ;;  %v20644_v9 = vshrl.u32 %v18384_v28, 16  ;;  %v4400_v1 = vor.u32 %v4399_v21, %v4396_v6  ;;  %v20645_v13 = vshll.u32 %v18384_v28, 16  ;;  %v20649_v21 = vshll.u32 %v18395_v46, 16 }
 0x29f   : > { %v9653_v33 = vrot.slane %v20646_v45, 4  ;;  %v4583_v45 = vsel %vm1011_vm3, %v4581_v43, %v18136_v41  ;;  %v4584_v43 = vrot.slane %v18011_v56, 4 }
 0x2a0   : > { %v9649_v0 = vrot.slane %v20644_v9, 4  ;;  %v9650_v32 = vrot.slane %v20645_v13, 5  ;;  %v4401_v9 = vsel %vm3194_vm4, %v18376_v31, %v4400_v1  ;;  %v9658_v28 = vrot.slane %v20649_v21, 5 }
 0x2a1   : > { %14515 = vmatpush3.bf16.msra.mxu0 %v16002_v63  ;;  %v20539_v63 = vshll.u32 %v18378_v53, 16  ;;  %v20650_v13 = vshrl.u32 %v18402_v47, 16  ;;  %v4585_v56 = vsel %vm1011_vm3, %v18136_v41, %v4584_v43  ;;  %v16006_v41 = vld [vmem:[%s20491_s4 + $0x118] sm:$0xff]   ;;  %v4772_v21 = vshll.u32 %v18407_v48, 16 }
 0x2a2   : > { %14532 = vmatprep.subr.bf16.mxu0 %v18374_v30  ;;  %v9651_v6 = vor.u32 %v9650_v32, %v9649_v0 }
 0x2a3   : > { %v9642_v14 = vrot.slane %v20539_v63, 5  ;;  %v9665_v4 = vrot.slane %v20650_v13, 4 }
 0x2a4   : > { %14501 = vmatmul.mubr.msk.bf16.gmra.mrb[72].mxu0 %vm380_vm1, %v4383_v38  ;;  %v9646_v38 = vrot.slane %v20643_v29, 5  ;;  %v20648_v29 = vshrl.u32 %v18395_v46, 16 }
 0x2a5   : > { %14504 = vmatprep.mubr.msk.bf16.mxu0 %vm380_vm1, %v4392_v17  ;;  %v9645_v17 = vrot.slane %v20540_v49, 4  ;;  %v18429_v53 = vor.u32 %v9642_v14, %v9641_v5  ;;  %v20647_v49 = vshll.u32 %v18387_v44, 16  ;;  %v20651_v5 = vshll.u32 %v18402_v47, 16 }
 0x2a6   : > { %v9657_v23 = vrot.slane %v20648_v29, 4 }
 0x2a7   : > { %v9647_v63 = vor.u32 %v9646_v38, %v9645_v17  ;;  %v9654_v57 = vrot.slane %v20647_v49, 5  ;;  %v9666_v1 = vrot.slane %v20651_v5, 5  ;;  %v4774_v5 = vrot.slane %v4772_v21, 5  ;;  %v18550_v21 = vld [vmem:[#allocation2 + $0xe8] sm:$0xff] }
 0x2a8   : > { %v9659_v32 = vor.u32 %v9658_v28, %v9657_v23  ;;  %20661 = vst [vmem:[#allocation34_spill] sm:$0xff] %v18550_v21 }
 0x2a9   : > { %v18446_v49 = vsel %vm3429_vm5, %v18429_v53, %v9647_v63  ;;  %v9655_v38 = vor.u32 %v9654_v57, %v9653_v33  ;;  %v18452_v0 = vsel %vm3429_vm5, %v9647_v63, %v9651_v6  ;;  %v18457_v17 = vor.u32 %v9666_v1, %v9665_v4  ;;  %v16004_v4 = vld [vmem:[%s20491_s4 + $0x108] sm:$0xff]   ;;  %v18508_v1 = vld [vmem:[#allocation2 + $0x100] sm:$0xff] }
 0x2aa   : > { %v18465_v33 = vsel %vm3429_vm5, %v9659_v32, %v18348_v61  ;;  %v4586_v57 = vrot.slane %v18013_v18, 4  ;;  %v16005_v18 = vld [vmem:[%s20491_s4 + $0x110] sm:$0xff]   ;;  %v4588_v63 = vrot.slane %v18016_v36, 4  ;;  %v18495_v36 = vrot.slane %v18023_v27, 4  ;;  %v18506_v27 = vld [vmem:[#allocation2 + $0xf8] sm:$0xff]  ;;  %20655 = vst [vmem:[#allocation28_spill] sm:$0xff] %v18508_v1 }
 0x2ab   : > { %v18455_v14 = vsel %vm3429_vm5, %v9651_v6, %v9655_v38  ;;  %20652 = vst [vmem:[#allocation25_spill] sm:$0xff] %v18457_v17  ;;  %v18461_v29 = vsel %vm3429_vm5, %v9655_v38, %v9659_v32  ;;  %v18471_v23 = vsel %vm3429_vm5, %v18348_v61, %v18457_v17  ;;  %20654 = vst [vmem:[#allocation27_spill] sm:$0xff] %v18506_v27  ;;  %v4596_v32 = vrot.slane %v18369_v50, 4 }
 0x2ac   : > { %14505 = vmatmul.mubr.msk.bf16.gmra.mrb[76].mxu0 %vm380_vm1, %v4401_v9  ;;  %20653 = vst [vmem:[#allocation26_spill] sm:$0xff] %v18471_v23  ;;  %v4587_v28 = vsel %vm1011_vm3, %v4584_v43, %v4586_v57  ;;  %v4590_v9 = vrot.slane %v18018_v19, 4  ;;  %v4589_v6 = vsel %vm1011_vm3, %v4586_v57, %v4588_v63  ;;  %v4769_v19 = vshrl.u32 %v18407_v48, 16 }
 0x2ad   : > { %14516 = vmatprep.mubr.msk.bf16.mxu0 %vm380_vm1, %v4583_v45  ;;  %v4595_v45 = vsel %vm1011_vm3, %v18185_v54, %v18495_v36  ;;  %v20552_v48 = vshrl.u32 %v18506_v27, 16  ;;  %v20551_v43 = vshll.u32 %v18506_v27, 16 }
 0x2ae   : > { %v4593_v13 = vsel %vm1011_vm3, %v4590_v9, %v18185_v54  ;;  %v4771_v38 = vrot.slane %v4769_v19, 4  ;;  %v20550_v54 = vshrl.u32 %v18508_v1, 16  ;;  %v18548_v19 = vld [vmem:[#allocation2 + $0xe0] sm:$0xff] }
 0x2af   : > { %v10751_v50 = vrot.slane %v20552_v48, 4  ;;  %20660 = vst [vmem:[#allocation33_spill] sm:$0xff] %v18548_v19 }
 0x2b0   : > { %v4775_v57 = vor.u32 %v4774_v5, %v4771_v38  ;;  %v18555_v38 = vld [vmem:[#allocation2 + $0xf8] sm:$0xff]  ;;  %v20556_v5 = vshll.u32 %v18548_v19, 16 }
 0x2b1   : > { %20663 = vst [vmem:[#allocation36_spill] sm:$0xff] %v18555_v38 }
 0x2b4   : > { %14517 = vmatmul.mubr.msk.bf16.vlgmr.msra.gmra.mrb[64].mxu0 %vm380_vm1, %v4585_v56  ;;  %v20549_v56 = vshll.u32 %v18508_v1, 16 }
 0x2b5   : > { %14533 = vmatpush3.bf16.msra.mxu0 %v18374_v30  ;;  %14520 = vmatprep.mubr.msk.bf16.mxu0 %vm380_vm1, %v4587_v28  ;;  %v4591_v30 = vsel %vm1011_vm3, %v4588_v63, %v4590_v9  ;;  %v4779_v28 = vsel %vm3429_vm5, %v4775_v57, %v17957_v34  ;;  %v11420_v63 = vrot.slane %v20550_v54, 4 }
 0x2b6   : > { %14534 = vmatprep.subr.bf16.mxu0 %v16004_v4  ;;  %v11421_v9 = vrot.slane %v20549_v56, 5 }
 0x2b9   : > { %14535 = vmatpush3.bf16.msra.mxu0 %v16004_v4  ;;  %v4597_v4 = vsel %vm1011_vm3, %v18495_v36, %v4596_v32  ;;  %v20559_v32 = vshrl.u32 %v18550_v21, 16 }
 0x2ba   : > { %14536 = vmatprep.subr.bf16.mxu0 %v16005_v18 }
 0x2bb   : > { %v12073_v56 = vrot.slane %v20559_v32, 4 }
 0x2bc   : > { %14521 = vmatmul.mubr.msk.bf16.gmra.mrb[68].mxu0 %vm380_vm1, %v4589_v6  ;;  %v18531_v6 = vor.u32 %v11421_v9, %v11420_v63  ;;  %v12070_v63 = vrot.slane %v20556_v5, 5 }
 0x2bd   : > { %14524 = vmatprep.mubr.msk.bf16.mxu0 %vm380_vm1, %v4591_v30  ;;  %14537 = vmatpush3.bf16.msra.mxu0 %v16005_v18  ;;  %v10752_v18 = vrot.slane %v20551_v43, 5  ;;  %v18544_v30 = vld [vmem:[#allocation2 + $0xd8] sm:$0xff] }
 0x2be   : > { %14538 = vmatprep.subr.bf16.mxu0 %v16006_v41  ;;  %20657 = vst [vmem:[#allocation30_spill] sm:$0xff] %v18531_v6  ;;  %20659 = vst [vmem:[#allocation32_spill] sm:$0xff] %v18544_v30 }
 0x2c1   : > { %14539 = vmatpush3.bf16.msra.mxu0 %v16006_v41  ;;  %v18529_v41 = vor.u32 %v10752_v18, %v10751_v50 }
 0x2c3   : > { %20656 = vst [vmem:[#allocation29_spill] sm:$0xff] %v18529_v41  ;;  %v18536_v34 = vsel %vm3429_vm5, %v18529_v41, %v18531_v6 }
 0x2c4   : > { %14525 = vmatmul.mubr.msk.bf16.gmra.mrb[72].mxu0 %vm380_vm1, %v4593_v13  ;;  %20658 = vst [vmem:[#allocation31_spill] sm:$0xff] %v18536_v34  ;;  %v4759_v13 = vld [vmem:[#allocation2 + $0x50] sm:$0x1f] }
 0x2c5   : > { %14528 = vmatprep.mubr.msk.bf16.mxu0 %vm380_vm1, %v4595_v45  ;;  %v18552_v45 = vld [vmem:[#allocation2 + $0xf0] sm:$0xff]  ;;  %v4805_v57 = vshrl.u32 %v4759_v13, 16 }
 0x2c6   : > { %20662 = vst [vmem:[#allocation35_spill] sm:$0xff] %v18552_v45  ;;  %v20564_v50 = vshrl.u32 %v18552_v45, 16  ;;  %v20563_v18 = vshll.u32 %v18552_v45, 16 }
 0x2c7   : > { %v4807_v54 = vrot.slane %v4805_v57, 4 }
 0x2c8   : > { %v12078_v5 = vrot.slane %v20563_v18, 5 }
 0x2cc   : > { %14529 = vmatmul.mubr.msk.bf16.gmra.mrb[76].mxu0 %vm380_vm1, %v4597_v4  ;;  %v4808_v4 = vshll.u32 %v4759_v13, 16 }
 0x2cd   : > { %14540 = vmatprep.mubr.msk.bf16.mxu0 %vm380_vm1, %v4779_v28  ;;  %v20562_v28 = vshll.u32 %v18550_v21, 16 }
 0x2d4   : > { %14541 = vmatmul.mubr.msk.bf16.vlgmr.msra.gmra.mrb[64].mxu0 %vm380_vm1, %v18068_v62  ;;  %v20553_v62 = vshrl.u32 %v18544_v30, 16 }
 0x2d5   : > { %14544 = vmatprep.mubr.msk.bf16.mxu0 %vm380_vm1, %v18075_v59  ;;  %v20554_v59 = vshll.u32 %v18544_v30, 16 }
 0x2d6   : > { %v12065_v43 = vrot.slane %v20553_v62, 4  ;;  %v4810_v62 = vrot.slane %v4808_v4, 5 }
 0x2d7   : > { %v12066_v13 = vrot.slane %v20554_v59, 5  ;;  %v12077_v59 = vrot.slane %v20564_v50, 4 }
 0x2d9   : > { %v18588_v9 = vor.u32 %v12066_v13, %v12065_v43  ;;  %v12079_v43 = vor.u32 %v12078_v5, %v12077_v59  ;;  %v4811_v13 = vor.u32 %v4810_v62, %v4807_v54  ;;  %v18631_v62 = vld [vmem:[#allocation8] ss:$0 sm:$0xff] }
 0x2db   : > { %20665 = vst [vmem:[#allocation38_spill] sm:$0xff] %v18588_v9 }
 0x2dc   : > { %14545 = vmatmul.mubr.msk.bf16.gmra.mrb[68].mxu0 %vm380_vm1, %v18078_v40  ;;  %v20555_v40 = vshrl.u32 %v18548_v19, 16  ;;  %v20666_v19 = vshrl.u32 %v18555_v38, 16 }
 0x2dd   : > { %14548 = vmatprep.mubr.msk.bf16.mxu0 %vm380_vm1, %v18085_v51  ;;  %v18561_v51 = vld [vmem:[#allocation2 + $0x108] sm:$0xff] }
 0x2de   : > { %20664 = vst [vmem:[#allocation37_spill] sm:$0xff] %v18561_v51  ;;  %v12069_v48 = vrot.slane %v20555_v40, 4  ;;  %v12081_v32 = vrot.slane %v20666_v19, 4  ;;  %v20668_v4 = vshrl.u32 %v18561_v51, 16 }
 0x2e0   : > { %v12071_v40 = vor.u32 %v12070_v63, %v12069_v48  ;;  %v12089_v21 = vrot.slane %v20668_v4, 4  ;;  %v20670_v48 = vshll.u32 %v18561_v51, 16 }
 0x2e2   : > { %v12090_v63 = vrot.slane %v20670_v48, 5 }
 0x2e4   : > { %14549 = vmatmul.mubr.msk.bf16.gmra.mrb[72].mxu0 %vm380_vm1, %v18089_v10  ;;  %v12074_v10 = vrot.slane %v20562_v28, 5  ;;  %v18600_v28 = vsel %vm3429_vm5, %v18588_v9, %v12071_v40 }
 0x2e5   : > { %14552 = vmatprep.mubr.msk.bf16.mxu0 %vm380_vm1, %v18097_v52  ;;  %v20667_v52 = vshll.u32 %v18555_v38, 16  ;;  %20669 = vst [vmem:[#allocation39_spill] sm:$0xff] %v18600_v28 }
 0x2e6   : > { %v12075_v34 = vor.u32 %v12074_v10, %v12073_v56  ;;  %v18610_v10 = vor.u32 %v12090_v63, %v12089_v21  ;;  %v16019_v21 = vld [vmem:[%s20491_s4 + $0x20] sm:$0xff]  }
 0x2e7   : > { %v12082_v57 = vrot.slane %v20667_v52, 5  ;;  %v4812_v52 = vsel %vm3429_vm5, %v18080_v39, %v4811_v13  ;;  %14556 = vmatprep.subr.bf16.mxu1 %v16019_v21 }
 0x2e8   : > { %v18605_v18 = vsel %vm3429_vm5, %v12071_v40, %v12075_v34  ;;  %v18608_v56 = vsel %vm3429_vm5, %v12075_v34, %v12079_v43  ;;  %20673 = vst [vmem:[#allocation42_spill] sm:$0xff] %v18610_v10  ;;  %v18625_v54 = vsel %vm3429_vm5, %v18531_v6, %v18610_v10  ;;  %v20677_v34 = vmov 0  }
 0x2e9   : > { %20671 = vst [vmem:[#allocation40_spill] sm:$0xff] %v18605_v18  ;;  %v12083_v19 = vor.u32 %v12082_v57, %v12081_v32  ;;  %20672 = vst [vmem:[#allocation41_spill] sm:$0xff] %v18608_v56 }
 0x2ea   : > { %20676 = vst [vmem:[#allocation45_spill] sm:$0xff] %v18625_v54 }
 0x2eb   : > { %v18615_v4 = vsel %vm3429_vm5, %v12079_v43, %v12083_v19  ;;  %v18619_v59 = vsel %vm3429_vm5, %v12083_v19, %v18531_v6 }
 0x2ec   : > { %20674 = vst [vmem:[#allocation43_spill] sm:$0xff] %v18615_v4  ;;  %20675 = vst [vmem:[#allocation44_spill] sm:$0xff] %v18619_v59  ;;  %14553 = vmatmul.mubr.msk.bf16.gmra.mrb[76].mxu0 %vm380_vm1, %v4812_v52 }
 0x2ed   : > { %7607 = vmatprep.mubr.bf16.mxu0 %v20677_v34 }
 0x3a7   : > { %v14542_v40 = vpop.f32.mrb[64].mxu0 }
 0x3a8   : > { %v4982_v5 = vadd.f32 %v14542_v40, %v18631_v62  ;;  %v4895_v32 = vpop.f32.mrb[65].mxu0  ;;  %v16020_v40 = vld [vmem:[%s20491_s4 + $0x28] sm:$0xff]  }
 0x3a9   : > { %v4980_v57 = vadd.f32 %v18631_v62, %v4895_v32  ;;  %v14543_v43 = vpop.f32.mrb[66].mxu0 }
 0x3aa   : > { %v4983_v48 = vadd.f32 %v14543_v43, %v18631_v62  ;;  %v4898_v63 = vpop.f32.mrb[67].mxu0  ;;  %v4998_v19 = vmax.f32 %v4982_v5, 0.0 }
 0x3ab   : > { %v4981_v13 = vadd.f32 %v18631_v62, %v4898_v63  ;;  %v4996_v50 = vmax.f32 %v4980_v57, 0.0 }
 0x3ac   : > { %v4999_v52 = vmax.f32 %v4983_v48, 0.0 }
 0x3ad   : > { %v4997_v10 = vmax.f32 %v4981_v13, 0.0 }
 0x3ae   : > { %v5013_v54 = vpack.c.bf16 %v4999_v52, %v4998_v19 }
 0x3af   : > { %v5012_v59 = vpack.c.bf16 %v4997_v10, %v4996_v50  ;;  %v14546_v4 = vpop.f32.mrb[68].mxu0  ;;  %v16021_v10 = vld [vmem:[%s20491_s4 + $0x30] sm:$0xff]  }
 0x3b0   : > { %v4986_v56 = vadd.f32 %v14546_v4, %v18631_v62  ;;  %v4911_v32 = vpop.f32.mrb[69].mxu0 }
 0x3b1   : > { %v4984_v18 = vadd.f32 %v18631_v62, %v4911_v32  ;;  %v14547_v43 = vpop.f32.mrb[70].mxu0  ;;  %13134 = vmatmul.mubr.msk.bf16.vlgmr.msra.gmra.mrb[64].mxu1 %vm380_vm1, %v5012_v59 }
 0x3b2   : > { %v4987_v5 = vadd.f32 %v14547_v43, %v18631_v62  ;;  %14557 = vmatpush3.bf16.msra.mxu1 %v16019_v21  ;;  %v4914_v57 = vpop.f32.mrb[71].mxu0  ;;  %5193 = vmatprep.mubr.bf16.mxu1 %v20677_v34  ;;  %v5002_v4 = vmax.f32 %v4986_v56, 0.0  ;;  %v16022_v21 = vld [vmem:[%s20491_s4 + $0x38] sm:$0xff]  }
 0x3b3   : > { %v4985_v50 = vadd.f32 %v18631_v62, %v4914_v57  ;;  %14558 = vmatprep.subr.bf16.mxu1 %v16020_v40  ;;  %v5000_v63 = vmax.f32 %v4984_v18, 0.0 }
 0x3b4   : > { %v5003_v48 = vmax.f32 %v4987_v5, 0.0  ;;  %v16023_v5 = vld [vmem:[%s20491_s4] sm:$0xff]  }
 0x3b5   : > { %v5001_v13 = vmax.f32 %v4985_v50, 0.0 }
 0x3b6   : > { %v5015_v19 = vpack.c.bf16 %v5003_v48, %v5002_v4  ;;  %14559 = vmatpush3.bf16.msra.mxu1 %v16020_v40 }
 0x3b7   : > { %v5014_v59 = vpack.c.bf16 %v5001_v13, %v5000_v63  ;;  %v14550_v52 = vpop.f32.mrb[72].mxu0  ;;  %14560 = vmatprep.subr.bf16.mxu1 %v16021_v10 }
 0x3b8   : > { %v4990_v32 = vadd.f32 %v14550_v52, %v18631_v62  ;;  %v4927_v43 = vpop.f32.mrb[73].mxu0 }
 0x3b9   : > { %v4988_v57 = vadd.f32 %v18631_v62, %v4927_v43  ;;  %v14551_v28 = vpop.f32.mrb[74].mxu0  ;;  %13135 = vmatmul.mubr.msk.bf16.gmra.mrb[68].mxu1 %vm380_vm1, %v5013_v54 }
 0x3ba   : > { %v4991_v18 = vadd.f32 %v14551_v28, %v18631_v62  ;;  %v4930_v56 = vpop.f32.mrb[75].mxu0  ;;  %5203 = vmatprep.mubr.bf16.mxu1 %v20677_v34  ;;  %14561 = vmatpush3.bf16.msra.mxu1 %v16021_v10  ;;  %v5006_v50 = vmax.f32 %v4990_v32, 0.0 }
 0x3bb   : > { %v4989_v40 = vadd.f32 %v18631_v62, %v4930_v56  ;;  %14562 = vmatprep.subr.bf16.mxu1 %v16022_v21  ;;  %v5004_v48 = vmax.f32 %v4988_v57, 0.0 }
 0x3bc   : > { %v5007_v4 = vmax.f32 %v4991_v18, 0.0 }
 0x3bd   : > { %v5005_v63 = vmax.f32 %v4989_v40, 0.0 }
 0x3be   : > { %v5017_v13 = vpack.c.bf16 %v5007_v4, %v5006_v50  ;;  %14563 = vmatpush3.bf16.msra.mxu1 %v16022_v21 }
 0x3bf   : > { %v5016_v54 = vpack.c.bf16 %v5005_v63, %v5004_v48  ;;  %v14554_v52 = vpop.f32.mrb[76].mxu0  ;;  %14580 = vmatprep.subr.bf16.mxu1 %v16023_v5 }
 0x3c0   : > { %v4994_v28 = vadd.f32 %v14554_v52, %v18631_v62  ;;  %v4943_v43 = vpop.f32.mrb[77].mxu0 }
 0x3c1   : > { %v4992_v10 = vadd.f32 %v18631_v62, %v4943_v43  ;;  %v14555_v56 = vpop.f32.mrb[78].mxu0  ;;  %13136 = vmatmul.mubr.msk.bf16.gmra.mrb[72].mxu1 %vm380_vm1, %v5014_v59  ;;  %v18684_v59 = vld [vmem:[#allocation2 + $0x58] sm:$0xff]  ;;  %v18705_v43 = vld [vmem:[#allocation2 + $0x68] sm:$0xff] }
 0x3c2   : > { %v4995_v9 = vadd.f32 %v14555_v56, %v18631_v62  ;;  %v4946_v51 = vpop.f32.mrb[79].mxu0  ;;  %5213 = vmatprep.mubr.bf16.mxu1 %v20677_v34  ;;  %v5010_v57 = vmax.f32 %v4994_v28, 0.0  ;;  %v5480_v63 = vrot.slane %v18684_v59, 4  ;;  %v18701_v28 = vld [vmem:[#allocation2 + $0x60] sm:$0xff]  ;;  %v5484_v56 = vrot.slane %v18705_v43, 4 }
 0x3c3   : > { %v4993_v32 = vadd.f32 %v18631_v62, %v4946_v51  ;;  %v5008_v18 = vmax.f32 %v4992_v10, 0.0  ;;  %v18675_v51 = vld [vmem:[#allocation2 + $0x40] sm:$0xf0]  ;;  %v16025_v10 = vld [vmem:[%s20491_s4 + $0x10] sm:$0xff]   ;;  %v20581_v45 = vshrl.u32 %v18684_v59, 16  ;;  %v20582_v6 = vshll.u32 %v18684_v59, 16 }
 0x3c4   : > { %v5011_v21 = vmax.f32 %v4995_v9, 0.0  ;;  %v5475_v9 = vrot.slane %v18675_v51, 4  ;;  %v20586_v41 = vshll.u32 %v18705_v43, 16 }
 0x3c5   : > { %v5009_v40 = vmax.f32 %v4993_v32, 0.0  ;;  %v5669_v30 = vrot.slane %v20582_v6, 4 }
 0x3c6   : > { %v5019_v50 = vpack.c.bf16 %v5011_v21, %v5010_v57  ;;  %v5477_v62 = vsel %vm1011_vm3, %v5475_v9, %v18495_v36  ;;  %v18723_v21 = vld [vmem:[#allocation2 + $0x70] sm:$0xff] }
 0x3c7   : > { %v5018_v4 = vpack.c.bf16 %v5009_v40, %v5008_v18  ;;  %v5440_v18 = vld [vmem:[#allocation2 + $0x40] sm:$0xf8] }
 0x3c8   : > { %v16027_v40 = vld [vmem:[%s20491_s4 + $0x40] sm:$0xff]   ;;  %v5638_v9 = vshrl.u32 %v5440_v18, 16 }
 0x3c9   : > { %13137 = vmatmul.mubr.msk.bf16.gmra.mrb[76].mxu1 %vm380_vm1, %v5015_v19  ;;  %v18682_v19 = vld [vmem:[#allocation2 + $0x50] sm:$0xff] }
 0x3ca   : > { %5223 = vmatprep.mubr.bf16.mxu1 %v20677_v34  ;;  %v18687_v48 = vrot.slane %v18682_v19, 4  ;;  %v20585_v38 = vshll.u32 %v18682_v19, 16 }
 0x3cc   : > { %v18699_v52 = vsel %vm1011_vm3, %v18687_v48, %v5480_v63 }
 0x3d1   : > { %13138 = vmatmul.mubr.msk.bf16.gmra.mrb[80].mxu1 %vm380_vm1, %v5016_v54  ;;  %v5479_v54 = vsel %vm1011_vm3, %v18495_v36, %v18687_v48  ;;  %v5482_v36 = vrot.slane %v18701_v28, 4 }
 0x3d2   : > { %5233 = vmatprep.mubr.bf16.mxu1 %v20677_v34 }
 0x3d3   : > { %v18716_v32 = vsel %vm1011_vm3, %v5480_v63, %v5482_v36  ;;  %v18721_v57 = vsel %vm1011_vm3, %v5482_v36, %v5484_v56 }
 0x3d9   : > { %13139 = vmatmul.mubr.msk.bf16.gmra.mrb[84].mxu1 %vm380_vm1, %v5017_v13  ;;  %v16024_v13 = vld [vmem:[%s20491_s4 + $0x8] sm:$0xff]  }
 0x3da   : > { %5243 = vmatprep.mubr.bf16.mxu1 %v20677_v34 }
 0x3e1   : > { %13140 = vmatmul.mubr.msk.bf16.gmra.mrb[88].mxu1 %vm380_vm1, %v5018_v4  ;;  %v18732_v4 = vrot.slane %v18130_v60, 4 }
 0x3e2   : > { %5253 = vmatprep.mubr.bf16.mxu1 %v20677_v34 }
 0x3e9   : > { %13141 = vmatmul.mubr.msk.bf16.gmra.mrb[92].mxu1 %vm380_vm1, %v5019_v50  ;;  %v5486_v50 = vrot.slane %v18723_v21, 4 }
 0x3ea   : > { %14564 = vmatprep.mubr.msk.bf16.mxu1 %vm380_vm1, %v5477_v62  ;;  %v5641_v62 = vshll.u32 %v5440_v18, 16  ;;  %v20576_v18 = vshrl.u32 %v18682_v19, 16 }
 0x3eb   : > { %v18735_v63 = vsel %vm1011_vm3, %v5484_v56, %v5486_v50 }
 0x3ec   : > { %v5643_v36 = vrot.slane %v5641_v62, 4 }
 0x3f1   : > { %14565 = vmatmul.mubr.msk.bf16.vlgmr.msra.gmra.mrb[96].mxu1 %vm380_vm1, %v5479_v54  ;;  %v18743_v54 = vld [vmem:[#allocation2 + $0x80] sm:$0xf] }
 0x3f2   : > { %14581 = vmatpush3.bf16.msra.mxu1 %v16023_v5  ;;  %14568 = vmatprep.mubr.msk.bf16.mxu1 %vm380_vm1, %v18699_v52  ;;  %v16026_v5 = vld [vmem:[%s20491_s4 + $0x18] sm:$0xff]  }
 0x3f3   : > { %14582 = vmatprep.subr.bf16.mxu1 %v16024_v13 }
 0x3f6   : > { %14583 = vmatpush3.bf16.msra.mxu1 %v16024_v13  ;;  %v18741_v13 = vsel %vm1011_vm3, %v5486_v50, %v18732_v4 }
 0x3f7   : > { %14584 = vmatprep.subr.bf16.mxu1 %v16025_v10 }
 0x3f9   : > { %14569 = vmatmul.mubr.msk.bf16.gmra.mrb[100].mxu1 %vm380_vm1, %v18716_v32 }
 0x3fa   : > { %14572 = vmatprep.mubr.msk.bf16.mxu1 %vm380_vm1, %v18721_v57  ;;  %14585 = vmatpush3.bf16.msra.mxu1 %v16025_v10  ;;  %v5640_v10 = vrot.slane %v5638_v9, 3  ;;  %v5657_v9 = vrot.slane %v20576_v18, 3  ;;  %v20583_v18 = vshll.u32 %v18701_v28, 16 }
 0x3fb   : > { %14586 = vmatprep.subr.bf16.mxu1 %v16026_v5 }
 0x3fc   : > { %v5644_v56 = vor.u32 %v5643_v36, %v5640_v10  ;;  %v5660_v10 = vrot.slane %v20585_v38, 4  ;;  %v5666_v36 = vrot.slane %v20581_v45, 3  ;;  %v16028_v45 = vld [vmem:[%s20491_s4 + $0x48] sm:$0xff]  }
 0x3fe   : > { %14587 = vmatpush3.bf16.msra.mxu1 %v16026_v5  ;;  %v5490_v5 = vrot.slane %v18743_v54, 4  ;;  %v5653_v62 = vsel %vm3194_vm4, %v5644_v56, %v18376_v31  ;;  %v18768_v1 = vor.u32 %v5660_v10, %v5657_v9  ;;  %v20587_v56 = vshrl.u32 %v18705_v43, 16 }
 0x3ff   : > { %14604 = vmatprep.subr.bf16.mxu1 %v16027_v40  ;;  %v5678_v9 = vrot.slane %v20583_v18, 4  ;;  %v20591_v18 = vshrl.u32 %v18723_v21, 16 }
 0x400   : > { %v5491_v50 = vsel %vm1011_vm3, %v18732_v4, %v5490_v5  ;;  %v20584_v5 = vshrl.u32 %v18701_v28, 16  ;;  %v5662_v6 = vsel %vm3194_vm4, %v18376_v31, %v18768_v1  ;;  %v5684_v10 = vrot.slane %v20587_v56, 3  ;;  %v16029_v31 = vld [vmem:[%s20491_s4 + $0x50] sm:$0xff]  }
 0x401   : > { %14573 = vmatmul.mubr.msk.bf16.gmra.mrb[104].mxu1 %vm380_vm1, %v18735_v63  ;;  %v5693_v56 = vrot.slane %v20591_v18, 3  ;;  %v5709_v18 = vshrl.u32 %v18743_v54, 16 }
 0x402   : > { %14576 = vmatprep.mubr.msk.bf16.mxu1 %vm380_vm1, %v18741_v13 }
 0x409   : > { %14577 = vmatmul.mubr.msk.bf16.gmra.mrb[108].mxu1 %vm380_vm1, %v5491_v50  ;;  %v5670_v50 = vor.u32 %v5669_v30, %v5666_v36  ;;  %v5687_v36 = vrot.slane %v20586_v41, 4 }
 0x40a   : > { %14588 = vmatprep.mubr.msk.bf16.mxu1 %vm380_vm1, %v5653_v62  ;;  %v5675_v62 = vrot.slane %v20584_v5, 3  ;;  %v20590_v5 = vshll.u32 %v18723_v21, 16 }
 0x40b   : > { %v18785_v30 = vsel %vm3194_vm4, %v18768_v1, %v5670_v50  ;;  %v5688_v38 = vor.u32 %v5687_v36, %v5684_v10  ;;  %v20679_v36 = vshll.u32 %v18130_v60, 16 }
 0x40d   : > { %v5705_v27 = vrot.slane %v20679_v36, 4  ;;  %v5711_v36 = vrot.slane %v5709_v18, 3  ;;  %v20680_v18 = vshrl.u32 %v18682_v19, 16 }
 0x411   : > { %14589 = vmatmul.mubr.msk.bf16.vlgmr.msra.gmra.mrb[96].mxu1 %vm380_vm1, %v5662_v6  ;;  %v5679_v6 = vor.u32 %v5678_v9, %v5675_v62  ;;  %v5696_v62 = vrot.slane %v20590_v5, 4 }
 0x412   : > { %14605 = vmatpush3.bf16.msra.mxu1 %v16027_v40  ;;  %14592 = vmatprep.mubr.msk.bf16.mxu1 %vm380_vm1, %v18785_v30  ;;  %v16030_v40 = vld [vmem:[%s20491_s4 + $0x58] sm:$0xff]  }
 0x413   : > { %14606 = vmatprep.subr.bf16.mxu1 %v16028_v45  ;;  %v18802_v41 = vsel %vm3194_vm4, %v5670_v50, %v5679_v6  ;;  %v18811_v9 = vsel %vm3194_vm4, %v5679_v6, %v5688_v38  ;;  %v16031_v50 = vld [vmem:[%s20491_s4 + $0x60] sm:$0xff]   ;;  %v5697_v5 = vor.u32 %v5696_v62, %v5693_v56  ;;  %v5712_v6 = vshll.u32 %v18743_v54, 16 }
 0x414   : > { %v5883_v62 = vrot.slane %v20680_v18, 4  ;;  %v20685_v18 = vshll.u32 %v18701_v28, 16 }
 0x415   : > { %v5714_v23 = vrot.slane %v5712_v6, 4 }
 0x416   : > { %14607 = vmatpush3.bf16.msra.mxu1 %v16028_v45  ;;  %v20678_v45 = vshrl.u32 %v18130_v60, 16  ;;  %v5875_v60 = vshll.u32 %v18675_v51, 16 }
 0x417   : > { %14608 = vmatprep.subr.bf16.mxu1 %v16029_v31 }
 0x418   : > { %v5702_v10 = vrot.slane %v20678_v45, 3  ;;  %v5872_v45 = vshrl.u32 %v18675_v51, 16  ;;  %v5877_v54 = vrot.slane %v5875_v60, 5  ;;  %v5715_v51 = vor.u32 %v5714_v23, %v5711_v36 }
 0x419   : > { %14593 = vmatmul.mubr.msk.bf16.gmra.mrb[100].mxu1 %vm380_vm1, %v18802_v41  ;;  %v20683_v23 = vshll.u32 %v18684_v59, 16 }
 0x41a   : > { %14596 = vmatprep.mubr.msk.bf16.mxu1 %vm380_vm1, %v18811_v9  ;;  %14609 = vmatpush3.bf16.msra.mxu1 %v16029_v31  ;;  %v18824_v17 = vor.u32 %v5705_v27, %v5702_v10  ;;  %v18829_v31 = vsel %vm3194_vm4, %v5688_v38, %v5697_v5  ;;  %v5874_v27 = vrot.slane %v5872_v45, 4  ;;  %v20682_v45 = vshrl.u32 %v18684_v59, 16 }
 0x41b   : > { %14610 = vmatprep.subr.bf16.mxu1 %v16030_v40  ;;  %v5888_v36 = vrot.slane %v20683_v23, 5  ;;  %v5892_v59 = vrot.slane %v20685_v18, 5  ;;  %v16034_v23 = vld [vmem:[%s20491_s4 + $0x78] sm:$0xff]   ;;  %v6077_v18 = vld [vmem:[#allocation2 + $0x48] sm:$0xf8] }
 0x41c   : > { %v18835_v56 = vsel %vm3194_vm4, %v5697_v5, %v18824_v17  ;;  %v5716_v38 = vsel %vm3194_vm4, %v18824_v17, %v5715_v51  ;;  %v20681_v5 = vshll.u32 %v18682_v19, 16  ;;  %v5887_v60 = vrot.slane %v20682_v45, 4  ;;  %v16032_v51 = vld [vmem:[%s20491_s4 + $0x68] sm:$0xff]  }
 0x41e   : > { %14611 = vmatpush3.bf16.msra.mxu1 %v16030_v40  ;;  %v5878_v40 = vor.u32 %v5877_v54, %v5874_v27  ;;  %v5884_v6 = vrot.slane %v20681_v5, 5  ;;  %v5889_v54 = vor.u32 %v5888_v36, %v5887_v60 }
 0x41f   : > { %14628 = vmatprep.subr.bf16.mxu1 %v16031_v50 }
 0x420   : > { %v5882_v10 = vsel %vm3429_vm5, %v5878_v40, %v18080_v39  ;;  %v18853_v27 = vor.u32 %v5884_v6, %v5883_v62  ;;  %v20684_v40 = vshrl.u32 %v18701_v28, 16  ;;  %v20687_v6 = vshll.u32 %v18705_v43, 16 }
 0x421   : > { %14597 = vmatmul.mubr.msk.bf16.gmra.mrb[104].mxu1 %vm380_vm1, %v18829_v31 }
 0x422   : > { %14600 = vmatprep.mubr.msk.bf16.mxu1 %vm380_vm1, %v18835_v56  ;;  %v5886_v19 = vsel %vm3429_vm5, %v18080_v39, %v18853_v27  ;;  %v18868_v62 = vsel %vm3429_vm5, %v18853_v27, %v5889_v54  ;;  %v5896_v45 = vrot.slane %v20687_v6, 5  ;;  %v16033_v39 = vld [vmem:[%s20491_s4 + $0x70] sm:$0xff]   ;;  %v6098_v6 = vshll.u32 %v6077_v18, 16 }
 0x429   : > { %14601 = vmatmul.mubr.msk.bf16.gmra.mrb[108].mxu1 %vm380_vm1, %v5716_v38  ;;  %v5891_v38 = vrot.slane %v20684_v40, 4 }
 0x42a   : > { %14612 = vmatprep.mubr.msk.bf16.mxu1 %vm380_vm1, %v5882_v10  ;;  %v20686_v10 = vshrl.u32 %v18705_v43, 16 }
 0x42b   : > { %v5893_v28 = vor.u32 %v5892_v59, %v5891_v38 }
 0x42c   : > { %v5895_v5 = vrot.slane %v20686_v10, 4 }
 0x42d   : > { %v18883_v43 = vsel %vm3429_vm5, %v5889_v54, %v5893_v28  ;;  %v16035_v54 = vld [vmem:[%s20491_s4 + $0x80] sm:$0xff]  }
 0x42e   : > { %v5897_v60 = vor.u32 %v5896_v45, %v5895_v5  ;;  %v6095_v5 = vshrl.u32 %v6077_v18, 16  ;;  %v16036_v18 = vld [vmem:[%s20491_s4 + $0x88] sm:$0xff]  }
 0x430   : > { %v18892_v38 = vsel %vm3429_vm5, %v5893_v28, %v5897_v60 }
 0x431   : > { %14613 = vmatmul.mubr.msk.bf16.vlgmr.msra.gmra.mrb[96].mxu1 %vm380_vm1, %v5886_v19  ;;  %v20689_v19 = vshll.u32 %v18723_v21, 16 }
 0x432   : > { %14629 = vmatpush3.bf16.msra.mxu1 %v16031_v50  ;;  %14616 = vmatprep.mubr.msk.bf16.mxu1 %vm380_vm1, %v18868_v62  ;;  %v20688_v50 = vshrl.u32 %v18723_v21, 16 }
 0x433   : > { %14630 = vmatprep.subr.bf16.mxu1 %v16032_v51  ;;  %v5900_v40 = vrot.slane %v20689_v19, 5  ;;  %v6097_v19 = vrot.slane %v6095_v5, 3 }
 0x434   : > { %v5899_v36 = vrot.slane %v20688_v50, 4 }
 0x436   : > { %14631 = vmatpush3.bf16.msra.mxu1 %v16032_v51  ;;  %v5862_v51 = vld [vmem:[#allocation2 + $0x80] sm:$0x1f]  ;;  %v5901_v59 = vor.u32 %v5900_v40, %v5899_v36  ;;  %v6100_v36 = vrot.slane %v6098_v6, 4 }
 0x437   : > { %14632 = vmatprep.subr.bf16.mxu1 %v16033_v39  ;;  %v5908_v21 = vshrl.u32 %v5862_v51, 16  ;;  %v5911_v10 = vshll.u32 %v5862_v51, 16 }
 0x438   : > { %v18900_v45 = vsel %vm3429_vm5, %v5897_v60, %v5901_v59 }
 0x439   : > { %14617 = vmatmul.mubr.msk.bf16.gmra.mrb[100].mxu1 %vm380_vm1, %v18883_v43  ;;  %v5910_v28 = vrot.slane %v5908_v21, 4  ;;  %v5913_v50 = vrot.slane %v5911_v10, 5  ;;  %v18935_v21 = vld [vmem:[#allocation2 + $0x88] sm:$0xf]  ;;  %v16039_v10 = vld [vmem:[%s20491_s4 + $0xa0] sm:$0xff]  }
 0x43a   : > { %14620 = vmatprep.mubr.msk.bf16.mxu1 %vm380_vm1, %v18892_v38  ;;  %14633 = vmatpush3.bf16.msra.mxu1 %v16033_v39  ;;  %v18906_v39 = vsel %vm3429_vm5, %v5901_v59, %v18162_v20  ;;  %v20691_v59 = vshll.u32 %v18133_v25, 16  ;;  %v6166_v5 = vshrl.u32 %v18935_v21, 16 }
 0x43b   : > { %14634 = vmatprep.subr.bf16.mxu1 %v16034_v23  ;;  %v5914_v40 = vor.u32 %v5913_v50, %v5910_v28  ;;  %v6335_v50 = vld [vmem:[#allocation2 + $0x48] sm:$0xf0] }
 0x43d   : > { %v5915_v60 = vsel %vm3429_vm5, %v18162_v20, %v5914_v40  ;;  %v16037_v20 = vld [vmem:[%s20491_s4 + $0x90] sm:$0xff]  }
 0x43e   : > { %14635 = vmatpush3.bf16.msra.mxu1 %v16034_v23  ;;  %v6101_v23 = vor.u32 %v6100_v36, %v6097_v19  ;;  %v6353_v36 = vrot.slane %v6335_v50, 4 }
 0x43f   : > { %14652 = vmatprep.subr.bf16.mxu1 %v16035_v54 }
 0x440   : > { %v6110_v51 = vsel %vm3194_vm4, %v6101_v23, %v18768_v1  ;;  %v16038_v1 = vld [vmem:[%s20491_s4 + $0x98] sm:$0xff]   ;;  %v6355_v23 = vsel %vm1011_vm3, %v6353_v36, %v18687_v48 }
 0x441   : > { %14621 = vmatmul.mubr.msk.bf16.gmra.mrb[104].mxu1 %vm380_vm1, %v18900_v45  ;;  %v16042_v48 = vld [vmem:[%s20491_s4 + $0xb8] sm:$0xff]  }
 0x442   : > { %14624 = vmatprep.mubr.msk.bf16.mxu1 %vm380_vm1, %v18906_v39 }
 0x449   : > { %14625 = vmatmul.mubr.msk.bf16.gmra.mrb[108].mxu1 %vm380_vm1, %v5915_v60 }
 0x44a   : > { %14636 = vmatprep.mubr.msk.bf16.mxu1 %vm380_vm1, %v6110_v51  ;;  %v16165_v51 = vld [vmem:[#allocation2 + $0x80] sm:$0xff] }
 0x451   : > { %14637 = vmatmul.mubr.msk.bf16.vlgmr.msra.gmra.mrb[96].mxu1 %vm380_vm1, %v18785_v30  ;;  %v20690_v30 = vshrl.u32 %v18133_v25, 16  ;;  %v6168_v25 = vrot.slane %v6166_v5, 3 }
 0x452   : > { %14653 = vmatpush3.bf16.msra.mxu1 %v16035_v54  ;;  %14640 = vmatprep.mubr.msk.bf16.mxu1 %vm380_vm1, %v18802_v41  ;;  %v6162_v41 = vrot.slane %v20691_v59, 4 }
 0x453   : > { %14654 = vmatprep.subr.bf16.mxu1 %v16036_v18  ;;  %v6159_v54 = vrot.slane %v20690_v30, 3  ;;  %v2996_v30 = vld [vmem:[#allocation11] sm:$0x3] }
 0x455   : > { %v18944_v6 = vor.u32 %v6162_v41, %v6159_v54 }
 0x456   : > { %14655 = vmatpush3.bf16.msra.mxu1 %v16036_v18  ;;  %v18981_v18 = vrot.slane %v16165_v51, 4 }
 0x457   : > { %14656 = vmatprep.subr.bf16.mxu1 %v16037_v20 }
 0x458   : > { %v6367_v54 = vsel %vm1011_vm3, %v18732_v4, %v18981_v18 }
 0x459   : > { %14641 = vmatmul.mubr.msk.bf16.gmra.mrb[100].mxu1 %vm380_vm1, %v18811_v9  ;;  %v6169_v9 = vshll.u32 %v18935_v21, 16 }
 0x45a   : > { %14644 = vmatprep.mubr.msk.bf16.mxu1 %vm380_vm1, %v18829_v31  ;;  %14657 = vmatpush3.bf16.msra.mxu1 %v16037_v20  ;;  %v6164_v31 = vsel %vm3194_vm4, %v18824_v17, %v18944_v6  ;;  %v16041_v17 = vld [vmem:[%s20491_s4 + $0xb0] sm:$0xff]   ;;  %v6541_v20 = vshrl.u32 %v6335_v50, 16 }
 0x45b   : > { %14658 = vmatprep.subr.bf16.mxu1 %v16038_v1  ;;  %v6171_v28 = vrot.slane %v6169_v9, 4  ;;  %v5029_v9 = vld [vmem:[%s16681_s24 + $0x8] sm:$0xff] }
 0x45c   : > { %v6543_v41 = vrot.slane %v6541_v20, 4  ;;  %v5046_v36 = vunpack.c.l.bf16 %v5029_v9  ;;  %v5030_v20 = vld [vmem:[%s16681_s24 + $0x10] sm:$0xff] }
 0x45d   : > { %v6172_v19 = vor.u32 %v6171_v28, %v6168_v25 }
 0x45e   : > { %14659 = vmatpush3.bf16.msra.mxu1 %v16038_v1  ;;  %v6544_v1 = vshll.u32 %v6335_v50, 16  ;;  %v6368_v50 = vrot.slane %v18935_v21, 4 }
 0x45f   : > { %14676 = vmatprep.subr.bf16.mxu1 %v16039_v10  ;;  %v6173_v40 = vsel %vm3194_vm4, %v18944_v6, %v6172_v19 }
 0x460   : > { %v6369_v21 = vsel %vm1011_vm3, %v18981_v18, %v6368_v50 }
 0x461   : > { %14645 = vmatmul.mubr.msk.bf16.gmra.mrb[104].mxu1 %vm380_vm1, %v18835_v56  ;;  %v16040_v56 = vld [vmem:[%s20491_s4 + $0xa8] sm:$0xff]  }
 0x462   : > { %14648 = vmatprep.mubr.msk.bf16.mxu1 %vm380_vm1, %v6164_v31 }
 0x469   : > { %14649 = vmatmul.mubr.msk.bf16.gmra.mrb[108].mxu1 %vm380_vm1, %v6173_v40 }
 0x46a   : > { %14660 = vmatprep.mubr.msk.bf16.mxu1 %vm380_vm1, %v6355_v23 }
 0x471   : > { %14661 = vmatmul.mubr.msk.bf16.vlgmr.msra.gmra.mrb[96].mxu1 %vm380_vm1, %v18699_v52  ;;  %v18978_v52 = vld [vmem:[%s20491_s4 + $0xc0] sm:$0xff]  }
 0x472   : > { %14677 = vmatpush3.bf16.msra.mxu1 %v16039_v10  ;;  %14664 = vmatprep.mubr.msk.bf16.mxu1 %vm380_vm1, %v18716_v32  ;;  %v20692_v32 = vld [vmem:[#allocation19_spill] sm:$0xff]  ;;  %v6546_v10 = vrot.slane %v6544_v1, 5 }
 0x473   : > { %14678 = vmatprep.subr.bf16.mxu1 %v16040_v56  ;;  %v5079_v60 = vsub.s32 0, %v20692_v32 }
 0x474   : > { %v6547_v4 = vor.u32 %v6546_v10, %v6543_v41 }
 0x475   : > { %v18991_v59 = vrot.slane %v2996_v30, %v5079_v60 }
 0x476   : > { %14679 = vmatpush3.bf16.msra.mxu1 %v16040_v56  ;;  %v5047_v56 = vunpack.c.h.bf16 %v5029_v9  ;;  %v5031_v9 = vld [vmem:[%s16681_s24 + $0x18] sm:$0xff] }
 0x477   : > { %14680 = vmatprep.subr.bf16.mxu1 %v16041_v17 }
 0x479   : > { %14665 = vmatmul.mubr.msk.bf16.gmra.mrb[100].mxu1 %vm380_vm1, %v18721_v57  ;;  %v5083_v57 = vsub.s32 1, %v20692_v32 }
 0x47a   : > { %14668 = vmatprep.mubr.msk.bf16.mxu1 %vm380_vm1, %v18735_v63  ;;  %14681 = vmatpush3.bf16.msra.mxu1 %v16041_v17  ;;  %v5028_v63 = vld [vmem:[%s16681_s24] sm:$0xff] }
 0x47b   : > { %14682 = vmatprep.subr.bf16.mxu1 %v16042_v48  ;;  %v18994_v5 = vrot.slane %v2996_v30, %v5083_v57  ;;  %v5044_v25 = vunpack.c.l.bf16 %v5028_v63  ;;  %v5045_v31 = vunpack.c.h.bf16 %v5028_v63  ;;  %v6551_v30 = vsel %vm3429_vm5, %v6547_v4, %v18853_v27  ;;  %v16055_v63 = vld [vmem:[#allocation9] ss:$8 sps:$4 sm:$0xff]  }
 0x47e   : > { %14683 = vmatpush3.bf16.msra.mxu1 %v16042_v48 }
 0x47f   : > { %14700 = vmatprep.subr.bf16.mxu1 %v18978_v52 }
 0x481   : > { %14669 = vmatmul.mubr.msk.bf16.gmra.mrb[104].mxu1 %vm380_vm1, %v18741_v13 }
 0x482   : > { %14672 = vmatprep.mubr.msk.bf16.mxu1 %vm380_vm1, %v6367_v54  ;;  %v16057_v54 = vld [vmem:[#allocation9 + $0x4] ss:$8 sps:$4 sm:$0xff]  }
 0x483   : > { %7575 = vmatprep.subr.bf16.mxu0 %v16057_v54  ;;  %v16061_v54 = vld [vmem:[#allocation9 + $0x20] ss:$8 sps:$4 sm:$0xff]  }
 0x484   : > { %v5185_v28 = vpop.f32.mrb[64].mxu1  ;;  %7576 = vmatpush1.bf16.msra.mxu0 %v16055_v63  ;;  %v5032_v63 = vld [vmem:[%s16681_s24 + $0x20] sm:$0xff] }
 0x485   : > { %v5186_v13 = vadd.f32 %v5185_v28, %v18991_v59  ;;  %v5187_v19 = vpop.f32.mrb[65].mxu1 }
 0x486   : > { %v5188_v40 = vadd.f32 %v5187_v19, %v18994_v5  ;;  %v5189_v23 = vpop.f32.mrb[66].mxu1 }
 0x487   : > { %v5264_v17 = vadd.f32 %v5186_v13, %v5044_v25  ;;  %v5190_v48 = vadd.f32 %v5189_v23, %v18991_v59  ;;  %v5191_v32 = vpop.f32.mrb[67].mxu1  ;;  %v16060_v25 = vld [vmem:[#allocation9 + $0x14] ss:$8 sps:$4 sm:$0xff]   ;;  %v5050_v23 = vunpack.c.l.bf16 %v5031_v9 }
 0x488   : > { %v5265_v60 = vadd.f32 %v5188_v40, %v5045_v31  ;;  %v5192_v51 = vadd.f32 %v5191_v32, %v18994_v5  ;;  %v5048_v31 = vunpack.c.l.bf16 %v5030_v20  ;;  %v16058_v40 = vld [vmem:[#allocation9 + $0x10] ss:$8 sps:$4 sm:$0xff]   ;;  %7577 = vmatprep.subr.bf16.mxu0 %v16060_v25 }
 0x489   : > { %v5296_v1 = vmax.f32 %v5264_v17, 0.0  ;;  %v5266_v57 = vadd.f32 %v5190_v48, %v5046_v36  ;;  %14673 = vmatmul.mubr.msk.bf16.gmra.mrb[108].mxu1 %vm380_vm1, %v6369_v21  ;;  %v5049_v36 = vunpack.c.h.bf16 %v5030_v20  ;;  %7578 = vmatpush1.bf16.msra.mxu0 %v16058_v40  ;;  %v5053_v40 = vunpack.c.h.bf16 %v5032_v63 }
 0x48a   : > { %v5297_v41 = vmax.f32 %v5265_v60, 0.0  ;;  %v5267_v10 = vadd.f32 %v5192_v51, %v5047_v56  ;;  %14684 = vmatprep.mubr.msk.bf16.mxu1 %vm380_vm1, %v6551_v30  ;;  %v16063_v56 = vld [vmem:[#allocation9 + $0x24] ss:$8 sps:$4 sm:$0xff]   ;;  %v5051_v60 = vunpack.c.h.bf16 %v5031_v9 }
 0x48b   : > { %v5298_v28 = vmax.f32 %v5266_v57, 0.0  ;;  %7579 = vmatprep.subr.bf16.mxu0 %v16063_v56 }
 0x48c   : > { %v13586_v50 = vpack.c.bf16 %v5297_v41, %v5296_v1  ;;  %v5299_v13 = vmax.f32 %v5267_v10, 0.0  ;;  %v5195_v19 = vpop.f32.mrb[68].mxu1  ;;  %v16044_v1 = vld [vmem:[%s20491_s4 + $0xc8] sm:$0xff]  }
 0x48d   : > { %v5196_v27 = vadd.f32 %v5195_v19, %v18991_v59  ;;  %v5197_v4 = vpop.f32.mrb[69].mxu1  ;;  %7580 = vmatpush1.bf16.msra.mxu0 %v16061_v54 }
 0x48e   : > { %5424 = vst [vmem:[%s19013_s21] sm:$0xff] %v13586_v50  ;;  %v13587_v17 = vpack.c.bf16 %v5299_v13, %v5298_v28  ;;  %v5198_v48 = vadd.f32 %v5197_v4, %v18994_v5  ;;  %v5199_v32 = vpop.f32.mrb[70].mxu1  ;;  %v5033_v28 = vld [vmem:[%s16681_s24 + $0x28] sm:$0xff]  ;;  %v5052_v50 = vunpack.c.l.bf16 %v5032_v63  ;;  %v16045_v13 = vld [vmem:[%s20491_s4 + $0xd0] sm:$0xff]  }
 0x48f   : > { %v5268_v51 = vadd.f32 %v5196_v27, %v5048_v31  ;;  %v5200_v21 = vadd.f32 %v5199_v32, %v18991_v59  ;;  %v5201_v20 = vpop.f32.mrb[71].mxu1  ;;  %v5054_v4 = vunpack.c.l.bf16 %v5033_v28  ;;  %v6746_v63 = vld [vmem:[#allocation2 + $0x50] sm:$0xf8] }
 0x490   : > { %5425 = vst [vmem:[%s19013_s21 + $0x8] sm:$0xff] %v13587_v17  ;;  %v5269_v57 = vadd.f32 %v5198_v48, %v5049_v36  ;;  %v5202_v30 = vadd.f32 %v5201_v20, %v18994_v5  ;;  %v5055_v17 = vunpack.c.h.bf16 %v5033_v28 }
 0x491   : > { %v5300_v41 = vmax.f32 %v5268_v51, 0.0  ;;  %v5270_v10 = vadd.f32 %v5200_v21, %v5050_v23  ;;  %14685 = vmatmul.mubr.msk.bf16.vlgmr.msra.gmra.mrb[96].mxu1 %vm380_vm1, %v18868_v62  ;;  %v16046_v51 = vld [vmem:[%s20491_s4 + $0xd8] sm:$0xff]   ;;  %v6531_v21 = vld [vmem:[#allocation2 + $0x88] sm:$0x1f] }
 0x492   : > { %v5301_v9 = vmax.f32 %v5269_v57, 0.0  ;;  %v5271_v25 = vadd.f32 %v5202_v30, %v5051_v60  ;;  %14701 = vmatpush3.bf16.msra.mxu1 %v18978_v52  ;;  %14688 = vmatprep.mubr.msk.bf16.mxu1 %vm380_vm1, %v18883_v43  ;;  %v5034_v30 = vld [vmem:[%s16681_s24 + $0x30] sm:$0xff] }
 0x493   : > { %v5302_v31 = vmax.f32 %v5270_v10, 0.0  ;;  %14702 = vmatprep.subr.bf16.mxu1 %v16044_v1 }
 0x494   : > { %v13588_v19 = vpack.c.bf16 %v5301_v9, %v5300_v41  ;;  %v5303_v36 = vmax.f32 %v5271_v25, 0.0  ;;  %v5205_v62 = vpop.f32.mrb[72].mxu1  ;;  %v5035_v9 = vld [vmem:[%s16681_s24 + $0x38] sm:$0xff]  ;;  %v6577_v25 = vshrl.u32 %v6531_v21, 16 }
 0x495   : > { %v5206_v27 = vadd.f32 %v5205_v62, %v18991_v59  ;;  %v5207_v52 = vpop.f32.mrb[73].mxu1 }
 0x496   : > { %5426 = vst [vmem:[%s19013_s21 + $0x10] sm:$0xff] %v13588_v19  ;;  %v13589_v43 = vpack.c.bf16 %v5303_v36, %v5302_v31  ;;  %v5208_v23 = vadd.f32 %v5207_v52, %v18994_v5  ;;  %v5209_v56 = vpop.f32.mrb[74].mxu1  ;;  %14703 = vmatpush3.bf16.msra.mxu1 %v16044_v1  ;;  %v5056_v31 = vunpack.c.l.bf16 %v5034_v30  ;;  %v6764_v19 = vshrl.u32 %v6746_v63, 16  ;;  %v19051_v36 = vld [vmem:[%s20491_s4 + $0xe0] sm:$0xff]  }
 0x497   : > { %v5272_v48 = vadd.f32 %v5206_v27, %v5052_v50  ;;  %v5210_v32 = vadd.f32 %v5209_v56, %v18991_v59  ;;  %v5211_v60 = vpop.f32.mrb[75].mxu1  ;;  %14704 = vmatprep.subr.bf16.mxu1 %v16045_v13  ;;  %v6580_v50 = vshll.u32 %v6531_v21, 16  ;;  %v5057_v27 = vunpack.c.h.bf16 %v5034_v30 }
 0x498   : > { %5427 = vst [vmem:[%s19013_s21 + $0x18] sm:$0xff] %v13589_v43  ;;  %v5273_v20 = vadd.f32 %v5208_v23, %v5053_v40  ;;  %v5212_v57 = vadd.f32 %v5211_v60, %v18994_v5  ;;  %v6767_v52 = vshll.u32 %v6746_v63, 16  ;;  %v6579_v21 = vrot.slane %v6577_v25, 4  ;;  %v5036_v63 = vld [vmem:[%s16681_s24 + $0x40] sm:$0xff] }
 0x499   : > { %v5304_v54 = vmax.f32 %v5272_v48, 0.0  ;;  %v5274_v41 = vadd.f32 %v5210_v32, %v5054_v4  ;;  %14689 = vmatmul.mubr.msk.bf16.gmra.mrb[100].mxu1 %vm380_vm1, %v18892_v38  ;;  %v5058_v4 = vunpack.c.l.bf16 %v5035_v9  ;;  %v20694_v25 = vshll.u32 %v18188_v55, 16 }
 0x49a   : > { %v5305_v1 = vmax.f32 %v5273_v20, 0.0  ;;  %v5275_v10 = vadd.f32 %v5212_v57, %v5055_v17  ;;  %14692 = vmatprep.mubr.msk.bf16.mxu1 %vm380_vm1, %v18900_v45  ;;  %14705 = vmatpush3.bf16.msra.mxu1 %v16045_v13  ;;  %v5059_v17 = vunpack.c.h.bf16 %v5035_v9  ;;  %v6582_v20 = vrot.slane %v6580_v50, 5 }
 0x49b   : > { %v5306_v28 = vmax.f32 %v5274_v41, 0.0  ;;  %14706 = vmatprep.subr.bf16.mxu1 %v16046_v51  ;;  %v6769_v41 = vrot.slane %v6767_v52, 4 }
 0x49c   : > { %v13590_v38 = vpack.c.bf16 %v5305_v1, %v5304_v54  ;;  %v5307_v62 = vmax.f32 %v5275_v10, 0.0  ;;  %v5215_v40 = vpop.f32.mrb[76].mxu1  ;;  %v6766_v54 = vrot.slane %v6764_v19, 3 }
 0x49d   : > { %v5216_v45 = vadd.f32 %v5215_v40, %v18991_v59  ;;  %v5217_v13 = vpop.f32.mrb[77].mxu1  ;;  %v6583_v40 = vor.u32 %v6582_v20, %v6579_v21 }
 0x49e   : > { %5428 = vst [vmem:[%s19013_s21 + $0x20] sm:$0xff] %v13590_v38  ;;  %v13591_v43 = vpack.c.bf16 %v5307_v62, %v5306_v28  ;;  %v5218_v23 = vadd.f32 %v5217_v13, %v18994_v5  ;;  %v5219_v56 = vpop.f32.mrb[78].mxu1  ;;  %14707 = vmatpush3.bf16.msra.mxu1 %v16046_v51  ;;  %v20693_v51 = vshrl.u32 %v18188_v55, 16  ;;  %v6777_v28 = vrot.slane %v20694_v25, 4  ;;  %v5037_v38 = vld [vmem:[%s16681_s24 + $0x48] sm:$0xff] }
 0x49f   : > { %v5276_v48 = vadd.f32 %v5216_v45, %v5056_v31  ;;  %v5220_v32 = vadd.f32 %v5219_v56, %v18991_v59  ;;  %v5221_v60 = vpop.f32.mrb[79].mxu1  ;;  %14724 = vmatprep.subr.bf16.mxu1 %v19051_v36  ;;  %v5060_v62 = vunpack.c.l.bf16 %v5036_v63  ;;  %v5062_v55 = vunpack.c.l.bf16 %v5037_v38 }
 0x4a0   : > { %5429 = vst [vmem:[%s19013_s21 + $0x28] sm:$0xff] %v13591_v43  ;;  %v5277_v57 = vadd.f32 %v5218_v23, %v5057_v27  ;;  %v5222_v30 = vadd.f32 %v5221_v60, %v18994_v5  ;;  %v6774_v9 = vrot.slane %v20693_v51, 3  ;;  %v6770_v43 = vor.u32 %v6769_v41, %v6766_v54  ;;  %v5038_v41 = vld [vmem:[%s16681_s24 + $0x50] sm:$0xff] }
 0x4a1   : > { %v5308_v1 = vmax.f32 %v5276_v48, 0.0  ;;  %v5278_v10 = vadd.f32 %v5220_v32, %v5058_v4  ;;  %14693 = vmatmul.mubr.msk.bf16.gmra.mrb[104].mxu1 %vm380_vm1, %v18906_v39  ;;  %v5061_v39 = vunpack.c.h.bf16 %v5036_v63  ;;  %v5063_v48 = vunpack.c.h.bf16 %v5037_v38 }
 0x4a2   : > { %v5309_v31 = vmax.f32 %v5277_v57, 0.0  ;;  %v5279_v50 = vadd.f32 %v5222_v30, %v5059_v17  ;;  %14696 = vmatprep.mubr.msk.bf16.mxu1 %vm380_vm1, %v18169_v42  ;;  %v6778_v23 = vor.u32 %v6777_v28, %v6774_v9  ;;  %v6584_v20 = vsel %vm3429_vm5, %v18164_v8, %v6583_v40 }
 0x4a3   : > { %v5310_v19 = vmax.f32 %v5278_v10, 0.0  ;;  %v20695_v57 = vshrl.u32 %v18190_v58, 16  ;;  %v20697_v51 = vshrl.u32 %v18197_v22, 16  ;;  %v5064_v40 = vunpack.c.l.bf16 %v5038_v41 }
 0x4a4   : > { %v13592_v27 = vpack.c.bf16 %v5309_v31, %v5308_v1  ;;  %v5311_v52 = vmax.f32 %v5279_v50, 0.0  ;;  %v5225_v45 = vpop.f32.mrb[80].mxu1  ;;  %v20696_v1 = vshll.u32 %v18190_v58, 16  ;;  %v6779_v8 = vsel %vm3194_vm4, %v6770_v43, %v6778_v23 }
 0x4a5   : > { %v5226_v13 = vadd.f32 %v5225_v45, %v18991_v59  ;;  %v5227_v4 = vpop.f32.mrb[81].mxu1  ;;  %v6783_v30 = vrot.slane %v20695_v57, 3  ;;  %v6792_v9 = vrot.slane %v20697_v51, 3  ;;  %v20698_v31 = vshll.u32 %v18197_v22, 16  ;;  %v5040_v51 = vld [vmem:[%s16681_s24 + $0x60] sm:$0xff] }
 0x4a6   : > { %5430 = vst [vmem:[%s19013_s21 + $0x30] sm:$0xff] %v13592_v27  ;;  %v13593_v56 = vpack.c.bf16 %v5311_v52, %v5310_v19  ;;  %v5228_v42 = vadd.f32 %v5227_v4, %v18994_v5  ;;  %v5229_v17 = vpop.f32.mrb[82].mxu1  ;;  %v6786_v10 = vrot.slane %v20696_v1, 4  ;;  %v20699_v57 = vshrl.u32 %v18205_v15, 16 }
 0x4a7   : > { %v5280_v32 = vadd.f32 %v5226_v13, %v5060_v62  ;;  %v5230_v60 = vadd.f32 %v5229_v17, %v18991_v59  ;;  %v5231_v21 = vpop.f32.mrb[83].mxu1  ;;  %v6795_v50 = vrot.slane %v20698_v31, 4  ;;  %v5039_v62 = vld [vmem:[%s16681_s24 + $0x58] sm:$0xff] }
 0x4a8   : > { %5431 = vst [vmem:[%s19013_s21 + $0x38] sm:$0xff] %v13593_v56  ;;  %v5281_v63 = vadd.f32 %v5228_v42, %v5061_v39  ;;  %v5232_v54 = vadd.f32 %v5231_v21, %v18994_v5  ;;  %v5065_v39 = vunpack.c.h.bf16 %v5038_v41  ;;  %v6787_v13 = vor.u32 %v6786_v10, %v6783_v30 }
 0x4a9   : > { %v5312_v25 = vmax.f32 %v5280_v32, 0.0  ;;  %v5282_v28 = vadd.f32 %v5230_v60, %v5062_v55  ;;  %14697 = vmatmul.mubr.msk.bf16.gmra.mrb[108].mxu1 %vm380_vm1, %v6584_v20  ;;  %v5066_v43 = vunpack.c.l.bf16 %v5039_v62  ;;  %v6796_v22 = vor.u32 %v6795_v50, %v6792_v9  ;;  %v16048_v20 = vld [vmem:[%s20491_s4 + $0xe8] sm:$0xff]  }
 0x4aa   : > { %v5313_v38 = vmax.f32 %v5281_v63, 0.0  ;;  %v5283_v19 = vadd.f32 %v5232_v54, %v5063_v48  ;;  %14708 = vmatprep.mubr.msk.bf16.mxu1 %vm380_vm1, %v6779_v8  ;;  %v5067_v48 = vunpack.c.h.bf16 %v5039_v62  ;;  %v6801_v30 = vrot.slane %v20699_v57, 3 }
 0x4ab   : > { %v5314_v58 = vmax.f32 %v5282_v28, 0.0  ;;  %v20700_v63 = vshll.u32 %v18205_v15, 16  ;;  %v6788_v10 = vsel %vm3194_vm4, %v6778_v23, %v6787_v13  ;;  %v20701_v9 = vshrl.u32 %v18209_v26, 16  ;;  %v5041_v23 = vld [vmem:[%s16681_s24 + $0x68] sm:$0xff] }
 0x4ac   : > { %v13594_v27 = vpack.c.bf16 %v5313_v38, %v5312_v25  ;;  %v5315_v52 = vmax.f32 %v5283_v19, 0.0  ;;  %v5235_v45 = vpop.f32.mrb[84].mxu1  ;;  %v6797_v31 = vsel %vm3194_vm4, %v6787_v13, %v6796_v22  ;;  %v20702_v15 = vshll.u32 %v18209_v26, 16 }
 0x4ad   : > { %v5236_v4 = vadd.f32 %v5235_v45, %v18991_v59  ;;  %v5237_v55 = vpop.f32.mrb[85].mxu1  ;;  %v6804_v54 = vrot.slane %v20700_v63, 4  ;;  %v6810_v25 = vrot.slane %v20701_v9, 3  ;;  %v5069_v26 = vunpack.c.h.bf16 %v5040_v51 }
 0x4ae   : > { %5432 = vst [vmem:[%s19013_s21 + $0x40] sm:$0xff] %v13594_v27  ;;  %v13595_v56 = vpack.c.bf16 %v5315_v52, %v5314_v58  ;;  %v5238_v42 = vadd.f32 %v5237_v55, %v18994_v5  ;;  %v5239_v17 = vpop.f32.mrb[86].mxu1  ;;  %v6813_v50 = vrot.slane %v20702_v15, 4  ;;  %v5068_v58 = vunpack.c.l.bf16 %v5040_v51 }
 0x4af   : > { %v5284_v32 = vadd.f32 %v5236_v4, %v5064_v40  ;;  %v5240_v60 = vadd.f32 %v5239_v17, %v18991_v59  ;;  %v5241_v21 = vpop.f32.mrb[87].mxu1  ;;  %v16049_v40 = vld [vmem:[%s20491_s4 + $0xf0] sm:$0xff]   ;;  %v5070_v4 = vunpack.c.l.bf16 %v5041_v23  ;;  %v5071_v17 = vunpack.c.h.bf16 %v5041_v23 }
 0x4b0   : > { %5433 = vst [vmem:[%s19013_s21 + $0x48] sm:$0xff] %v13595_v56  ;;  %v5285_v41 = vadd.f32 %v5238_v42, %v5065_v39  ;;  %v5242_v1 = vadd.f32 %v5241_v21, %v18994_v5  ;;  %v6805_v39 = vor.u32 %v6804_v54, %v6801_v30  ;;  %v6814_v55 = vor.u32 %v6813_v50, %v6810_v25  ;;  %v16050_v21 = vld [vmem:[%s20491_s4 + $0xf8] sm:$0xff]   ;;  %v5042_v54 = vld [vmem:[%s16681_s24 + $0x70] sm:$0xff] }
 0x4b1   : > { %v5316_v28 = vmax.f32 %v5284_v32, 0.0  ;;  %v5286_v8 = vadd.f32 %v5240_v60, %v5066_v43  ;;  %14709 = vmatmul.mubr.msk.bf16.vlgmr.msra.gmra.mrb[96].mxu1 %vm380_vm1, %v6788_v10  ;;  %v20704_v25 = vshll.u32 %v18217_v35, 16  ;;  %v5072_v50 = vunpack.c.l.bf16 %v5042_v54 }
 0x4b2   : > { %v5317_v38 = vmax.f32 %v5285_v41, 0.0  ;;  %v5287_v19 = vadd.f32 %v5242_v1, %v5067_v48  ;;  %14725 = vmatpush3.bf16.msra.mxu1 %v19051_v36  ;;  %14712 = vmatprep.mubr.msk.bf16.mxu1 %vm380_vm1, %v6797_v31  ;;  %v6806_v63 = vsel %vm3194_vm4, %v6796_v22, %v6805_v39  ;;  %v20703_v41 = vshrl.u32 %v18217_v35, 16  ;;  %v19131_v1 = vld [vmem:[#allocation2 + $0x90] sm:$0xf] }
 0x4b3   : > { %v5318_v62 = vmax.f32 %v5286_v8, 0.0  ;;  %14726 = vmatprep.subr.bf16.mxu1 %v16048_v20  ;;  %v6815_v9 = vsel %vm3194_vm4, %v6805_v39, %v6814_v55  ;;  %v5043_v22 = vld [vmem:[%s16681_s24 + $0x78] sm:$0xff] }
 0x4b4   : > { %v13596_v27 = vpack.c.bf16 %v5317_v38, %v5316_v28  ;;  %v5319_v52 = vmax.f32 %v5287_v19, 0.0  ;;  %v5245_v45 = vpop.f32.mrb[88].mxu1  ;;  %v6831_v28 = vrot.slane %v20704_v25, 4  ;;  %v6835_v38 = vshrl.u32 %v19131_v1, 16  ;;  %v16051_v19 = vld [vmem:[%s20491_s4 + $0x100] sm:$0xff]  }
 0x4b5   : > { %v5246_v13 = vadd.f32 %v5245_v45, %v18991_v59  ;;  %v5247_v36 = vpop.f32.mrb[89].mxu1 }
 0x4b6   : > { %5434 = vst [vmem:[%s19013_s21 + $0x50] sm:$0xff] %v13596_v27  ;;  %v13597_v43 = vpack.c.bf16 %v5319_v52, %v5318_v62  ;;  %v5248_v56 = vadd.f32 %v5247_v36, %v18994_v5  ;;  %v5249_v42 = vpop.f32.mrb[90].mxu1  ;;  %14727 = vmatpush3.bf16.msra.mxu1 %v16048_v20  ;;  %v6828_v20 = vrot.slane %v20703_v41, 3  ;;  %v6838_v27 = vshll.u32 %v19131_v1, 16 }
 0x4b7   : > { %v5288_v48 = vadd.f32 %v5246_v13, %v5068_v58  ;;  %v5250_v32 = vadd.f32 %v5249_v42, %v18991_v59  ;;  %v5251_v60 = vpop.f32.mrb[91].mxu1  ;;  %14728 = vmatprep.subr.bf16.mxu1 %v16049_v40  ;;  %v5073_v58 = vunpack.c.h.bf16 %v5042_v54 }
 0x4b8   : > { %5435 = vst [vmem:[%s19013_s21 + $0x58] sm:$0xff] %v13597_v43  ;;  %v5289_v57 = vadd.f32 %v5248_v56, %v5069_v26  ;;  %v5252_v30 = vadd.f32 %v5251_v60, %v18994_v5  ;;  %v19145_v26 = vor.u32 %v6831_v28, %v6828_v20  ;;  %v6824_v60 = vsel %vm3194_vm4, %v6814_v55, %v18944_v6  ;;  %v7004_v20 = vld [vmem:[#allocation2 + $0x50] sm:$0xf0]  ;;  %v16166_v28 = vld [vmem:[#allocation2 + $0x58] sm:$0xff] }
 0x4b9   : > { %v5320_v10 = vmax.f32 %v5288_v48, 0.0  ;;  %v5290_v51 = vadd.f32 %v5250_v32, %v5070_v4  ;;  %14713 = vmatmul.mubr.msk.bf16.gmra.mrb[100].mxu1 %vm380_vm1, %v6806_v63  ;;  %v5075_v4 = vunpack.c.h.bf16 %v5043_v22  ;;  %v7022_v25 = vrot.slane %v7004_v20, 4 }
 0x4ba   : > { %v5321_v8 = vmax.f32 %v5289_v57, 0.0  ;;  %v5291_v31 = vadd.f32 %v5252_v30, %v5071_v17  ;;  %14716 = vmatprep.mubr.msk.bf16.mxu1 %vm380_vm1, %v6815_v9  ;;  %14729 = vmatpush3.bf16.msra.mxu1 %v16049_v40  ;;  %v5074_v40 = vunpack.c.l.bf16 %v5043_v22  ;;  %v6837_v17 = vrot.slane %v6835_v38, 3  ;;  %v16168_v38 = vld [vmem:[#allocation2 + $0x68] sm:$0xff] }
 0x4bb   : > { %v5322_v15 = vmax.f32 %v5290_v51, 0.0  ;;  %14730 = vmatprep.subr.bf16.mxu1 %v16050_v21  ;;  %v6840_v57 = vrot.slane %v6838_v27, 4  ;;  %v16053_v27 = vld [vmem:[%s20491_s4 + $0x110] sm:$0xff]  }
 0x4bc   : > { %v13598_v23 = vpack.c.bf16 %v5321_v8, %v5320_v10  ;;  %v5323_v62 = vmax.f32 %v5291_v31, 0.0  ;;  %v5255_v35 = vpop.f32.mrb[92].mxu1  ;;  %v7023_v8 = vrot.slane %v16166_v28, 4 }
 0x4bd   : > { %v5256_v52 = vadd.f32 %v5255_v35, %v18991_v59  ;;  %v5257_v45 = vpop.f32.mrb[93].mxu1  ;;  %v6841_v55 = vor.u32 %v6840_v57, %v6837_v17  ;;  %v7037_v57 = vrot.slane %v19131_v1, 4 }
 0x4be   : > { %5436 = vst [vmem:[%s19013_s21 + $0x60] sm:$0xff] %v13598_v23  ;;  %v13599_v39 = vpack.c.bf16 %v5323_v62, %v5322_v15  ;;  %v5258_v13 = vadd.f32 %v5257_v45, %v18994_v5  ;;  %v5259_v36 = vpop.f32.mrb[94].mxu1  ;;  %14731 = vmatpush3.bf16.msra.mxu1 %v16050_v21  ;;  %v6833_v21 = vsel %vm3194_vm4, %v18944_v6, %v19145_v26  ;;  %v16167_v15 = vld [vmem:[#allocation2 + $0x60] sm:$0xff]  ;;  %v7027_v23 = vrot.slane %v16168_v38, 4  ;;  %v16052_v62 = vld [vmem:[%s20491_s4 + $0x108] sm:$0xff]  }
 0x4bf   : > { %v5292_v43 = vadd.f32 %v5256_v52, %v5072_v50  ;;  %v5260_v56 = vadd.f32 %v5259_v36, %v18991_v59  ;;  %v5261_v42 = vpop.f32.mrb[95].mxu1  ;;  %14748 = vmatprep.subr.bf16.mxu1 %v16051_v19  ;;  %v6842_v22 = vsel %vm3194_vm4, %v19145_v26, %v6841_v55  ;;  %v7024_v6 = vsel %vm1011_vm3, %v7022_v25, %v7023_v8  ;;  %v16169_v52 = vld [vmem:[#allocation2 + $0x70] sm:$0xff] }
 0x4c0   : > { %5437 = vst [vmem:[%s19013_s21 + $0x68] sm:$0xff] %v13599_v39  ;;  %v5293_v48 = vadd.f32 %v5258_v13, %v5073_v58  ;;  %v5262_v32 = vadd.f32 %v5261_v42, %v18994_v5  ;;  %v7025_v50 = vrot.slane %v16167_v15, 4  ;;  %v7029_v45 = vrot.slane %v16169_v52, 4  ;;  %v16054_v13 = vld [vmem:[%s20491_s4 + $0x118] sm:$0xff]  }
 0x4c1   : > { %v5324_v30 = vmax.f32 %v5292_v43, 0.0  ;;  %v5294_v63 = vadd.f32 %v5260_v56, %v5074_v40  ;;  %14717 = vmatmul.mubr.msk.bf16.gmra.mrb[104].mxu1 %vm380_vm1, %v6824_v60  ;;  %v16170_v40 = vld [vmem:[#allocation2 + $0x78] sm:$0xff]  ;;  %v7210_v56 = vshrl.u32 %v7004_v20, 16  ;;  %v7213_v42 = vshll.u32 %v7004_v20, 16 }
 0x4c2   : > { %v5325_v54 = vmax.f32 %v5293_v48, 0.0  ;;  %v5295_v41 = vadd.f32 %v5262_v32, %v5075_v4  ;;  %14720 = vmatprep.mubr.msk.bf16.mxu1 %vm380_vm1, %v6833_v21  ;;  %v7026_v35 = vsel %vm1011_vm3, %v7023_v8, %v7025_v50  ;;  %v7028_v58 = vsel %vm1011_vm3, %v7025_v50, %v7027_v23  ;;  %v16171_v4 = vld [vmem:[#allocation2 + $0x88] sm:$0xff] }
 0x4c3   : > { %v5326_v10 = vmax.f32 %v5294_v63, 0.0  ;;  %v7031_v39 = vrot.slane %v16170_v40, 4  ;;  %v7030_v36 = vsel %vm1011_vm3, %v7027_v23, %v7029_v45  ;;  %v19183_v43 = vrot.slane %v16171_v4, 4 }
 0x4c4   : > { %v13600_v51 = vpack.c.bf16 %v5325_v54, %v5324_v30  ;;  %v5327_v9 = vmax.f32 %v5295_v41, 0.0  ;;  %v7212_v32 = vrot.slane %v7210_v56, 4  ;;  %v7215_v60 = vrot.slane %v7213_v42, 5 }
 0x4c5   : > { %v7034_v17 = vsel %vm1011_vm3, %v7031_v39, %v18981_v18  ;;  %v7036_v48 = vsel %vm1011_vm3, %v18981_v18, %v19183_v43  ;;  %v7038_v63 = vsel %vm1011_vm3, %v19183_v43, %v7037_v57  ;;  %v7200_v18 = vld [vmem:[#allocation2 + $0x90] sm:$0x1f] }
 0x4c6   : > { %5438 = vst [vmem:[%s19013_s21 + $0x70] sm:$0xff] %v13600_v51  ;;  %v13601_v31 = vpack.c.bf16 %v5327_v9, %v5326_v10  ;;  %v7216_v30 = vor.u32 %v7215_v60, %v7212_v32  ;;  %v7246_v1 = vshrl.u32 %v7200_v18, 16  ;;  %v7249_v54 = vshll.u32 %v7200_v18, 16  ;;  %v19218_v10 = vld [vmem:[#allocation8] ss:$0 sm:$0xff] }
 0x4c7   : > { %v16070_v32 = vld [vmem:[%s20491_s4 + $0x38] sm:$0xff]  }
 0x4c8   : > { %5439 = vst [vmem:[%s19013_s21 + $0x78] sm:$0xff] %v13601_v31  ;;  %v7220_v21 = vsel %vm3429_vm5, %v7216_v30, %v18236_v37  ;;  %v7248_v41 = vrot.slane %v7246_v1, 4  ;;  %v7251_v20 = vrot.slane %v7249_v54, 5  ;;  %v16071_v54 = vld [vmem:[%s20491_s4] sm:$0xff]  }
 0x4c9   : > { %14721 = vmatmul.mubr.msk.bf16.gmra.mrb[108].mxu1 %vm380_vm1, %v6842_v22 }
 0x4ca   : > { %14732 = vmatprep.mubr.msk.bf16.mxu1 %vm380_vm1, %v7024_v6  ;;  %v7252_v37 = vor.u32 %v7251_v20, %v7248_v41 }
 0x4d1   : > { %14733 = vmatmul.mubr.msk.bf16.vlgmr.msra.gmra.mrb[96].mxu1 %vm380_vm1, %v7026_v35 }
 0x4d2   : > { %14749 = vmatpush3.bf16.msra.mxu1 %v16051_v19  ;;  %14736 = vmatprep.mubr.msk.bf16.mxu1 %vm380_vm1, %v7028_v58  ;;  %v7032_v19 = vsel %vm1011_vm3, %v7029_v45, %v7031_v39 }
 0x4d3   : > { %14750 = vmatprep.subr.bf16.mxu1 %v16052_v62 }
 0x4d6   : > { %14751 = vmatpush3.bf16.msra.mxu1 %v16052_v62  ;;  %v16068_v62 = vld [vmem:[%s20491_s4 + $0x28] sm:$0xff]  }
 0x4d7   : > { %14752 = vmatprep.subr.bf16.mxu1 %v16053_v27 }
 0x4d9   : > { %14737 = vmatmul.mubr.msk.bf16.gmra.mrb[100].mxu1 %vm380_vm1, %v7030_v36 }
 0x4da   : > { %14740 = vmatprep.mubr.msk.bf16.mxu1 %vm380_vm1, %v7032_v19  ;;  %14753 = vmatpush3.bf16.msra.mxu1 %v16053_v27 }
 0x4db   : > { %14754 = vmatprep.subr.bf16.mxu1 %v16054_v13 }
 0x4de   : > { %14755 = vmatpush3.bf16.msra.mxu1 %v16054_v13  ;;  %v16069_v13 = vld [vmem:[%s20491_s4 + $0x30] sm:$0xff]  }
 0x4e1   : > { %14741 = vmatmul.mubr.msk.bf16.gmra.mrb[104].mxu1 %vm380_vm1, %v7034_v17 }
 0x4e2   : > { %14744 = vmatprep.mubr.msk.bf16.mxu1 %vm380_vm1, %v7036_v48 }
 0x4e9   : > { %14745 = vmatmul.mubr.msk.bf16.gmra.mrb[108].mxu1 %vm380_vm1, %v7038_v63 }
 0x4ea   : > { %14756 = vmatprep.mubr.msk.bf16.mxu1 %vm380_vm1, %v7220_v21 }
 0x4f1   : > { %14757 = vmatmul.mubr.msk.bf16.vlgmr.msra.gmra.mrb[96].mxu1 %vm380_vm1, %v18241_v24  ;;  %v7253_v24 = vsel %vm3429_vm5, %v18261_v2, %v7252_v37 }
 0x4f2   : > { %14760 = vmatprep.mubr.msk.bf16.mxu1 %vm380_vm1, %v18244_v11  ;;  %v16064_v11 = vld [vmem:[#allocation9 + $0x30] ss:$8 sps:$4 sm:$0xff]  }
 0x4f9   : > { %14761 = vmatmul.mubr.msk.bf16.gmra.mrb[100].mxu1 %vm380_vm1, %v18264_v3  ;;  %v16067_v3 = vld [vmem:[%s20491_s4 + $0x20] sm:$0xff]  }
 0x4fa   : > { %14764 = vmatprep.mubr.msk.bf16.mxu1 %vm380_vm1, %v18269_v12  ;;  %v16066_v12 = vld [vmem:[#allocation9 + $0x34] ss:$8 sps:$4 sm:$0xff]  }
 0x4fb   : > { %7581 = vmatprep.subr.bf16.mxu0 %v16066_v12 }
 0x4fc   : > { %7582 = vmatpush1.bf16.msra.mxu0 %v16064_v11 }
 0x4fd   : > { %14772 = vmatprep.subr.bf16.mxu0 %v16067_v3 }
 0x501   : > { %14765 = vmatmul.mubr.msk.bf16.gmra.mrb[104].mxu1 %vm380_vm1, %v18273_v7 }
 0x502   : > { %14768 = vmatprep.mubr.msk.bf16.mxu1 %vm380_vm1, %v18278_v16 }
 0x509   : > { %14769 = vmatmul.mubr.msk.bf16.gmra.mrb[108].mxu1 %vm380_vm1, %v7253_v24 }
 0x50a   : > { %10031 = vmatprep.mubr.bf16.mxu1 %v20677_v34 }
 0x5c4   : > { %v14758_v7 = vpop.f32.mrb[96].mxu1 }
 0x5c5   : > { %v7417_v16 = vadd.f32 %v19218_v10, %v14758_v7  ;;  %v7336_v51 = vpop.f32.mrb[97].mxu1 }
 0x5c6   : > { %v7415_v9 = vadd.f32 %v19218_v10, %v7336_v51  ;;  %v14759_v55 = vpop.f32.mrb[98].mxu1 }
 0x5c7   : > { %v7418_v25 = vadd.f32 %v19218_v10, %v14759_v55  ;;  %v7339_v28 = vpop.f32.mrb[99].mxu1  ;;  %v7433_v31 = vmax.f32 %v7417_v16, 0.0 }
 0x5c8   : > { %v7416_v8 = vadd.f32 %v19218_v10, %v7339_v28  ;;  %v7431_v6 = vmax.f32 %v7415_v9, 0.0 }
 0x5c9   : > { %v7434_v22 = vmax.f32 %v7418_v25, 0.0 }
 0x5ca   : > { %v7432_v15 = vmax.f32 %v7416_v8, 0.0 }
 0x5cb   : > { %v7448_v50 = vpack.c.bf16 %v7434_v22, %v7433_v31 }
 0x5cc   : > { %v7447_v38 = vpack.c.bf16 %v7432_v15, %v7431_v6  ;;  %v14762_v23 = vpop.f32.mrb[100].mxu1 }
 0x5cd   : > { %v7421_v35 = vadd.f32 %v19218_v10, %v14762_v23  ;;  %v7352_v58 = vpop.f32.mrb[101].mxu1 }
 0x5ce   : > { %v7419_v27 = vadd.f32 %v19218_v10, %v7352_v58  ;;  %v14763_v52 = vpop.f32.mrb[102].mxu1  ;;  %13274 = vmatmul.mubr.msk.bf16.vlgmr.msra.gmra.mrb[80].mxu0 %vm380_vm1, %v7447_v38 }
 0x5cf   : > { %v7422_v45 = vadd.f32 %v19218_v10, %v14763_v52  ;;  %14773 = vmatpush3.bf16.msra.mxu0 %v16067_v3  ;;  %v7355_v40 = vpop.f32.mrb[103].mxu1  ;;  %7617 = vmatprep.mubr.bf16.mxu0 %v20677_v34  ;;  %v7437_v36 = vmax.f32 %v7421_v35, 0.0  ;;  %v19271_v35 = vld [vmem:[#allocation2 + $0x98] sm:$0xff]  ;;  %v16072_v52 = vld [vmem:[%s20491_s4 + $0x8] sm:$0xff]  }
 0x5d0   : > { %v7420_v39 = vadd.f32 %v19218_v10, %v7355_v40  ;;  %14774 = vmatprep.subr.bf16.mxu0 %v16068_v62  ;;  %v7435_v4 = vmax.f32 %v7419_v27, 0.0  ;;  %v7904_v27 = vrot.slane %v19271_v35, 4 }
 0x5d1   : > { %v7438_v19 = vmax.f32 %v7422_v45, 0.0 }
 0x5d2   : > { %v7436_v56 = vmax.f32 %v7420_v39, 0.0  ;;  %v19288_v39 = vld [vmem:[#allocation2 + $0xa0] sm:$0xff] }
 0x5d3   : > { %v7450_v42 = vpack.c.bf16 %v7438_v19, %v7437_v36  ;;  %14775 = vmatpush3.bf16.msra.mxu0 %v16068_v62  ;;  %v19268_v62 = vld [vmem:[#allocation2 + $0x90] sm:$0xff] }
 0x5d4   : > { %v7449_v17 = vpack.c.bf16 %v7436_v56, %v7435_v4  ;;  %v14766_v48 = vpop.f32.mrb[104].mxu1  ;;  %14776 = vmatprep.subr.bf16.mxu0 %v16069_v13  ;;  %v19274_v58 = vrot.slane %v19268_v62, 4  ;;  %v16073_v36 = vld [vmem:[%s20491_s4 + $0x10] sm:$0xff]   ;;  %v16074_v4 = vld [vmem:[%s20491_s4 + $0x18] sm:$0xff]  }
 0x5d5   : > { %v7425_v60 = vadd.f32 %v19218_v10, %v14766_v48  ;;  %v7368_v57 = vpop.f32.mrb[105].mxu1  ;;  %v16075_v48 = vld [vmem:[%s20491_s4 + $0x40] sm:$0xff]  }
 0x5d6   : > { %v7423_v30 = vadd.f32 %v19218_v10, %v7368_v57  ;;  %v14767_v63 = vpop.f32.mrb[106].mxu1  ;;  %13275 = vmatmul.mubr.msk.bf16.gmra.mrb[84].mxu0 %vm380_vm1, %v7448_v50  ;;  %v7903_v45 = vsel %vm1011_vm3, %v19183_v43, %v19274_v58  ;;  %v19286_v40 = vsel %vm1011_vm3, %v19274_v58, %v7904_v27  ;;  %v16173_v57 = vld [vmem:[#allocation2 + $0xb8] sm:$0xff] }
 0x5d7   : > { %v7426_v21 = vadd.f32 %v19218_v10, %v14767_v63  ;;  %v7371_v18 = vpop.f32.mrb[107].mxu1  ;;  %7627 = vmatprep.mubr.bf16.mxu0 %v20677_v34  ;;  %14777 = vmatpush3.bf16.msra.mxu0 %v16069_v13  ;;  %v7441_v41 = vmax.f32 %v7425_v60, 0.0  ;;  %v19292_v13 = vld [vmem:[#allocation2 + $0xa8] sm:$0xff]  ;;  %v7864_v60 = vld [vmem:[#allocation2 + $0x80] sm:$0xf8] }
 0x5d8   : > { %v7424_v1 = vadd.f32 %v19218_v10, %v7371_v18  ;;  %14778 = vmatprep.subr.bf16.mxu0 %v16070_v32  ;;  %v7439_v37 = vmax.f32 %v7423_v30, 0.0  ;;  %v7908_v19 = vrot.slane %v19292_v13, 4  ;;  %v19318_v30 = vrot.slane %v16173_v57, 4 }
 0x5d9   : > { %v7442_v20 = vmax.f32 %v7426_v21, 0.0  ;;  %v8062_v63 = vshrl.u32 %v7864_v60, 16  ;;  %v8065_v21 = vshll.u32 %v7864_v60, 16 }
 0x5da   : > { %v7440_v24 = vmax.f32 %v7424_v1, 0.0 }
 0x5db   : > { %v7452_v11 = vpack.c.bf16 %v7442_v20, %v7441_v41  ;;  %14779 = vmatpush3.bf16.msra.mxu0 %v16070_v32  ;;  %v8064_v41 = vrot.slane %v8062_v63, 3  ;;  %v8067_v20 = vrot.slane %v8065_v21, 4 }
 0x5dc   : > { %v7451_v12 = vpack.c.bf16 %v7440_v24, %v7439_v37  ;;  %v14770_v3 = vpop.f32.mrb[108].mxu1  ;;  %14796 = vmatprep.subr.bf16.mxu0 %v16071_v54  ;;  %v8079_v24 = vshrl.u32 %v19268_v62, 16 }
 0x5dd   : > { %v7429_v7 = vadd.f32 %v19218_v10, %v14770_v3  ;;  %v7384_v16 = vpop.f32.mrb[109].mxu1  ;;  %v8091_v3 = vshll.u32 %v19271_v35, 16 }
 0x5de   : > { %v7427_v51 = vadd.f32 %v19218_v10, %v7384_v16  ;;  %v14771_v9 = vpop.f32.mrb[110].mxu1  ;;  %13276 = vmatmul.mubr.msk.bf16.gmra.mrb[88].mxu0 %vm380_vm1, %v7449_v17  ;;  %v19310_v17 = vld [vmem:[#allocation2 + $0xb0] sm:$0xff] }
 0x5df   : > { %v7430_v55 = vadd.f32 %v19218_v10, %v14771_v9  ;;  %v7387_v25 = vpop.f32.mrb[111].mxu1  ;;  %7637 = vmatprep.mubr.bf16.mxu0 %v20677_v34  ;;  %v7445_v8 = vmax.f32 %v7429_v7, 0.0  ;;  %v7910_v32 = vrot.slane %v19310_v17, 4  ;;  %v8068_v7 = vor.u32 %v8067_v20, %v8064_v41  ;;  %v20705_v20 = vld [vmem:[#allocation18_spill] sm:$0xff] }
 0x5e0   : > { %v7428_v28 = vadd.f32 %v19218_v10, %v7387_v25  ;;  %v7443_v22 = vmax.f32 %v7427_v51, 0.0  ;;  %v19262_v10 = vld [vmem:[#allocation2 + $0x80] sm:$0xf0]  ;;  %v8081_v51 = vrot.slane %v8079_v24, 3 }
 0x5e1   : > { %v7446_v31 = vmax.f32 %v7430_v55, 0.0  ;;  %v7899_v38 = vrot.slane %v19262_v10, 4  ;;  %v19321_v18 = vsel %vm1011_vm3, %v7908_v19, %v7910_v32  ;;  %v19327_v1 = vsel %vm1011_vm3, %v7910_v32, %v19318_v30 }
 0x5e2   : > { %v7444_v6 = vmax.f32 %v7428_v28, 0.0  ;;  %v8077_v55 = vsel %vm3194_vm4, %v8068_v7, %v19145_v26  ;;  %v8093_v28 = vrot.slane %v8091_v3, 4  ;;  %v8118_v32 = vshll.u32 %v19310_v17, 16 }
 0x5e3   : > { %v7454_v15 = vpack.c.bf16 %v7446_v31, %v7445_v8  ;;  %v7901_v23 = vsel %vm1011_vm3, %v7899_v38, %v19183_v43  ;;  %v7906_v43 = vrot.slane %v19288_v39, 4  ;;  %v8097_v31 = vshrl.u32 %v19288_v39, 16  ;;  %v16076_v38 = vld [vmem:[%s20491_s4 + $0x48] sm:$0xff]  }
 0x5e4   : > { %v7453_v50 = vpack.c.bf16 %v7444_v6, %v7443_v22  ;;  %v8100_v22 = vshll.u32 %v19288_v39, 16  ;;  %v8120_v21 = vrot.slane %v8118_v32, 4 }
 0x5e5   : > { %v19303_v56 = vsel %vm1011_vm3, %v7904_v27, %v7906_v43  ;;  %v8099_v27 = vrot.slane %v8097_v31, 3 }
 0x5e6   : > { %13277 = vmatmul.mubr.msk.bf16.gmra.mrb[92].mxu0 %vm380_vm1, %v7450_v42  ;;  %v19308_v42 = vsel %vm1011_vm3, %v7906_v43, %v7908_v19 }
 0x5e7   : > { %7647 = vmatprep.mubr.bf16.mxu0 %v20677_v34 }
 0x5ee   : > { %13278 = vmatmul.mubr.msk.bf16.gmra.mrb[96].mxu0 %vm380_vm1, %v7451_v12  ;;  %v8088_v12 = vshrl.u32 %v19271_v35, 16  ;;  %v8316_v35 = vrot.slane %v8100_v22, 5 }
 0x5ef   : > { %7657 = vmatprep.mubr.bf16.mxu0 %v20677_v34 }
 0x5f0   : > { %v8090_v25 = vrot.slane %v8088_v12, 3 }
 0x5f2   : > { %v8094_v6 = vor.u32 %v8093_v28, %v8090_v25 }
 0x5f6   : > { %13279 = vmatmul.mubr.msk.bf16.gmra.mrb[100].mxu0 %vm380_vm1, %v7452_v11  ;;  %v8082_v11 = vshll.u32 %v19268_v62, 16  ;;  %v16080_v62 = vld [vmem:[%s20491_s4 + $0x68] sm:$0xff]  }
 0x5f7   : > { %7667 = vmatprep.mubr.bf16.mxu0 %v20677_v34 }
 0x5f8   : > { %v8084_v9 = vrot.slane %v8082_v11, 4 }
 0x5fa   : > { %v19352_v8 = vor.u32 %v8084_v9, %v8081_v51  ;;  %v16079_v9 = vld [vmem:[%s20491_s4 + $0x60] sm:$0xff]  }
 0x5fe   : > { %13280 = vmatmul.mubr.msk.bf16.gmra.mrb[104].mxu0 %vm380_vm1, %v7453_v50  ;;  %v8109_v50 = vshll.u32 %v19292_v13, 16 }
 0x5ff   : > { %7677 = vmatprep.mubr.bf16.mxu0 %v20677_v34 }
 0x600   : > { %v8111_v43 = vrot.slane %v8109_v50, 4 }
 0x606   : > { %13281 = vmatmul.mubr.msk.bf16.gmra.mrb[108].mxu0 %vm380_vm1, %v7454_v15  ;;  %v8106_v15 = vshrl.u32 %v19292_v13, 16 }
 0x607   : > { %14780 = vmatprep.mubr.msk.bf16.mxu0 %vm380_vm1, %v7901_v23  ;;  %v8086_v23 = vsel %vm3194_vm4, %v19145_v26, %v19352_v8  ;;  %v16077_v26 = vld [vmem:[%s20491_s4 + $0x50] sm:$0xff]  }
 0x60e   : > { %14781 = vmatmul.mubr.msk.bf16.vlgmr.msra.gmra.mrb[112].mxu0 %vm380_vm1, %v7903_v45  ;;  %v19371_v45 = vsel %vm3194_vm4, %v19352_v8, %v8094_v6 }
 0x60f   : > { %14797 = vmatpush3.bf16.msra.mxu0 %v16071_v54  ;;  %14784 = vmatprep.mubr.msk.bf16.mxu0 %vm380_vm1, %v19286_v40  ;;  %v19329_v54 = vld [vmem:[#allocation2 + $0xc0] sm:$0xf] }
 0x610   : > { %14798 = vmatprep.subr.bf16.mxu0 %v16072_v52  ;;  %v7914_v37 = vrot.slane %v19329_v54, 4  ;;  %v8133_v25 = vshrl.u32 %v19329_v54, 16  ;;  %v8136_v28 = vshll.u32 %v19329_v54, 16 }
 0x612   : > { %v7915_v16 = vsel %vm1011_vm3, %v19318_v30, %v7914_v37  ;;  %v20706_v37 = vshrl.u32 %v20705_v20, 16 }
 0x613   : > { %14799 = vmatpush3.bf16.msra.mxu0 %v16072_v52  ;;  %v8102_v52 = vrot.slane %v8100_v22, 4  ;;  %v16082_v22 = vld [vmem:[%s20491_s4 + $0x78] sm:$0xff]  }
 0x614   : > { %14800 = vmatprep.subr.bf16.mxu0 %v16073_v36  ;;  %v8126_v7 = vrot.slane %v20706_v37, 3  ;;  %v8312_v37 = vrot.slane %v8091_v3, 5  ;;  %v8319_v3 = vrot.slane %v8106_v15, 4 }
 0x615   : > { %v8103_v19 = vor.u32 %v8102_v52, %v8099_v27  ;;  %v8135_v52 = vrot.slane %v8133_v25, 3  ;;  %v16083_v25 = vld [vmem:[%s20491_s4 + $0x80] sm:$0xff]  }
 0x616   : > { %14785 = vmatmul.mubr.msk.bf16.gmra.mrb[116].mxu0 %vm380_vm1, %v19303_v56 }
 0x617   : > { %14788 = vmatprep.mubr.msk.bf16.mxu0 %vm380_vm1, %v19308_v42  ;;  %14801 = vmatpush3.bf16.msra.mxu0 %v16073_v36  ;;  %v8108_v36 = vrot.slane %v8106_v15, 3  ;;  %v19388_v57 = vsel %vm3194_vm4, %v8094_v6, %v8103_v19 }
 0x618   : > { %14802 = vmatprep.subr.bf16.mxu0 %v16074_v4 }
 0x619   : > { %v8112_v60 = vor.u32 %v8111_v43, %v8108_v36  ;;  %v8138_v36 = vrot.slane %v8136_v28, 4 }
 0x61b   : > { %14803 = vmatpush3.bf16.msra.mxu0 %v16074_v4  ;;  %v8115_v4 = vshrl.u32 %v19310_v17, 16  ;;  %v19397_v41 = vsel %vm3194_vm4, %v8103_v19, %v8112_v60  ;;  %v8139_v19 = vor.u32 %v8138_v36, %v8135_v52 }
 0x61c   : > { %14820 = vmatprep.subr.bf16.mxu0 %v16075_v48 }
 0x61d   : > { %v8117_v63 = vrot.slane %v8115_v4, 3  ;;  %v8323_v15 = vrot.slane %v8115_v4, 4 }
 0x61e   : > { %14789 = vmatmul.mubr.msk.bf16.gmra.mrb[120].mxu0 %vm380_vm1, %v19321_v18 }
 0x61f   : > { %14792 = vmatprep.mubr.msk.bf16.mxu0 %vm380_vm1, %v19327_v1 }
 0x626   : > { %14793 = vmatmul.mubr.msk.bf16.gmra.mrb[124].mxu0 %vm380_vm1, %v7915_v16  ;;  %v20707_v16 = vshll.u32 %v20705_v20, 16  ;;  %v8311_v20 = vrot.slane %v8088_v12, 4 }
 0x627   : > { %14804 = vmatprep.mubr.msk.bf16.mxu0 %vm380_vm1, %v8077_v55  ;;  %v8121_v55 = vor.u32 %v8120_v21, %v8117_v63  ;;  %v8308_v63 = vrot.slane %v8082_v11, 5  ;;  %v8315_v11 = vrot.slane %v8097_v31, 4 }
 0x628   : > { %v8129_v51 = vrot.slane %v20707_v16, 4  ;;  %v8313_v16 = vor.u32 %v8312_v37, %v8311_v20  ;;  %v16084_v37 = vld [vmem:[%s20491_s4 + $0x88] sm:$0xff]  }
 0x629   : > { %v19415_v27 = vsel %vm3194_vm4, %v8112_v60, %v8121_v55  ;;  %v8317_v39 = vor.u32 %v8316_v35, %v8315_v11  ;;  %v19521_v35 = vld [vmem:[#allocation2 + $0xc8] sm:$0xf] }
 0x62a   : > { %v19410_v6 = vor.u32 %v8129_v51, %v8126_v7  ;;  %v8320_v51 = vrot.slane %v8109_v50, 5  ;;  %v8324_v50 = vrot.slane %v8118_v32, 5  ;;  %v8501_v32 = vld [vmem:[#allocation2 + $0x88] sm:$0xf8] }
 0x62b   : > { %v19469_v13 = vsel %vm3429_vm5, %v8313_v16, %v8317_v39 }
 0x62c   : > { %v19421_v43 = vsel %vm3194_vm4, %v8121_v55, %v19410_v6  ;;  %v8140_v60 = vsel %vm3194_vm4, %v19410_v6, %v8139_v19  ;;  %v8321_v31 = vor.u32 %v8320_v51, %v8319_v3  ;;  %v8286_v55 = vld [vmem:[#allocation2 + $0xc0] sm:$0x1f]  ;;  %v8325_v4 = vor.u32 %v8324_v50, %v8323_v15  ;;  %v8759_v15 = vld [vmem:[#allocation2 + $0x88] sm:$0xf0] }
 0x62d   : > { %v8332_v28 = vshrl.u32 %v8286_v55, 16  ;;  %v8335_v17 = vshll.u32 %v8286_v55, 16  ;;  %v16087_v3 = vld [vmem:[%s20491_s4 + $0xa0] sm:$0xff]   ;;  %v8590_v51 = vshrl.u32 %v19521_v35, 16  ;;  %v8777_v50 = vrot.slane %v8759_v15, 4 }
 0x62e   : > { %14805 = vmatmul.mubr.msk.bf16.vlgmr.msra.gmra.mrb[112].mxu0 %vm380_vm1, %v8086_v23  ;;  %v8299_v23 = vshll.u32 %v19262_v10, 16  ;;  %v19486_v52 = vsel %vm3429_vm5, %v8321_v31, %v8325_v4 }
 0x62f   : > { %14821 = vmatpush3.bf16.msra.mxu0 %v16075_v48  ;;  %14808 = vmatprep.mubr.msk.bf16.mxu0 %vm380_vm1, %v19371_v45  ;;  %v16078_v48 = vld [vmem:[%s20491_s4 + $0x58] sm:$0xff]   ;;  %v8334_v36 = vrot.slane %v8332_v28, 4  ;;  %v8965_v28 = vshrl.u32 %v8759_v15, 16 }
 0x630   : > { %14822 = vmatprep.subr.bf16.mxu0 %v16076_v38 }
 0x633   : > { %14823 = vmatpush3.bf16.msra.mxu0 %v16076_v38  ;;  %v8296_v38 = vshrl.u32 %v19262_v10, 16 }
 0x634   : > { %14824 = vmatprep.subr.bf16.mxu0 %v16077_v26 }
 0x635   : > { %v8298_v54 = vrot.slane %v8296_v38, 4  ;;  %v8519_v38 = vshrl.u32 %v8501_v32, 16 }
 0x636   : > { %14809 = vmatmul.mubr.msk.bf16.gmra.mrb[116].mxu0 %vm380_vm1, %v19388_v57 }
 0x637   : > { %14812 = vmatprep.mubr.msk.bf16.mxu0 %vm380_vm1, %v19397_v41  ;;  %14825 = vmatpush3.bf16.msra.mxu0 %v16077_v26  ;;  %v8301_v26 = vrot.slane %v8299_v23, 5  ;;  %v8522_v23 = vshll.u32 %v8501_v32, 16  ;;  %v7463_v32 = vld [vmem:[%s16681_s24 + $0x80] sm:$0xff] }
 0x638   : > { %14826 = vmatprep.subr.bf16.mxu0 %v16078_v48 }
 0x639   : > { %v8302_v10 = vor.u32 %v8301_v26, %v8298_v54  ;;  %v8337_v54 = vrot.slane %v8335_v17, 5  ;;  %v20708_v26 = vld [vmem:[#allocation20_spill] sm:$0xff]  ;;  %v8968_v17 = vshll.u32 %v8759_v15, 16 }
 0x63a   : > { %v19492_v19 = vsel %vm3429_vm5, %v8325_v4, %v20708_v26 }
 0x63b   : > { %14827 = vmatpush3.bf16.msra.mxu0 %v16078_v48  ;;  %v8307_v48 = vrot.slane %v8079_v24, 4  ;;  %v8306_v21 = vsel %vm3429_vm5, %v8302_v10, %v18261_v2  ;;  %v8521_v10 = vrot.slane %v8519_v38, 3  ;;  %v7479_v38 = vunpack.c.l.bf16 %v7463_v32 }
 0x63c   : > { %14844 = vmatprep.subr.bf16.mxu0 %v16079_v9 }
 0x63d   : > { %v19439_v7 = vor.u32 %v8308_v63, %v8307_v48  ;;  %v8338_v48 = vor.u32 %v8337_v54, %v8334_v36  ;;  %v8970_v36 = vrot.slane %v8968_v17, 5  ;;  %v16111_v17 = vld [vmem:[#allocation9 + $0x24] ss:$8 sps:$4 sm:$0xff]  }
 0x63e   : > { %14813 = vmatmul.mubr.msk.bf16.gmra.mrb[120].mxu0 %vm380_vm1, %v19415_v27 }
 0x63f   : > { %14816 = vmatprep.mubr.msk.bf16.mxu0 %vm380_vm1, %v19421_v43  ;;  %v8310_v24 = vsel %vm3429_vm5, %v18261_v2, %v19439_v7  ;;  %v19454_v12 = vsel %vm3429_vm5, %v19439_v7, %v8313_v16  ;;  %v16081_v2 = vld [vmem:[%s20491_s4 + $0x70] sm:$0xff]  }
 0x640   : > { %v16085_v16 = vld [vmem:[%s20491_s4 + $0x90] sm:$0xff]  }
 0x646   : > { %14817 = vmatmul.mubr.msk.bf16.gmra.mrb[124].mxu0 %vm380_vm1, %v8140_v60  ;;  %v8524_v60 = vrot.slane %v8522_v23, 4  ;;  %v8967_v23 = vrot.slane %v8965_v28, 4 }
 0x647   : > { %14828 = vmatprep.mubr.msk.bf16.mxu0 %vm380_vm1, %v8306_v21  ;;  %v8339_v21 = vsel %vm3429_vm5, %v20708_v26, %v8338_v48  ;;  %v7480_v26 = vunpack.c.h.bf16 %v7463_v32 }
 0x648   : > { %v8525_v63 = vor.u32 %v8524_v60, %v8521_v10  ;;  %v8792_v10 = vrot.slane %v19521_v35, 4 }
 0x64a   : > { %v8534_v20 = vsel %vm3194_vm4, %v8525_v63, %v19352_v8  ;;  %v16086_v8 = vld [vmem:[%s20491_s4 + $0x98] sm:$0xff]  }
 0x64e   : > { %14829 = vmatmul.mubr.msk.bf16.vlgmr.msra.gmra.mrb[112].mxu0 %vm380_vm1, %v8310_v24 }
 0x64f   : > { %14845 = vmatpush3.bf16.msra.mxu0 %v16079_v9  ;;  %14832 = vmatprep.mubr.msk.bf16.mxu0 %vm380_vm1, %v19454_v12  ;;  %v19478_v9 = vsel %vm3429_vm5, %v8317_v39, %v8321_v31  ;;  %v8592_v39 = vrot.slane %v8590_v51, 3  ;;  %v16103_v51 = vld [vmem:[#allocation9] ss:$8 sps:$4 sm:$0xff]  }
 0x650   : > { %14846 = vmatprep.subr.bf16.mxu0 %v16080_v62 }
 0x653   : > { %14847 = vmatpush3.bf16.msra.mxu0 %v16080_v62  ;;  %v20709_v62 = vld [vmem:[#allocation17_spill] sm:$0xff] }
 0x654   : > { %14848 = vmatprep.subr.bf16.mxu0 %v16081_v2  ;;  %v20711_v11 = vshll.u32 %v20709_v62, 16 }
 0x656   : > { %14833 = vmatmul.mubr.msk.bf16.gmra.mrb[116].mxu0 %vm380_vm1, %v19469_v13 }
 0x657   : > { %14836 = vmatprep.mubr.msk.bf16.mxu0 %vm380_vm1, %v19478_v9  ;;  %14849 = vmatpush3.bf16.msra.mxu0 %v16081_v2 }
 0x658   : > { %14850 = vmatprep.subr.bf16.mxu0 %v16082_v22 }
 0x65b   : > { %14851 = vmatpush3.bf16.msra.mxu0 %v16082_v22 }
 0x65c   : > { %14868 = vmatprep.subr.bf16.mxu0 %v16083_v25 }
 0x65e   : > { %14837 = vmatmul.mubr.msk.bf16.gmra.mrb[120].mxu0 %vm380_vm1, %v19486_v52 }
 0x65f   : > { %14840 = vmatprep.mubr.msk.bf16.mxu0 %vm380_vm1, %v19492_v19 }
 0x666   : > { %14841 = vmatmul.mubr.msk.bf16.gmra.mrb[124].mxu0 %vm380_vm1, %v8339_v21 }
 0x667   : > { %14852 = vmatprep.mubr.msk.bf16.mxu0 %vm380_vm1, %v8534_v20 }
 0x66e   : > { %14853 = vmatmul.mubr.msk.bf16.vlgmr.msra.gmra.mrb[112].mxu0 %vm380_vm1, %v19371_v45  ;;  %v20710_v45 = vshrl.u32 %v20709_v62, 16 }
 0x66f   : > { %14869 = vmatpush3.bf16.msra.mxu0 %v16083_v25  ;;  %14856 = vmatprep.mubr.msk.bf16.mxu0 %vm380_vm1, %v19388_v57  ;;  %v8586_v57 = vrot.slane %v20711_v11, 4  ;;  %v8779_v25 = vsel %vm1011_vm3, %v8777_v50, %v19274_v58  ;;  %v16090_v58 = vld [vmem:[%s20491_s4 + $0xb8] sm:$0xff]   ;;  %v7465_v11 = vld [vmem:[%s16681_s24 + $0x90] sm:$0xff] }
 0x670   : > { %14870 = vmatprep.subr.bf16.mxu0 %v16084_v37  ;;  %v8583_v24 = vrot.slane %v20710_v45, 3  ;;  %v7483_v50 = vunpack.c.l.bf16 %v7465_v11 }
 0x672   : > { %v19530_v2 = vor.u32 %v8586_v57, %v8583_v24 }
 0x673   : > { %14871 = vmatpush3.bf16.msra.mxu0 %v16084_v37 }
 0x674   : > { %14872 = vmatprep.subr.bf16.mxu0 %v16085_v16 }
 0x676   : > { %14857 = vmatmul.mubr.msk.bf16.gmra.mrb[116].mxu0 %vm380_vm1, %v19397_v41  ;;  %v8593_v41 = vshll.u32 %v19521_v35, 16 }
 0x677   : > { %14860 = vmatprep.mubr.msk.bf16.mxu0 %vm380_vm1, %v19415_v27  ;;  %14873 = vmatpush3.bf16.msra.mxu0 %v16085_v16  ;;  %v8588_v27 = vsel %vm3194_vm4, %v19410_v6, %v19530_v2  ;;  %v16089_v6 = vld [vmem:[%s20491_s4 + $0xb0] sm:$0xff]  }
 0x678   : > { %14874 = vmatprep.subr.bf16.mxu0 %v16086_v8  ;;  %v8595_v31 = vrot.slane %v8593_v41, 4  ;;  %v16105_v41 = vld [vmem:[#allocation9 + $0x4] ss:$8 sps:$4 sm:$0xff]  }
 0x679   : > { %9999 = vmatprep.subr.bf16.mxu1 %v16105_v41 }
 0x67a   : > { %v8596_v22 = vor.u32 %v8595_v31, %v8592_v39  ;;  %10000 = vmatpush1.bf16.msra.mxu1 %v16103_v51 }
 0x67b   : > { %14875 = vmatpush3.bf16.msra.mxu0 %v16086_v8  ;;  %v8971_v8 = vor.u32 %v8970_v36, %v8967_v23 }
 0x67c   : > { %14892 = vmatprep.subr.bf16.mxu0 %v16087_v3  ;;  %v8597_v55 = vsel %vm3194_vm4, %v19530_v2, %v8596_v22  ;;  %v16108_v22 = vld [vmem:[#allocation9 + $0x14] ss:$8 sps:$4 sm:$0xff]  }
 0x67d   : > { %10001 = vmatprep.subr.bf16.mxu1 %v16108_v22  ;;  %v16094_v22 = vld [vmem:[%s20491_s4 + $0xd8] sm:$0xff]  }
 0x67e   : > { %14861 = vmatmul.mubr.msk.bf16.gmra.mrb[120].mxu0 %vm380_vm1, %v19421_v43  ;;  %v16088_v43 = vld [vmem:[%s20491_s4 + $0xa8] sm:$0xff]  }
 0x67f   : > { %14864 = vmatprep.mubr.msk.bf16.mxu0 %vm380_vm1, %v8588_v27  ;;  %v7466_v27 = vld [vmem:[%s16681_s24 + $0x98] sm:$0xff] }
 0x680   : > { %v7485_v28 = vunpack.c.l.bf16 %v7466_v27 }
 0x686   : > { %14865 = vmatmul.mubr.msk.bf16.gmra.mrb[124].mxu0 %vm380_vm1, %v8597_v55 }
 0x687   : > { %14876 = vmatprep.mubr.msk.bf16.mxu0 %vm380_vm1, %v8779_v25 }
 0x68e   : > { %14877 = vmatmul.mubr.msk.bf16.vlgmr.msra.gmra.mrb[112].mxu0 %vm380_vm1, %v19286_v40  ;;  %v19564_v40 = vld [vmem:[%s20491_s4 + $0xc0] sm:$0xff]  }
 0x68f   : > { %14893 = vmatpush3.bf16.msra.mxu0 %v16087_v3  ;;  %14880 = vmatprep.mubr.msk.bf16.mxu0 %vm380_vm1, %v19303_v56  ;;  %v16174_v56 = vld [vmem:[#allocation2 + $0xc0] sm:$0xff]  ;;  %v8975_v3 = vsel %vm3429_vm5, %v8971_v8, %v19439_v7 }
 0x690   : > { %14894 = vmatprep.subr.bf16.mxu0 %v16088_v43  ;;  %v19566_v4 = vrot.slane %v16174_v56, 4 }
 0x692   : > { %v8793_v24 = vsel %vm1011_vm3, %v19566_v4, %v8792_v10 }
 0x693   : > { %14895 = vmatpush3.bf16.msra.mxu0 %v16088_v43 }
 0x694   : > { %14896 = vmatprep.subr.bf16.mxu0 %v16089_v6 }
 0x696   : > { %14881 = vmatmul.mubr.msk.bf16.gmra.mrb[116].mxu0 %vm380_vm1, %v19308_v42  ;;  %v8791_v42 = vsel %vm1011_vm3, %v19318_v30, %v19566_v4 }
 0x697   : > { %14884 = vmatprep.mubr.msk.bf16.mxu0 %vm380_vm1, %v19321_v18  ;;  %14897 = vmatpush3.bf16.msra.mxu0 %v16089_v6  ;;  %v7464_v18 = vld [vmem:[%s16681_s24 + $0x88] sm:$0xff]  ;;  %v7484_v6 = vunpack.c.h.bf16 %v7465_v11 }
 0x698   : > { %14898 = vmatprep.subr.bf16.mxu0 %v16090_v58  ;;  %v7481_v63 = vunpack.c.l.bf16 %v7464_v18  ;;  %v7482_v20 = vunpack.c.h.bf16 %v7464_v18 }
 0x69b   : > { %14899 = vmatpush3.bf16.msra.mxu0 %v16090_v58  ;;  %v16106_v58 = vld [vmem:[#allocation9 + $0x10] ss:$8 sps:$4 sm:$0xff]  }
 0x69c   : > { %14916 = vmatprep.subr.bf16.mxu0 %v19564_v40  ;;  %10002 = vmatpush1.bf16.msra.mxu1 %v16106_v58 }
 0x69d   : > { %10003 = vmatprep.subr.bf16.mxu1 %v16111_v17 }
 0x69e   : > { %14885 = vmatmul.mubr.msk.bf16.gmra.mrb[120].mxu0 %vm380_vm1, %v19327_v1 }
 0x69f   : > { %14888 = vmatprep.mubr.msk.bf16.mxu0 %vm380_vm1, %v8791_v42 }
 0x6a1   : > { %v7609_v54 = vpop.f32.mrb[80].mxu0 }
 0x6a2   : > { %v7610_v60 = vadd.f32 %v7609_v54, %v18991_v59  ;;  %v7611_v48 = vpop.f32.mrb[81].mxu0 }
 0x6a3   : > { %v7612_v1 = vadd.f32 %v7611_v48, %v18994_v5  ;;  %v7613_v21 = vpop.f32.mrb[82].mxu0  ;;  %v7467_v48 = vld [vmem:[%s16681_s24 + $0xa0] sm:$0xff] }
 0x6a4   : > { %v7688_v30 = vadd.f32 %v7610_v60, %v7479_v38  ;;  %v7614_v37 = vadd.f32 %v7613_v21, %v18991_v59  ;;  %v7615_v16 = vpop.f32.mrb[83].mxu0  ;;  %v7486_v38 = vunpack.c.h.bf16 %v7466_v27  ;;  %v7487_v8 = vunpack.c.l.bf16 %v7467_v48 }
 0x6a5   : > { %v7689_v62 = vadd.f32 %v7612_v1, %v7480_v26  ;;  %v7616_v45 = vadd.f32 %v7615_v16, %v18994_v5  ;;  %v16092_v26 = vld [vmem:[%s20491_s4 + $0xc8] sm:$0xff]   ;;  %v7488_v11 = vunpack.c.h.bf16 %v7467_v48 }
 0x6a6   : > { %v7720_v57 = vmax.f32 %v7688_v30, 0.0  ;;  %v7690_v35 = vadd.f32 %v7614_v37, %v7481_v63  ;;  %14889 = vmatmul.mubr.msk.bf16.gmra.mrb[124].mxu0 %vm380_vm1, %v8793_v24  ;;  %v16109_v63 = vld [vmem:[#allocation9 + $0x20] ss:$8 sps:$4 sm:$0xff]  }
 0x6a7   : > { %v7721_v39 = vmax.f32 %v7689_v62, 0.0  ;;  %v7691_v31 = vadd.f32 %v7616_v45, %v7482_v20  ;;  %14900 = vmatprep.mubr.msk.bf16.mxu0 %vm380_vm1, %v8975_v3  ;;  %v7468_v37 = vld [vmem:[%s16681_s24 + $0xa8] sm:$0xff]  ;;  %v16093_v62 = vld [vmem:[%s20491_s4 + $0xd0] sm:$0xff]   ;;  %10004 = vmatpush1.bf16.msra.mxu1 %v16109_v63 }
 0x6a8   : > { %v7722_v15 = vmax.f32 %v7690_v35, 0.0  ;;  %v7489_v35 = vunpack.c.l.bf16 %v7468_v37  ;;  %v7490_v41 = vunpack.c.h.bf16 %v7468_v37 }
 0x6a9   : > { %v13602_v55 = vpack.c.bf16 %v7721_v39, %v7720_v57  ;;  %v7723_v25 = vmax.f32 %v7691_v31, 0.0  ;;  %v7619_v43 = vpop.f32.mrb[84].mxu0 }
 0x6aa   : > { %v7620_v7 = vadd.f32 %v7619_v43, %v18991_v59  ;;  %v7621_v56 = vpop.f32.mrb[85].mxu0 }
 0x6ab   : > { %7848 = vst [vmem:[%s19013_s21 + $0x80] sm:$0xff] %v13602_v55  ;;  %v13603_v32 = vpack.c.bf16 %v7723_v25, %v7722_v15  ;;  %v7622_v42 = vadd.f32 %v7621_v56, %v18994_v5  ;;  %v7623_v18 = vpop.f32.mrb[86].mxu0  ;;  %v7469_v55 = vld [vmem:[%s16681_s24 + $0xb0] sm:$0xff]  ;;  %v7470_v56 = vld [vmem:[%s16681_s24 + $0xb8] sm:$0xff] }
 0x6ac   : > { %v7692_v23 = vadd.f32 %v7620_v7, %v7483_v50  ;;  %v7624_v36 = vadd.f32 %v7623_v18, %v18991_v59  ;;  %v7625_v54 = vpop.f32.mrb[87].mxu0  ;;  %v8955_v25 = vld [vmem:[#allocation2 + $0xc8] sm:$0x1f] }
 0x6ad   : > { %7849 = vst [vmem:[%s19013_s21 + $0x88] sm:$0xff] %v13603_v32  ;;  %v7693_v10 = vadd.f32 %v7622_v42, %v7484_v6  ;;  %v7626_v60 = vadd.f32 %v7625_v54, %v18994_v5  ;;  %v7491_v32 = vunpack.c.l.bf16 %v7469_v55  ;;  %v9001_v42 = vshrl.u32 %v8955_v25, 16 }
 0x6ae   : > { %v7724_v1 = vmax.f32 %v7692_v23, 0.0  ;;  %v7694_v21 = vadd.f32 %v7624_v36, %v7485_v28  ;;  %14901 = vmatmul.mubr.msk.bf16.vlgmr.msra.gmra.mrb[112].mxu0 %vm380_vm1, %v19454_v12  ;;  %v9170_v28 = vld [vmem:[#allocation2 + $0x90] sm:$0xf8]  ;;  %v9004_v18 = vshll.u32 %v8955_v25, 16  ;;  %v7492_v54 = vunpack.c.h.bf16 %v7469_v55 }
 0x6af   : > { %v7725_v20 = vmax.f32 %v7693_v10, 0.0  ;;  %v7695_v30 = vadd.f32 %v7626_v60, %v7486_v38  ;;  %14917 = vmatpush3.bf16.msra.mxu0 %v19564_v40  ;;  %14904 = vmatprep.mubr.msk.bf16.mxu0 %vm380_vm1, %v19469_v13  ;;  %v19627_v38 = vld [vmem:[%s20491_s4 + $0xe0] sm:$0xff]   ;;  %v7493_v10 = vunpack.c.l.bf16 %v7470_v56  ;;  %v9188_v60 = vshrl.u32 %v9170_v28, 16 }
 0x6b0   : > { %v7726_v16 = vmax.f32 %v7694_v21, 0.0  ;;  %14918 = vmatprep.subr.bf16.mxu0 %v16092_v26  ;;  %v7494_v21 = vunpack.c.h.bf16 %v7470_v56 }
 0x6b1   : > { %v13604_v45 = vpack.c.bf16 %v7725_v20, %v7724_v1  ;;  %v7727_v24 = vmax.f32 %v7695_v30, 0.0  ;;  %v7629_v12 = vpop.f32.mrb[88].mxu0  ;;  %v9191_v20 = vshll.u32 %v9170_v28, 16 }
 0x6b2   : > { %v7630_v57 = vadd.f32 %v7629_v12, %v18991_v59  ;;  %v7631_v40 = vpop.f32.mrb[89].mxu0  ;;  %v7471_v12 = vld [vmem:[%s16681_s24 + $0xc0] sm:$0xff] }
 0x6b3   : > { %7850 = vst [vmem:[%s19013_s21 + $0x90] sm:$0xff] %v13604_v45  ;;  %v13605_v13 = vpack.c.bf16 %v7727_v24, %v7726_v16  ;;  %v7632_v3 = vadd.f32 %v7631_v40, %v18994_v5  ;;  %v7633_v51 = vpop.f32.mrb[90].mxu0  ;;  %14919 = vmatpush3.bf16.msra.mxu0 %v16092_v26  ;;  %v20712_v40 = vld [vmem:[#allocation22_spill] sm:$0xff]  ;;  %v7495_v55 = vunpack.c.l.bf16 %v7471_v12 }
 0x6b4   : > { %v7696_v39 = vadd.f32 %v7630_v57, %v7487_v8  ;;  %v7634_v31 = vadd.f32 %v7633_v51, %v18991_v59  ;;  %v7635_v27 = vpop.f32.mrb[91].mxu0  ;;  %14920 = vmatprep.subr.bf16.mxu0 %v16093_v62  ;;  %v9003_v8 = vrot.slane %v9001_v42, 4 }
 0x6b5   : > { %7851 = vst [vmem:[%s19013_s21 + $0x98] sm:$0xff] %v13605_v13  ;;  %v7697_v15 = vadd.f32 %v7632_v3, %v7488_v11  ;;  %v7636_v50 = vadd.f32 %v7635_v27, %v18994_v5  ;;  %v20714_v3 = vshll.u32 %v20712_v40, 16  ;;  %v7472_v27 = vld [vmem:[%s16681_s24 + $0xc8] sm:$0xff] }
 0x6b6   : > { %v7728_v43 = vmax.f32 %v7696_v39, 0.0  ;;  %v7698_v6 = vadd.f32 %v7634_v31, %v7489_v35  ;;  %14905 = vmatmul.mubr.msk.bf16.gmra.mrb[116].mxu0 %vm380_vm1, %v19478_v9  ;;  %v20713_v35 = vshrl.u32 %v20712_v40, 16  ;;  %v20715_v31 = vld [vmem:[#allocation21_spill] sm:$0xff]  ;;  %v7497_v28 = vunpack.c.l.bf16 %v7472_v27  ;;  %v7474_v40 = vld [vmem:[%s16681_s24 + $0xd8] sm:$0xff] }
 0x6b7   : > { %v7729_v58 = vmax.f32 %v7697_v15, 0.0  ;;  %v7699_v7 = vadd.f32 %v7636_v50, %v7490_v41  ;;  %14908 = vmatprep.mubr.msk.bf16.mxu0 %vm380_vm1, %v19486_v52  ;;  %14921 = vmatpush3.bf16.msra.mxu0 %v16093_v62  ;;  %v9006_v62 = vrot.slane %v9004_v18, 5  ;;  %v9201_v51 = vrot.slane %v20714_v3, 4 }
 0x6b8   : > { %v7730_v17 = vmax.f32 %v7698_v6, 0.0  ;;  %14922 = vmatprep.subr.bf16.mxu0 %v16094_v22  ;;  %v9198_v13 = vrot.slane %v20713_v35, 3  ;;  %v9193_v15 = vrot.slane %v9191_v20, 4 }
 0x6b9   : > { %v13606_v9 = vpack.c.bf16 %v7729_v58, %v7728_v43  ;;  %v7731_v23 = vmax.f32 %v7699_v7, 0.0  ;;  %v7639_v36 = vpop.f32.mrb[92].mxu0  ;;  %v9007_v25 = vor.u32 %v9006_v62, %v9003_v8  ;;  %v7496_v58 = vunpack.c.h.bf16 %v7471_v12 }
 0x6ba   : > { %v7640_v52 = vadd.f32 %v7639_v36, %v18991_v59  ;;  %v7641_v26 = vpop.f32.mrb[93].mxu0 }
 0x6bb   : > { %7852 = vst [vmem:[%s19013_s21 + $0xa0] sm:$0xff] %v13606_v9  ;;  %v13607_v48 = vpack.c.bf16 %v7731_v23, %v7730_v17  ;;  %v7642_v63 = vadd.f32 %v7641_v26, %v18994_v5  ;;  %v7643_v1 = vpop.f32.mrb[94].mxu0  ;;  %14923 = vmatpush3.bf16.msra.mxu0 %v16094_v22  ;;  %v9190_v22 = vrot.slane %v9188_v60, 3  ;;  %v9202_v17 = vor.u32 %v9201_v51, %v9198_v13 }
 0x6bc   : > { %v7700_v30 = vadd.f32 %v7640_v52, %v7491_v32  ;;  %v7644_v37 = vadd.f32 %v7643_v1, %v18991_v59  ;;  %v7645_v16 = vpop.f32.mrb[95].mxu0  ;;  %14940 = vmatprep.subr.bf16.mxu0 %v19627_v38  ;;  %v7498_v9 = vunpack.c.h.bf16 %v7472_v27  ;;  %v9008_v26 = vsel %vm3429_vm5, %v18348_v61, %v9007_v25 }
 0x6bd   : > { %7853 = vst [vmem:[%s19013_s21 + $0xa8] sm:$0xff] %v13607_v48  ;;  %v7701_v45 = vadd.f32 %v7642_v63, %v7492_v54  ;;  %v7646_v24 = vadd.f32 %v7645_v16, %v18994_v5  ;;  %v9194_v23 = vor.u32 %v9193_v15, %v9190_v22  ;;  %v7501_v15 = vunpack.c.l.bf16 %v7474_v40 }
 0x6be   : > { %v7732_v11 = vmax.f32 %v7700_v30, 0.0  ;;  %v7702_v57 = vadd.f32 %v7644_v37, %v7493_v10  ;;  %14909 = vmatmul.mubr.msk.bf16.gmra.mrb[120].mxu0 %vm380_vm1, %v19492_v19  ;;  %v20716_v10 = vld [vmem:[#allocation23_spill] sm:$0xff]  ;;  %v20719_v37 = vld [vmem:[#allocation24_spill] sm:$0xff] }
 0x6bf   : > { %v7733_v41 = vmax.f32 %v7701_v45, 0.0  ;;  %v7703_v39 = vadd.f32 %v7646_v24, %v7494_v21  ;;  %14912 = vmatprep.mubr.msk.bf16.mxu0 %vm380_vm1, %v20715_v31  ;;  %v20717_v60 = vshrl.u32 %v20716_v10, 16  ;;  %v7473_v21 = vld [vmem:[%s16681_s24 + $0xd0] sm:$0xff]  ;;  %v20718_v20 = vshll.u32 %v20716_v10, 16 }
 0x6c0   : > { %v7734_v50 = vmax.f32 %v7702_v57, 0.0  ;;  %v20720_v16 = vshrl.u32 %v20719_v37, 16  ;;  %v9203_v61 = vsel %vm3194_vm4, %v9194_v23, %v9202_v17  ;;  %v20721_v24 = vshll.u32 %v20719_v37, 16  ;;  %v16097_v37 = vld [vmem:[%s20491_s4 + $0xf0] sm:$0xff]  }
 0x6c1   : > { %v13608_v43 = vpack.c.bf16 %v7733_v41, %v7732_v11  ;;  %v7735_v19 = vmax.f32 %v7703_v39, 0.0  ;;  %v7649_v6 = vpop.f32.mrb[96].mxu0  ;;  %v9207_v48 = vrot.slane %v20717_v60, 3  ;;  %v9210_v30 = vrot.slane %v20718_v20, 4 }
 0x6c2   : > { %v7650_v7 = vadd.f32 %v7649_v6, %v18991_v59  ;;  %v7651_v56 = vpop.f32.mrb[97].mxu0  ;;  %v9216_v8 = vrot.slane %v20720_v16, 3  ;;  %v9219_v12 = vrot.slane %v20721_v24, 4  ;;  %v7499_v13 = vunpack.c.l.bf16 %v7473_v21 }
 0x6c3   : > { %7854 = vst [vmem:[%s19013_s21 + $0xb0] sm:$0xff] %v13608_v43  ;;  %v13609_v32 = vpack.c.bf16 %v7735_v19, %v7734_v50  ;;  %v7652_v42 = vadd.f32 %v7651_v56, %v18994_v5  ;;  %v7653_v18 = vpop.f32.mrb[98].mxu0  ;;  %v7500_v39 = vunpack.c.h.bf16 %v7473_v21  ;;  %v9211_v31 = vor.u32 %v9210_v30, %v9207_v48  ;;  %v16096_v56 = vld [vmem:[%s20491_s4 + $0xe8] sm:$0xff]  }
 0x6c4   : > { %v7704_v36 = vadd.f32 %v7650_v7, %v7495_v55  ;;  %v7654_v54 = vadd.f32 %v7653_v18, %v18991_v59  ;;  %v7655_v52 = vpop.f32.mrb[99].mxu0  ;;  %v9220_v50 = vor.u32 %v9219_v12, %v9216_v8  ;;  %v7502_v19 = vunpack.c.h.bf16 %v7474_v40 }
 0x6c5   : > { %7855 = vst [vmem:[%s19013_s21 + $0xb8] sm:$0xff] %v13609_v32  ;;  %v7705_v63 = vadd.f32 %v7652_v42, %v7496_v58  ;;  %v7656_v1 = vadd.f32 %v7655_v52, %v18994_v5  ;;  %v20723_v42 = vshll.u32 %v18387_v44, 16  ;;  %v20724_v52 = vshrl.u32 %v18395_v46, 16 }
 0x6c6   : > { %v7736_v62 = vmax.f32 %v7704_v36, 0.0  ;;  %v7706_v45 = vadd.f32 %v7654_v54, %v7497_v28  ;;  %14913 = vmatmul.mubr.msk.bf16.gmra.mrb[124].mxu0 %vm380_vm1, %v9008_v26  ;;  %v20722_v28 = vshrl.u32 %v18387_v44, 16  ;;  %v9212_v36 = vsel %vm3194_vm4, %v9202_v17, %v9211_v31  ;;  %v7475_v54 = vld [vmem:[%s16681_s24 + $0xe0] sm:$0xff]  ;;  %v7476_v17 = vld [vmem:[%s16681_s24 + $0xe8] sm:$0xff] }
 0x6c7   : > { %v7737_v11 = vmax.f32 %v7705_v63, 0.0  ;;  %v7707_v57 = vadd.f32 %v7656_v1, %v7498_v9  ;;  %14924 = vmatprep.mubr.msk.bf16.mxu0 %vm380_vm1, %v9203_v61  ;;  %v9228_v18 = vrot.slane %v20723_v42, 4  ;;  %v9234_v26 = vrot.slane %v20724_v52, 3 }
 0x6c8   : > { %v7738_v35 = vmax.f32 %v7706_v45, 0.0  ;;  %v9225_v32 = vrot.slane %v20722_v28, 3  ;;  %v9221_v48 = vsel %vm3194_vm4, %v9211_v31, %v9220_v50  ;;  %v20725_v44 = vshll.u32 %v18395_v46, 16  ;;  %v7478_v28 = vld [vmem:[%s16681_s24 + $0xf8] sm:$0xff] }
 0x6c9   : > { %v13610_v3 = vpack.c.bf16 %v7737_v11, %v7736_v62  ;;  %v7739_v51 = vmax.f32 %v7707_v57, 0.0  ;;  %v7659_v41 = vpop.f32.mrb[100].mxu0  ;;  %v7503_v30 = vunpack.c.l.bf16 %v7475_v54  ;;  %v7504_v46 = vunpack.c.h.bf16 %v7475_v54 }
 0x6ca   : > { %v7660_v27 = vadd.f32 %v7659_v41, %v18991_v59  ;;  %v7661_v22 = vpop.f32.mrb[101].mxu0  ;;  %v9237_v63 = vrot.slane %v20725_v44, 4  ;;  %v9229_v45 = vor.u32 %v9228_v18, %v9225_v32  ;;  %v7505_v24 = vunpack.c.l.bf16 %v7476_v17  ;;  %v16098_v41 = vld [vmem:[%s20491_s4 + $0xf8] sm:$0xff]   ;;  %v16099_v18 = vld [vmem:[%s20491_s4 + $0x100] sm:$0xff]  }
 0x6cb   : > { %7856 = vst [vmem:[%s19013_s21 + $0xc0] sm:$0xff] %v13610_v3  ;;  %v13611_v55 = vpack.c.bf16 %v7739_v51, %v7738_v35  ;;  %v7662_v25 = vadd.f32 %v7661_v22, %v18994_v5  ;;  %v7663_v43 = vpop.f32.mrb[102].mxu0  ;;  %v7506_v35 = vunpack.c.h.bf16 %v7476_v17  ;;  %v7477_v22 = vld [vmem:[%s16681_s24 + $0xf0] sm:$0xff] }
 0x6cc   : > { %v7708_v6 = vadd.f32 %v7660_v27, %v7499_v13  ;;  %v7664_v58 = vadd.f32 %v7663_v43, %v18991_v59  ;;  %v7665_v7 = vpop.f32.mrb[103].mxu0  ;;  %v9238_v12 = vor.u32 %v9237_v63, %v9234_v26  ;;  %v9230_v27 = vsel %vm3194_vm4, %v9220_v50, %v9229_v45  ;;  %v19713_v50 = vld [vmem:[#allocation2 + $0xd0] sm:$0xf] }
 0x6cd   : > { %7857 = vst [vmem:[%s19013_s21 + $0xc8] sm:$0xff] %v13611_v55  ;;  %v7709_v9 = vadd.f32 %v7662_v25, %v7500_v39  ;;  %v7666_v23 = vadd.f32 %v7665_v7, %v18994_v5  ;;  %v7507_v42 = vunpack.c.l.bf16 %v7477_v22  ;;  %v7509_v26 = vunpack.c.l.bf16 %v7478_v28 }
 0x6ce   : > { %v7740_v10 = vmax.f32 %v7708_v6, 0.0  ;;  %v7710_v60 = vadd.f32 %v7664_v58, %v7501_v15  ;;  %14925 = vmatmul.mubr.msk.bf16.vlgmr.msra.gmra.mrb[112].mxu0 %vm380_vm1, %v9212_v36  ;;  %v20726_v15 = vshrl.u32 %v18402_v47, 16  ;;  %v20727_v6 = vshll.u32 %v18402_v47, 16 }
 0x6cf   : > { %v7741_v1 = vmax.f32 %v7709_v9, 0.0  ;;  %v7711_v21 = vadd.f32 %v7666_v23, %v7502_v19  ;;  %14941 = vmatpush3.bf16.msra.mxu0 %v19627_v38  ;;  %14928 = vmatprep.mubr.msk.bf16.mxu0 %vm380_vm1, %v9221_v48  ;;  %v9239_v19 = vsel %vm3194_vm4, %v9229_v45, %v9238_v12  ;;  %v7508_v36 = vunpack.c.h.bf16 %v7477_v22 }
 0x6d0   : > { %v7742_v20 = vmax.f32 %v7710_v60, 0.0  ;;  %14942 = vmatprep.subr.bf16.mxu0 %v16096_v56  ;;  %v9252_v55 = vrot.slane %v20726_v15, 3  ;;  %v9255_v58 = vrot.slane %v20727_v6, 4  ;;  %v9259_v60 = vshrl.u32 %v19713_v50, 16  ;;  %v16177_v15 = vld [vmem:[#allocation2 + $0xa8] sm:$0xff]  ;;  %v16101_v6 = vld [vmem:[%s20491_s4 + $0x110] sm:$0xff]  }
 0x6d1   : > { %v13612_v16 = vpack.c.bf16 %v7741_v1, %v7740_v10  ;;  %v7743_v8 = vmax.f32 %v7711_v21, 0.0  ;;  %v7669_v62 = vpop.f32.mrb[104].mxu0  ;;  %v7510_v1 = vunpack.c.h.bf16 %v7478_v28  ;;  %v9262_v21 = vshll.u32 %v19713_v50, 16 }
 0x6d2   : > { %v7670_v61 = vadd.f32 %v7669_v62, %v18991_v59  ;;  %v7671_v38 = vpop.f32.mrb[105].mxu0  ;;  %v19719_v10 = vor.u32 %v9255_v58, %v9252_v55  ;;  %v9451_v55 = vrot.slane %v16177_v15, 4  ;;  %v16178_v58 = vld [vmem:[#allocation2 + $0xb0] sm:$0xff] }
 0x6d3   : > { %7858 = vst [vmem:[%s19013_s21 + $0xd0] sm:$0xff] %v13612_v16  ;;  %v13613_v11 = vpack.c.bf16 %v7743_v8, %v7742_v20  ;;  %v7672_v57 = vadd.f32 %v7671_v38, %v18994_v5  ;;  %v7673_v40 = vpop.f32.mrb[106].mxu0  ;;  %14943 = vmatpush3.bf16.msra.mxu0 %v16096_v56  ;;  %v9248_v8 = vsel %vm3194_vm4, %v9238_v12, %v19530_v2  ;;  %v9428_v12 = vld [vmem:[#allocation2 + $0x90] sm:$0xf0] }
 0x6d4   : > { %v7712_v13 = vadd.f32 %v7670_v61, %v7503_v30  ;;  %v7674_v3 = vadd.f32 %v7673_v40, %v18991_v59  ;;  %v7675_v51 = vpop.f32.mrb[107].mxu0  ;;  %14944 = vmatprep.subr.bf16.mxu0 %v16097_v37  ;;  %v9257_v45 = vsel %vm3194_vm4, %v19530_v2, %v19719_v10 }
 0x6d5   : > { %7859 = vst [vmem:[%s19013_s21 + $0xd8] sm:$0xff] %v13613_v11  ;;  %v7713_v39 = vadd.f32 %v7672_v57, %v7504_v46  ;;  %v7676_v31 = vadd.f32 %v7675_v51, %v18994_v5  ;;  %v9264_v11 = vrot.slane %v9262_v21, 4 }
 0x6d6   : > { %v7744_v25 = vmax.f32 %v7712_v13, 0.0  ;;  %v7714_v43 = vadd.f32 %v7674_v3, %v7505_v24  ;;  %14929 = vmatmul.mubr.msk.bf16.gmra.mrb[116].mxu0 %vm380_vm1, %v9230_v27  ;;  %v9261_v24 = vrot.slane %v9259_v60, 3  ;;  %v16175_v13 = vld [vmem:[#allocation2 + $0x98] sm:$0xff]  ;;  %v16176_v27 = vld [vmem:[#allocation2 + $0xa0] sm:$0xff] }
 0x6d7   : > { %v7745_v7 = vmax.f32 %v7713_v39, 0.0  ;;  %v7715_v56 = vadd.f32 %v7676_v31, %v7506_v35  ;;  %14932 = vmatprep.mubr.msk.bf16.mxu0 %vm380_vm1, %v9239_v19  ;;  %14945 = vmatpush3.bf16.msra.mxu0 %v16097_v37  ;;  %v9447_v3 = vrot.slane %v16175_v13, 4  ;;  %v9446_v39 = vrot.slane %v9428_v12, 4 }
 0x6d8   : > { %v7746_v32 = vmax.f32 %v7714_v43, 0.0  ;;  %14946 = vmatprep.subr.bf16.mxu0 %v16098_v41  ;;  %v9449_v22 = vrot.slane %v16176_v27, 4 }
 0x6d9   : > { %v13614_v9 = vpack.c.bf16 %v7745_v7, %v7744_v25  ;;  %v7747_v23 = vmax.f32 %v7715_v56, 0.0  ;;  %v7679_v47 = vpop.f32.mrb[108].mxu0  ;;  %v9448_v31 = vsel %vm1011_vm3, %v9446_v39, %v9447_v3  ;;  %v16100_v25 = vld [vmem:[%s20491_s4 + $0x108] sm:$0xff]   ;;  %v9453_v7 = vrot.slane %v16178_v58, 4  ;;  %v16179_v56 = vld [vmem:[#allocation2 + $0xb8] sm:$0xff] }
 0x6da   : > { %v7680_v54 = vadd.f32 %v7679_v47, %v18991_v59  ;;  %v7681_v52 = vpop.f32.mrb[109].mxu0  ;;  %v9450_v43 = vsel %vm1011_vm3, %v9447_v3, %v9449_v22  ;;  %v9452_v19 = vsel %vm1011_vm3, %v9449_v22, %v9451_v55  ;;  %v9455_v28 = vrot.slane %v16179_v56, 4 }
 0x6db   : > { %7860 = vst [vmem:[%s19013_s21 + $0xe0] sm:$0xff] %v13614_v9  ;;  %v13615_v48 = vpack.c.bf16 %v7747_v23, %v7746_v32  ;;  %v7682_v44 = vadd.f32 %v7681_v52, %v18994_v5  ;;  %v7683_v63 = vpop.f32.mrb[110].mxu0  ;;  %14947 = vmatpush3.bf16.msra.mxu0 %v16098_v41  ;;  %v9265_v41 = vor.u32 %v9264_v11, %v9261_v24  ;;  %v16102_v32 = vld [vmem:[%s20491_s4 + $0x118] sm:$0xff]   ;;  %v16180_v9 = vld [vmem:[#allocation2 + $0xc8] sm:$0xff]  ;;  %v9634_v47 = vshrl.u32 %v9428_v12, 16 }
 0x6dc   : > { %v7716_v17 = vadd.f32 %v7680_v54, %v7507_v42  ;;  %v7684_v20 = vadd.f32 %v7683_v63, %v18991_v59  ;;  %v7685_v30 = vpop.f32.mrb[111].mxu0  ;;  %14964 = vmatprep.subr.bf16.mxu0 %v16099_v18  ;;  %v9454_v42 = vsel %vm1011_vm3, %v9451_v55, %v9453_v7  ;;  %v19759_v23 = vrot.slane %v16180_v9, 4  ;;  %v16117_v55 = vld [vmem:[%s20491_s4 + $0x30] sm:$0xff]  }
 0x6dd   : > { %7861 = vst [vmem:[%s19013_s21 + $0xe8] sm:$0xff] %v13615_v48  ;;  %v7717_v37 = vadd.f32 %v7682_v44, %v7508_v36  ;;  %v7686_v16 = vadd.f32 %v7685_v30, %v18994_v5  ;;  %v9266_v2 = vsel %vm3194_vm4, %v19719_v10, %v9265_v41  ;;  %v9637_v36 = vshll.u32 %v9428_v12, 16  ;;  %v20729_v30 = vld [vmem:[#allocation25_spill] sm:$0xff] }
 0x6de   : > { %v7748_v62 = vmax.f32 %v7716_v17, 0.0  ;;  %v7718_v46 = vadd.f32 %v7684_v20, %v7509_v26  ;;  %14933 = vmatmul.mubr.msk.bf16.gmra.mrb[120].mxu0 %vm380_vm1, %v9248_v8  ;;  %v9458_v54 = vsel %vm1011_vm3, %v9455_v28, %v19566_v4  ;;  %v9460_v52 = vsel %vm1011_vm3, %v19566_v4, %v19759_v23  ;;  %v9624_v4 = vld [vmem:[#allocation2 + $0xd0] sm:$0x1f] }
 0x6df   : > { %v7749_v61 = vmax.f32 %v7717_v37, 0.0  ;;  %v7719_v38 = vadd.f32 %v7686_v16, %v7510_v1  ;;  %14936 = vmatprep.mubr.msk.bf16.mxu0 %vm380_vm1, %v9257_v45  ;;  %v9636_v26 = vrot.slane %v9634_v47, 4  ;;  %v9639_v60 = vrot.slane %v9637_v36, 5  ;;  %v19794_v16 = vld [vmem:[#allocation8] ss:$0 sm:$0xff] }
 0x6e0   : > { %v7750_v57 = vmax.f32 %v7718_v46, 0.0  ;;  %v9461_v48 = vrot.slane %v19713_v50, 4  ;;  %v9670_v50 = vshrl.u32 %v9624_v4, 16  ;;  %v9673_v21 = vshll.u32 %v9624_v4, 16 }
 0x6e1   : > { %v13616_v40 = vpack.c.bf16 %v7749_v61, %v7748_v62  ;;  %v7751_v35 = vmax.f32 %v7719_v38, 0.0  ;;  %v9640_v44 = vor.u32 %v9639_v60, %v9636_v26 }
 0x6e2   : > { %v9462_v63 = vsel %vm1011_vm3, %v19759_v23, %v9461_v48  ;;  %v9672_v17 = vrot.slane %v9670_v50, 4 }
 0x6e3   : > { %7862 = vst [vmem:[%s19013_s21 + $0xf0] sm:$0xff] %v13616_v40  ;;  %v13617_v51 = vpack.c.bf16 %v7751_v35, %v7750_v57  ;;  %v9644_v1 = vsel %vm3429_vm5, %v9640_v44, %v18429_v53  ;;  %v20728_v53 = vld [vmem:[#allocation26_spill] sm:$0xff] }
 0x6e5   : > { %7863 = vst [vmem:[%s19013_s21 + $0xf8] sm:$0xff] %v13617_v51  ;;  %v16116_v51 = vld [vmem:[%s20491_s4 + $0x28] sm:$0xff]  }
 0x6e6   : > { %14937 = vmatmul.mubr.msk.bf16.gmra.mrb[124].mxu0 %vm380_vm1, %v9266_v2 }
 0x6e7   : > { %14948 = vmatprep.mubr.msk.bf16.mxu0 %vm380_vm1, %v9448_v31 }
 0x6ee   : > { %14949 = vmatmul.mubr.msk.bf16.vlgmr.msra.gmra.mrb[112].mxu0 %vm380_vm1, %v9450_v43 }
 0x6ef   : > { %14965 = vmatpush3.bf16.msra.mxu0 %v16099_v18  ;;  %14952 = vmatprep.mubr.msk.bf16.mxu0 %vm380_vm1, %v9452_v19  ;;  %v9456_v18 = vsel %vm1011_vm3, %v9453_v7, %v9455_v28  ;;  %v16118_v28 = vld [vmem:[%s20491_s4 + $0x38] sm:$0xff]  }
 0x6f0   : > { %14966 = vmatprep.subr.bf16.mxu0 %v16100_v25 }
 0x6f3   : > { %14967 = vmatpush3.bf16.msra.mxu0 %v16100_v25 }
 0x6f4   : > { %14968 = vmatprep.subr.bf16.mxu0 %v16101_v6 }
 0x6f6   : > { %14953 = vmatmul.mubr.msk.bf16.gmra.mrb[116].mxu0 %vm380_vm1, %v9454_v42 }
 0x6f7   : > { %14956 = vmatprep.mubr.msk.bf16.mxu0 %vm380_vm1, %v9456_v18  ;;  %14969 = vmatpush3.bf16.msra.mxu0 %v16101_v6 }
 0x6f8   : > { %14970 = vmatprep.subr.bf16.mxu0 %v16102_v32 }
 0x6fb   : > { %14971 = vmatpush3.bf16.msra.mxu0 %v16102_v32 }
 0x6fe   : > { %14957 = vmatmul.mubr.msk.bf16.gmra.mrb[120].mxu0 %vm380_vm1, %v9458_v54 }
 0x6ff   : > { %14960 = vmatprep.mubr.msk.bf16.mxu0 %vm380_vm1, %v9460_v52  ;;  %v16119_v52 = vld [vmem:[%s20491_s4] sm:$0xff]  }
 0x706   : > { %14961 = vmatmul.mubr.msk.bf16.gmra.mrb[124].mxu0 %vm380_vm1, %v9462_v63 }
 0x707   : > { %14972 = vmatprep.mubr.msk.bf16.mxu0 %vm380_vm1, %v9644_v1 }
 0x70e   : > { %14973 = vmatmul.mubr.msk.bf16.vlgmr.msra.gmra.mrb[112].mxu0 %vm380_vm1, %v18446_v49  ;;  %v9675_v49 = vrot.slane %v9673_v21, 5 }
 0x70f   : > { %14976 = vmatprep.mubr.msk.bf16.mxu0 %vm380_vm1, %v18452_v0 }
 0x710   : > { %v9676_v20 = vor.u32 %v9675_v49, %v9672_v17 }
 0x712   : > { %v9677_v0 = vsel %vm3429_vm5, %v20729_v30, %v9676_v20 }
 0x716   : > { %14977 = vmatmul.mubr.msk.bf16.gmra.mrb[116].mxu0 %vm380_vm1, %v18455_v14  ;;  %v16112_v14 = vld [vmem:[#allocation9 + $0x30] ss:$8 sps:$4 sm:$0xff]  }
 0x717   : > { %14980 = vmatprep.mubr.msk.bf16.mxu0 %vm380_vm1, %v18461_v29  ;;  %v16114_v29 = vld [vmem:[#allocation9 + $0x34] ss:$8 sps:$4 sm:$0xff]  }
 0x718   : > { %10005 = vmatprep.subr.bf16.mxu1 %v16114_v29 }
 0x719   : > { %10006 = vmatpush1.bf16.msra.mxu1 %v16112_v14 }
 0x71e   : > { %14981 = vmatmul.mubr.msk.bf16.gmra.mrb[120].mxu0 %vm380_vm1, %v18465_v33  ;;  %v16115_v33 = vld [vmem:[%s20491_s4 + $0x20] sm:$0xff]  }
 0x71f   : > { %14984 = vmatprep.mubr.msk.bf16.mxu0 %vm380_vm1, %v20728_v53  ;;  %14988 = vmatprep.subr.bf16.mxu1 %v16115_v33 }
 0x726   : > { %14985 = vmatmul.mubr.msk.bf16.gmra.mrb[124].mxu0 %vm380_vm1, %v9677_v0 }
 0x727   : > { %12455 = vmatprep.mubr.bf16.mxu0 %v20677_v34 }
 0x7e1   : > { %v14974_v37 = vpop.f32.mrb[112].mxu0 }
 0x7e2   : > { %v9841_v8 = vadd.f32 %v19794_v16, %v14974_v37  ;;  %v9760_v62 = vpop.f32.mrb[113].mxu0 }
 0x7e3   : > { %v9839_v46 = vadd.f32 %v19794_v16, %v9760_v62  ;;  %v14975_v45 = vpop.f32.mrb[114].mxu0 }
 0x7e4   : > { %v9842_v61 = vadd.f32 %v19794_v16, %v14975_v45  ;;  %v9763_v38 = vpop.f32.mrb[115].mxu0  ;;  %v9857_v11 = vmax.f32 %v9841_v8, 0.0 }
 0x7e5   : > { %v9840_v24 = vadd.f32 %v19794_v16, %v9763_v38  ;;  %v9855_v40 = vmax.f32 %v9839_v46, 0.0  ;;  %v19847_v38 = vld [vmem:[#allocation2 + $0xd0] sm:$0xff] }
 0x7e6   : > { %v9858_v57 = vmax.f32 %v9842_v61, 0.0  ;;  %v19845_v61 = vld [vmem:[#allocation2 + $0xd8] sm:$0xff] }
 0x7e7   : > { %v9856_v35 = vmax.f32 %v9840_v24, 0.0  ;;  %v10328_v24 = vrot.slane %v19845_v61, 4 }
 0x7e8   : > { %v9872_v12 = vpack.c.bf16 %v9858_v57, %v9857_v11  ;;  %v19851_v11 = vrot.slane %v19847_v38, 4  ;;  %v16120_v57 = vld [vmem:[%s20491_s4 + $0x8] sm:$0xff]  }
 0x7e9   : > { %v9871_v13 = vpack.c.bf16 %v9856_v35, %v9855_v40  ;;  %v14978_v3 = vpop.f32.mrb[116].mxu0 }
 0x7ea   : > { %v9845_v41 = vadd.f32 %v19794_v16, %v14978_v3  ;;  %v9776_v39 = vpop.f32.mrb[117].mxu0  ;;  %v10327_v40 = vsel %vm1011_vm3, %v19759_v23, %v19851_v11  ;;  %v19862_v35 = vsel %vm1011_vm3, %v19851_v11, %v10328_v24  ;;  %v16121_v3 = vld [vmem:[%s20491_s4 + $0x10] sm:$0xff]  }
 0x7eb   : > { %v9843_v2 = vadd.f32 %v19794_v16, %v9776_v39  ;;  %v14979_v31 = vpop.f32.mrb[118].mxu0  ;;  %13414 = vmatmul.mubr.msk.bf16.vlgmr.msra.gmra.mrb[112].mxu1 %vm380_vm1, %v9871_v13  ;;  %v19868_v13 = vld [vmem:[#allocation2 + $0xe8] sm:$0xff] }
 0x7ec   : > { %v9846_v27 = vadd.f32 %v19794_v16, %v14979_v31  ;;  %14989 = vmatpush3.bf16.msra.mxu1 %v16115_v33  ;;  %v9779_v22 = vpop.f32.mrb[119].mxu0  ;;  %10041 = vmatprep.mubr.bf16.mxu1 %v20677_v34  ;;  %v9861_v25 = vmax.f32 %v9845_v41, 0.0  ;;  %v16122_v41 = vld [vmem:[%s20491_s4 + $0x18] sm:$0xff]   ;;  %v19886_v31 = vld [vmem:[#allocation2 + $0xf0] sm:$0xff] }
 0x7ed   : > { %v9844_v15 = vadd.f32 %v19794_v16, %v9779_v22  ;;  %14990 = vmatprep.subr.bf16.mxu1 %v16116_v51  ;;  %v9859_v19 = vmax.f32 %v9843_v2, 0.0  ;;  %v16123_v22 = vld [vmem:[%s20491_s4 + $0x40] sm:$0xff]  }
 0x7ee   : > { %v9862_v43 = vmax.f32 %v9846_v27, 0.0  ;;  %v10288_v27 = vld [vmem:[#allocation2 + $0xc0] sm:$0xf8] }
 0x7ef   : > { %v9860_v6 = vmax.f32 %v9844_v15, 0.0  ;;  %v10334_v15 = vrot.slane %v19886_v31, 4 }
 0x7f0   : > { %v9874_v58 = vpack.c.bf16 %v9862_v43, %v9861_v25  ;;  %14991 = vmatpush3.bf16.msra.mxu1 %v16116_v51  ;;  %v10332_v51 = vrot.slane %v19868_v13, 4  ;;  %v10486_v43 = vshrl.u32 %v10288_v27, 16 }
 0x7f1   : > { %v9873_v7 = vpack.c.bf16 %v9860_v6, %v9859_v19  ;;  %v14982_v56 = vpop.f32.mrb[120].mxu0  ;;  %14992 = vmatprep.subr.bf16.mxu1 %v16117_v55  ;;  %v10489_v19 = vshll.u32 %v10288_v27, 16 }
 0x7f2   : > { %v9849_v32 = vadd.f32 %v19794_v16, %v14982_v56  ;;  %v9792_v42 = vpop.f32.mrb[121].mxu0  ;;  %v19897_v6 = vsel %vm1011_vm3, %v10332_v51, %v10334_v15  ;;  %v10488_v56 = vrot.slane %v10486_v43, 3 }
 0x7f3   : > { %v9847_v18 = vadd.f32 %v19794_v16, %v9792_v42  ;;  %v14983_v9 = vpop.f32.mrb[122].mxu0  ;;  %13415 = vmatmul.mubr.msk.bf16.gmra.mrb[116].mxu1 %vm380_vm1, %v9872_v12  ;;  %v19864_v12 = vld [vmem:[#allocation2 + $0xe0] sm:$0xff] }
 0x7f4   : > { %v9850_v47 = vadd.f32 %v19794_v16, %v14983_v9  ;;  %v9795_v36 = vpop.f32.mrb[123].mxu0  ;;  %10051 = vmatprep.mubr.bf16.mxu1 %v20677_v34  ;;  %14993 = vmatpush3.bf16.msra.mxu1 %v16117_v55  ;;  %v9865_v26 = vmax.f32 %v9849_v32, 0.0  ;;  %v16182_v55 = vld [vmem:[#allocation2 + $0xf8] sm:$0xff]  ;;  %v10515_v9 = vshll.u32 %v19845_v61, 16 }
 0x7f5   : > { %v9848_v54 = vadd.f32 %v19794_v16, %v9795_v36  ;;  %14994 = vmatprep.subr.bf16.mxu1 %v16118_v28  ;;  %v9863_v48 = vmax.f32 %v9847_v18, 0.0  ;;  %v19894_v25 = vrot.slane %v16182_v55, 4  ;;  %v10512_v18 = vshrl.u32 %v19845_v61, 16 }
 0x7f6   : > { %v9866_v60 = vmax.f32 %v9850_v47, 0.0  ;;  %v10503_v47 = vshrl.u32 %v19847_v38, 16  ;;  %v10506_v36 = vshll.u32 %v19847_v38, 16 }
 0x7f7   : > { %v9864_v44 = vmax.f32 %v9848_v54, 0.0 }
 0x7f8   : > { %v9876_v63 = vpack.c.bf16 %v9866_v60, %v9865_v26  ;;  %14995 = vmatpush3.bf16.msra.mxu1 %v16118_v28  ;;  %v10491_v28 = vrot.slane %v10489_v19, 4  ;;  %v10514_v26 = vrot.slane %v10512_v18, 3  ;;  %v10517_v60 = vrot.slane %v10515_v9, 4 }
 0x7f9   : > { %v9875_v1 = vpack.c.bf16 %v9864_v44, %v9863_v48  ;;  %v14986_v4 = vpop.f32.mrb[124].mxu0  ;;  %15012 = vmatprep.subr.bf16.mxu1 %v16119_v52  ;;  %v10505_v48 = vrot.slane %v10503_v47, 3  ;;  %v10508_v44 = vrot.slane %v10506_v36, 4 }
 0x7fa   : > { %v9853_v50 = vadd.f32 %v19794_v16, %v14986_v4  ;;  %v9808_v21 = vpop.f32.mrb[125].mxu0  ;;  %v10492_v42 = vor.u32 %v10491_v28, %v10488_v56  ;;  %v10518_v4 = vor.u32 %v10517_v60, %v10514_v26 }
 0x7fb   : > { %v9851_v53 = vadd.f32 %v19794_v16, %v9808_v21  ;;  %v14987_v17 = vpop.f32.mrb[126].mxu0  ;;  %13416 = vmatmul.mubr.msk.bf16.gmra.mrb[120].mxu1 %vm380_vm1, %v9873_v7  ;;  %v19905_v7 = vld [vmem:[#allocation2 + $0x100] sm:$0xf]  ;;  %v10533_v21 = vshll.u32 %v19868_v13, 16 }
 0x7fc   : > { %v9854_v49 = vadd.f32 %v19794_v16, %v14987_v17  ;;  %v9811_v20 = vpop.f32.mrb[127].mxu0  ;;  %10061 = vmatprep.mubr.bf16.mxu1 %v20677_v34  ;;  %v9869_v14 = vmax.f32 %v9853_v50, 0.0  ;;  %v10338_v32 = vrot.slane %v19905_v7, 4  ;;  %v10530_v50 = vshrl.u32 %v19868_v13, 16  ;;  %v16124_v17 = vld [vmem:[%s20491_s4 + $0x48] sm:$0xff]  }
 0x7fd   : > { %v9852_v0 = vadd.f32 %v19794_v16, %v9811_v20  ;;  %v9867_v33 = vmax.f32 %v9851_v53, 0.0  ;;  %v19838_v16 = vld [vmem:[#allocation2 + $0xc0] sm:$0xf0]  ;;  %v19932_v53 = vor.u32 %v10508_v44, %v10505_v48  ;;  %v10557_v43 = vshrl.u32 %v19905_v7, 16 }
 0x7fe   : > { %v9870_v29 = vmax.f32 %v9854_v49, 0.0  ;;  %v10323_v46 = vrot.slane %v19838_v16, 4  ;;  %v10339_v54 = vsel %vm1011_vm3, %v19894_v25, %v10338_v32  ;;  %v10560_v19 = vshll.u32 %v19905_v7, 16 }
 0x7ff   : > { %v9868_v37 = vmax.f32 %v9852_v0, 0.0  ;;  %v10510_v49 = vsel %vm3194_vm4, %v19719_v10, %v19932_v53  ;;  %v10720_v28 = vshrl.u32 %v19838_v16, 16  ;;  %v10723_v32 = vshll.u32 %v19838_v16, 16 }
 0x800   : > { %v9878_v8 = vpack.c.bf16 %v9870_v29, %v9869_v14  ;;  %v10325_v45 = vsel %vm1011_vm3, %v10323_v46, %v19759_v23  ;;  %v10330_v23 = vrot.slane %v19864_v12, 4  ;;  %v19947_v14 = vsel %vm3194_vm4, %v19932_v53, %v10518_v4 }
 0x801   : > { %v9877_v62 = vpack.c.bf16 %v9868_v37, %v9867_v33  ;;  %v10532_v29 = vrot.slane %v10530_v50, 3  ;;  %v10535_v33 = vrot.slane %v10533_v21, 4  ;;  %v10722_v7 = vrot.slane %v10720_v28, 4 }
 0x802   : > { %v19879_v39 = vsel %vm1011_vm3, %v10328_v24, %v10330_v23  ;;  %v19884_v2 = vsel %vm1011_vm3, %v10330_v23, %v10332_v51  ;;  %v20730_v23 = vld [vmem:[#allocation27_spill] sm:$0xff]  ;;  %v10725_v60 = vrot.slane %v10723_v32, 5 }
 0x803   : > { %13417 = vmatmul.mubr.msk.bf16.gmra.mrb[124].mxu1 %vm380_vm1, %v9874_v58  ;;  %v19903_v58 = vsel %vm1011_vm3, %v10334_v15, %v19894_v25  ;;  %v10536_v46 = vor.u32 %v10535_v33, %v10532_v29  ;;  %v20731_v51 = vshrl.u32 %v20730_v23, 16  ;;  %v20732_v27 = vshll.u32 %v20730_v23, 16  ;;  %v16127_v15 = vld [vmem:[%s20491_s4 + $0x60] sm:$0xff]  }
 0x804   : > { %10071 = vmatprep.mubr.bf16.mxu1 %v20677_v34  ;;  %v10726_v48 = vor.u32 %v10725_v60, %v10722_v7  ;;  %v16133_v7 = vld [vmem:[%s20491_s4 + $0x90] sm:$0xff]  }
 0x805   : > { %v20734_v60 = vld [vmem:[#allocation28_spill] sm:$0xff] }
 0x80b   : > { %13418 = vmatmul.mubr.msk.bf16.gmra.mrb[128].mxu1 %vm380_vm1, %v9875_v1  ;;  %v10524_v1 = vshll.u32 %v19864_v12, 16 }
 0x80c   : > { %10081 = vmatprep.mubr.bf16.mxu1 %v20677_v34 }
 0x80d   : > { %v10526_v0 = vrot.slane %v10524_v1, 4 }
 0x813   : > { %13419 = vmatmul.mubr.msk.bf16.gmra.mrb[132].mxu1 %vm380_vm1, %v9876_v63  ;;  %v10521_v63 = vshrl.u32 %v19864_v12, 16 }
 0x814   : > { %10091 = vmatprep.mubr.bf16.mxu1 %v20677_v34 }
 0x815   : > { %v10523_v20 = vrot.slane %v10521_v63, 3 }
 0x817   : > { %v10527_v37 = vor.u32 %v10526_v0, %v10523_v20  ;;  %v10731_v20 = vrot.slane %v10503_v47, 4  ;;  %v10732_v0 = vrot.slane %v10506_v36, 5  ;;  %v10743_v47 = vrot.slane %v10530_v50, 4 }
 0x818   : > { %v10744_v36 = vrot.slane %v10533_v21, 5 }
 0x819   : > { %v19964_v24 = vsel %vm3194_vm4, %v10518_v4, %v10527_v37  ;;  %v10730_v4 = vsel %vm3429_vm5, %v10726_v48, %v20729_v30  ;;  %v20015_v33 = vor.u32 %v10732_v0, %v10731_v20  ;;  %v20736_v48 = vshll.u32 %v20734_v60, 16 }
 0x81b   : > { %13420 = vmatmul.mubr.msk.bf16.gmra.mrb[136].mxu1 %vm380_vm1, %v9877_v62  ;;  %v10542_v62 = vshll.u32 %v19886_v31, 16  ;;  %v10734_v61 = vsel %vm3429_vm5, %v20729_v30, %v20015_v33  ;;  %v16129_v30 = vld [vmem:[%s20491_s4 + $0x70] sm:$0xff]  }
 0x81c   : > { %10101 = vmatprep.mubr.bf16.mxu1 %v20677_v34 }
 0x81d   : > { %v10748_v21 = vrot.slane %v10542_v62, 5 }
 0x823   : > { %13421 = vmatmul.mubr.msk.bf16.gmra.mrb[140].mxu1 %vm380_vm1, %v9878_v8  ;;  %v10539_v8 = vshrl.u32 %v19886_v31, 16 }
 0x824   : > { %14996 = vmatprep.mubr.msk.bf16.mxu1 %vm380_vm1, %v10325_v45  ;;  %v16126_v45 = vld [vmem:[%s20491_s4 + $0x58] sm:$0xff]  }
 0x825   : > { %v10747_v50 = vrot.slane %v10539_v8, 4 }
 0x82b   : > { %14997 = vmatmul.mubr.msk.bf16.vlgmr.msra.gmra.mrb[144].mxu1 %vm380_vm1, %v10327_v40  ;;  %v10544_v40 = vrot.slane %v10542_v62, 4 }
 0x82c   : > { %15013 = vmatpush3.bf16.msra.mxu1 %v16119_v52  ;;  %15000 = vmatprep.mubr.msk.bf16.mxu1 %vm380_vm1, %v19862_v35  ;;  %v10501_v52 = vsel %vm3194_vm4, %v10492_v42, %v19719_v10  ;;  %v16125_v10 = vld [vmem:[%s20491_s4 + $0x50] sm:$0xff]  }
 0x82d   : > { %15014 = vmatprep.subr.bf16.mxu1 %v16120_v57 }
 0x830   : > { %15015 = vmatpush3.bf16.msra.mxu1 %v16120_v57  ;;  %v10541_v57 = vrot.slane %v10539_v8, 3  ;;  %v16131_v8 = vld [vmem:[%s20491_s4 + $0x80] sm:$0xff]  }
 0x831   : > { %15016 = vmatprep.subr.bf16.mxu1 %v16121_v3 }
 0x832   : > { %v10545_v55 = vor.u32 %v10544_v40, %v10541_v57  ;;  %v10749_v57 = vor.u32 %v10748_v21, %v10747_v50 }
 0x833   : > { %15001 = vmatmul.mubr.msk.bf16.gmra.mrb[148].mxu1 %vm380_vm1, %v19879_v39 }
 0x834   : > { %15004 = vmatprep.mubr.msk.bf16.mxu1 %vm380_vm1, %v19884_v2  ;;  %15017 = vmatpush3.bf16.msra.mxu1 %v16121_v3  ;;  %v19973_v3 = vsel %vm3194_vm4, %v10527_v37, %v10536_v46  ;;  %v19991_v42 = vsel %vm3194_vm4, %v10536_v46, %v10545_v55  ;;  %v10710_v46 = vld [vmem:[#allocation2 + $0x100] sm:$0x1f] }
 0x835   : > { %15018 = vmatprep.subr.bf16.mxu1 %v16122_v41  ;;  %v10756_v31 = vshrl.u32 %v10710_v46, 16  ;;  %v10759_v62 = vshll.u32 %v10710_v46, 16 }
 0x838   : > { %15019 = vmatpush3.bf16.msra.mxu1 %v16122_v41  ;;  %v10550_v41 = vrot.slane %v20731_v51, 3 }
 0x839   : > { %15036 = vmatprep.subr.bf16.mxu1 %v16123_v22 }
 0x83b   : > { %15005 = vmatmul.mubr.msk.bf16.gmra.mrb[152].mxu1 %vm380_vm1, %v19897_v6 }
 0x83c   : > { %15008 = vmatprep.mubr.msk.bf16.mxu1 %vm380_vm1, %v19903_v58 }
 0x843   : > { %15009 = vmatmul.mubr.msk.bf16.gmra.mrb[156].mxu1 %vm380_vm1, %v10339_v54  ;;  %v10559_v54 = vrot.slane %v10557_v43, 3 }
 0x844   : > { %15020 = vmatprep.mubr.msk.bf16.mxu1 %vm380_vm1, %v10501_v52  ;;  %v10562_v52 = vrot.slane %v10560_v19, 4 }
 0x846   : > { %v10563_v16 = vor.u32 %v10562_v52, %v10559_v54  ;;  %v16132_v52 = vld [vmem:[%s20491_s4 + $0x88] sm:$0xff]  }
 0x84b   : > { %15021 = vmatmul.mubr.msk.bf16.vlgmr.msra.gmra.mrb[144].mxu1 %vm380_vm1, %v10510_v49  ;;  %v10736_v49 = vrot.slane %v10515_v9, 5  ;;  %v10740_v9 = vrot.slane %v10524_v1, 5  ;;  %v16130_v1 = vld [vmem:[%s20491_s4 + $0x78] sm:$0xff]  }
 0x84c   : > { %15037 = vmatpush3.bf16.msra.mxu1 %v16123_v22  ;;  %15024 = vmatprep.mubr.msk.bf16.mxu1 %vm380_vm1, %v19947_v14  ;;  %v10553_v22 = vrot.slane %v20732_v27, 4  ;;  %v10761_v27 = vrot.slane %v10759_v62, 5 }
 0x84d   : > { %15038 = vmatprep.subr.bf16.mxu1 %v16124_v17 }
 0x84e   : > { %v19986_v56 = vor.u32 %v10553_v22, %v10550_v41  ;;  %v10758_v41 = vrot.slane %v10756_v31, 4  ;;  %v20733_v22 = vld [vmem:[#allocation29_spill] sm:$0xff] }
 0x850   : > { %15039 = vmatpush3.bf16.msra.mxu1 %v16124_v17  ;;  %v19997_v26 = vsel %vm3194_vm4, %v10545_v55, %v19986_v56  ;;  %v10564_v44 = vsel %vm3194_vm4, %v19986_v56, %v10563_v16  ;;  %v10735_v17 = vrot.slane %v10512_v18, 4  ;;  %v10739_v18 = vrot.slane %v10521_v63, 4 }
 0x851   : > { %15040 = vmatprep.subr.bf16.mxu1 %v16125_v10  ;;  %v10745_v63 = vor.u32 %v10744_v36, %v10743_v47  ;;  %v10762_v19 = vor.u32 %v10761_v27, %v10758_v41 }
 0x852   : > { %v10737_v29 = vor.u32 %v10736_v49, %v10735_v17  ;;  %v10741_v12 = vor.u32 %v10740_v9, %v10739_v18 }
 0x853   : > { %15025 = vmatmul.mubr.msk.bf16.gmra.mrb[148].mxu1 %vm380_vm1, %v19964_v24  ;;  %v20062_v51 = vsel %vm3429_vm5, %v10745_v63, %v10749_v57  ;;  %v10763_v32 = vsel %vm3429_vm5, %v20733_v22, %v10762_v19  ;;  %v9889_v19 = vld [vmem:[%s16681_s24 + $0x110] sm:$0xff] }
 0x854   : > { %15028 = vmatprep.mubr.msk.bf16.mxu1 %vm380_vm1, %v19973_v3  ;;  %15041 = vmatpush3.bf16.msra.mxu1 %v16125_v10  ;;  %v16128_v10 = vld [vmem:[%s20491_s4 + $0x68] sm:$0xff]   ;;  %v20030_v38 = vsel %vm3429_vm5, %v20015_v33, %v10737_v29  ;;  %v20045_v13 = vsel %vm3429_vm5, %v10737_v29, %v10741_v12  ;;  %v20054_v37 = vsel %vm3429_vm5, %v10741_v12, %v10745_v63  ;;  %v9887_v12 = vld [vmem:[%s16681_s24 + $0x100] sm:$0xff] }
 0x855   : > { %15042 = vmatprep.subr.bf16.mxu1 %v16126_v45  ;;  %v9903_v63 = vunpack.c.l.bf16 %v9887_v12  ;;  %v9904_v46 = vunpack.c.h.bf16 %v9887_v12  ;;  %v9891_v12 = vld [vmem:[%s16681_s24 + $0x120] sm:$0xff] }
 0x858   : > { %15043 = vmatpush3.bf16.msra.mxu1 %v16126_v45  ;;  %v10925_v45 = vld [vmem:[#allocation2 + $0xc8] sm:$0xf8] }
 0x859   : > { %15060 = vmatprep.subr.bf16.mxu1 %v16127_v15  ;;  %v10943_v40 = vshrl.u32 %v10925_v45, 16  ;;  %v10946_v23 = vshll.u32 %v10925_v45, 16 }
 0x85b   : > { %15029 = vmatmul.mubr.msk.bf16.gmra.mrb[152].mxu1 %vm380_vm1, %v19991_v42  ;;  %v10945_v55 = vrot.slane %v10943_v40, 3  ;;  %v10948_v43 = vrot.slane %v10946_v23, 4 }
 0x85c   : > { %15032 = vmatprep.mubr.msk.bf16.mxu1 %vm380_vm1, %v19997_v26 }
 0x85d   : > { %v10949_v28 = vor.u32 %v10948_v43, %v10945_v55 }
 0x85f   : > { %v10958_v54 = vsel %vm3194_vm4, %v10949_v28, %v19932_v53  ;;  %v16134_v53 = vld [vmem:[%s20491_s4 + $0x98] sm:$0xff]  }
 0x863   : > { %15033 = vmatmul.mubr.msk.bf16.gmra.mrb[156].mxu1 %vm380_vm1, %v10564_v44  ;;  %v20097_v44 = vld [vmem:[#allocation2 + $0x108] sm:$0xf] }
 0x864   : > { %15044 = vmatprep.mubr.msk.bf16.mxu1 %vm380_vm1, %v10730_v4  ;;  %v16135_v4 = vld [vmem:[%s20491_s4 + $0xa0] sm:$0xff]   ;;  %v11014_v17 = vshrl.u32 %v20097_v44, 16  ;;  %v11216_v45 = vrot.slane %v20097_v44, 4 }
 0x866   : > { %v11016_v20 = vrot.slane %v11014_v17, 3 }
 0x86b   : > { %15045 = vmatmul.mubr.msk.bf16.vlgmr.msra.gmra.mrb[144].mxu1 %vm380_vm1, %v10734_v61 }
 0x86c   : > { %15061 = vmatpush3.bf16.msra.mxu1 %v16127_v15  ;;  %15048 = vmatprep.mubr.msk.bf16.mxu1 %vm380_vm1, %v20030_v38  ;;  %v20068_v15 = vsel %vm3429_vm5, %v10749_v57, %v20733_v22 }
 0x86d   : > { %15062 = vmatprep.subr.bf16.mxu1 %v16128_v10 }
 0x870   : > { %15063 = vmatpush3.bf16.msra.mxu1 %v16128_v10  ;;  %v11183_v10 = vld [vmem:[#allocation2 + $0xc8] sm:$0xf0] }
 0x871   : > { %15064 = vmatprep.subr.bf16.mxu1 %v16129_v30  ;;  %v11201_v61 = vrot.slane %v11183_v10, 4  ;;  %v11389_v36 = vshrl.u32 %v11183_v10, 16 }
 0x873   : > { %15049 = vmatmul.mubr.msk.bf16.gmra.mrb[148].mxu1 %vm380_vm1, %v20045_v13  ;;  %v11203_v9 = vsel %vm1011_vm3, %v11201_v61, %v19851_v11  ;;  %v16138_v11 = vld [vmem:[%s20491_s4 + $0xb8] sm:$0xff]  }
 0x874   : > { %15052 = vmatprep.mubr.msk.bf16.mxu1 %vm380_vm1, %v20054_v37  ;;  %15065 = vmatpush3.bf16.msra.mxu1 %v16129_v30  ;;  %v11392_v30 = vshll.u32 %v11183_v10, 16 }
 0x875   : > { %15066 = vmatprep.subr.bf16.mxu1 %v16130_v1 }
 0x876   : > { %v11394_v50 = vrot.slane %v11392_v30, 5 }
 0x878   : > { %15067 = vmatpush3.bf16.msra.mxu1 %v16130_v1  ;;  %v11391_v1 = vrot.slane %v11389_v36, 4 }
 0x879   : > { %15084 = vmatprep.subr.bf16.mxu1 %v16131_v8 }
 0x87a   : > { %v11395_v27 = vor.u32 %v11394_v50, %v11391_v1 }
 0x87b   : > { %15053 = vmatmul.mubr.msk.bf16.gmra.mrb[152].mxu1 %vm380_vm1, %v20062_v51 }
 0x87c   : > { %15056 = vmatprep.mubr.msk.bf16.mxu1 %vm380_vm1, %v20068_v15 }
 0x883   : > { %15057 = vmatmul.mubr.msk.bf16.gmra.mrb[156].mxu1 %vm380_vm1, %v10763_v32 }
 0x884   : > { %15068 = vmatprep.mubr.msk.bf16.mxu1 %vm380_vm1, %v10958_v54  ;;  %v11399_v54 = vsel %vm3429_vm5, %v11395_v27, %v20015_v33 }
 0x88b   : > { %15069 = vmatmul.mubr.msk.bf16.vlgmr.msra.gmra.mrb[144].mxu1 %vm380_vm1, %v19947_v14  ;;  %v20735_v14 = vshrl.u32 %v20734_v60, 16 }
 0x88c   : > { %15085 = vmatpush3.bf16.msra.mxu1 %v16131_v8  ;;  %15072 = vmatprep.mubr.msk.bf16.mxu1 %vm380_vm1, %v19964_v24  ;;  %v11010_v24 = vrot.slane %v20736_v48, 4 }
 0x88d   : > { %15086 = vmatprep.subr.bf16.mxu1 %v16132_v52  ;;  %v11007_v16 = vrot.slane %v20735_v14, 3  ;;  %v9890_v14 = vld [vmem:[%s16681_s24 + $0x118] sm:$0xff] }
 0x88f   : > { %v20106_v49 = vor.u32 %v11010_v24, %v11007_v16  ;;  %v16156_v16 = vld [vmem:[#allocation9 + $0x14] ss:$8 sps:$4 sm:$0xff]   ;;  %v9907_v24 = vunpack.c.l.bf16 %v9889_v19 }
 0x890   : > { %15087 = vmatpush3.bf16.msra.mxu1 %v16132_v52  ;;  %v16151_v52 = vld [vmem:[#allocation9] ss:$8 sps:$4 sm:$0xff]  }
 0x891   : > { %15088 = vmatprep.subr.bf16.mxu1 %v16133_v7 }
 0x893   : > { %15073 = vmatmul.mubr.msk.bf16.gmra.mrb[148].mxu1 %vm380_vm1, %v19973_v3  ;;  %v11017_v3 = vshll.u32 %v20097_v44, 16 }
 0x894   : > { %15076 = vmatprep.mubr.msk.bf16.mxu1 %vm380_vm1, %v19991_v42  ;;  %15089 = vmatpush3.bf16.msra.mxu1 %v16133_v7  ;;  %v11012_v42 = vsel %vm3194_vm4, %v19986_v56, %v20106_v49  ;;  %v16137_v56 = vld [vmem:[%s20491_s4 + $0xb0] sm:$0xff]   ;;  %v16153_v7 = vld [vmem:[#allocation9 + $0x4] ss:$8 sps:$4 sm:$0xff]  }
 0x895   : > { %15090 = vmatprep.subr.bf16.mxu1 %v16134_v53  ;;  %v11019_v0 = vrot.slane %v11017_v3, 4  ;;  %12423 = vmatprep.subr.bf16.mxu0 %v16153_v7  ;;  %v9908_v3 = vunpack.c.h.bf16 %v9889_v19 }
 0x896   : > { %12424 = vmatpush1.bf16.msra.mxu0 %v16151_v52 }
 0x897   : > { %v11020_v29 = vor.u32 %v11019_v0, %v11016_v20  ;;  %v16154_v20 = vld [vmem:[#allocation9 + $0x10] ss:$8 sps:$4 sm:$0xff]   ;;  %12425 = vmatprep.subr.bf16.mxu0 %v16156_v16 }
 0x898   : > { %15091 = vmatpush3.bf16.msra.mxu1 %v16134_v53  ;;  %v11594_v16 = vld [vmem:[#allocation2 + $0xd0] sm:$0xf8] }
 0x899   : > { %15108 = vmatprep.subr.bf16.mxu1 %v16135_v4  ;;  %v11021_v18 = vsel %vm3194_vm4, %v20106_v49, %v11020_v29  ;;  %v16159_v29 = vld [vmem:[#allocation9 + $0x24] ss:$8 sps:$4 sm:$0xff]  }
 0x89a   : > { %12426 = vmatpush1.bf16.msra.mxu0 %v16154_v20 }
 0x89b   : > { %15077 = vmatmul.mubr.msk.bf16.gmra.mrb[152].mxu1 %vm380_vm1, %v19997_v26  ;;  %v16136_v26 = vld [vmem:[%s20491_s4 + $0xa8] sm:$0xff]   ;;  %12427 = vmatprep.subr.bf16.mxu0 %v16159_v29  ;;  %v11612_v29 = vshrl.u32 %v11594_v16, 16 }
 0x89c   : > { %15080 = vmatprep.mubr.msk.bf16.mxu1 %vm380_vm1, %v11012_v42  ;;  %v9909_v42 = vunpack.c.l.bf16 %v9890_v14 }
 0x8a3   : > { %15081 = vmatmul.mubr.msk.bf16.gmra.mrb[156].mxu1 %vm380_vm1, %v11021_v18 }
 0x8a4   : > { %15092 = vmatprep.mubr.msk.bf16.mxu1 %vm380_vm1, %v11203_v9  ;;  %v9910_v9 = vunpack.c.h.bf16 %v9890_v14  ;;  %v9894_v14 = vld [vmem:[%s16681_s24 + $0x138] sm:$0xff] }
 0x8ab   : > { %15093 = vmatmul.mubr.msk.bf16.vlgmr.msra.gmra.mrb[144].mxu1 %vm380_vm1, %v19862_v35  ;;  %v20140_v35 = vld [vmem:[%s20491_s4 + $0xc0] sm:$0xff]  }
 0x8ac   : > { %15109 = vmatpush3.bf16.msra.mxu1 %v16135_v4  ;;  %15096 = vmatprep.mubr.msk.bf16.mxu1 %vm380_vm1, %v19879_v39  ;;  %v16183_v39 = vld [vmem:[#allocation2 + $0x100] sm:$0xff] }
 0x8ad   : > { %15110 = vmatprep.subr.bf16.mxu1 %v16136_v26  ;;  %v20142_v47 = vrot.slane %v16183_v39, 4  ;;  %v16140_v39 = vld [vmem:[%s20491_s4 + $0xc8] sm:$0xff]  }
 0x8af   : > { %v11217_v43 = vsel %vm1011_vm3, %v20142_v47, %v11216_v45  ;;  %v9911_v45 = vunpack.c.l.bf16 %v9891_v12 }
 0x8b0   : > { %15111 = vmatpush3.bf16.msra.mxu1 %v16136_v26 }
 0x8b1   : > { %15112 = vmatprep.subr.bf16.mxu1 %v16137_v56 }
 0x8b3   : > { %15097 = vmatmul.mubr.msk.bf16.gmra.mrb[148].mxu1 %vm380_vm1, %v19884_v2  ;;  %v11215_v2 = vsel %vm1011_vm3, %v19894_v25, %v20142_v47 }
 0x8b4   : > { %15100 = vmatprep.mubr.msk.bf16.mxu1 %vm380_vm1, %v19897_v6  ;;  %15113 = vmatpush3.bf16.msra.mxu1 %v16137_v56  ;;  %v9888_v6 = vld [vmem:[%s16681_s24 + $0x108] sm:$0xff] }
 0x8b5   : > { %15114 = vmatprep.subr.bf16.mxu1 %v16138_v11  ;;  %v9905_v31 = vunpack.c.l.bf16 %v9888_v6  ;;  %v9906_v40 = vunpack.c.h.bf16 %v9888_v6 }
 0x8b8   : > { %15115 = vmatpush3.bf16.msra.mxu1 %v16138_v11 }
 0x8b9   : > { %15132 = vmatprep.subr.bf16.mxu1 %v20140_v35 }
 0x8bb   : > { %15101 = vmatmul.mubr.msk.bf16.gmra.mrb[152].mxu1 %vm380_vm1, %v19903_v58 }
 0x8bc   : > { %15104 = vmatprep.mubr.msk.bf16.mxu1 %vm380_vm1, %v11215_v2  ;;  %v16157_v2 = vld [vmem:[#allocation9 + $0x20] ss:$8 sps:$4 sm:$0xff]  }
 0x8bd   : > { %12428 = vmatpush1.bf16.msra.mxu0 %v16157_v2 }
 0x8be   : > { %v10033_v21 = vpop.f32.mrb[112].mxu1 }
 0x8bf   : > { %v10034_v8 = vadd.f32 %v10033_v21, %v18991_v59  ;;  %v10035_v57 = vpop.f32.mrb[113].mxu1  ;;  %v9892_v21 = vld [vmem:[%s16681_s24 + $0x128] sm:$0xff] }
 0x8c0   : > { %v10036_v58 = vadd.f32 %v10035_v57, %v18994_v5  ;;  %v10037_v62 = vpop.f32.mrb[114].mxu1 }
 0x8c1   : > { %v10112_v25 = vadd.f32 %v10034_v8, %v9903_v63  ;;  %v10038_v23 = vadd.f32 %v10037_v62, %v18991_v59  ;;  %v10039_v41 = vpop.f32.mrb[115].mxu1  ;;  %v16141_v8 = vld [vmem:[%s20491_s4 + $0xd0] sm:$0xff]  }
 0x8c2   : > { %v10113_v22 = vadd.f32 %v10036_v58, %v9904_v46  ;;  %v10040_v55 = vadd.f32 %v10039_v41, %v18994_v5  ;;  %v9912_v58 = vunpack.c.h.bf16 %v9891_v12  ;;  %v9914_v41 = vunpack.c.h.bf16 %v9892_v21 }
 0x8c3   : > { %v10144_v28 = vmax.f32 %v10112_v25, 0.0  ;;  %v10114_v32 = vadd.f32 %v10038_v23, %v9905_v31  ;;  %15105 = vmatmul.mubr.msk.bf16.gmra.mrb[156].mxu1 %vm380_vm1, %v11217_v43  ;;  %v16142_v43 = vld [vmem:[%s20491_s4 + $0xd8] sm:$0xff]  }
 0x8c4   : > { %v10145_v53 = vmax.f32 %v10113_v22, 0.0  ;;  %v10115_v60 = vadd.f32 %v10040_v55, %v9906_v40  ;;  %15116 = vmatprep.mubr.msk.bf16.mxu1 %vm380_vm1, %v11399_v54  ;;  %v9913_v40 = vunpack.c.l.bf16 %v9892_v21  ;;  %v11379_v54 = vld [vmem:[#allocation2 + $0x108] sm:$0x1f] }
 0x8c5   : > { %v10146_v48 = vmax.f32 %v10114_v32, 0.0  ;;  %v9893_v32 = vld [vmem:[%s16681_s24 + $0x130] sm:$0xff] }
 0x8c6   : > { %v13618_v44 = vpack.c.bf16 %v10145_v53, %v10144_v28  ;;  %v10147_v4 = vmax.f32 %v10115_v60, 0.0  ;;  %v10043_v17 = vpop.f32.mrb[116].mxu1 }
 0x8c7   : > { %v10044_v33 = vadd.f32 %v10043_v17, %v18991_v59  ;;  %v10045_v0 = vpop.f32.mrb[117].mxu1  ;;  %v20203_v17 = vld [vmem:[%s20491_s4 + $0xe0] sm:$0xff]  }
 0x8c8   : > { %10272 = vst [vmem:[%s19013_s21 + $0x100] sm:$0xff] %v13618_v44  ;;  %v13619_v10 = vpack.c.bf16 %v10147_v4, %v10146_v48  ;;  %v10046_v61 = vadd.f32 %v10045_v0, %v18994_v5  ;;  %v10047_v18 = vpop.f32.mrb[118].mxu1  ;;  %v11425_v44 = vshrl.u32 %v11379_v54, 16  ;;  %v11428_v4 = vshll.u32 %v11379_v54, 16 }
 0x8c9   : > { %v10116_v26 = vadd.f32 %v10044_v33, %v9907_v24  ;;  %v10048_v56 = vadd.f32 %v10047_v18, %v18991_v59  ;;  %v10049_v11 = vpop.f32.mrb[119].mxu1  ;;  %v9915_v24 = vunpack.c.l.bf16 %v9893_v32  ;;  %v9916_v33 = vunpack.c.h.bf16 %v9893_v32 }
 0x8ca   : > { %10273 = vst [vmem:[%s19013_s21 + $0x108] sm:$0xff] %v13619_v10  ;;  %v10117_v36 = vadd.f32 %v10046_v61, %v9908_v3  ;;  %v10050_v30 = vadd.f32 %v10049_v11, %v18994_v5 }
 0x8cb   : > { %v10148_v6 = vmax.f32 %v10116_v26, 0.0  ;;  %v10118_v63 = vadd.f32 %v10048_v56, %v9909_v42  ;;  %15117 = vmatmul.mubr.msk.bf16.vlgmr.msra.gmra.mrb[144].mxu1 %vm380_vm1, %v20030_v38  ;;  %v9917_v42 = vunpack.c.l.bf16 %v9894_v14  ;;  %v11615_v26 = vshll.u32 %v11594_v16, 16  ;;  %v20741_v16 = vld [vmem:[#allocation30_spill] sm:$0xff] }
 0x8cc   : > { %v10149_v1 = vmax.f32 %v10117_v36, 0.0  ;;  %v10119_v50 = vadd.f32 %v10050_v30, %v9910_v9  ;;  %15133 = vmatpush3.bf16.msra.mxu1 %v20140_v35  ;;  %15120 = vmatprep.mubr.msk.bf16.mxu1 %vm380_vm1, %v20045_v13  ;;  %v9918_v9 = vunpack.c.h.bf16 %v9894_v14  ;;  %v11427_v36 = vrot.slane %v11425_v44, 4 }
 0x8cd   : > { %v10150_v46 = vmax.f32 %v10118_v63, 0.0  ;;  %15134 = vmatprep.subr.bf16.mxu1 %v16140_v39  ;;  %v11430_v30 = vrot.slane %v11428_v4, 5 }
 0x8ce   : > { %v13620_v57 = vpack.c.bf16 %v10149_v1, %v10148_v6  ;;  %v10151_v31 = vmax.f32 %v10119_v50, 0.0  ;;  %v10053_v38 = vpop.f32.mrb[120].mxu1  ;;  %v9895_v6 = vld [vmem:[%s16681_s24 + $0x140] sm:$0xff] }
 0x8cf   : > { %v10054_v62 = vadd.f32 %v10053_v38, %v18991_v59  ;;  %v10055_v35 = vpop.f32.mrb[121].mxu1  ;;  %v20737_v50 = vld [vmem:[#allocation32_spill] sm:$0xff]  ;;  %v20740_v38 = vld [vmem:[#allocation31_spill] sm:$0xff] }
 0x8d0   : > { %10274 = vst [vmem:[%s19013_s21 + $0x110] sm:$0xff] %v13620_v57  ;;  %v13621_v13 = vpack.c.bf16 %v10151_v31, %v10150_v46  ;;  %v10056_v25 = vadd.f32 %v10055_v35, %v18994_v5  ;;  %v10057_v23 = vpop.f32.mrb[122].mxu1  ;;  %15135 = vmatpush3.bf16.msra.mxu1 %v16140_v39  ;;  %v20738_v21 = vshrl.u32 %v20737_v50, 16  ;;  %v11617_v35 = vrot.slane %v11615_v26, 4 }
 0x8d1   : > { %v10120_v27 = vadd.f32 %v10054_v62, %v9911_v45  ;;  %v10058_v22 = vadd.f32 %v10057_v23, %v18991_v59  ;;  %v10059_v55 = vpop.f32.mrb[123].mxu1  ;;  %15136 = vmatprep.subr.bf16.mxu1 %v16141_v8  ;;  %v20739_v45 = vshll.u32 %v20737_v50, 16  ;;  %v11614_v62 = vrot.slane %v11612_v29, 3 }
 0x8d2   : > { %10275 = vst [vmem:[%s19013_s21 + $0x118] sm:$0xff] %v13621_v13  ;;  %v10121_v19 = vadd.f32 %v10056_v25, %v9912_v58  ;;  %v10060_v28 = vadd.f32 %v10059_v55, %v18994_v5  ;;  %v11622_v46 = vrot.slane %v20738_v21, 3  ;;  %v9896_v58 = vld [vmem:[%s16681_s24 + $0x148] sm:$0xff]  ;;  %v9919_v13 = vunpack.c.l.bf16 %v9895_v6 }
 0x8d3   : > { %v10152_v52 = vmax.f32 %v10120_v27, 0.0  ;;  %v10122_v7 = vadd.f32 %v10058_v22, %v9913_v40  ;;  %15121 = vmatmul.mubr.msk.bf16.gmra.mrb[148].mxu1 %vm380_vm1, %v20054_v37  ;;  %v11431_v25 = vor.u32 %v11430_v30, %v11427_v36  ;;  %v9920_v27 = vunpack.c.h.bf16 %v9895_v6 }
 0x8d4   : > { %v10153_v53 = vmax.f32 %v10121_v19, 0.0  ;;  %v10123_v60 = vadd.f32 %v10060_v28, %v9914_v41  ;;  %15124 = vmatprep.mubr.msk.bf16.mxu1 %vm380_vm1, %v20062_v51  ;;  %15137 = vmatpush3.bf16.msra.mxu1 %v16141_v8  ;;  %v11625_v8 = vrot.slane %v20739_v45, 4 }
 0x8d5   : > { %v10154_v48 = vmax.f32 %v10122_v7, 0.0  ;;  %15138 = vmatprep.subr.bf16.mxu1 %v16142_v43  ;;  %v11618_v7 = vor.u32 %v11617_v35, %v11614_v62 }
 0x8d6   : > { %v13622_v37 = vpack.c.bf16 %v10153_v53, %v10152_v52  ;;  %v10155_v3 = vmax.f32 %v10123_v60, 0.0  ;;  %v10063_v20 = vpop.f32.mrb[124].mxu1  ;;  %v11626_v19 = vor.u32 %v11625_v8, %v11622_v46  ;;  %v9922_v52 = vunpack.c.h.bf16 %v9896_v58 }
 0x8d7   : > { %v10064_v51 = vadd.f32 %v10063_v20, %v18991_v59  ;;  %v10065_v0 = vpop.f32.mrb[125].mxu1  ;;  %v9897_v20 = vld [vmem:[%s16681_s24 + $0x150] sm:$0xff] }
 0x8d8   : > { %10276 = vst [vmem:[%s19013_s21 + $0x120] sm:$0xff] %v13622_v37  ;;  %v13623_v10 = vpack.c.bf16 %v10155_v3, %v10154_v48  ;;  %v10066_v61 = vadd.f32 %v10065_v0, %v18994_v5  ;;  %v10067_v18 = vpop.f32.mrb[126].mxu1  ;;  %15139 = vmatpush3.bf16.msra.mxu1 %v16142_v43  ;;  %v9921_v43 = vunpack.c.l.bf16 %v9896_v58  ;;  %v11432_v48 = vsel %vm3429_vm5, %v20741_v16, %v11431_v25  ;;  %v20745_v0 = vld [vmem:[#allocation34_spill] sm:$0xff] }
 0x8d9   : > { %v10124_v56 = vadd.f32 %v10064_v51, %v9915_v24  ;;  %v10068_v11 = vadd.f32 %v10067_v18, %v18991_v59  ;;  %v10069_v39 = vpop.f32.mrb[127].mxu1  ;;  %15156 = vmatprep.subr.bf16.mxu1 %v20203_v17  ;;  %v20742_v24 = vld [vmem:[#allocation33_spill] sm:$0xff]  ;;  %v11627_v18 = vsel %vm3194_vm4, %v11618_v7, %v11626_v19  ;;  %v9923_v30 = vunpack.c.l.bf16 %v9897_v20 }
 0x8da   : > { %10277 = vst [vmem:[%s19013_s21 + $0x128] sm:$0xff] %v13623_v10  ;;  %v10125_v12 = vadd.f32 %v10066_v61, %v9916_v33  ;;  %v10070_v2 = vadd.f32 %v10069_v39, %v18994_v5  ;;  %v20743_v44 = vshrl.u32 %v20742_v24, 16  ;;  %v20744_v33 = vshll.u32 %v20742_v24, 16  ;;  %v9898_v39 = vld [vmem:[%s16681_s24 + $0x158] sm:$0xff] }
 0x8db   : > { %v10156_v63 = vmax.f32 %v10124_v56, 0.0  ;;  %v10126_v1 = vadd.f32 %v10068_v11, %v9917_v42  ;;  %15125 = vmatmul.mubr.msk.bf16.gmra.mrb[152].mxu1 %vm380_vm1, %v20068_v15  ;;  %v20746_v42 = vshrl.u32 %v20745_v0, 16  ;;  %v9925_v46 = vunpack.c.l.bf16 %v9898_v39 }
 0x8dc   : > { %v10157_v57 = vmax.f32 %v10125_v12, 0.0  ;;  %v10127_v31 = vadd.f32 %v10070_v2, %v9918_v9  ;;  %15128 = vmatprep.mubr.msk.bf16.mxu1 %vm380_vm1, %v20740_v38  ;;  %v11631_v4 = vrot.slane %v20743_v44, 3  ;;  %v11634_v51 = vrot.slane %v20744_v33, 4 }
 0x8dd   : > { %v10158_v40 = vmax.f32 %v10126_v1, 0.0  ;;  %v11640_v29 = vrot.slane %v20746_v42, 3  ;;  %v20747_v9 = vshll.u32 %v20745_v0, 16  ;;  %v9926_v38 = vunpack.c.h.bf16 %v9898_v39  ;;  %v16146_v39 = vld [vmem:[%s20491_s4 + $0xf8] sm:$0xff]  }
 0x8de   : > { %v13624_v23 = vpack.c.bf16 %v10157_v57, %v10156_v63  ;;  %v10159_v15 = vmax.f32 %v10127_v31, 0.0  ;;  %v10073_v41 = vpop.f32.mrb[128].mxu1  ;;  %v9924_v63 = vunpack.c.h.bf16 %v9897_v20  ;;  %v11635_v1 = vor.u32 %v11634_v51, %v11631_v4  ;;  %v16145_v4 = vld [vmem:[%s20491_s4 + $0xf0] sm:$0xff]  }
 0x8df   : > { %v10074_v22 = vadd.f32 %v10073_v41, %v18991_v59  ;;  %v10075_v55 = vpop.f32.mrb[129].mxu1  ;;  %v11643_v26 = vrot.slane %v20747_v9, 4 }
 0x8e0   : > { %10278 = vst [vmem:[%s19013_s21 + $0x130] sm:$0xff] %v13624_v23  ;;  %v13625_v28 = vpack.c.bf16 %v10159_v15, %v10158_v40  ;;  %v10076_v32 = vadd.f32 %v10075_v55, %v18994_v5  ;;  %v10077_v54 = vpop.f32.mrb[130].mxu1  ;;  %v16144_v40 = vld [vmem:[%s20491_s4 + $0xe8] sm:$0xff]   ;;  %v11636_v55 = vsel %vm3194_vm4, %v11626_v19, %v11635_v1  ;;  %v9900_v19 = vld [vmem:[%s16681_s24 + $0x168] sm:$0xff] }
 0x8e1   : > { %v10128_v53 = vadd.f32 %v10074_v22, %v9919_v13  ;;  %v10078_v60 = vadd.f32 %v10077_v54, %v18991_v59  ;;  %v10079_v14 = vpop.f32.mrb[131].mxu1  ;;  %v11644_v45 = vor.u32 %v11643_v26, %v11640_v29  ;;  %v20748_v13 = vld [vmem:[#allocation35_spill] sm:$0xff]  ;;  %v9929_v42 = vunpack.c.l.bf16 %v9900_v19 }
 0x8e2   : > { %10279 = vst [vmem:[%s19013_s21 + $0x138] sm:$0xff] %v13625_v28  ;;  %v10129_v37 = vadd.f32 %v10076_v32, %v9920_v27  ;;  %v10080_v3 = vadd.f32 %v10079_v14, %v18994_v5  ;;  %v20749_v25 = vshrl.u32 %v20748_v13, 16  ;;  %v20750_v15 = vshll.u32 %v20748_v13, 16  ;;  %v20751_v28 = vld [vmem:[#allocation36_spill] sm:$0xff]  ;;  %v16147_v13 = vld [vmem:[%s20491_s4 + $0x100] sm:$0xff]  }
 0x8e3   : > { %v10160_v10 = vmax.f32 %v10128_v53, 0.0  ;;  %v10130_v61 = vadd.f32 %v10078_v60, %v9921_v43  ;;  %15129 = vmatmul.mubr.msk.bf16.gmra.mrb[156].mxu1 %vm380_vm1, %v11432_v48  ;;  %v9899_v43 = vld [vmem:[%s16681_s24 + $0x160] sm:$0xff]  ;;  %v20752_v32 = vshrl.u32 %v20751_v28, 16  ;;  %v11645_v53 = vsel %vm3194_vm4, %v11635_v1, %v11644_v45 }
 0x8e4   : > { %v10161_v56 = vmax.f32 %v10129_v37, 0.0  ;;  %v10131_v11 = vadd.f32 %v10080_v3, %v9922_v52  ;;  %15140 = vmatprep.mubr.msk.bf16.mxu1 %vm380_vm1, %v11627_v18  ;;  %v11649_v23 = vrot.slane %v20749_v25, 3  ;;  %v11652_v41 = vrot.slane %v20750_v15, 4 }
 0x8e5   : > { %v10162_v36 = vmax.f32 %v10130_v61, 0.0  ;;  %v11658_v54 = vrot.slane %v20752_v32, 3  ;;  %v20753_v60 = vshll.u32 %v20751_v28, 16  ;;  %v9927_v44 = vunpack.c.l.bf16 %v9899_v43 }
 0x8e6   : > { %v13626_v12 = vpack.c.bf16 %v10161_v56, %v10160_v10  ;;  %v10163_v2 = vmax.f32 %v10131_v11, 0.0  ;;  %v10083_v6 = vpop.f32.mrb[132].mxu1  ;;  %v9928_v33 = vunpack.c.h.bf16 %v9899_v43  ;;  %v11653_v51 = vor.u32 %v11652_v41, %v11649_v23 }
 0x8e7   : > { %v10084_v50 = vadd.f32 %v10083_v6, %v18991_v59  ;;  %v10085_v21 = vpop.f32.mrb[133].mxu1  ;;  %v11661_v14 = vrot.slane %v20753_v60, 4  ;;  %v9930_v9 = vunpack.c.h.bf16 %v9900_v19  ;;  %v20754_v6 = vld [vmem:[#allocation37_spill] sm:$0xff] }
 0x8e8   : > { %10280 = vst [vmem:[%s19013_s21 + $0x140] sm:$0xff] %v13626_v12  ;;  %v13627_v8 = vpack.c.bf16 %v10163_v2, %v10162_v36  ;;  %v10086_v57 = vadd.f32 %v10085_v21, %v18994_v5  ;;  %v10087_v31 = vpop.f32.mrb[134].mxu1  ;;  %v11654_v12 = vsel %vm3194_vm4, %v11644_v45, %v11653_v51  ;;  %v9901_v2 = vld [vmem:[%s16681_s24 + $0x170] sm:$0xff]  ;;  %v9902_v45 = vld [vmem:[%s16681_s24 + $0x178] sm:$0xff] }
 0x8e9   : > { %v10132_v58 = vadd.f32 %v10084_v50, %v9923_v30  ;;  %v10088_v62 = vadd.f32 %v10087_v31, %v18991_v59  ;;  %v10089_v35 = vpop.f32.mrb[135].mxu1  ;;  %v11662_v29 = vor.u32 %v11661_v14, %v11658_v54  ;;  %v20283_v50 = vld [vmem:[#allocation2 + $0x110] sm:$0xf]  ;;  %v9932_v41 = vunpack.c.h.bf16 %v9901_v2 }
 0x8ea   : > { %10281 = vst [vmem:[%s19013_s21 + $0x148] sm:$0xff] %v13627_v8  ;;  %v10133_v27 = vadd.f32 %v10086_v57, %v9924_v63  ;;  %v10090_v22 = vadd.f32 %v10089_v35, %v18994_v5  ;;  %v20755_v63 = vshrl.u32 %v20754_v6, 16  ;;  %v20756_v57 = vshll.u32 %v20754_v6, 16  ;;  %v16149_v6 = vld [vmem:[%s20491_s4 + $0x110] sm:$0xff]  }
 0x8eb   : > { %v10164_v52 = vmax.f32 %v10132_v58, 0.0  ;;  %v10134_v7 = vadd.f32 %v10088_v62, %v9925_v46  ;;  %15141 = vmatmul.mubr.msk.bf16.vlgmr.msra.gmra.mrb[144].mxu1 %vm380_vm1, %v11636_v55  ;;  %v11663_v8 = vsel %vm3194_vm4, %v11653_v51, %v11662_v29  ;;  %v9931_v35 = vunpack.c.l.bf16 %v9901_v2 }
 0x8ec   : > { %v10165_v16 = vmax.f32 %v10133_v27, 0.0  ;;  %v10135_v48 = vadd.f32 %v10090_v22, %v9926_v38  ;;  %15157 = vmatpush3.bf16.msra.mxu1 %v20203_v17  ;;  %15144 = vmatprep.mubr.msk.bf16.mxu1 %vm380_vm1, %v11645_v53  ;;  %v11676_v1 = vrot.slane %v20755_v63, 3  ;;  %v11679_v31 = vrot.slane %v20756_v57, 4  ;;  %v16187_v63 = vld [vmem:[#allocation2 + $0xf0] sm:$0xff] }
 0x8ed   : > { %v10166_v24 = vmax.f32 %v10134_v7, 0.0  ;;  %15158 = vmatprep.subr.bf16.mxu1 %v16144_v40  ;;  %v11686_v27 = vshll.u32 %v20283_v50, 16  ;;  %v9933_v43 = vunpack.c.l.bf16 %v9902_v45  ;;  %v9934_v7 = vunpack.c.h.bf16 %v9902_v45 }
 0x8ee   : > { %v13628_v37 = vpack.c.bf16 %v10165_v16, %v10164_v52  ;;  %v10167_v3 = vmax.f32 %v10135_v48, 0.0  ;;  %v10093_v20 = vpop.f32.mrb[136].mxu1  ;;  %v11680_v28 = vor.u32 %v11679_v31, %v11676_v1  ;;  %v11877_v1 = vrot.slane %v16187_v63, 4 }
 0x8ef   : > { %v10094_v0 = vadd.f32 %v10093_v20, %v18991_v59  ;;  %v10095_v17 = vpop.f32.mrb[137].mxu1 }
 0x8f0   : > { %10282 = vst [vmem:[%s19013_s21 + $0x150] sm:$0xff] %v13628_v37  ;;  %v13629_v10 = vpack.c.bf16 %v10167_v3, %v10166_v24  ;;  %v10096_v61 = vadd.f32 %v10095_v17, %v18994_v5  ;;  %v10097_v18 = vpop.f32.mrb[138].mxu1  ;;  %15159 = vmatpush3.bf16.msra.mxu1 %v16144_v40  ;;  %v11683_v40 = vshrl.u32 %v20283_v50, 16  ;;  %v11672_v24 = vsel %vm3194_vm4, %v11662_v29, %v20106_v49  ;;  %v16184_v29 = vld [vmem:[#allocation2 + $0xd8] sm:$0xff] }
 0x8f1   : > { %v10136_v26 = vadd.f32 %v10094_v0, %v9927_v44  ;;  %v10098_v56 = vadd.f32 %v10097_v18, %v18991_v59  ;;  %v10099_v11 = vpop.f32.mrb[139].mxu1  ;;  %15160 = vmatprep.subr.bf16.mxu1 %v16145_v4  ;;  %v11688_v44 = vrot.slane %v11686_v27, 4  ;;  %v11681_v3 = vsel %vm3194_vm4, %v20106_v49, %v11680_v28  ;;  %v20757_v27 = vld [vmem:[#allocation38_spill] sm:$0xff] }
 0x8f2   : > { %10283 = vst [vmem:[%s19013_s21 + $0x158] sm:$0xff] %v13629_v10  ;;  %v10137_v36 = vadd.f32 %v10096_v61, %v9928_v33  ;;  %v10100_v30 = vadd.f32 %v10099_v11, %v18994_v5  ;;  %v11685_v16 = vrot.slane %v11683_v40, 3  ;;  %v11852_v10 = vld [vmem:[#allocation2 + $0xd0] sm:$0xf0]  ;;  %v11871_v61 = vrot.slane %v16184_v29, 4 }
 0x8f3   : > { %v10168_v21 = vmax.f32 %v10136_v26, 0.0  ;;  %v10138_v46 = vadd.f32 %v10098_v56, %v9929_v42  ;;  %15145 = vmatmul.mubr.msk.bf16.gmra.mrb[148].mxu1 %vm380_vm1, %v11654_v12  ;;  %v16185_v56 = vld [vmem:[#allocation2 + $0xe0] sm:$0xff]  ;;  %v12058_v45 = vshrl.u32 %v11852_v10, 16 }
 0x8f4   : > { %v10169_v38 = vmax.f32 %v10137_v36, 0.0  ;;  %v10139_v58 = vadd.f32 %v10100_v30, %v9930_v9  ;;  %15148 = vmatprep.mubr.msk.bf16.mxu1 %vm380_vm1, %v11663_v8  ;;  %15161 = vmatpush3.bf16.msra.mxu1 %v16145_v4  ;;  %v11689_v42 = vor.u32 %v11688_v44, %v11685_v16  ;;  %v11870_v9 = vrot.slane %v11852_v10, 4  ;;  %v16148_v30 = vld [vmem:[%s20491_s4 + $0x108] sm:$0xff]   ;;  %v16150_v8 = vld [vmem:[%s20491_s4 + $0x118] sm:$0xff]  }
 0x8f5   : > { %v10170_v62 = vmax.f32 %v10138_v46, 0.0  ;;  %15162 = vmatprep.subr.bf16.mxu1 %v16146_v39  ;;  %v11873_v11 = vrot.slane %v16185_v56, 4  ;;  %v20764_v16 = vld [vmem:[#allocation42_spill] sm:$0xff] }
 0x8f6   : > { %v13630_v25 = vpack.c.bf16 %v10169_v38, %v10168_v21  ;;  %v10171_v23 = vmax.f32 %v10139_v58, 0.0  ;;  %v10103_v15 = vpop.f32.mrb[140].mxu1  ;;  %v11690_v26 = vsel %vm3194_vm4, %v11680_v28, %v11689_v42  ;;  %v11872_v49 = vsel %vm1011_vm3, %v11870_v9, %v11871_v61  ;;  %v16188_v21 = vld [vmem:[#allocation2 + $0xf8] sm:$0xff]  ;;  %v16189_v38 = vld [vmem:[#allocation2 + $0x108] sm:$0xff] }
 0x8f7   : > { %v10104_v22 = vadd.f32 %v10103_v15, %v18991_v59  ;;  %v10105_v55 = vpop.f32.mrb[141].mxu1  ;;  %v11874_v12 = vsel %vm1011_vm3, %v11871_v61, %v11873_v11  ;;  %v11879_v46 = vrot.slane %v16188_v21, 4  ;;  %v11883_v58 = vrot.slane %v16189_v38, 4  ;;  %v20761_v28 = vld [vmem:[#allocation43_spill] sm:$0xff] }
 0x8f8   : > { %10284 = vst [vmem:[%s19013_s21 + $0x160] sm:$0xff] %v13630_v25  ;;  %v13631_v32 = vpack.c.bf16 %v10171_v23, %v10170_v62  ;;  %v10106_v54 = vadd.f32 %v10105_v55, %v18994_v5  ;;  %v10107_v52 = vpop.f32.mrb[142].mxu1  ;;  %15163 = vmatpush3.bf16.msra.mxu1 %v16146_v39  ;;  %v16186_v39 = vld [vmem:[#allocation2 + $0xe8] sm:$0xff]  ;;  %v12061_v62 = vshll.u32 %v11852_v10, 16  ;;  %v11885_v23 = vrot.slane %v20283_v50, 4 }
 0x8f9   : > { %v10140_v53 = vadd.f32 %v10104_v22, %v9931_v35  ;;  %v10108_v60 = vadd.f32 %v10107_v52, %v18991_v59  ;;  %v10109_v14 = vpop.f32.mrb[143].mxu1  ;;  %15180 = vmatprep.subr.bf16.mxu1 %v16147_v13  ;;  %v11875_v36 = vrot.slane %v16186_v39, 4  ;;  %v11880_v31 = vsel %vm1011_vm3, %v11877_v1, %v11879_v46  ;;  %v20758_v55 = vld [vmem:[#allocation39_spill] sm:$0xff] }
 0x8fa   : > { %10285 = vst [vmem:[%s19013_s21 + $0x168] sm:$0xff] %v13631_v32  ;;  %v10141_v48 = vadd.f32 %v10106_v54, %v9932_v41  ;;  %v10110_v19 = vadd.f32 %v10109_v14, %v18994_v5  ;;  %v11882_v35 = vsel %vm1011_vm3, %v11879_v46, %v20142_v47  ;;  %v11884_v40 = vsel %vm1011_vm3, %v20142_v47, %v11883_v58  ;;  %v20759_v47 = vld [vmem:[#allocation40_spill] sm:$0xff]  ;;  %v12048_v50 = vld [vmem:[#allocation2 + $0x110] sm:$0x1f] }
 0x8fb   : > { %v10172_v4 = vmax.f32 %v10140_v53, 0.0  ;;  %v10142_v37 = vadd.f32 %v10108_v60, %v9933_v43  ;;  %15149 = vmatmul.mubr.msk.bf16.gmra.mrb[152].mxu1 %vm380_vm1, %v11672_v24  ;;  %v11876_v2 = vsel %vm1011_vm3, %v11873_v11, %v11875_v36  ;;  %v11878_v57 = vsel %vm1011_vm3, %v11875_v36, %v11877_v1  ;;  %v20760_v43 = vld [vmem:[#allocation41_spill] sm:$0xff]  ;;  %v20762_v53 = vld [vmem:[#allocation44_spill] sm:$0xff] }
 0x8fc   : > { %v10173_v20 = vmax.f32 %v10141_v48, 0.0  ;;  %v10143_v33 = vadd.f32 %v10110_v19, %v9934_v7  ;;  %15152 = vmatprep.mubr.msk.bf16.mxu1 %vm380_vm1, %v11681_v3  ;;  %v12063_v25 = vrot.slane %v12061_v62, 5  ;;  %v11886_v41 = vsel %vm1011_vm3, %v11883_v58, %v11885_v23  ;;  %v20763_v60 = vld [vmem:[#allocation45_spill] sm:$0xff]  ;;  %v16160_v19 = vld [vmem:[#allocation9 + $0x30] ss:$8 sps:$4 sm:$0xff]  }
 0x8fd   : > { %v10174_v51 = vmax.f32 %v10142_v37, 0.0  ;;  %v12094_v32 = vshrl.u32 %v12048_v50, 16  ;;  %v12097_v54 = vshll.u32 %v12048_v50, 16  ;;  %v16162_v24 = vld [vmem:[#allocation9 + $0x34] ss:$8 sps:$4 sm:$0xff]  }
 0x8fe   : > { %v13632_v0 = vpack.c.bf16 %v10173_v20, %v10172_v4  ;;  %v10175_v17 = vmax.f32 %v10143_v33, 0.0  ;;  %12429 = vmatprep.subr.bf16.mxu0 %v16162_v24  ;;  %v16190_v4 = vld [vmem:[#allocation8] ss:$0 sm:$0xff] }
 0x8ff   : > { %v12096_v52 = vrot.slane %v12094_v32, 4  ;;  %v12099_v7 = vrot.slane %v12097_v54, 5  ;;  %12430 = vmatpush1.bf16.msra.mxu0 %v16160_v19 }
 0x900   : > { %10286 = vst [vmem:[%s19013_s21 + $0x170] sm:$0xff] %v13632_v0  ;;  %v13633_v18 = vpack.c.bf16 %v10175_v17, %v10174_v51 }
 0x901   : > { %v12100_v14 = vor.u32 %v12099_v7, %v12096_v52 }
 0x902   : > { %10287 = vst [vmem:[%s19013_s21 + $0x178] sm:$0xff] %v13633_v18 }
 0x903   : > { %15153 = vmatmul.mubr.msk.bf16.gmra.mrb[156].mxu1 %vm380_vm1, %v11690_v26  ;;  %v12101_v48 = vsel %vm3429_vm5, %v20764_v16, %v12100_v14  ;;  %v12311_v16 = vld [vmem:[%s16681_s24 + $0x180] sm:$0xff] }
 0x904   : > { %15164 = vmatprep.mubr.msk.bf16.mxu1 %vm380_vm1, %v11872_v49  ;;  %v12327_v19 = vunpack.c.l.bf16 %v12311_v16 }
 0x90b   : > { %15165 = vmatmul.mubr.msk.bf16.vlgmr.msra.gmra.mrb[144].mxu1 %vm380_vm1, %v11874_v12 }
 0x90c   : > { %15181 = vmatpush3.bf16.msra.mxu1 %v16147_v13  ;;  %15168 = vmatprep.mubr.msk.bf16.mxu1 %vm380_vm1, %v11876_v2  ;;  %v12060_v13 = vrot.slane %v12058_v45, 4 }
 0x90d   : > { %15182 = vmatprep.subr.bf16.mxu1 %v16148_v30 }
 0x90e   : > { %v12064_v15 = vor.u32 %v12063_v25, %v12060_v13 }
 0x910   : > { %15183 = vmatpush3.bf16.msra.mxu1 %v16148_v30  ;;  %v12068_v22 = vsel %vm3429_vm5, %v12064_v15, %v20757_v27 }
 0x911   : > { %15184 = vmatprep.subr.bf16.mxu1 %v16149_v6 }
 0x913   : > { %15169 = vmatmul.mubr.msk.bf16.gmra.mrb[148].mxu1 %vm380_vm1, %v11878_v57 }
 0x914   : > { %15172 = vmatprep.mubr.msk.bf16.mxu1 %vm380_vm1, %v11880_v31  ;;  %15185 = vmatpush3.bf16.msra.mxu1 %v16149_v6 }
 0x915   : > { %15186 = vmatprep.subr.bf16.mxu1 %v16150_v8 }
 0x918   : > { %15187 = vmatpush3.bf16.msra.mxu1 %v16150_v8 }
 0x91b   : > { %15173 = vmatmul.mubr.msk.bf16.gmra.mrb[152].mxu1 %vm380_vm1, %v11882_v35 }
 0x91c   : > { %15176 = vmatprep.mubr.msk.bf16.mxu1 %vm380_vm1, %v11884_v40 }
 0x923   : > { %15177 = vmatmul.mubr.msk.bf16.gmra.mrb[156].mxu1 %vm380_vm1, %v11886_v41 }
 0x924   : > { %15188 = vmatprep.mubr.msk.bf16.mxu1 %vm380_vm1, %v12068_v22 }
 0x92b   : > { %15189 = vmatmul.mubr.msk.bf16.vlgmr.msra.gmra.mrb[144].mxu1 %vm380_vm1, %v20758_v55 }
 0x92c   : > { %15192 = vmatprep.mubr.msk.bf16.mxu1 %vm380_vm1, %v20759_v47 }
 0x933   : > { %15193 = vmatmul.mubr.msk.bf16.gmra.mrb[148].mxu1 %vm380_vm1, %v20760_v43 }
 0x934   : > { %15196 = vmatprep.mubr.msk.bf16.mxu1 %vm380_vm1, %v20761_v28 }
 0x93b   : > { %15197 = vmatmul.mubr.msk.bf16.gmra.mrb[152].mxu1 %vm380_vm1, %v20762_v53 }
 0x93c   : > { %15200 = vmatprep.mubr.msk.bf16.mxu1 %vm380_vm1, %v20763_v60 }
 0x943   : > { %15201 = vmatmul.mubr.msk.bf16.gmra.mrb[156].mxu1 %vm380_vm1, %v12101_v48  ;;  %v12312_v48 = vld [vmem:[%s16681_s24 + $0x188] sm:$0xff] }
 0x9fe   : > { %v15190_v44 = vpop.f32.mrb[144].mxu1 }
 0x9ff   : > { %v12265_v37 = vadd.f32 %v16190_v4, %v15190_v44  ;;  %v12184_v3 = vpop.f32.mrb[145].mxu1  ;;  %v12328_v44 = vunpack.c.h.bf16 %v12311_v16 }
 0xa00   : > { %v12263_v20 = vadd.f32 %v16190_v4, %v12184_v3  ;;  %v15191_v33 = vpop.f32.mrb[146].mxu1  ;;  %v12329_v3 = vunpack.c.l.bf16 %v12312_v48 }
 0xa01   : > { %v12266_v51 = vadd.f32 %v16190_v4, %v15191_v33  ;;  %v12187_v0 = vpop.f32.mrb[147].mxu1  ;;  %v12281_v42 = vmax.f32 %v12265_v37, 0.0 }
 0xa02   : > { %v12264_v17 = vadd.f32 %v16190_v4, %v12187_v0  ;;  %v12279_v29 = vmax.f32 %v12263_v20, 0.0 }
 0xa03   : > { %v12282_v10 = vmax.f32 %v12266_v51, 0.0  ;;  %v12330_v51 = vunpack.c.h.bf16 %v12312_v48 }
 0xa04   : > { %v12280_v61 = vmax.f32 %v12264_v17, 0.0 }
 0xa05   : > { %v12296_v18 = vpack.c.bf16 %v12282_v10, %v12281_v42 }
 0xa06   : > { %v12295_v9 = vpack.c.bf16 %v12280_v61, %v12279_v29  ;;  %v15194_v26 = vpop.f32.mrb[148].mxu1  ;;  %v12313_v29 = vld [vmem:[%s16681_s24 + $0x190] sm:$0xff] }
 0xa07   : > { %v12269_v49 = vadd.f32 %v16190_v4, %v15194_v26  ;;  %v12200_v56 = vpop.f32.mrb[149].mxu1 }
 0xa08   : > { %v12267_v11 = vadd.f32 %v16190_v4, %v12200_v56  ;;  %v15195_v39 = vpop.f32.mrb[150].mxu1  ;;  %13554 = vmatmul.mubr.msk.bf16.vlgmr.msra.gmra.mrb[128].mxu0 %vm380_vm1, %v12295_v9 }
 0xa09   : > { %v12270_v36 = vadd.f32 %v16190_v4, %v15195_v39  ;;  %v12203_v30 = vpop.f32.mrb[151].mxu1  ;;  %12465 = vmatprep.mubr.bf16.mxu0 %v20677_v34  ;;  %v12285_v2 = vmax.f32 %v12269_v49, 0.0  ;;  %v12314_v49 = vld [vmem:[%s16681_s24 + $0x198] sm:$0xff] }
 0xa0a   : > { %v12268_v12 = vadd.f32 %v16190_v4, %v12203_v30  ;;  %v12283_v63 = vmax.f32 %v12267_v11, 0.0  ;;  %v12331_v11 = vunpack.c.l.bf16 %v12313_v29 }
 0xa0b   : > { %v12286_v6 = vmax.f32 %v12270_v36, 0.0 }
 0xa0c   : > { %v12284_v1 = vmax.f32 %v12268_v12, 0.0  ;;  %v12332_v12 = vunpack.c.h.bf16 %v12313_v29 }
 0xa0d   : > { %v12298_v21 = vpack.c.bf16 %v12286_v6, %v12285_v2 }
 0xa0e   : > { %v12297_v46 = vpack.c.bf16 %v12284_v1, %v12283_v63  ;;  %v15198_v8 = vpop.f32.mrb[152].mxu1  ;;  %v12333_v63 = vunpack.c.l.bf16 %v12314_v49 }
 0xa0f   : > { %v12273_v57 = vadd.f32 %v16190_v4, %v15198_v8  ;;  %v12216_v31 = vpop.f32.mrb[153].mxu1  ;;  %v12334_v8 = vunpack.c.h.bf16 %v12314_v49 }
 0xa10   : > { %v12271_v38 = vadd.f32 %v16190_v4, %v12216_v31  ;;  %v15199_v58 = vpop.f32.mrb[154].mxu1  ;;  %13555 = vmatmul.mubr.msk.bf16.gmra.mrb[132].mxu0 %vm380_vm1, %v12296_v18 }
 0xa11   : > { %v12274_v45 = vadd.f32 %v16190_v4, %v15199_v58  ;;  %v12219_v62 = vpop.f32.mrb[155].mxu1  ;;  %12475 = vmatprep.mubr.bf16.mxu0 %v20677_v34  ;;  %v12289_v40 = vmax.f32 %v12273_v57, 0.0 }
 0xa12   : > { %v12272_v35 = vadd.f32 %v16190_v4, %v12219_v62  ;;  %v12287_v25 = vmax.f32 %v12271_v38, 0.0  ;;  %v12315_v62 = vld [vmem:[%s16681_s24 + $0x1a0] sm:$0xff] }
 0xa13   : > { %v12290_v13 = vmax.f32 %v12274_v45, 0.0 }
 0xa14   : > { %v12288_v23 = vmax.f32 %v12272_v35, 0.0 }
 0xa15   : > { %v12300_v15 = vpack.c.bf16 %v12290_v13, %v12289_v40 }
 0xa16   : > { %v12299_v41 = vpack.c.bf16 %v12288_v23, %v12287_v25  ;;  %v15202_v27 = vpop.f32.mrb[156].mxu1  ;;  %v12316_v23 = vld [vmem:[%s16681_s24 + $0x1a8] sm:$0xff] }
 0xa17   : > { %v12277_v22 = vadd.f32 %v16190_v4, %v15202_v27  ;;  %v12232_v55 = vpop.f32.mrb[157].mxu1 }
 0xa18   : > { %v12275_v47 = vadd.f32 %v16190_v4, %v12232_v55  ;;  %v15203_v43 = vpop.f32.mrb[158].mxu1  ;;  %13556 = vmatmul.mubr.msk.bf16.gmra.mrb[136].mxu0 %vm380_vm1, %v12297_v46 }
 0xa19   : > { %v12278_v50 = vadd.f32 %v16190_v4, %v15203_v43  ;;  %v12235_v28 = vpop.f32.mrb[159].mxu1  ;;  %12485 = vmatprep.mubr.bf16.mxu0 %v20677_v34  ;;  %v12293_v54 = vmax.f32 %v12277_v22, 0.0 }
 0xa1a   : > { %v12276_v32 = vadd.f32 %v16190_v4, %v12235_v28  ;;  %v12291_v7 = vmax.f32 %v12275_v47, 0.0  ;;  %v12336_v47 = vunpack.c.h.bf16 %v12315_v62  ;;  %v12337_v28 = vunpack.c.l.bf16 %v12316_v23 }
 0xa1b   : > { %v12294_v52 = vmax.f32 %v12278_v50, 0.0 }
 0xa1c   : > { %v12292_v53 = vmax.f32 %v12276_v32, 0.0 }
 0xa1d   : > { %v12302_v60 = vpack.c.bf16 %v12294_v52, %v12293_v54 }
 0xa1e   : > { %v12301_v14 = vpack.c.bf16 %v12292_v53, %v12291_v7  ;;  %v12338_v7 = vunpack.c.h.bf16 %v12316_v23 }
 0xa20   : > { %13557 = vmatmul.mubr.msk.bf16.gmra.mrb[140].mxu0 %vm380_vm1, %v12298_v21 }
 0xa21   : > { %12495 = vmatprep.mubr.bf16.mxu0 %v20677_v34 }
 0xa28   : > { %13558 = vmatmul.mubr.msk.bf16.gmra.mrb[144].mxu0 %vm380_vm1, %v12299_v41  ;;  %v12335_v41 = vunpack.c.l.bf16 %v12315_v62 }
 0xa29   : > { %12505 = vmatprep.mubr.bf16.mxu0 %v20677_v34 }
 0xa30   : > { %13559 = vmatmul.mubr.msk.bf16.gmra.mrb[148].mxu0 %vm380_vm1, %v12300_v15 }
 0xa31   : > { %12515 = vmatprep.mubr.bf16.mxu0 %v20677_v34 }
 0xa38   : > { %13560 = vmatmul.mubr.msk.bf16.gmra.mrb[152].mxu0 %vm380_vm1, %v12301_v14 }
 0xa39   : > { %12525 = vmatprep.mubr.bf16.mxu0 %v20677_v34 }
 0xa40   : > { %13561 = vmatmul.mubr.msk.bf16.gmra.mrb[156].mxu0 %vm380_vm1, %v12302_v60 }
 0xadb   : > { %v12457_v24 = vpop.f32.mrb[128].mxu0 }
 0xadc   : > { %v12458_v4 = vadd.f32 %v12457_v24, %v18991_v59  ;;  %v12459_v37 = vpop.f32.mrb[129].mxu0 }
 0xadd   : > { %v12460_v20 = vadd.f32 %v12459_v37, %v18994_v5  ;;  %v12461_v33 = vpop.f32.mrb[130].mxu0 }
 0xade   : > { %v12536_v0 = vadd.f32 %v12458_v4, %v12327_v19  ;;  %v12462_v34 = vadd.f32 %v12461_v33, %v18991_v59  ;;  %v12463_v17 = vpop.f32.mrb[131].mxu0  ;;  %v12317_v19 = vld [vmem:[%s16681_s24 + $0x1b0] sm:$0xff] }
 0xadf   : > { %v12537_v42 = vadd.f32 %v12460_v20, %v12328_v44  ;;  %v12464_v10 = vadd.f32 %v12463_v17, %v18994_v5  ;;  %v12339_v33 = vunpack.c.l.bf16 %v12317_v19  ;;  %v12340_v17 = vunpack.c.h.bf16 %v12317_v19 }
 0xae0   : > { %v12568_v61 = vmax.f32 %v12536_v0, 0.0  ;;  %v12538_v18 = vadd.f32 %v12462_v34, %v12329_v3  ;;  %v12318_v3 = vld [vmem:[%s16681_s24 + $0x1b8] sm:$0xff] }
 0xae1   : > { %v12569_v9 = vmax.f32 %v12537_v42, 0.0  ;;  %v12539_v26 = vadd.f32 %v12464_v10, %v12330_v51  ;;  %v12341_v29 = vunpack.c.l.bf16 %v12318_v3 }
 0xae2   : > { %v12570_v56 = vmax.f32 %v12538_v18, 0.0 }
 0xae3   : > { %v13634_v39 = vpack.c.bf16 %v12569_v9, %v12568_v61  ;;  %v12571_v36 = vmax.f32 %v12539_v26, 0.0  ;;  %v12467_v30 = vpop.f32.mrb[132].mxu0  ;;  %v12342_v26 = vunpack.c.h.bf16 %v12318_v3 }
 0xae4   : > { %v12468_v2 = vadd.f32 %v12467_v30, %v18991_v59  ;;  %v12469_v6 = vpop.f32.mrb[133].mxu0  ;;  %v12319_v30 = vld [vmem:[%s16681_s24 + $0x1c0] sm:$0xff] }
 0xae5   : > { %12696 = vst [vmem:[%s19013_s21 + $0x180] sm:$0xff] %v13634_v39  ;;  %v13635_v1 = vpack.c.bf16 %v12571_v36, %v12570_v56  ;;  %v12470_v21 = vadd.f32 %v12469_v6, %v18994_v5  ;;  %v12471_v46 = vpop.f32.mrb[134].mxu0 }
 0xae6   : > { %v12540_v57 = vadd.f32 %v12468_v2, %v12331_v11  ;;  %v12472_v31 = vadd.f32 %v12471_v46, %v18991_v59  ;;  %v12473_v38 = vpop.f32.mrb[135].mxu0  ;;  %v12343_v46 = vunpack.c.l.bf16 %v12319_v30 }
 0xae7   : > { %12697 = vst [vmem:[%s19013_s21 + $0x188] sm:$0xff] %v13635_v1  ;;  %v12541_v58 = vadd.f32 %v12470_v21, %v12332_v12  ;;  %v12474_v45 = vadd.f32 %v12473_v38, %v18994_v5  ;;  %v12320_v1 = vld [vmem:[%s16681_s24 + $0x1c8] sm:$0xff]  ;;  %v12344_v38 = vunpack.c.h.bf16 %v12319_v30 }
 0xae8   : > { %v12572_v35 = vmax.f32 %v12540_v57, 0.0  ;;  %v12542_v40 = vadd.f32 %v12472_v31, %v12333_v63  ;;  %v12345_v62 = vunpack.c.l.bf16 %v12320_v1 }
 0xae9   : > { %v12573_v13 = vmax.f32 %v12541_v58, 0.0  ;;  %v12543_v25 = vadd.f32 %v12474_v45, %v12334_v8 }
 0xaea   : > { %v12574_v15 = vmax.f32 %v12542_v40, 0.0 }
 0xaeb   : > { %v13636_v27 = vpack.c.bf16 %v12573_v13, %v12572_v35  ;;  %v12575_v22 = vmax.f32 %v12543_v25, 0.0  ;;  %v12477_v55 = vpop.f32.mrb[136].mxu0  ;;  %v12346_v25 = vunpack.c.h.bf16 %v12320_v1 }
 0xaec   : > { %v12478_v43 = vadd.f32 %v12477_v55, %v18991_v59  ;;  %v12479_v50 = vpop.f32.mrb[137].mxu0  ;;  %v12321_v55 = vld [vmem:[%s16681_s24 + $0x1d0] sm:$0xff] }
 0xaed   : > { %12698 = vst [vmem:[%s19013_s21 + $0x190] sm:$0xff] %v13636_v27  ;;  %v13637_v32 = vpack.c.bf16 %v12575_v22, %v12574_v15  ;;  %v12480_v54 = vadd.f32 %v12479_v50, %v18994_v5  ;;  %v12481_v52 = vpop.f32.mrb[138].mxu0 }
 0xaee   : > { %v12544_v53 = vadd.f32 %v12478_v43, %v12335_v41  ;;  %v12482_v60 = vadd.f32 %v12481_v52, %v18991_v59  ;;  %v12483_v14 = vpop.f32.mrb[139].mxu0  ;;  %v12347_v52 = vunpack.c.l.bf16 %v12321_v55 }
 0xaef   : > { %12699 = vst [vmem:[%s19013_s21 + $0x198] sm:$0xff] %v13637_v32  ;;  %v12545_v16 = vadd.f32 %v12480_v54, %v12336_v47  ;;  %v12484_v48 = vadd.f32 %v12483_v14, %v18994_v5  ;;  %v12322_v32 = vld [vmem:[%s16681_s24 + $0x1d8] sm:$0xff]  ;;  %v12348_v14 = vunpack.c.h.bf16 %v12321_v55 }
 0xaf0   : > { %v12576_v24 = vmax.f32 %v12544_v53, 0.0  ;;  %v12546_v44 = vadd.f32 %v12482_v60, %v12337_v28  ;;  %v12349_v19 = vunpack.c.l.bf16 %v12322_v32 }
 0xaf1   : > { %v12577_v4 = vmax.f32 %v12545_v16, 0.0  ;;  %v12547_v37 = vadd.f32 %v12484_v48, %v12338_v7 }
 0xaf2   : > { %v12578_v20 = vmax.f32 %v12546_v44, 0.0 }
 0xaf3   : > { %v13638_v51 = vpack.c.bf16 %v12577_v4, %v12576_v24  ;;  %v12579_v0 = vmax.f32 %v12547_v37, 0.0  ;;  %v12487_v34 = vpop.f32.mrb[140].mxu0  ;;  %v12350_v37 = vunpack.c.h.bf16 %v12322_v32 }
 0xaf4   : > { %v12488_v42 = vadd.f32 %v12487_v34, %v18991_v59  ;;  %v12489_v10 = vpop.f32.mrb[141].mxu0  ;;  %v12323_v34 = vld [vmem:[%s16681_s24 + $0x1e0] sm:$0xff] }
 0xaf5   : > { %12700 = vst [vmem:[%s19013_s21 + $0x1a0] sm:$0xff] %v13638_v51  ;;  %v13639_v61 = vpack.c.bf16 %v12579_v0, %v12578_v20  ;;  %v12490_v18 = vadd.f32 %v12489_v10, %v18994_v5  ;;  %v12491_v9 = vpop.f32.mrb[142].mxu0 }
 0xaf6   : > { %v12548_v49 = vadd.f32 %v12488_v42, %v12339_v33  ;;  %v12492_v56 = vadd.f32 %v12491_v9, %v18991_v59  ;;  %v12493_v11 = vpop.f32.mrb[143].mxu0  ;;  %v12351_v9 = vunpack.c.l.bf16 %v12323_v34 }
 0xaf7   : > { %12701 = vst [vmem:[%s19013_s21 + $0x1a8] sm:$0xff] %v13639_v61  ;;  %v12549_v39 = vadd.f32 %v12490_v18, %v12340_v17  ;;  %v12494_v36 = vadd.f32 %v12493_v11, %v18994_v5  ;;  %v12324_v61 = vld [vmem:[%s16681_s24 + $0x1e8] sm:$0xff]  ;;  %v12352_v11 = vunpack.c.h.bf16 %v12323_v34 }
 0xaf8   : > { %v12580_v12 = vmax.f32 %v12548_v49, 0.0  ;;  %v12550_v2 = vadd.f32 %v12492_v56, %v12341_v29  ;;  %v12353_v30 = vunpack.c.l.bf16 %v12324_v61 }
 0xaf9   : > { %v12581_v6 = vmax.f32 %v12549_v39, 0.0  ;;  %v12551_v63 = vadd.f32 %v12494_v36, %v12342_v26 }
 0xafa   : > { %v12582_v21 = vmax.f32 %v12550_v2, 0.0 }
 0xafb   : > { %v13640_v8 = vpack.c.bf16 %v12581_v6, %v12580_v12  ;;  %v12583_v57 = vmax.f32 %v12551_v63, 0.0  ;;  %v12497_v31 = vpop.f32.mrb[144].mxu0  ;;  %v12354_v63 = vunpack.c.h.bf16 %v12324_v61 }
 0xafc   : > { %v12498_v58 = vadd.f32 %v12497_v31, %v18991_v59  ;;  %v12499_v45 = vpop.f32.mrb[145].mxu0  ;;  %v12325_v31 = vld [vmem:[%s16681_s24 + $0x1f0] sm:$0xff] }
 0xafd   : > { %12702 = vst [vmem:[%s19013_s21 + $0x1b0] sm:$0xff] %v13640_v8  ;;  %v13641_v35 = vpack.c.bf16 %v12583_v57, %v12582_v21  ;;  %v12500_v40 = vadd.f32 %v12499_v45, %v18994_v5  ;;  %v12501_v13 = vpop.f32.mrb[146].mxu0 }
 0xafe   : > { %v12552_v23 = vadd.f32 %v12498_v58, %v12343_v46  ;;  %v12502_v15 = vadd.f32 %v12501_v13, %v18991_v59  ;;  %v12503_v41 = vpop.f32.mrb[147].mxu0  ;;  %v12355_v13 = vunpack.c.l.bf16 %v12325_v31 }
 0xaff   : > { %12703 = vst [vmem:[%s19013_s21 + $0x1b8] sm:$0xff] %v13641_v35  ;;  %v12553_v27 = vadd.f32 %v12500_v40, %v12344_v38  ;;  %v12504_v22 = vadd.f32 %v12503_v41, %v18994_v5  ;;  %v12326_v35 = vld [vmem:[%s16681_s24 + $0x1f8] sm:$0xff]  ;;  %v12356_v41 = vunpack.c.h.bf16 %v12325_v31  ;;  %s13651_s24 = sshll.u32 %s16487_s9, 13  ;;  %s16418_s9 = smov [#allocation12]  }
 0xb00   : > { %v12584_v47 = vmax.f32 %v12552_v23, 0.0  ;;  %v12554_v43 = vadd.f32 %v12502_v15, %v12345_v62  ;;  %v12357_v55 = vunpack.c.l.bf16 %v12326_v35  ;;  %s20440_s23 = scalar_lea.hbm %s20495_s8, %s13651_s24  ;;  %s16337_s13 = sshll.u32 %s16418_s9, 4  ;;  %s16338_s13 = int_to_ptr.vmem [resolvable:$false] %s16337_s13 }
 0xb01   : > { %v12585_v50 = vmax.f32 %v12553_v27, 0.0  ;;  %v12555_v28 = vadd.f32 %v12504_v22, %v12346_v25  ;;  %s16339_s11 = scalar_lea.vmem %s16338_s13, 16384  ;;  %p16340_p3 = scmp.lt.s32.totalorder %s20442_s19, %s16338_s13 }
 0xb02   : > { %v12586_v54 = vmax.f32 %v12554_v43, 0.0  ;;  %p16341_p7 = scmp.lt.s32.totalorder %s16339_s11, %s16333_s16 }
 0xb03   : > { %v13642_v7 = vpack.c.bf16 %v12585_v50, %v12584_v47  ;;  %v12587_v53 = vmax.f32 %v12555_v28, 0.0  ;;  %v12507_v60 = vpop.f32.mrb[148].mxu0  ;;  %v12358_v28 = vunpack.c.h.bf16 %v12326_v35 }
 0xb04   : > { %v12508_v16 = vadd.f32 %v12507_v60, %v18991_v59  ;;  %v12509_v48 = vpop.f32.mrb[149].mxu0  ;;  %p16342_p9 = por %p16341_p7, %p16340_p3 }
 0xb05   : > { %12704 = vst [vmem:[%s19013_s21 + $0x1c0] sm:$0xff] %v13642_v7  ;;  %v13643_v24 = vpack.c.bf16 %v12587_v53, %v12586_v54  ;;  %v12510_v44 = vadd.f32 %v12509_v48, %v18994_v5  ;;  %v12511_v4 = vpop.f32.mrb[150].mxu0 }
 0xb06   : > { %v12556_v3 = vadd.f32 %v12508_v16, %v12347_v52  ;;  %v12512_v20 = vadd.f32 %v12511_v4, %v18991_v59  ;;  %v12513_v33 = vpop.f32.mrb[151].mxu0  ;;  %p16343_p12 = pnand %p16342_p9, %p16336_p8 }
 0xb07   : > { %12705 = vst [vmem:[%s19013_s21 + $0x1c8] sm:$0xff] %v13643_v24  ;;  %v12557_v51 = vadd.f32 %v12510_v44, %v12348_v14  ;;  %v12514_v0 = vadd.f32 %v12513_v33, %v18994_v5 }
 0xb08   : > { %v12588_v17 = vmax.f32 %v12556_v3, 0.0  ;;  %v12558_v42 = vadd.f32 %v12512_v20, %v12349_v19 }
 0xb09   : > { %v12589_v10 = vmax.f32 %v12557_v51, 0.0  ;;  %v12559_v29 = vadd.f32 %v12514_v0, %v12350_v37 }
 0xb0a   : > { %v12590_v18 = vmax.f32 %v12558_v42, 0.0 }
 0xb0b   : > { %v13644_v26 = vpack.c.bf16 %v12589_v10, %v12588_v17  ;;  %v12591_v49 = vmax.f32 %v12559_v29, 0.0  ;;  %v12517_v56 = vpop.f32.mrb[152].mxu0 }
 0xb0c   : > { %v12518_v39 = vadd.f32 %v12517_v56, %v18991_v59  ;;  %v12519_v36 = vpop.f32.mrb[153].mxu0 }
 0xb0d   : > { %12706 = vst [vmem:[%s19013_s21 + $0x1d0] sm:$0xff] %v13644_v26  ;;  %v13645_v12 = vpack.c.bf16 %v12591_v49, %v12590_v18  ;;  %v12520_v2 = vadd.f32 %v12519_v36, %v18994_v5  ;;  %v12521_v6 = vpop.f32.mrb[154].mxu0 }
 0xb0e   : > { %v12560_v1 = vadd.f32 %v12518_v39, %v12351_v9  ;;  %v12522_v21 = vadd.f32 %v12521_v6, %v18991_v59  ;;  %v12523_v46 = vpop.f32.mrb[155].mxu0 }
 0xb0f   : > { %12707 = vst [vmem:[%s19013_s21 + $0x1d8] sm:$0xff] %v13645_v12  ;;  %v12561_v8 = vadd.f32 %v12520_v2, %v12352_v11  ;;  %v12524_v57 = vadd.f32 %v12523_v46, %v18994_v5 }
 0xb10   : > { %v12592_v38 = vmax.f32 %v12560_v1, 0.0  ;;  %v12562_v58 = vadd.f32 %v12522_v21, %v12353_v30 }
 0xb11   : > { %v12593_v45 = vmax.f32 %v12561_v8, 0.0  ;;  %v12563_v62 = vadd.f32 %v12524_v57, %v12354_v63 }
 0xb12   : > { %v12594_v40 = vmax.f32 %v12562_v58, 0.0 }
 0xb13   : > { %v13646_v25 = vpack.c.bf16 %v12593_v45, %v12592_v38  ;;  %v12595_v23 = vmax.f32 %v12563_v62, 0.0  ;;  %v12527_v15 = vpop.f32.mrb[156].mxu0 }
 0xb14   : > { %v12528_v27 = vadd.f32 %v12527_v15, %v18991_v59  ;;  %v12529_v22 = vpop.f32.mrb[157].mxu0 }
 0xb15   : > { %12708 = vst [vmem:[%s19013_s21 + $0x1e0] sm:$0xff] %v13646_v25  ;;  %v13647_v47 = vpack.c.bf16 %v12595_v23, %v12594_v40  ;;  %v12530_v43 = vadd.f32 %v12529_v22, %v18994_v5  ;;  %v12531_v50 = vpop.f32.mrb[158].mxu0 }
 0xb16   : > { %v12564_v32 = vadd.f32 %v12528_v27, %v12355_v13  ;;  %v12532_v54 = vadd.f32 %v12531_v50, %v18991_v59  ;;  %v12533_v52 = vpop.f32.mrb[159].mxu0 }
 0xb17   : > { %12709 = vst [vmem:[%s19013_s21 + $0x1e8] sm:$0xff] %v13647_v47  ;;  %v12565_v7 = vadd.f32 %v12530_v43, %v12356_v41  ;;  %v12534_v53 = vadd.f32 %v12533_v52, %v18994_v5 }
 0xb18   : > { %v12596_v60 = vmax.f32 %v12564_v32, 0.0  ;;  %v12566_v14 = vadd.f32 %v12532_v54, %v12357_v55 }
 0xb19   : > { %v12597_v16 = vmax.f32 %v12565_v7, 0.0  ;;  %v12567_v48 = vadd.f32 %v12534_v53, %v12358_v28 }
 0xb1a   : > { %v12598_v19 = vmax.f32 %v12566_v14, 0.0 }
 0xb1b   : > { %v13648_v24 = vpack.c.bf16 %v12597_v16, %v12596_v60  ;;  %v12599_v44 = vmax.f32 %v12567_v48, 0.0 }
 0xb1d   : > { %12710 = vst [vmem:[%s19013_s21 + $0x1f0] sm:$0xff] %v13648_v24  ;;  %v13649_v59 = vpack.c.bf16 %v12599_v44, %v12598_v19 }
 0xb1f   : > { %12711 = vst [vmem:[%s19013_s21 + $0x1f8] sm:$0xff] %v13649_v59 }
 0xb20   : > { %16346 = shalt.err (!%p16343_p12)
}
 0xb21   : > { %s16347_s21 = scalar_lea.hbm %s20440_s23, 8192  ;;  %s16351_s25 = scalar_lea.hbm %s20495_s8, 65536 }
 0xb22   : > { %p16348_p0 = scmp.ne.s32.totalorder %s20440_s23, %s16347_s21  ;;  %p16352_p11 = scmp.lt.u32.totalorder %s20440_s23, %s20495_s8 }
 0xb23   : > { %p16353_p13 = scmp.lt.u32.totalorder %s16351_s25, %s16347_s21  ;;  %p16355_p4 = scmp.lt.u32.totalorder %s16347_s21, %s20440_s23 }
 0xb24   : > { %p16349_p5 = pnand %p16348_p0, %p16620_p1 }
 0xb25   : > { %p16354_p2 = por %p16353_p13, %p16352_p11 }
 0xb26   : > { %p16350_p10 = pneg %p16349_p5 }
 0xb27   : > { %p16356_p6 = por %p16355_p4, %p16354_p2 }
 0xb29   : > { %p16357_p8 = pnand %p16356_p6, %p16350_p10 }
 0xb2b   : > { %16360 = shalt.err (!%p16357_p8)
}
 0xb2c   : > { %s16419_s10 = smov 128   ;;  %s16420_s16 = smov 8  }
 0xb2d   : > { %15734 = dma.vmem_to_hbm [thread:$0]  (%p16620_p1), %s20442_s19, 8192, %s20440_s23, %s12713_s18, %s16419_s10, %s16419_s10, %s16420_s16  }
 0xb2e PF: > { %p15766_p3 = scmp.ge.s32.totalorder %s16407_s30, 2  ;;  %s12742_s9 = sand.u32 1, %s16395_s27  }
 0xb2f   : > { %p20765_p7 = scmp.ne.s32.totalorder %s20596_s12, 0  ;;  %s12743_s13 = scalar_lea.sflag [#allocation5], %s12742_s9 }
 0xb31   : > { %p15754_p9 = pnand %p15766_p3, %p20765_p7 }
 0xb33   : > { %16390 = dma.done.wait (!%p15754_p9), %s12743_s13, 8192  }
 0xb34   : > { %16392 = vsyncadd (!%p15754_p9), %s12743_s13, 4294959104  ;;  %p23_p12 = scmp.ge.s32.totalorder %s16610_s26, 10   ;;  %s20766_s27 = smov %s16399_s28 }
 0xb35   : > { %s20767_s28 = smov %s16403_s29  ;;  %s20768_s29 = smov %s16626_s14 }
 0xb36   : > { %s20769_s30 = smov %s16610_s26  ;;  %25 = sbr.rel (!%p23_p12) target bundleno = 9 (0x9), region = 113 }
 0xb3d   :  { %12748 = vsyncpa [#allocation4], 1 }
 0xb3e   :  { %12750 = vsyncpa [#allocation4 + $0x1], 1 }
 0xb3f   :  { %12751 = vsyncpa [#allocation7], 1 }
 0xb40   :  { %12752 = vsyncpa [#allocation10], 1 }
 0xb41   :  { %12753 = vsyncpa [#allocation5], 1 }
 0xb42   :  { %12755 = vsyncpa [#allocation5 + $0x1], 1 }

</bundles_post_ra>
